<compile_context>
chip_gen: v5e
topology: v5e:2x2
jax: 0.10.0
libtpu: 0.0.40
codegen_flags: <defaults>
</compile_context>

<pallas_src>
import functools

import jax
import jax.numpy as jnp
import numpy as np
from jax.experimental import pallas as pl
from jax.experimental.pallas import tpu as pltpu

EPS = 1e-5            # PyTorch BatchNorm2d default

# Geometry fixed by the module (MNIST 28x28, 5x5 convs, pad 2, two 2x2 pools).
KS = 5                # conv kernel size
PAD = 2               # conv padding
H0 = 28               # input spatial size
P1 = 14               # spatial size after pool1
P2 = 7                # spatial size after pool2
C1 = 16               # channels after conv1
C2 = 32               # channels after conv2
WP = P1 + 2 * PAD         # 18: padded row stride of the flattened pooled-1 map
HP = P1 + 2 * PAD + 1     # 19: padded rows (+1 slack row so tap slices never run OOB)
NPIX = HP * WP            # 342: flattened padded pooled-1 map
WPP = 384                 # per-image lane stride (342 rounded up to a multiple of 128)
M2 = P1 * WP              # 252: columns of the full-resolution conv2 accumulator
NSEL = M2 - WP - 1        # 233: columns of the 2x2-window max fed to pool2 selection


# ------------------------------- fused kernel ------------------------------- #

def _make_kernel(blk):
    """Kernel processing `blk` images per grid step, everything lane-dense & in registers."""

    def kernel(p1t_ref, w1t_ref, s1_ref, t1_ref, pmask_ref,
               w2t_ref, s2_ref, t2_ref,
               selT_ref, fcwT_ref, dmask_ref, gsel_ref, fcb_ref,
               o_ref):
        for b in range(blk):                      # static unroll over the batch block
            base = b * WPP

            # ---- layer 1: conv5x5 + BN + ReLU + maxpool as 4 pool-offset matmuls + max ----
            h1 = None
            for d in range(4):                    # pool offsets (di, dj)
                # (16, 25) @ (25, 384) -> (16, 384), spatial-last (lane-dense)
                y = jnp.dot(w1t_ref[...], p1t_ref[0, d, :, base:base + WPP],
                            preferred_element_type=jnp.float32)
                y = jnp.maximum(y * s1_ref[...] + t1_ref[...], 0.0)   # folded bias+BN, ReLU
                h1 = y if h1 is None else jnp.maximum(h1, y)
            # exact zeros on the conv-pad / alignment-pad columns (BN shift made them !=0)
            h1 = h1 * pmask_ref[...]              # (16, 384), zero-padded 19x18 layout

            # ---- layer 2: conv5x5 as 25 tap matmuls, accumulated in registers ----
            acc = None
            for kh in range(KS):
                for kw in range(KS):
                    off = kh * WP + kw
                    # (32, 16) @ (16, 252) -> (32, 252)
                    part = jnp.dot(w2t_ref[kh * KS + kw], h1[:, off:off + M2],
                                   preferred_element_type=jnp.float32)
                    acc = part if acc is None else acc + part
            # BN + ReLU; width-padding columns are finite garbage, never selected below.
            acc = jnp.maximum(acc * s2_ref[...] + t2_ref[...], 0.0)   # (32, 252)

            # ---- maxpool 2x2: adjacent-col/row maxes + exact 0/1 selection matmul ----
            hm = jnp.maximum(
                jnp.maximum(acc[:, 0:NSEL], acc[:, 1:NSEL + 1]),
                jnp.maximum(acc[:, WP:WP + NSEL], acc[:, WP + 1:WP + 1 + NSEL]))  # (32, 233)
            pooled = jnp.dot(hm, selT_ref[...],
                             preferred_element_type=jnp.float32)                 # (32, 49)

            # ---- FC on the MXU via block-diagonal expansion (no reshape/relayout) ----
            # z[c', k*32+c] = sum_s pooled[c', s] * fc_w[c*49+s, k]
            z = jnp.dot(pooled, fcwT_ref[...],
                        preferred_element_type=jnp.float32) * dmask_ref[...]     # keep c'==c
            o2 = jnp.dot(z, gsel_ref[...],
                         preferred_element_type=jnp.float32)                     # (32, nc)
            out_b = jnp.sum(o2, axis=0) + fcb_ref[0]                             # (nc,)
            o_ref[0, b, :] = out_b.astype(o_ref.dtype)

    return kernel


# ------------------------------ wrapper / glue ------------------------------ #

def _fold_bn(bias, gamma, beta, mean, var):
    scale = gamma / jnp.sqrt(var + EPS)
    shift = (bias - mean) * scale + beta
    return scale, shift


def _conv1_pool_patches(x_nchw):
    """(N,1,28,28) -> (N, 4, 25, 384) lane-dense pool-offset/tap patches.

    The 14x14 valid grid for each (pool-offset, tap) pair is placed directly on the
    zero-padded flattened 19x18 grid (padded to 384 lanes) that conv2 slices from, so the
    kernel needs no scatter / zeroing at all.
    """
    x = x_nchw[:, 0].astype(jnp.float32)                     # (N, 28, 28)
    xp = jnp.pad(x, ((0, 0), (PAD, PAD), (PAD, PAD)))        # (N, 32, 32)
    blocks = []
    for di in range(2):
        for dj in range(2):
            taps = []
            for kh in range(KS):
                for kw in range(KS):
                    r0, c0 = di + kh, dj + kw
                    taps.append(xp[:, r0:r0 + 2 * P1:2, c0:c0 + 2 * P1:2])   # (N, 14, 14)
            t = jnp.stack(taps, axis=1)                                       # (N, 25, 14, 14)
            t = jnp.pad(t, ((0, 0), (0, 0),
                            (PAD, HP - P1 - PAD), (PAD, WP - P1 - PAD)))      # (N, 25, 19, 18)
            t = t.reshape(-1, KS * KS, NPIX)
            t = jnp.pad(t, ((0, 0), (0, 0), (0, WPP - NPIX)))                 # (N, 25, 384)
            blocks.append(t)
    return jnp.stack(blocks, axis=1)                                          # (N, 4, 25, 384)


def _block_patches(p1t, blk):
    """(N, 4, 25, 384) -> (N//blk, 4, 25, blk*384): images concatenated along lanes."""
    n = p1t.shape[0]
    g = n // blk
    return (p1t.reshape(g, blk, 4, KS * KS, WPP)
            .transpose(0, 2, 3, 1, 4)
            .reshape(g, 4, KS * KS, blk * WPP))


def _pad_mask():
    m = np.zeros((HP, WP), np.float32)
    m[PAD:PAD + P1, PAD:PAD + P1] = 1.0
    m = np.concatenate([m.reshape(1, NPIX),
                        np.zeros((1, WPP - NPIX), np.float32)], axis=1)
    return jnp.asarray(m)                                     # (1, 384)


def _pool2_selection_T():
    sel = np.zeros((NSEL, P2 * P2), np.float32)
    for i2 in range(P2):
        for j2 in range(P2):
            sel[(2 * i2) * WP + 2 * j2, i2 * P2 + j2] = 1.0
    return jnp.asarray(sel)                                   # (233, 49)


def _fc_block_diag_mats(nc):
    j = np.arange(nc * C2)
    dmask = (j[None, :] % C2 == np.arange(C2)[:, None]).astype(np.float32)   # (32, nc*32)
    gsel = (j[:, None] // C2 == np.arange(nc)[None, :]).astype(np.float32)   # (nc*32, nc)
    return jnp.asarray(dmask), jnp.asarray(gsel)


def _prepare_params(p):
    w1t = p["w1"][:, 0].reshape(C1, KS * KS).astype(jnp.float32)             # (16, 25)
    w2t = (jnp.transpose(p["w2"], (2, 3, 0, 1))
           .reshape(KS * KS, C2, C1).astype(jnp.float32))                     # (25, 32, 16)
    s1, t1 = _fold_bn(p["b1"], p["g1"], p["be1"], p["m1"], p["v1"])
    s2, t2 = _fold_bn(p["b2"], p["g2"], p["be2"], p["m2"], p["v2"])
    nc = p["fc_w"].shape[1]
    # fcwT[s, k*32 + c] = fc_w[c*49 + s, k]  (matches PyTorch's NCHW flatten)
    fcwT = (jnp.transpose(p["fc_w"].reshape(C2, P2 * P2, nc), (1, 2, 0))
            .reshape(P2 * P2, nc * C2).astype(jnp.float32))
    return (w1t,
            s1.reshape(C1, 1).astype(jnp.float32), t1.reshape(C1, 1).astype(jnp.float32),
            w2t,
            s2.reshape(C2, 1).astype(jnp.float32), t2.reshape(C2, 1).astype(jnp.float32),
            fcwT, p["fc_b"].reshape(1, nc).astype(jnp.float32))


@functools.partial(jax.jit, static_argnames=("block_b",))
def convnet_forward(x_nchw, params, block_b=8):
    n = x_nchw.shape[0]
    nc = params["fc_w"].shape[1]

    # Batch block size: amortize per-step overhead, but keep >=2 grid steps when possible
    # so v7x's two TensorCores both get work under dimension_semantics=("parallel",).
    blk = min(block_b, n)
    if n >= 2 and blk >= n:
        blk = max(1, n // 2)
    g = -(-n // blk)
    n_pad = g * blk
    if n_pad != n:
        x_nchw = jnp.pad(x_nchw, ((0, n_pad - n), (0, 0), (0, 0), (0, 0)))

    p1t = _block_patches(_conv1_pool_patches(x_nchw), blk)    # (g, 4, 25, blk*384)
    w1t, s1, t1, w2t, s2, t2, fcwT, fcb = _prepare_params(params)
    pmask = _pad_mask()
    selT = _pool2_selection_T()
    dmask, gsel = _fc_block_diag_mats(nc)

    flops_per_img = 2 * (4 * C1 * KS * KS * WPP               # conv1 (pool-decomposed)
                         + KS * KS * C2 * C1 * M2             # conv2 tap matmuls
                         + C2 * NSEL * P2 * P2                # pool2 selection matmul
                         + C2 * P2 * P2 * nc * C2             # fc (block-diag expanded)
                         + C2 * nc * C2 * nc)                 # class regrouping matmul
    bytes_accessed = 4 * (p1t.size + w1t.size + s1.size + t1.size + pmask.size
                          + w2t.size + s2.size + t2.size + selT.size + fcwT.size
                          + dmask.size + gsel.size + fcb.size + n_pad * nc)

    out = pl.pallas_call(
        _make_kernel(blk),
        out_shape=jax.ShapeDtypeStruct((g, blk, nc), jnp.float32),
        grid_spec=pltpu.PrefetchScalarGridSpec(
            num_scalar_prefetch=0,
            grid=(g,),
            in_specs=[
                pl.BlockSpec((1, 4, KS * KS, blk * WPP), lambda i: (i, 0, 0, 0)),
                pl.BlockSpec((C1, KS * KS), lambda i: (0, 0)),
                pl.BlockSpec((C1, 1), lambda i: (0, 0)),
                pl.BlockSpec((C1, 1), lambda i: (0, 0)),
                pl.BlockSpec((1, WPP), lambda i: (0, 0)),
                pl.BlockSpec((KS * KS, C2, C1), lambda i: (0, 0, 0)),
                pl.BlockSpec((C2, 1), lambda i: (0, 0)),
                pl.BlockSpec((C2, 1), lambda i: (0, 0)),
                pl.BlockSpec((NSEL, P2 * P2), lambda i: (0, 0)),
                pl.BlockSpec((P2 * P2, nc * C2), lambda i: (0, 0)),
                pl.BlockSpec((C2, nc * C2), lambda i: (0, 0)),
                pl.BlockSpec((nc * C2, nc), lambda i: (0, 0)),
                pl.BlockSpec((1, nc), lambda i: (0, 0)),
            ],
            out_specs=pl.BlockSpec((1, blk, nc), lambda i: (i, 0, 0)),
        ),
        compiler_params=pltpu.CompilerParams(dimension_semantics=("parallel",)),
        cost_estimate=pl.CostEstimate(flops=int(n_pad * flops_per_img), transcendentals=0,
                                      bytes_accessed=int(bytes_accessed)),
    )(p1t, w1t, s1, t1, pmask, w2t, s2, t2, selT, fcwT, dmask, gsel, fcb)
    return out.reshape(n_pad, nc)[:n]


# ---------------------------- pure-JAX reference ---------------------------- #

def _ref_forward(x_nchw, p):
    def block(x, w, b, g, be, m, v):
        y = jax.lax.conv_general_dilated(
            x, w, window_strides=(1, 1), padding=((PAD, PAD), (PAD, PAD)),
            dimension_numbers=("NCHW", "OIHW", "NCHW"))
        y = y + b[None, :, None, None]
        y = (y - m[None, :, None, None]) / jnp.sqrt(v[None, :, None, None] + EPS)
        y = y * g[None, :, None, None] + be[None, :, None, None]
        y = jnp.maximum(y, 0.0)
        return jax.lax.reduce_window(y, -jnp.inf, jax.lax.max,
                                     (1, 1, 2, 2), (1, 1, 2, 2), "VALID")
    y = block(x_nchw, p["w1"], p["b1"], p["g1"], p["be1"], p["m1"], p["v1"])
    y = block(y, p["w2"], p["b2"], p["g2"], p["be2"], p["m2"], p["v2"])
    y = y.reshape(y.shape[0], -1)
    return y @ p["fc_w"] + p["fc_b"][None, :]


# ---------------------------------- main ------------------------------------ #

def _init_params(key, num_classes=10):
    ks = jax.random.split(key, 8)
    p = {
        "w1": 0.1 * jax.random.normal(ks[0], (16, 1, 5, 5), jnp.float32),
        "b1": 0.1 * jax.random.normal(ks[1], (16,), jnp.float32),
        "g1": 1.0 + 0.05 * jax.random.normal(ks[2], (16,), jnp.float32),
        "be1": 0.05 * jax.random.normal(ks[3], (16,), jnp.float32),
        "m1": jnp.zeros((16,), jnp.float32),
        "v1": jnp.ones((16,), jnp.float32),
        "w2": 0.1 * jax.random.normal(ks[4], (32, 16, 5, 5), jnp.float32),
        "b2": 0.1 * jax.random.normal(ks[5], (32,), jnp.float32),
        "g2": 1.0 + 0.05 * jax.random.normal(ks[6], (32,), jnp.float32),
        "be2": 0.05 * jax.random.normal(ks[7], (32,), jnp.float32),
        "m2": jnp.zeros((32,), jnp.float32),
        "v2": jnp.ones((32,), jnp.float32),
    }
    kfc_w, kfc_b = jax.random.split(jax.random.fold_in(key, 123))
    p["fc_w"] = 0.02 * jax.random.normal(kfc_w, (7 * 7 * 32, num_classes), jnp.float32)
    p["fc_b"] = 0.02 * jax.random.normal(kfc_b, (num_classes,), jnp.float32)
    return p


if __name__ == "__main__":
    key = jax.random.PRNGKey(0)
    kx, kp = jax.random.split(key)
    x = jax.random.normal(kx, (4, 1, 28, 28), jnp.float32)  # NCHW, MNIST-sized
    params = _init_params(kp, num_classes=10)

    out = jax.block_until_ready(convnet_forward(x, params))
    assert out.shape == (4, 10), out.shape

    ref = _ref_forward(x, params)
    np.testing.assert_allclose(np.asarray(out), np.asarray(ref), rtol=1e-3, atol=1e-3)

    print("KERNEL_OK")
</pallas_src>

<mosaic_0001>
module attributes {stable_mosaic.version = 11 : i64} {
  func.func @kernel(%arg0: i32, %arg1: memref<1x4x25x768xf32, #tpu.memory_space<vmem>>, %arg2: memref<16x25xf32, #tpu.memory_space<vmem>>, %arg3: memref<16x1xf32, #tpu.memory_space<vmem>>, %arg4: memref<16x1xf32, #tpu.memory_space<vmem>>, %arg5: memref<1x384xf32, #tpu.memory_space<vmem>>, %arg6: memref<25x32x16xf32, #tpu.memory_space<vmem>>, %arg7: memref<32x1xf32, #tpu.memory_space<vmem>>, %arg8: memref<32x1xf32, #tpu.memory_space<vmem>>, %arg9: memref<233x49xf32, #tpu.memory_space<vmem>>, %arg10: memref<49x320xf32, #tpu.memory_space<vmem>>, %arg11: memref<32x320xf32, #tpu.memory_space<vmem>>, %arg12: memref<320x10xf32, #tpu.memory_space<vmem>>, %arg13: memref<1x10xf32, #tpu.memory_space<vmem>>, %arg14: memref<1x2x10xf32, #tpu.memory_space<vmem>>) attributes {dimension_semantics = [#tpu.dimension_semantics<parallel>], iteration_bounds = array<i64: 2>, scalar_prefetch = 0 : i64, scratch_operands = 0 : i64, tpu.core_type = #tpu.core_type<tc>, window_params = [{transform_indices = @transform_0, window_bounds = array<i64: 1, 4, 25, 768>}, {pipeline_mode = #tpu.pipeline_mode<synchronous>, transform_indices = @transform_1, window_bounds = array<i64: 16, 25>}, {pipeline_mode = #tpu.pipeline_mode<synchronous>, transform_indices = @transform_2, window_bounds = array<i64: 16, 1>}, {pipeline_mode = #tpu.pipeline_mode<synchronous>, transform_indices = @transform_3, window_bounds = array<i64: 16, 1>}, {pipeline_mode = #tpu.pipeline_mode<synchronous>, transform_indices = @transform_4, window_bounds = array<i64: 1, 384>}, {pipeline_mode = #tpu.pipeline_mode<synchronous>, transform_indices = @transform_5, window_bounds = array<i64: 25, 32, 16>}, {pipeline_mode = #tpu.pipeline_mode<synchronous>, transform_indices = @transform_6, window_bounds = array<i64: 32, 1>}, {pipeline_mode = #tpu.pipeline_mode<synchronous>, transform_indices = @transform_7, window_bounds = array<i64: 32, 1>}, {pipeline_mode = #tpu.pipeline_mode<synchronous>, transform_indices = @transform_8, window_bounds = array<i64: 233, 49>}, {pipeline_mode = #tpu.pipeline_mode<synchronous>, transform_indices = @transform_9, window_bounds = array<i64: 49, 320>}, {pipeline_mode = #tpu.pipeline_mode<synchronous>, transform_indices = @transform_10, window_bounds = array<i64: 32, 320>}, {pipeline_mode = #tpu.pipeline_mode<synchronous>, transform_indices = @transform_11, window_bounds = array<i64: 320, 10>}, {pipeline_mode = #tpu.pipeline_mode<synchronous>, transform_indices = @transform_12, window_bounds = array<i64: 1, 10>}, {transform_indices = @transform_13, window_bounds = array<i64: 1, 2, 10>}]} {
    %c0 = arith.constant 0 : index
    %c0_0 = arith.constant 0 : index
    %0 = vector.load %arg2[%c0, %c0_0] : memref<16x25xf32, #tpu.memory_space<vmem>>, vector<16x25xf32>
    %c0_1 = arith.constant 0 : index
    %c0_2 = arith.constant 0 : index
    %c0_3 = arith.constant 0 : index
    %c0_4 = arith.constant 0 : index
    %1 = vector.load %arg1[%c0_1, %c0_2, %c0_3, %c0_4] : memref<1x4x25x768xf32, #tpu.memory_space<vmem>>, vector<1x1x25x384xf32>
    %2 = vector.shape_cast %1 : vector<1x1x25x384xf32> to vector<25x384xf32>
    %cst = arith.constant dense<0.000000e+00> : vector<16x384xf32>
    %3 = tpu.matmul %0, %2, %cst {dimension_numbers = #tpu.dot_dimension_numbers<[1], [0], [0], [1], [0, 0, 1, 1], [], []>} : vector<16x25xf32>, vector<25x384xf32>, vector<16x384xf32> -> vector<16x384xf32>
    %c0_5 = arith.constant 0 : index
    %c0_6 = arith.constant 0 : index
    %4 = vector.load %arg3[%c0_5, %c0_6] : memref<16x1xf32, #tpu.memory_space<vmem>>, vector<16x1xf32>
    %5 = vector.broadcast %4 : vector<16x1xf32> to vector<16x384xf32>
    %6 = arith.mulf %3, %5 : vector<16x384xf32>
    %c0_7 = arith.constant 0 : index
    %c0_8 = arith.constant 0 : index
    %7 = vector.load %arg4[%c0_7, %c0_8] : memref<16x1xf32, #tpu.memory_space<vmem>>, vector<16x1xf32>
    %8 = vector.broadcast %7 : vector<16x1xf32> to vector<16x384xf32>
    %9 = arith.addf %6, %8 : vector<16x384xf32>
    %cst_9 = arith.constant 0.000000e+00 : f32
    %10 = vector.broadcast %cst_9 : f32 to vector<16x384xf32>
    %11 = arith.maximumf %9, %10 : vector<16x384xf32>
    %c0_10 = arith.constant 0 : index
    %c0_11 = arith.constant 0 : index
    %12 = vector.load %arg2[%c0_10, %c0_11] : memref<16x25xf32, #tpu.memory_space<vmem>>, vector<16x25xf32>
    %c0_12 = arith.constant 0 : index
    %c1 = arith.constant 1 : index
    %c0_13 = arith.constant 0 : index
    %c0_14 = arith.constant 0 : index
    %13 = vector.load %arg1[%c0_12, %c1, %c0_13, %c0_14] : memref<1x4x25x768xf32, #tpu.memory_space<vmem>>, vector<1x1x25x384xf32>
    %14 = vector.shape_cast %13 : vector<1x1x25x384xf32> to vector<25x384xf32>
    %cst_15 = arith.constant dense<0.000000e+00> : vector<16x384xf32>
    %15 = tpu.matmul %12, %14, %cst_15 {dimension_numbers = #tpu.dot_dimension_numbers<[1], [0], [0], [1], [0, 0, 1, 1], [], []>} : vector<16x25xf32>, vector<25x384xf32>, vector<16x384xf32> -> vector<16x384xf32>
    %c0_16 = arith.constant 0 : index
    %c0_17 = arith.constant 0 : index
    %16 = vector.load %arg3[%c0_16, %c0_17] : memref<16x1xf32, #tpu.memory_space<vmem>>, vector<16x1xf32>
    %17 = vector.broadcast %16 : vector<16x1xf32> to vector<16x384xf32>
    %18 = arith.mulf %15, %17 : vector<16x384xf32>
    %c0_18 = arith.constant 0 : index
    %c0_19 = arith.constant 0 : index
    %19 = vector.load %arg4[%c0_18, %c0_19] : memref<16x1xf32, #tpu.memory_space<vmem>>, vector<16x1xf32>
    %20 = vector.broadcast %19 : vector<16x1xf32> to vector<16x384xf32>
    %21 = arith.addf %18, %20 : vector<16x384xf32>
    %cst_20 = arith.constant 0.000000e+00 : f32
    %22 = vector.broadcast %cst_20 : f32 to vector<16x384xf32>
    %23 = arith.maximumf %21, %22 : vector<16x384xf32>
    %24 = arith.maximumf %11, %23 : vector<16x384xf32>
    %c0_21 = arith.constant 0 : index
    %c0_22 = arith.constant 0 : index
    %25 = vector.load %arg2[%c0_21, %c0_22] : memref<16x25xf32, #tpu.memory_space<vmem>>, vector<16x25xf32>
    %c0_23 = arith.constant 0 : index
    %c2 = arith.constant 2 : index
    %c0_24 = arith.constant 0 : index
    %c0_25 = arith.constant 0 : index
    %26 = vector.load %arg1[%c0_23, %c2, %c0_24, %c0_25] : memref<1x4x25x768xf32, #tpu.memory_space<vmem>>, vector<1x1x25x384xf32>
    %27 = vector.shape_cast %26 : vector<1x1x25x384xf32> to vector<25x384xf32>
    %cst_26 = arith.constant dense<0.000000e+00> : vector<16x384xf32>
    %28 = tpu.matmul %25, %27, %cst_26 {dimension_numbers = #tpu.dot_dimension_numbers<[1], [0], [0], [1], [0, 0, 1, 1], [], []>} : vector<16x25xf32>, vector<25x384xf32>, vector<16x384xf32> -> vector<16x384xf32>
    %c0_27 = arith.constant 0 : index
    %c0_28 = arith.constant 0 : index
    %29 = vector.load %arg3[%c0_27, %c0_28] : memref<16x1xf32, #tpu.memory_space<vmem>>, vector<16x1xf32>
    %30 = vector.broadcast %29 : vector<16x1xf32> to vector<16x384xf32>
    %31 = arith.mulf %28, %30 : vector<16x384xf32>
    %c0_29 = arith.constant 0 : index
    %c0_30 = arith.constant 0 : index
    %32 = vector.load %arg4[%c0_29, %c0_30] : memref<16x1xf32, #tpu.memory_space<vmem>>, vector<16x1xf32>
    %33 = vector.broadcast %32 : vector<16x1xf32> to vector<16x384xf32>
    %34 = arith.addf %31, %33 : vector<16x384xf32>
    %cst_31 = arith.constant 0.000000e+00 : f32
    %35 = vector.broadcast %cst_31 : f32 to vector<16x384xf32>
    %36 = arith.maximumf %34, %35 : vector<16x384xf32>
    %37 = arith.maximumf %24, %36 : vector<16x384xf32>
    %c0_32 = arith.constant 0 : index
    %c0_33 = arith.constant 0 : index
    %38 = vector.load %arg2[%c0_32, %c0_33] : memref<16x25xf32, #tpu.memory_space<vmem>>, vector<16x25xf32>
    %c0_34 = arith.constant 0 : index
    %c3 = arith.constant 3 : index
    %c0_35 = arith.constant 0 : index
    %c0_36 = arith.constant 0 : index
    %39 = vector.load %arg1[%c0_34, %c3, %c0_35, %c0_36] : memref<1x4x25x768xf32, #tpu.memory_space<vmem>>, vector<1x1x25x384xf32>
    %40 = vector.shape_cast %39 : vector<1x1x25x384xf32> to vector<25x384xf32>
    %cst_37 = arith.constant dense<0.000000e+00> : vector<16x384xf32>
    %41 = tpu.matmul %38, %40, %cst_37 {dimension_numbers = #tpu.dot_dimension_numbers<[1], [0], [0], [1], [0, 0, 1, 1], [], []>} : vector<16x25xf32>, vector<25x384xf32>, vector<16x384xf32> -> vector<16x384xf32>
    %c0_38 = arith.constant 0 : index
    %c0_39 = arith.constant 0 : index
    %42 = vector.load %arg3[%c0_38, %c0_39] : memref<16x1xf32, #tpu.memory_space<vmem>>, vector<16x1xf32>
    %43 = vector.broadcast %42 : vector<16x1xf32> to vector<16x384xf32>
    %44 = arith.mulf %41, %43 : vector<16x384xf32>
    %c0_40 = arith.constant 0 : index
    %c0_41 = arith.constant 0 : index
    %45 = vector.load %arg4[%c0_40, %c0_41] : memref<16x1xf32, #tpu.memory_space<vmem>>, vector<16x1xf32>
    %46 = vector.broadcast %45 : vector<16x1xf32> to vector<16x384xf32>
    %47 = arith.addf %44, %46 : vector<16x384xf32>
    %cst_42 = arith.constant 0.000000e+00 : f32
    %48 = vector.broadcast %cst_42 : f32 to vector<16x384xf32>
    %49 = arith.maximumf %47, %48 : vector<16x384xf32>
    %50 = arith.maximumf %37, %49 : vector<16x384xf32>
    %c0_43 = arith.constant 0 : index
    %c0_44 = arith.constant 0 : index
    %51 = vector.load %arg5[%c0_43, %c0_44] : memref<1x384xf32, #tpu.memory_space<vmem>>, vector<1x384xf32>
    %52 = vector.broadcast %51 : vector<1x384xf32> to vector<16x384xf32>
    %53 = arith.mulf %50, %52 : vector<16x384xf32>
    %c0_45 = arith.constant 0 : index
    %c0_46 = arith.constant 0 : index
    %c0_47 = arith.constant 0 : index
    %54 = vector.load %arg6[%c0_45, %c0_46, %c0_47] : memref<25x32x16xf32, #tpu.memory_space<vmem>>, vector<1x32x16xf32>
    %55 = vector.shape_cast %54 : vector<1x32x16xf32> to vector<32x16xf32>
    %56 = vector.extract_strided_slice %53 {offsets = [0, 0], sizes = [16, 252], strides = [1, 1]} : vector<16x384xf32> to vector<16x252xf32>
    %cst_48 = arith.constant dense<0.000000e+00> : vector<32x252xf32>
    %57 = tpu.matmul %55, %56, %cst_48 {dimension_numbers = #tpu.dot_dimension_numbers<[1], [0], [0], [1], [0, 0, 1, 1], [], []>} : vector<32x16xf32>, vector<16x252xf32>, vector<32x252xf32> -> vector<32x252xf32>
    %c1_49 = arith.constant 1 : index
    %c0_50 = arith.constant 0 : index
    %c0_51 = arith.constant 0 : index
    %58 = vector.load %arg6[%c1_49, %c0_50, %c0_51] : memref<25x32x16xf32, #tpu.memory_space<vmem>>, vector<1x32x16xf32>
    %59 = vector.shape_cast %58 : vector<1x32x16xf32> to vector<32x16xf32>
    %60 = vector.extract_strided_slice %53 {offsets = [0, 1], sizes = [16, 252], strides = [1, 1]} : vector<16x384xf32> to vector<16x252xf32>
    %cst_52 = arith.constant dense<0.000000e+00> : vector<32x252xf32>
    %61 = tpu.matmul %59, %60, %cst_52 {dimension_numbers = #tpu.dot_dimension_numbers<[1], [0], [0], [1], [0, 0, 1, 1], [], []>} : vector<32x16xf32>, vector<16x252xf32>, vector<32x252xf32> -> vector<32x252xf32>
    %62 = arith.addf %57, %61 : vector<32x252xf32>
    %c2_53 = arith.constant 2 : index
    %c0_54 = arith.constant 0 : index
    %c0_55 = arith.constant 0 : index
    %63 = vector.load %arg6[%c2_53, %c0_54, %c0_55] : memref<25x32x16xf32, #tpu.memory_space<vmem>>, vector<1x32x16xf32>
    %64 = vector.shape_cast %63 : vector<1x32x16xf32> to vector<32x16xf32>
    %65 = vector.extract_strided_slice %53 {offsets = [0, 2], sizes = [16, 252], strides = [1, 1]} : vector<16x384xf32> to vector<16x252xf32>
    %cst_56 = arith.constant dense<0.000000e+00> : vector<32x252xf32>
    %66 = tpu.matmul %64, %65, %cst_56 {dimension_numbers = #tpu.dot_dimension_numbers<[1], [0], [0], [1], [0, 0, 1, 1], [], []>} : vector<32x16xf32>, vector<16x252xf32>, vector<32x252xf32> -> vector<32x252xf32>
    %67 = arith.addf %62, %66 : vector<32x252xf32>
    %c3_57 = arith.constant 3 : index
    %c0_58 = arith.constant 0 : index
    %c0_59 = arith.constant 0 : index
    %68 = vector.load %arg6[%c3_57, %c0_58, %c0_59] : memref<25x32x16xf32, #tpu.memory_space<vmem>>, vector<1x32x16xf32>
    %69 = vector.shape_cast %68 : vector<1x32x16xf32> to vector<32x16xf32>
    %70 = vector.extract_strided_slice %53 {offsets = [0, 3], sizes = [16, 252], strides = [1, 1]} : vector<16x384xf32> to vector<16x252xf32>
    %cst_60 = arith.constant dense<0.000000e+00> : vector<32x252xf32>
    %71 = tpu.matmul %69, %70, %cst_60 {dimension_numbers = #tpu.dot_dimension_numbers<[1], [0], [0], [1], [0, 0, 1, 1], [], []>} : vector<32x16xf32>, vector<16x252xf32>, vector<32x252xf32> -> vector<32x252xf32>
    %72 = arith.addf %67, %71 : vector<32x252xf32>
    %c4 = arith.constant 4 : index
    %c0_61 = arith.constant 0 : index
    %c0_62 = arith.constant 0 : index
    %73 = vector.load %arg6[%c4, %c0_61, %c0_62] : memref<25x32x16xf32, #tpu.memory_space<vmem>>, vector<1x32x16xf32>
    %74 = vector.shape_cast %73 : vector<1x32x16xf32> to vector<32x16xf32>
    %75 = vector.extract_strided_slice %53 {offsets = [0, 4], sizes = [16, 252], strides = [1, 1]} : vector<16x384xf32> to vector<16x252xf32>
    %cst_63 = arith.constant dense<0.000000e+00> : vector<32x252xf32>
    %76 = tpu.matmul %74, %75, %cst_63 {dimension_numbers = #tpu.dot_dimension_numbers<[1], [0], [0], [1], [0, 0, 1, 1], [], []>} : vector<32x16xf32>, vector<16x252xf32>, vector<32x252xf32> -> vector<32x252xf32>
    %77 = arith.addf %72, %76 : vector<32x252xf32>
    %c5 = arith.constant 5 : index
    %c0_64 = arith.constant 0 : index
    %c0_65 = arith.constant 0 : index
    %78 = vector.load %arg6[%c5, %c0_64, %c0_65] : memref<25x32x16xf32, #tpu.memory_space<vmem>>, vector<1x32x16xf32>
    %79 = vector.shape_cast %78 : vector<1x32x16xf32> to vector<32x16xf32>
    %80 = vector.extract_strided_slice %53 {offsets = [0, 18], sizes = [16, 252], strides = [1, 1]} : vector<16x384xf32> to vector<16x252xf32>
    %cst_66 = arith.constant dense<0.000000e+00> : vector<32x252xf32>
    %81 = tpu.matmul %79, %80, %cst_66 {dimension_numbers = #tpu.dot_dimension_numbers<[1], [0], [0], [1], [0, 0, 1, 1], [], []>} : vector<32x16xf32>, vector<16x252xf32>, vector<32x252xf32> -> vector<32x252xf32>
    %82 = arith.addf %77, %81 : vector<32x252xf32>
    %c6 = arith.constant 6 : index
    %c0_67 = arith.constant 0 : index
    %c0_68 = arith.constant 0 : index
    %83 = vector.load %arg6[%c6, %c0_67, %c0_68] : memref<25x32x16xf32, #tpu.memory_space<vmem>>, vector<1x32x16xf32>
    %84 = vector.shape_cast %83 : vector<1x32x16xf32> to vector<32x16xf32>
    %85 = vector.extract_strided_slice %53 {offsets = [0, 19], sizes = [16, 252], strides = [1, 1]} : vector<16x384xf32> to vector<16x252xf32>
    %cst_69 = arith.constant dense<0.000000e+00> : vector<32x252xf32>
    %86 = tpu.matmul %84, %85, %cst_69 {dimension_numbers = #tpu.dot_dimension_numbers<[1], [0], [0], [1], [0, 0, 1, 1], [], []>} : vector<32x16xf32>, vector<16x252xf32>, vector<32x252xf32> -> vector<32x252xf32>
    %87 = arith.addf %82, %86 : vector<32x252xf32>
    %c7 = arith.constant 7 : index
    %c0_70 = arith.constant 0 : index
    %c0_71 = arith.constant 0 : index
    %88 = vector.load %arg6[%c7, %c0_70, %c0_71] : memref<25x32x16xf32, #tpu.memory_space<vmem>>, vector<1x32x16xf32>
    %89 = vector.shape_cast %88 : vector<1x32x16xf32> to vector<32x16xf32>
    %90 = vector.extract_strided_slice %53 {offsets = [0, 20], sizes = [16, 252], strides = [1, 1]} : vector<16x384xf32> to vector<16x252xf32>
    %cst_72 = arith.constant dense<0.000000e+00> : vector<32x252xf32>
    %91 = tpu.matmul %89, %90, %cst_72 {dimension_numbers = #tpu.dot_dimension_numbers<[1], [0], [0], [1], [0, 0, 1, 1], [], []>} : vector<32x16xf32>, vector<16x252xf32>, vector<32x252xf32> -> vector<32x252xf32>
    %92 = arith.addf %87, %91 : vector<32x252xf32>
    %c8 = arith.constant 8 : index
    %c0_73 = arith.constant 0 : index
    %c0_74 = arith.constant 0 : index
    %93 = vector.load %arg6[%c8, %c0_73, %c0_74] : memref<25x32x16xf32, #tpu.memory_space<vmem>>, vector<1x32x16xf32>
    %94 = vector.shape_cast %93 : vector<1x32x16xf32> to vector<32x16xf32>
    %95 = vector.extract_strided_slice %53 {offsets = [0, 21], sizes = [16, 252], strides = [1, 1]} : vector<16x384xf32> to vector<16x252xf32>
    %cst_75 = arith.constant dense<0.000000e+00> : vector<32x252xf32>
    %96 = tpu.matmul %94, %95, %cst_75 {dimension_numbers = #tpu.dot_dimension_numbers<[1], [0], [0], [1], [0, 0, 1, 1], [], []>} : vector<32x16xf32>, vector<16x252xf32>, vector<32x252xf32> -> vector<32x252xf32>
    %97 = arith.addf %92, %96 : vector<32x252xf32>
    %c9 = arith.constant 9 : index
    %c0_76 = arith.constant 0 : index
    %c0_77 = arith.constant 0 : index
    %98 = vector.load %arg6[%c9, %c0_76, %c0_77] : memref<25x32x16xf32, #tpu.memory_space<vmem>>, vector<1x32x16xf32>
    %99 = vector.shape_cast %98 : vector<1x32x16xf32> to vector<32x16xf32>
    %100 = vector.extract_strided_slice %53 {offsets = [0, 22], sizes = [16, 252], strides = [1, 1]} : vector<16x384xf32> to vector<16x252xf32>
    %cst_78 = arith.constant dense<0.000000e+00> : vector<32x252xf32>
    %101 = tpu.matmul %99, %100, %cst_78 {dimension_numbers = #tpu.dot_dimension_numbers<[1], [0], [0], [1], [0, 0, 1, 1], [], []>} : vector<32x16xf32>, vector<16x252xf32>, vector<32x252xf32> -> vector<32x252xf32>
    %102 = arith.addf %97, %101 : vector<32x252xf32>
    %c10 = arith.constant 10 : index
    %c0_79 = arith.constant 0 : index
    %c0_80 = arith.constant 0 : index
    %103 = vector.load %arg6[%c10, %c0_79, %c0_80] : memref<25x32x16xf32, #tpu.memory_space<vmem>>, vector<1x32x16xf32>
    %104 = vector.shape_cast %103 : vector<1x32x16xf32> to vector<32x16xf32>
    %105 = vector.extract_strided_slice %53 {offsets = [0, 36], sizes = [16, 252], strides = [1, 1]} : vector<16x384xf32> to vector<16x252xf32>
    %cst_81 = arith.constant dense<0.000000e+00> : vector<32x252xf32>
    %106 = tpu.matmul %104, %105, %cst_81 {dimension_numbers = #tpu.dot_dimension_numbers<[1], [0], [0], [1], [0, 0, 1, 1], [], []>} : vector<32x16xf32>, vector<16x252xf32>, vector<32x252xf32> -> vector<32x252xf32>
    %107 = arith.addf %102, %106 : vector<32x252xf32>
    %c11 = arith.constant 11 : index
    %c0_82 = arith.constant 0 : index
    %c0_83 = arith.constant 0 : index
    %108 = vector.load %arg6[%c11, %c0_82, %c0_83] : memref<25x32x16xf32, #tpu.memory_space<vmem>>, vector<1x32x16xf32>
    %109 = vector.shape_cast %108 : vector<1x32x16xf32> to vector<32x16xf32>
    %110 = vector.extract_strided_slice %53 {offsets = [0, 37], sizes = [16, 252], strides = [1, 1]} : vector<16x384xf32> to vector<16x252xf32>
    %cst_84 = arith.constant dense<0.000000e+00> : vector<32x252xf32>
    %111 = tpu.matmul %109, %110, %cst_84 {dimension_numbers = #tpu.dot_dimension_numbers<[1], [0], [0], [1], [0, 0, 1, 1], [], []>} : vector<32x16xf32>, vector<16x252xf32>, vector<32x252xf32> -> vector<32x252xf32>
    %112 = arith.addf %107, %111 : vector<32x252xf32>
    %c12 = arith.constant 12 : index
    %c0_85 = arith.constant 0 : index
    %c0_86 = arith.constant 0 : index
    %113 = vector.load %arg6[%c12, %c0_85, %c0_86] : memref<25x32x16xf32, #tpu.memory_space<vmem>>, vector<1x32x16xf32>
    %114 = vector.shape_cast %113 : vector<1x32x16xf32> to vector<32x16xf32>
    %115 = vector.extract_strided_slice %53 {offsets = [0, 38], sizes = [16, 252], strides = [1, 1]} : vector<16x384xf32> to vector<16x252xf32>
    %cst_87 = arith.constant dense<0.000000e+00> : vector<32x252xf32>
    %116 = tpu.matmul %114, %115, %cst_87 {dimension_numbers = #tpu.dot_dimension_numbers<[1], [0], [0], [1], [0, 0, 1, 1], [], []>} : vector<32x16xf32>, vector<16x252xf32>, vector<32x252xf32> -> vector<32x252xf32>
    %117 = arith.addf %112, %116 : vector<32x252xf32>
    %c13 = arith.constant 13 : index
    %c0_88 = arith.constant 0 : index
    %c0_89 = arith.constant 0 : index
    %118 = vector.load %arg6[%c13, %c0_88, %c0_89] : memref<25x32x16xf32, #tpu.memory_space<vmem>>, vector<1x32x16xf32>
    %119 = vector.shape_cast %118 : vector<1x32x16xf32> to vector<32x16xf32>
    %120 = vector.extract_strided_slice %53 {offsets = [0, 39], sizes = [16, 252], strides = [1, 1]} : vector<16x384xf32> to vector<16x252xf32>
    %cst_90 = arith.constant dense<0.000000e+00> : vector<32x252xf32>
    %121 = tpu.matmul %119, %120, %cst_90 {dimension_numbers = #tpu.dot_dimension_numbers<[1], [0], [0], [1], [0, 0, 1, 1], [], []>} : vector<32x16xf32>, vector<16x252xf32>, vector<32x252xf32> -> vector<32x252xf32>
    %122 = arith.addf %117, %121 : vector<32x252xf32>
    %c14 = arith.constant 14 : index
    %c0_91 = arith.constant 0 : index
    %c0_92 = arith.constant 0 : index
    %123 = vector.load %arg6[%c14, %c0_91, %c0_92] : memref<25x32x16xf32, #tpu.memory_space<vmem>>, vector<1x32x16xf32>
    %124 = vector.shape_cast %123 : vector<1x32x16xf32> to vector<32x16xf32>
    %125 = vector.extract_strided_slice %53 {offsets = [0, 40], sizes = [16, 252], strides = [1, 1]} : vector<16x384xf32> to vector<16x252xf32>
    %cst_93 = arith.constant dense<0.000000e+00> : vector<32x252xf32>
    %126 = tpu.matmul %124, %125, %cst_93 {dimension_numbers = #tpu.dot_dimension_numbers<[1], [0], [0], [1], [0, 0, 1, 1], [], []>} : vector<32x16xf32>, vector<16x252xf32>, vector<32x252xf32> -> vector<32x252xf32>
    %127 = arith.addf %122, %126 : vector<32x252xf32>
    %c15 = arith.constant 15 : index
    %c0_94 = arith.constant 0 : index
    %c0_95 = arith.constant 0 : index
    %128 = vector.load %arg6[%c15, %c0_94, %c0_95] : memref<25x32x16xf32, #tpu.memory_space<vmem>>, vector<1x32x16xf32>
    %129 = vector.shape_cast %128 : vector<1x32x16xf32> to vector<32x16xf32>
    %130 = vector.extract_strided_slice %53 {offsets = [0, 54], sizes = [16, 252], strides = [1, 1]} : vector<16x384xf32> to vector<16x252xf32>
    %cst_96 = arith.constant dense<0.000000e+00> : vector<32x252xf32>
    %131 = tpu.matmul %129, %130, %cst_96 {dimension_numbers = #tpu.dot_dimension_numbers<[1], [0], [0], [1], [0, 0, 1, 1], [], []>} : vector<32x16xf32>, vector<16x252xf32>, vector<32x252xf32> -> vector<32x252xf32>
    %132 = arith.addf %127, %131 : vector<32x252xf32>
    %c16 = arith.constant 16 : index
    %c0_97 = arith.constant 0 : index
    %c0_98 = arith.constant 0 : index
    %133 = vector.load %arg6[%c16, %c0_97, %c0_98] : memref<25x32x16xf32, #tpu.memory_space<vmem>>, vector<1x32x16xf32>
    %134 = vector.shape_cast %133 : vector<1x32x16xf32> to vector<32x16xf32>
    %135 = vector.extract_strided_slice %53 {offsets = [0, 55], sizes = [16, 252], strides = [1, 1]} : vector<16x384xf32> to vector<16x252xf32>
    %cst_99 = arith.constant dense<0.000000e+00> : vector<32x252xf32>
    %136 = tpu.matmul %134, %135, %cst_99 {dimension_numbers = #tpu.dot_dimension_numbers<[1], [0], [0], [1], [0, 0, 1, 1], [], []>} : vector<32x16xf32>, vector<16x252xf32>, vector<32x252xf32> -> vector<32x252xf32>
    %137 = arith.addf %132, %136 : vector<32x252xf32>
    %c17 = arith.constant 17 : index
    %c0_100 = arith.constant 0 : index
    %c0_101 = arith.constant 0 : index
    %138 = vector.load %arg6[%c17, %c0_100, %c0_101] : memref<25x32x16xf32, #tpu.memory_space<vmem>>, vector<1x32x16xf32>
    %139 = vector.shape_cast %138 : vector<1x32x16xf32> to vector<32x16xf32>
    %140 = vector.extract_strided_slice %53 {offsets = [0, 56], sizes = [16, 252], strides = [1, 1]} : vector<16x384xf32> to vector<16x252xf32>
    %cst_102 = arith.constant dense<0.000000e+00> : vector<32x252xf32>
    %141 = tpu.matmul %139, %140, %cst_102 {dimension_numbers = #tpu.dot_dimension_numbers<[1], [0], [0], [1], [0, 0, 1, 1], [], []>} : vector<32x16xf32>, vector<16x252xf32>, vector<32x252xf32> -> vector<32x252xf32>
    %142 = arith.addf %137, %141 : vector<32x252xf32>
    %c18 = arith.constant 18 : index
    %c0_103 = arith.constant 0 : index
    %c0_104 = arith.constant 0 : index
    %143 = vector.load %arg6[%c18, %c0_103, %c0_104] : memref<25x32x16xf32, #tpu.memory_space<vmem>>, vector<1x32x16xf32>
    %144 = vector.shape_cast %143 : vector<1x32x16xf32> to vector<32x16xf32>
    %145 = vector.extract_strided_slice %53 {offsets = [0, 57], sizes = [16, 252], strides = [1, 1]} : vector<16x384xf32> to vector<16x252xf32>
    %cst_105 = arith.constant dense<0.000000e+00> : vector<32x252xf32>
    %146 = tpu.matmul %144, %145, %cst_105 {dimension_numbers = #tpu.dot_dimension_numbers<[1], [0], [0], [1], [0, 0, 1, 1], [], []>} : vector<32x16xf32>, vector<16x252xf32>, vector<32x252xf32> -> vector<32x252xf32>
    %147 = arith.addf %142, %146 : vector<32x252xf32>
    %c19 = arith.constant 19 : index
    %c0_106 = arith.constant 0 : index
    %c0_107 = arith.constant 0 : index
    %148 = vector.load %arg6[%c19, %c0_106, %c0_107] : memref<25x32x16xf32, #tpu.memory_space<vmem>>, vector<1x32x16xf32>
    %149 = vector.shape_cast %148 : vector<1x32x16xf32> to vector<32x16xf32>
    %150 = vector.extract_strided_slice %53 {offsets = [0, 58], sizes = [16, 252], strides = [1, 1]} : vector<16x384xf32> to vector<16x252xf32>
    %cst_108 = arith.constant dense<0.000000e+00> : vector<32x252xf32>
    %151 = tpu.matmul %149, %150, %cst_108 {dimension_numbers = #tpu.dot_dimension_numbers<[1], [0], [0], [1], [0, 0, 1, 1], [], []>} : vector<32x16xf32>, vector<16x252xf32>, vector<32x252xf32> -> vector<32x252xf32>
    %152 = arith.addf %147, %151 : vector<32x252xf32>
    %c20 = arith.constant 20 : index
    %c0_109 = arith.constant 0 : index
    %c0_110 = arith.constant 0 : index
    %153 = vector.load %arg6[%c20, %c0_109, %c0_110] : memref<25x32x16xf32, #tpu.memory_space<vmem>>, vector<1x32x16xf32>
    %154 = vector.shape_cast %153 : vector<1x32x16xf32> to vector<32x16xf32>
    %155 = vector.extract_strided_slice %53 {offsets = [0, 72], sizes = [16, 252], strides = [1, 1]} : vector<16x384xf32> to vector<16x252xf32>
    %cst_111 = arith.constant dense<0.000000e+00> : vector<32x252xf32>
    %156 = tpu.matmul %154, %155, %cst_111 {dimension_numbers = #tpu.dot_dimension_numbers<[1], [0], [0], [1], [0, 0, 1, 1], [], []>} : vector<32x16xf32>, vector<16x252xf32>, vector<32x252xf32> -> vector<32x252xf32>
    %157 = arith.addf %152, %156 : vector<32x252xf32>
    %c21 = arith.constant 21 : index
    %c0_112 = arith.constant 0 : index
    %c0_113 = arith.constant 0 : index
    %158 = vector.load %arg6[%c21, %c0_112, %c0_113] : memref<25x32x16xf32, #tpu.memory_space<vmem>>, vector<1x32x16xf32>
    %159 = vector.shape_cast %158 : vector<1x32x16xf32> to vector<32x16xf32>
    %160 = vector.extract_strided_slice %53 {offsets = [0, 73], sizes = [16, 252], strides = [1, 1]} : vector<16x384xf32> to vector<16x252xf32>
    %cst_114 = arith.constant dense<0.000000e+00> : vector<32x252xf32>
    %161 = tpu.matmul %159, %160, %cst_114 {dimension_numbers = #tpu.dot_dimension_numbers<[1], [0], [0], [1], [0, 0, 1, 1], [], []>} : vector<32x16xf32>, vector<16x252xf32>, vector<32x252xf32> -> vector<32x252xf32>
    %162 = arith.addf %157, %161 : vector<32x252xf32>
    %c22 = arith.constant 22 : index
    %c0_115 = arith.constant 0 : index
    %c0_116 = arith.constant 0 : index
    %163 = vector.load %arg6[%c22, %c0_115, %c0_116] : memref<25x32x16xf32, #tpu.memory_space<vmem>>, vector<1x32x16xf32>
    %164 = vector.shape_cast %163 : vector<1x32x16xf32> to vector<32x16xf32>
    %165 = vector.extract_strided_slice %53 {offsets = [0, 74], sizes = [16, 252], strides = [1, 1]} : vector<16x384xf32> to vector<16x252xf32>
    %cst_117 = arith.constant dense<0.000000e+00> : vector<32x252xf32>
    %166 = tpu.matmul %164, %165, %cst_117 {dimension_numbers = #tpu.dot_dimension_numbers<[1], [0], [0], [1], [0, 0, 1, 1], [], []>} : vector<32x16xf32>, vector<16x252xf32>, vector<32x252xf32> -> vector<32x252xf32>
    %167 = arith.addf %162, %166 : vector<32x252xf32>
    %c23 = arith.constant 23 : index
    %c0_118 = arith.constant 0 : index
    %c0_119 = arith.constant 0 : index
    %168 = vector.load %arg6[%c23, %c0_118, %c0_119] : memref<25x32x16xf32, #tpu.memory_space<vmem>>, vector<1x32x16xf32>
    %169 = vector.shape_cast %168 : vector<1x32x16xf32> to vector<32x16xf32>
    %170 = vector.extract_strided_slice %53 {offsets = [0, 75], sizes = [16, 252], strides = [1, 1]} : vector<16x384xf32> to vector<16x252xf32>
    %cst_120 = arith.constant dense<0.000000e+00> : vector<32x252xf32>
    %171 = tpu.matmul %169, %170, %cst_120 {dimension_numbers = #tpu.dot_dimension_numbers<[1], [0], [0], [1], [0, 0, 1, 1], [], []>} : vector<32x16xf32>, vector<16x252xf32>, vector<32x252xf32> -> vector<32x252xf32>
    %172 = arith.addf %167, %171 : vector<32x252xf32>
    %c24 = arith.constant 24 : index
    %c0_121 = arith.constant 0 : index
    %c0_122 = arith.constant 0 : index
    %173 = vector.load %arg6[%c24, %c0_121, %c0_122] : memref<25x32x16xf32, #tpu.memory_space<vmem>>, vector<1x32x16xf32>
    %174 = vector.shape_cast %173 : vector<1x32x16xf32> to vector<32x16xf32>
    %175 = vector.extract_strided_slice %53 {offsets = [0, 76], sizes = [16, 252], strides = [1, 1]} : vector<16x384xf32> to vector<16x252xf32>
    %cst_123 = arith.constant dense<0.000000e+00> : vector<32x252xf32>
    %176 = tpu.matmul %174, %175, %cst_123 {dimension_numbers = #tpu.dot_dimension_numbers<[1], [0], [0], [1], [0, 0, 1, 1], [], []>} : vector<32x16xf32>, vector<16x252xf32>, vector<32x252xf32> -> vector<32x252xf32>
    %177 = arith.addf %172, %176 : vector<32x252xf32>
    %c0_124 = arith.constant 0 : index
    %c0_125 = arith.constant 0 : index
    %178 = vector.load %arg7[%c0_124, %c0_125] : memref<32x1xf32, #tpu.memory_space<vmem>>, vector<32x1xf32>
    %179 = vector.broadcast %178 : vector<32x1xf32> to vector<32x252xf32>
    %180 = arith.mulf %177, %179 : vector<32x252xf32>
    %c0_126 = arith.constant 0 : index
    %c0_127 = arith.constant 0 : index
    %181 = vector.load %arg8[%c0_126, %c0_127] : memref<32x1xf32, #tpu.memory_space<vmem>>, vector<32x1xf32>
    %182 = vector.broadcast %181 : vector<32x1xf32> to vector<32x252xf32>
    %183 = arith.addf %180, %182 : vector<32x252xf32>
    %cst_128 = arith.constant 0.000000e+00 : f32
    %184 = vector.broadcast %cst_128 : f32 to vector<32x252xf32>
    %185 = arith.maximumf %183, %184 : vector<32x252xf32>
    %186 = vector.extract_strided_slice %185 {offsets = [0, 0], sizes = [32, 233], strides = [1, 1]} : vector<32x252xf32> to vector<32x233xf32>
    %187 = vector.extract_strided_slice %185 {offsets = [0, 1], sizes = [32, 233], strides = [1, 1]} : vector<32x252xf32> to vector<32x233xf32>
    %188 = arith.maximumf %186, %187 : vector<32x233xf32>
    %189 = vector.extract_strided_slice %185 {offsets = [0, 18], sizes = [32, 233], strides = [1, 1]} : vector<32x252xf32> to vector<32x233xf32>
    %190 = vector.extract_strided_slice %185 {offsets = [0, 19], sizes = [32, 233], strides = [1, 1]} : vector<32x252xf32> to vector<32x233xf32>
    %191 = arith.maximumf %189, %190 : vector<32x233xf32>
    %192 = arith.maximumf %188, %191 : vector<32x233xf32>
    %c0_129 = arith.constant 0 : index
    %c0_130 = arith.constant 0 : index
    %193 = vector.load %arg9[%c0_129, %c0_130] : memref<233x49xf32, #tpu.memory_space<vmem>>, vector<233x49xf32>
    %cst_131 = arith.constant dense<0.000000e+00> : vector<32x49xf32>
    %194 = tpu.matmul %192, %193, %cst_131 {dimension_numbers = #tpu.dot_dimension_numbers<[1], [0], [0], [1], [0, 0, 1, 1], [], []>} : vector<32x233xf32>, vector<233x49xf32>, vector<32x49xf32> -> vector<32x49xf32>
    %c0_132 = arith.constant 0 : index
    %c0_133 = arith.constant 0 : index
    %195 = vector.load %arg10[%c0_132, %c0_133] : memref<49x320xf32, #tpu.memory_space<vmem>>, vector<49x320xf32>
    %cst_134 = arith.constant dense<0.000000e+00> : vector<32x320xf32>
    %196 = tpu.matmul %194, %195, %cst_134 {dimension_numbers = #tpu.dot_dimension_numbers<[1], [0], [0], [1], [0, 0, 1, 1], [], []>} : vector<32x49xf32>, vector<49x320xf32>, vector<32x320xf32> -> vector<32x320xf32>
    %c0_135 = arith.constant 0 : index
    %c0_136 = arith.constant 0 : index
    %197 = vector.load %arg11[%c0_135, %c0_136] : memref<32x320xf32, #tpu.memory_space<vmem>>, vector<32x320xf32>
    %198 = arith.mulf %196, %197 : vector<32x320xf32>
    %c0_137 = arith.constant 0 : index
    %c0_138 = arith.constant 0 : index
    %199 = vector.load %arg12[%c0_137, %c0_138] : memref<320x10xf32, #tpu.memory_space<vmem>>, vector<320x10xf32>
    %cst_139 = arith.constant dense<0.000000e+00> : vector<32x10xf32>
    %200 = tpu.matmul %198, %199, %cst_139 {dimension_numbers = #tpu.dot_dimension_numbers<[1], [0], [0], [1], [0, 0, 1, 1], [], []>} : vector<32x320xf32>, vector<320x10xf32>, vector<32x10xf32> -> vector<32x10xf32>
    %cst_140 = arith.constant dense<0.000000e+00> : vector<10xf32>
    %201 = vector.multi_reduction <add>, %200, %cst_140 [0] : vector<32x10xf32> to vector<10xf32>
    %c0_141 = arith.constant 0 : index
    %c0_142 = arith.constant 0 : index
    %202 = vector.load %arg13[%c0_141, %c0_142] : memref<1x10xf32, #tpu.memory_space<vmem>>, vector<1x10xf32>
    %203 = vector.shape_cast %202 : vector<1x10xf32> to vector<10xf32>
    %204 = arith.addf %201, %203 : vector<10xf32>
    %c0_143 = arith.constant 0 : index
    %c0_144 = arith.constant 0 : index
    %c0_145 = arith.constant 0 : index
    %205 = vector.load %arg14[%c0_143, %c0_144, %c0_145] : memref<1x2x10xf32, #tpu.memory_space<vmem>>, vector<1x1x10xf32>
    %206 = vector.shape_cast %205 : vector<1x1x10xf32> to vector<10xf32>
    %207 = vector.shape_cast %204 : vector<10xf32> to vector<1x1x10xf32>
    tpu.vector_store %arg14[%c0_143, %c0_144, %c0_145], %207 {strides = array<i32>} : memref<1x2x10xf32, #tpu.memory_space<vmem>>, vector<1x1x10xf32>,
    %c0_146 = arith.constant 0 : index
    %c0_147 = arith.constant 0 : index
    %208 = vector.load %arg2[%c0_146, %c0_147] : memref<16x25xf32, #tpu.memory_space<vmem>>, vector<16x25xf32>
    %c0_148 = arith.constant 0 : index
    %c0_149 = arith.constant 0 : index
    %c0_150 = arith.constant 0 : index
    %c384 = arith.constant 384 : index
    %209 = vector.load %arg1[%c0_148, %c0_149, %c0_150, %c384] : memref<1x4x25x768xf32, #tpu.memory_space<vmem>>, vector<1x1x25x384xf32>
    %210 = vector.shape_cast %209 : vector<1x1x25x384xf32> to vector<25x384xf32>
    %cst_151 = arith.constant dense<0.000000e+00> : vector<16x384xf32>
    %211 = tpu.matmul %208, %210, %cst_151 {dimension_numbers = #tpu.dot_dimension_numbers<[1], [0], [0], [1], [0, 0, 1, 1], [], []>} : vector<16x25xf32>, vector<25x384xf32>, vector<16x384xf32> -> vector<16x384xf32>
    %c0_152 = arith.constant 0 : index
    %c0_153 = arith.constant 0 : index
    %212 = vector.load %arg3[%c0_152, %c0_153] : memref<16x1xf32, #tpu.memory_space<vmem>>, vector<16x1xf32>
    %213 = vector.broadcast %212 : vector<16x1xf32> to vector<16x384xf32>
    %214 = arith.mulf %211, %213 : vector<16x384xf32>
    %c0_154 = arith.constant 0 : index
    %c0_155 = arith.constant 0 : index
    %215 = vector.load %arg4[%c0_154, %c0_155] : memref<16x1xf32, #tpu.memory_space<vmem>>, vector<16x1xf32>
    %216 = vector.broadcast %215 : vector<16x1xf32> to vector<16x384xf32>
    %217 = arith.addf %214, %216 : vector<16x384xf32>
    %cst_156 = arith.constant 0.000000e+00 : f32
    %218 = vector.broadcast %cst_156 : f32 to vector<16x384xf32>
    %219 = arith.maximumf %217, %218 : vector<16x384xf32>
    %c0_157 = arith.constant 0 : index
    %c0_158 = arith.constant 0 : index
    %220 = vector.load %arg2[%c0_157, %c0_158] : memref<16x25xf32, #tpu.memory_space<vmem>>, vector<16x25xf32>
    %c0_159 = arith.constant 0 : index
    %c1_160 = arith.constant 1 : index
    %c0_161 = arith.constant 0 : index
    %c384_162 = arith.constant 384 : index
    %221 = vector.load %arg1[%c0_159, %c1_160, %c0_161, %c384_162] : memref<1x4x25x768xf32, #tpu.memory_space<vmem>>, vector<1x1x25x384xf32>
    %222 = vector.shape_cast %221 : vector<1x1x25x384xf32> to vector<25x384xf32>
    %cst_163 = arith.constant dense<0.000000e+00> : vector<16x384xf32>
    %223 = tpu.matmul %220, %222, %cst_163 {dimension_numbers = #tpu.dot_dimension_numbers<[1], [0], [0], [1], [0, 0, 1, 1], [], []>} : vector<16x25xf32>, vector<25x384xf32>, vector<16x384xf32> -> vector<16x384xf32>
    %c0_164 = arith.constant 0 : index
    %c0_165 = arith.constant 0 : index
    %224 = vector.load %arg3[%c0_164, %c0_165] : memref<16x1xf32, #tpu.memory_space<vmem>>, vector<16x1xf32>
    %225 = vector.broadcast %224 : vector<16x1xf32> to vector<16x384xf32>
    %226 = arith.mulf %223, %225 : vector<16x384xf32>
    %c0_166 = arith.constant 0 : index
    %c0_167 = arith.constant 0 : index
    %227 = vector.load %arg4[%c0_166, %c0_167] : memref<16x1xf32, #tpu.memory_space<vmem>>, vector<16x1xf32>
    %228 = vector.broadcast %227 : vector<16x1xf32> to vector<16x384xf32>
    %229 = arith.addf %226, %228 : vector<16x384xf32>
    %cst_168 = arith.constant 0.000000e+00 : f32
    %230 = vector.broadcast %cst_168 : f32 to vector<16x384xf32>
    %231 = arith.maximumf %229, %230 : vector<16x384xf32>
    %232 = arith.maximumf %219, %231 : vector<16x384xf32>
    %c0_169 = arith.constant 0 : index
    %c0_170 = arith.constant 0 : index
    %233 = vector.load %arg2[%c0_169, %c0_170] : memref<16x25xf32, #tpu.memory_space<vmem>>, vector<16x25xf32>
    %c0_171 = arith.constant 0 : index
    %c2_172 = arith.constant 2 : index
    %c0_173 = arith.constant 0 : index
    %c384_174 = arith.constant 384 : index
    %234 = vector.load %arg1[%c0_171, %c2_172, %c0_173, %c384_174] : memref<1x4x25x768xf32, #tpu.memory_space<vmem>>, vector<1x1x25x384xf32>
    %235 = vector.shape_cast %234 : vector<1x1x25x384xf32> to vector<25x384xf32>
    %cst_175 = arith.constant dense<0.000000e+00> : vector<16x384xf32>
    %236 = tpu.matmul %233, %235, %cst_175 {dimension_numbers = #tpu.dot_dimension_numbers<[1], [0], [0], [1], [0, 0, 1, 1], [], []>} : vector<16x25xf32>, vector<25x384xf32>, vector<16x384xf32> -> vector<16x384xf32>
    %c0_176 = arith.constant 0 : index
    %c0_177 = arith.constant 0 : index
    %237 = vector.load %arg3[%c0_176, %c0_177] : memref<16x1xf32, #tpu.memory_space<vmem>>, vector<16x1xf32>
    %238 = vector.broadcast %237 : vector<16x1xf32> to vector<16x384xf32>
    %239 = arith.mulf %236, %238 : vector<16x384xf32>
    %c0_178 = arith.constant 0 : index
    %c0_179 = arith.constant 0 : index
    %240 = vector.load %arg4[%c0_178, %c0_179] : memref<16x1xf32, #tpu.memory_space<vmem>>, vector<16x1xf32>
    %241 = vector.broadcast %240 : vector<16x1xf32> to vector<16x384xf32>
    %242 = arith.addf %239, %241 : vector<16x384xf32>
    %cst_180 = arith.constant 0.000000e+00 : f32
    %243 = vector.broadcast %cst_180 : f32 to vector<16x384xf32>
    %244 = arith.maximumf %242, %243 : vector<16x384xf32>
    %245 = arith.maximumf %232, %244 : vector<16x384xf32>
    %c0_181 = arith.constant 0 : index
    %c0_182 = arith.constant 0 : index
    %246 = vector.load %arg2[%c0_181, %c0_182] : memref<16x25xf32, #tpu.memory_space<vmem>>, vector<16x25xf32>
    %c0_183 = arith.constant 0 : index
    %c3_184 = arith.constant 3 : index
    %c0_185 = arith.constant 0 : index
    %c384_186 = arith.constant 384 : index
    %247 = vector.load %arg1[%c0_183, %c3_184, %c0_185, %c384_186] : memref<1x4x25x768xf32, #tpu.memory_space<vmem>>, vector<1x1x25x384xf32>
    %248 = vector.shape_cast %247 : vector<1x1x25x384xf32> to vector<25x384xf32>
    %cst_187 = arith.constant dense<0.000000e+00> : vector<16x384xf32>
    %249 = tpu.matmul %246, %248, %cst_187 {dimension_numbers = #tpu.dot_dimension_numbers<[1], [0], [0], [1], [0, 0, 1, 1], [], []>} : vector<16x25xf32>, vector<25x384xf32>, vector<16x384xf32> -> vector<16x384xf32>
    %c0_188 = arith.constant 0 : index
    %c0_189 = arith.constant 0 : index
    %250 = vector.load %arg3[%c0_188, %c0_189] : memref<16x1xf32, #tpu.memory_space<vmem>>, vector<16x1xf32>
    %251 = vector.broadcast %250 : vector<16x1xf32> to vector<16x384xf32>
    %252 = arith.mulf %249, %251 : vector<16x384xf32>
    %c0_190 = arith.constant 0 : index
    %c0_191 = arith.constant 0 : index
    %253 = vector.load %arg4[%c0_190, %c0_191] : memref<16x1xf32, #tpu.memory_space<vmem>>, vector<16x1xf32>
    %254 = vector.broadcast %253 : vector<16x1xf32> to vector<16x384xf32>
    %255 = arith.addf %252, %254 : vector<16x384xf32>
    %cst_192 = arith.constant 0.000000e+00 : f32
    %256 = vector.broadcast %cst_192 : f32 to vector<16x384xf32>
    %257 = arith.maximumf %255, %256 : vector<16x384xf32>
    %258 = arith.maximumf %245, %257 : vector<16x384xf32>
    %c0_193 = arith.constant 0 : index
    %c0_194 = arith.constant 0 : index
    %259 = vector.load %arg5[%c0_193, %c0_194] : memref<1x384xf32, #tpu.memory_space<vmem>>, vector<1x384xf32>
    %260 = vector.broadcast %259 : vector<1x384xf32> to vector<16x384xf32>
    %261 = arith.mulf %258, %260 : vector<16x384xf32>
    %c0_195 = arith.constant 0 : index
    %c0_196 = arith.constant 0 : index
    %c0_197 = arith.constant 0 : index
    %262 = vector.load %arg6[%c0_195, %c0_196, %c0_197] : memref<25x32x16xf32, #tpu.memory_space<vmem>>, vector<1x32x16xf32>
    %263 = vector.shape_cast %262 : vector<1x32x16xf32> to vector<32x16xf32>
    %264 = vector.extract_strided_slice %261 {offsets = [0, 0], sizes = [16, 252], strides = [1, 1]} : vector<16x384xf32> to vector<16x252xf32>
    %cst_198 = arith.constant dense<0.000000e+00> : vector<32x252xf32>
    %265 = tpu.matmul %263, %264, %cst_198 {dimension_numbers = #tpu.dot_dimension_numbers<[1], [0], [0], [1], [0, 0, 1, 1], [], []>} : vector<32x16xf32>, vector<16x252xf32>, vector<32x252xf32> -> vector<32x252xf32>
    %c1_199 = arith.constant 1 : index
    %c0_200 = arith.constant 0 : index
    %c0_201 = arith.constant 0 : index
    %266 = vector.load %arg6[%c1_199, %c0_200, %c0_201] : memref<25x32x16xf32, #tpu.memory_space<vmem>>, vector<1x32x16xf32>
    %267 = vector.shape_cast %266 : vector<1x32x16xf32> to vector<32x16xf32>
    %268 = vector.extract_strided_slice %261 {offsets = [0, 1], sizes = [16, 252], strides = [1, 1]} : vector<16x384xf32> to vector<16x252xf32>
    %cst_202 = arith.constant dense<0.000000e+00> : vector<32x252xf32>
    %269 = tpu.matmul %267, %268, %cst_202 {dimension_numbers = #tpu.dot_dimension_numbers<[1], [0], [0], [1], [0, 0, 1, 1], [], []>} : vector<32x16xf32>, vector<16x252xf32>, vector<32x252xf32> -> vector<32x252xf32>
    %270 = arith.addf %265, %269 : vector<32x252xf32>
    %c2_203 = arith.constant 2 : index
    %c0_204 = arith.constant 0 : index
    %c0_205 = arith.constant 0 : index
    %271 = vector.load %arg6[%c2_203, %c0_204, %c0_205] : memref<25x32x16xf32, #tpu.memory_space<vmem>>, vector<1x32x16xf32>
    %272 = vector.shape_cast %271 : vector<1x32x16xf32> to vector<32x16xf32>
    %273 = vector.extract_strided_slice %261 {offsets = [0, 2], sizes = [16, 252], strides = [1, 1]} : vector<16x384xf32> to vector<16x252xf32>
    %cst_206 = arith.constant dense<0.000000e+00> : vector<32x252xf32>
    %274 = tpu.matmul %272, %273, %cst_206 {dimension_numbers = #tpu.dot_dimension_numbers<[1], [0], [0], [1], [0, 0, 1, 1], [], []>} : vector<32x16xf32>, vector<16x252xf32>, vector<32x252xf32> -> vector<32x252xf32>
    %275 = arith.addf %270, %274 : vector<32x252xf32>
    %c3_207 = arith.constant 3 : index
    %c0_208 = arith.constant 0 : index
    %c0_209 = arith.constant 0 : index
    %276 = vector.load %arg6[%c3_207, %c0_208, %c0_209] : memref<25x32x16xf32, #tpu.memory_space<vmem>>, vector<1x32x16xf32>
    %277 = vector.shape_cast %276 : vector<1x32x16xf32> to vector<32x16xf32>
    %278 = vector.extract_strided_slice %261 {offsets = [0, 3], sizes = [16, 252], strides = [1, 1]} : vector<16x384xf32> to vector<16x252xf32>
    %cst_210 = arith.constant dense<0.000000e+00> : vector<32x252xf32>
    %279 = tpu.matmul %277, %278, %cst_210 {dimension_numbers = #tpu.dot_dimension_numbers<[1], [0], [0], [1], [0, 0, 1, 1], [], []>} : vector<32x16xf32>, vector<16x252xf32>, vector<32x252xf32> -> vector<32x252xf32>
    %280 = arith.addf %275, %279 : vector<32x252xf32>
    %c4_211 = arith.constant 4 : index
    %c0_212 = arith.constant 0 : index
    %c0_213 = arith.constant 0 : index
    %281 = vector.load %arg6[%c4_211, %c0_212, %c0_213] : memref<25x32x16xf32, #tpu.memory_space<vmem>>, vector<1x32x16xf32>
    %282 = vector.shape_cast %281 : vector<1x32x16xf32> to vector<32x16xf32>
    %283 = vector.extract_strided_slice %261 {offsets = [0, 4], sizes = [16, 252], strides = [1, 1]} : vector<16x384xf32> to vector<16x252xf32>
    %cst_214 = arith.constant dense<0.000000e+00> : vector<32x252xf32>
    %284 = tpu.matmul %282, %283, %cst_214 {dimension_numbers = #tpu.dot_dimension_numbers<[1], [0], [0], [1], [0, 0, 1, 1], [], []>} : vector<32x16xf32>, vector<16x252xf32>, vector<32x252xf32> -> vector<32x252xf32>
    %285 = arith.addf %280, %284 : vector<32x252xf32>
    %c5_215 = arith.constant 5 : index
    %c0_216 = arith.constant 0 : index
    %c0_217 = arith.constant 0 : index
    %286 = vector.load %arg6[%c5_215, %c0_216, %c0_217] : memref<25x32x16xf32, #tpu.memory_space<vmem>>, vector<1x32x16xf32>
    %287 = vector.shape_cast %286 : vector<1x32x16xf32> to vector<32x16xf32>
    %288 = vector.extract_strided_slice %261 {offsets = [0, 18], sizes = [16, 252], strides = [1, 1]} : vector<16x384xf32> to vector<16x252xf32>
    %cst_218 = arith.constant dense<0.000000e+00> : vector<32x252xf32>
    %289 = tpu.matmul %287, %288, %cst_218 {dimension_numbers = #tpu.dot_dimension_numbers<[1], [0], [0], [1], [0, 0, 1, 1], [], []>} : vector<32x16xf32>, vector<16x252xf32>, vector<32x252xf32> -> vector<32x252xf32>
    %290 = arith.addf %285, %289 : vector<32x252xf32>
    %c6_219 = arith.constant 6 : index
    %c0_220 = arith.constant 0 : index
    %c0_221 = arith.constant 0 : index
    %291 = vector.load %arg6[%c6_219, %c0_220, %c0_221] : memref<25x32x16xf32, #tpu.memory_space<vmem>>, vector<1x32x16xf32>
    %292 = vector.shape_cast %291 : vector<1x32x16xf32> to vector<32x16xf32>
    %293 = vector.extract_strided_slice %261 {offsets = [0, 19], sizes = [16, 252], strides = [1, 1]} : vector<16x384xf32> to vector<16x252xf32>
    %cst_222 = arith.constant dense<0.000000e+00> : vector<32x252xf32>
    %294 = tpu.matmul %292, %293, %cst_222 {dimension_numbers = #tpu.dot_dimension_numbers<[1], [0], [0], [1], [0, 0, 1, 1], [], []>} : vector<32x16xf32>, vector<16x252xf32>, vector<32x252xf32> -> vector<32x252xf32>
    %295 = arith.addf %290, %294 : vector<32x252xf32>
    %c7_223 = arith.constant 7 : index
    %c0_224 = arith.constant 0 : index
    %c0_225 = arith.constant 0 : index
    %296 = vector.load %arg6[%c7_223, %c0_224, %c0_225] : memref<25x32x16xf32, #tpu.memory_space<vmem>>, vector<1x32x16xf32>
    %297 = vector.shape_cast %296 : vector<1x32x16xf32> to vector<32x16xf32>
    %298 = vector.extract_strided_slice %261 {offsets = [0, 20], sizes = [16, 252], strides = [1, 1]} : vector<16x384xf32> to vector<16x252xf32>
    %cst_226 = arith.constant dense<0.000000e+00> : vector<32x252xf32>
    %299 = tpu.matmul %297, %298, %cst_226 {dimension_numbers = #tpu.dot_dimension_numbers<[1], [0], [0], [1], [0, 0, 1, 1], [], []>} : vector<32x16xf32>, vector<16x252xf32>, vector<32x252xf32> -> vector<32x252xf32>
    %300 = arith.addf %295, %299 : vector<32x252xf32>
    %c8_227 = arith.constant 8 : index
    %c0_228 = arith.constant 0 : index
    %c0_229 = arith.constant 0 : index
    %301 = vector.load %arg6[%c8_227, %c0_228, %c0_229] : memref<25x32x16xf32, #tpu.memory_space<vmem>>, vector<1x32x16xf32>
    %302 = vector.shape_cast %301 : vector<1x32x16xf32> to vector<32x16xf32>
    %303 = vector.extract_strided_slice %261 {offsets = [0, 21], sizes = [16, 252], strides = [1, 1]} : vector<16x384xf32> to vector<16x252xf32>
    %cst_230 = arith.constant dense<0.000000e+00> : vector<32x252xf32>
    %304 = tpu.matmul %302, %303, %cst_230 {dimension_numbers = #tpu.dot_dimension_numbers<[1], [0], [0], [1], [0, 0, 1, 1], [], []>} : vector<32x16xf32>, vector<16x252xf32>, vector<32x252xf32> -> vector<32x252xf32>
    %305 = arith.addf %300, %304 : vector<32x252xf32>
    %c9_231 = arith.constant 9 : index
    %c0_232 = arith.constant 0 : index
    %c0_233 = arith.constant 0 : index
    %306 = vector.load %arg6[%c9_231, %c0_232, %c0_233] : memref<25x32x16xf32, #tpu.memory_space<vmem>>, vector<1x32x16xf32>
    %307 = vector.shape_cast %306 : vector<1x32x16xf32> to vector<32x16xf32>
    %308 = vector.extract_strided_slice %261 {offsets = [0, 22], sizes = [16, 252], strides = [1, 1]} : vector<16x384xf32> to vector<16x252xf32>
    %cst_234 = arith.constant dense<0.000000e+00> : vector<32x252xf32>
    %309 = tpu.matmul %307, %308, %cst_234 {dimension_numbers = #tpu.dot_dimension_numbers<[1], [0], [0], [1], [0, 0, 1, 1], [], []>} : vector<32x16xf32>, vector<16x252xf32>, vector<32x252xf32> -> vector<32x252xf32>
    %310 = arith.addf %305, %309 : vector<32x252xf32>
    %c10_235 = arith.constant 10 : index
    %c0_236 = arith.constant 0 : index
    %c0_237 = arith.constant 0 : index
    %311 = vector.load %arg6[%c10_235, %c0_236, %c0_237] : memref<25x32x16xf32, #tpu.memory_space<vmem>>, vector<1x32x16xf32>
    %312 = vector.shape_cast %311 : vector<1x32x16xf32> to vector<32x16xf32>
    %313 = vector.extract_strided_slice %261 {offsets = [0, 36], sizes = [16, 252], strides = [1, 1]} : vector<16x384xf32> to vector<16x252xf32>
    %cst_238 = arith.constant dense<0.000000e+00> : vector<32x252xf32>
    %314 = tpu.matmul %312, %313, %cst_238 {dimension_numbers = #tpu.dot_dimension_numbers<[1], [0], [0], [1], [0, 0, 1, 1], [], []>} : vector<32x16xf32>, vector<16x252xf32>, vector<32x252xf32> -> vector<32x252xf32>
    %315 = arith.addf %310, %314 : vector<32x252xf32>
    %c11_239 = arith.constant 11 : index
    %c0_240 = arith.constant 0 : index
    %c0_241 = arith.constant 0 : index
    %316 = vector.load %arg6[%c11_239, %c0_240, %c0_241] : memref<25x32x16xf32, #tpu.memory_space<vmem>>, vector<1x32x16xf32>
    %317 = vector.shape_cast %316 : vector<1x32x16xf32> to vector<32x16xf32>
    %318 = vector.extract_strided_slice %261 {offsets = [0, 37], sizes = [16, 252], strides = [1, 1]} : vector<16x384xf32> to vector<16x252xf32>
    %cst_242 = arith.constant dense<0.000000e+00> : vector<32x252xf32>
    %319 = tpu.matmul %317, %318, %cst_242 {dimension_numbers = #tpu.dot_dimension_numbers<[1], [0], [0], [1], [0, 0, 1, 1], [], []>} : vector<32x16xf32>, vector<16x252xf32>, vector<32x252xf32> -> vector<32x252xf32>
    %320 = arith.addf %315, %319 : vector<32x252xf32>
    %c12_243 = arith.constant 12 : index
    %c0_244 = arith.constant 0 : index
    %c0_245 = arith.constant 0 : index
    %321 = vector.load %arg6[%c12_243, %c0_244, %c0_245] : memref<25x32x16xf32, #tpu.memory_space<vmem>>, vector<1x32x16xf32>
    %322 = vector.shape_cast %321 : vector<1x32x16xf32> to vector<32x16xf32>
    %323 = vector.extract_strided_slice %261 {offsets = [0, 38], sizes = [16, 252], strides = [1, 1]} : vector<16x384xf32> to vector<16x252xf32>
    %cst_246 = arith.constant dense<0.000000e+00> : vector<32x252xf32>
    %324 = tpu.matmul %322, %323, %cst_246 {dimension_numbers = #tpu.dot_dimension_numbers<[1], [0], [0], [1], [0, 0, 1, 1], [], []>} : vector<32x16xf32>, vector<16x252xf32>, vector<32x252xf32> -> vector<32x252xf32>
    %325 = arith.addf %320, %324 : vector<32x252xf32>
    %c13_247 = arith.constant 13 : index
    %c0_248 = arith.constant 0 : index
    %c0_249 = arith.constant 0 : index
    %326 = vector.load %arg6[%c13_247, %c0_248, %c0_249] : memref<25x32x16xf32, #tpu.memory_space<vmem>>, vector<1x32x16xf32>
    %327 = vector.shape_cast %326 : vector<1x32x16xf32> to vector<32x16xf32>
    %328 = vector.extract_strided_slice %261 {offsets = [0, 39], sizes = [16, 252], strides = [1, 1]} : vector<16x384xf32> to vector<16x252xf32>
    %cst_250 = arith.constant dense<0.000000e+00> : vector<32x252xf32>
    %329 = tpu.matmul %327, %328, %cst_250 {dimension_numbers = #tpu.dot_dimension_numbers<[1], [0], [0], [1], [0, 0, 1, 1], [], []>} : vector<32x16xf32>, vector<16x252xf32>, vector<32x252xf32> -> vector<32x252xf32>
    %330 = arith.addf %325, %329 : vector<32x252xf32>
    %c14_251 = arith.constant 14 : index
    %c0_252 = arith.constant 0 : index
    %c0_253 = arith.constant 0 : index
    %331 = vector.load %arg6[%c14_251, %c0_252, %c0_253] : memref<25x32x16xf32, #tpu.memory_space<vmem>>, vector<1x32x16xf32>
    %332 = vector.shape_cast %331 : vector<1x32x16xf32> to vector<32x16xf32>
    %333 = vector.extract_strided_slice %261 {offsets = [0, 40], sizes = [16, 252], strides = [1, 1]} : vector<16x384xf32> to vector<16x252xf32>
    %cst_254 = arith.constant dense<0.000000e+00> : vector<32x252xf32>
    %334 = tpu.matmul %332, %333, %cst_254 {dimension_numbers = #tpu.dot_dimension_numbers<[1], [0], [0], [1], [0, 0, 1, 1], [], []>} : vector<32x16xf32>, vector<16x252xf32>, vector<32x252xf32> -> vector<32x252xf32>
    %335 = arith.addf %330, %334 : vector<32x252xf32>
    %c15_255 = arith.constant 15 : index
    %c0_256 = arith.constant 0 : index
    %c0_257 = arith.constant 0 : index
    %336 = vector.load %arg6[%c15_255, %c0_256, %c0_257] : memref<25x32x16xf32, #tpu.memory_space<vmem>>, vector<1x32x16xf32>
    %337 = vector.shape_cast %336 : vector<1x32x16xf32> to vector<32x16xf32>
    %338 = vector.extract_strided_slice %261 {offsets = [0, 54], sizes = [16, 252], strides = [1, 1]} : vector<16x384xf32> to vector<16x252xf32>
    %cst_258 = arith.constant dense<0.000000e+00> : vector<32x252xf32>
    %339 = tpu.matmul %337, %338, %cst_258 {dimension_numbers = #tpu.dot_dimension_numbers<[1], [0], [0], [1], [0, 0, 1, 1], [], []>} : vector<32x16xf32>, vector<16x252xf32>, vector<32x252xf32> -> vector<32x252xf32>
    %340 = arith.addf %335, %339 : vector<32x252xf32>
    %c16_259 = arith.constant 16 : index
    %c0_260 = arith.constant 0 : index
    %c0_261 = arith.constant 0 : index
    %341 = vector.load %arg6[%c16_259, %c0_260, %c0_261] : memref<25x32x16xf32, #tpu.memory_space<vmem>>, vector<1x32x16xf32>
    %342 = vector.shape_cast %341 : vector<1x32x16xf32> to vector<32x16xf32>
    %343 = vector.extract_strided_slice %261 {offsets = [0, 55], sizes = [16, 252], strides = [1, 1]} : vector<16x384xf32> to vector<16x252xf32>
    %cst_262 = arith.constant dense<0.000000e+00> : vector<32x252xf32>
    %344 = tpu.matmul %342, %343, %cst_262 {dimension_numbers = #tpu.dot_dimension_numbers<[1], [0], [0], [1], [0, 0, 1, 1], [], []>} : vector<32x16xf32>, vector<16x252xf32>, vector<32x252xf32> -> vector<32x252xf32>
    %345 = arith.addf %340, %344 : vector<32x252xf32>
    %c17_263 = arith.constant 17 : index
    %c0_264 = arith.constant 0 : index
    %c0_265 = arith.constant 0 : index
    %346 = vector.load %arg6[%c17_263, %c0_264, %c0_265] : memref<25x32x16xf32, #tpu.memory_space<vmem>>, vector<1x32x16xf32>
    %347 = vector.shape_cast %346 : vector<1x32x16xf32> to vector<32x16xf32>
    %348 = vector.extract_strided_slice %261 {offsets = [0, 56], sizes = [16, 252], strides = [1, 1]} : vector<16x384xf32> to vector<16x252xf32>
    %cst_266 = arith.constant dense<0.000000e+00> : vector<32x252xf32>
    %349 = tpu.matmul %347, %348, %cst_266 {dimension_numbers = #tpu.dot_dimension_numbers<[1], [0], [0], [1], [0, 0, 1, 1], [], []>} : vector<32x16xf32>, vector<16x252xf32>, vector<32x252xf32> -> vector<32x252xf32>
    %350 = arith.addf %345, %349 : vector<32x252xf32>
    %c18_267 = arith.constant 18 : index
    %c0_268 = arith.constant 0 : index
    %c0_269 = arith.constant 0 : index
    %351 = vector.load %arg6[%c18_267, %c0_268, %c0_269] : memref<25x32x16xf32, #tpu.memory_space<vmem>>, vector<1x32x16xf32>
    %352 = vector.shape_cast %351 : vector<1x32x16xf32> to vector<32x16xf32>
    %353 = vector.extract_strided_slice %261 {offsets = [0, 57], sizes = [16, 252], strides = [1, 1]} : vector<16x384xf32> to vector<16x252xf32>
    %cst_270 = arith.constant dense<0.000000e+00> : vector<32x252xf32>
    %354 = tpu.matmul %352, %353, %cst_270 {dimension_numbers = #tpu.dot_dimension_numbers<[1], [0], [0], [1], [0, 0, 1, 1], [], []>} : vector<32x16xf32>, vector<16x252xf32>, vector<32x252xf32> -> vector<32x252xf32>
    %355 = arith.addf %350, %354 : vector<32x252xf32>
    %c19_271 = arith.constant 19 : index
    %c0_272 = arith.constant 0 : index
    %c0_273 = arith.constant 0 : index
    %356 = vector.load %arg6[%c19_271, %c0_272, %c0_273] : memref<25x32x16xf32, #tpu.memory_space<vmem>>, vector<1x32x16xf32>
    %357 = vector.shape_cast %356 : vector<1x32x16xf32> to vector<32x16xf32>
    %358 = vector.extract_strided_slice %261 {offsets = [0, 58], sizes = [16, 252], strides = [1, 1]} : vector<16x384xf32> to vector<16x252xf32>
    %cst_274 = arith.constant dense<0.000000e+00> : vector<32x252xf32>
    %359 = tpu.matmul %357, %358, %cst_274 {dimension_numbers = #tpu.dot_dimension_numbers<[1], [0], [0], [1], [0, 0, 1, 1], [], []>} : vector<32x16xf32>, vector<16x252xf32>, vector<32x252xf32> -> vector<32x252xf32>
    %360 = arith.addf %355, %359 : vector<32x252xf32>
    %c20_275 = arith.constant 20 : index
    %c0_276 = arith.constant 0 : index
    %c0_277 = arith.constant 0 : index
    %361 = vector.load %arg6[%c20_275, %c0_276, %c0_277] : memref<25x32x16xf32, #tpu.memory_space<vmem>>, vector<1x32x16xf32>
    %362 = vector.shape_cast %361 : vector<1x32x16xf32> to vector<32x16xf32>
    %363 = vector.extract_strided_slice %261 {offsets = [0, 72], sizes = [16, 252], strides = [1, 1]} : vector<16x384xf32> to vector<16x252xf32>
    %cst_278 = arith.constant dense<0.000000e+00> : vector<32x252xf32>
    %364 = tpu.matmul %362, %363, %cst_278 {dimension_numbers = #tpu.dot_dimension_numbers<[1], [0], [0], [1], [0, 0, 1, 1], [], []>} : vector<32x16xf32>, vector<16x252xf32>, vector<32x252xf32> -> vector<32x252xf32>
    %365 = arith.addf %360, %364 : vector<32x252xf32>
    %c21_279 = arith.constant 21 : index
    %c0_280 = arith.constant 0 : index
    %c0_281 = arith.constant 0 : index
    %366 = vector.load %arg6[%c21_279, %c0_280, %c0_281] : memref<25x32x16xf32, #tpu.memory_space<vmem>>, vector<1x32x16xf32>
    %367 = vector.shape_cast %366 : vector<1x32x16xf32> to vector<32x16xf32>
    %368 = vector.extract_strided_slice %261 {offsets = [0, 73], sizes = [16, 252], strides = [1, 1]} : vector<16x384xf32> to vector<16x252xf32>
    %cst_282 = arith.constant dense<0.000000e+00> : vector<32x252xf32>
    %369 = tpu.matmul %367, %368, %cst_282 {dimension_numbers = #tpu.dot_dimension_numbers<[1], [0], [0], [1], [0, 0, 1, 1], [], []>} : vector<32x16xf32>, vector<16x252xf32>, vector<32x252xf32> -> vector<32x252xf32>
    %370 = arith.addf %365, %369 : vector<32x252xf32>
    %c22_283 = arith.constant 22 : index
    %c0_284 = arith.constant 0 : index
    %c0_285 = arith.constant 0 : index
    %371 = vector.load %arg6[%c22_283, %c0_284, %c0_285] : memref<25x32x16xf32, #tpu.memory_space<vmem>>, vector<1x32x16xf32>
    %372 = vector.shape_cast %371 : vector<1x32x16xf32> to vector<32x16xf32>
    %373 = vector.extract_strided_slice %261 {offsets = [0, 74], sizes = [16, 252], strides = [1, 1]} : vector<16x384xf32> to vector<16x252xf32>
    %cst_286 = arith.constant dense<0.000000e+00> : vector<32x252xf32>
    %374 = tpu.matmul %372, %373, %cst_286 {dimension_numbers = #tpu.dot_dimension_numbers<[1], [0], [0], [1], [0, 0, 1, 1], [], []>} : vector<32x16xf32>, vector<16x252xf32>, vector<32x252xf32> -> vector<32x252xf32>
    %375 = arith.addf %370, %374 : vector<32x252xf32>
    %c23_287 = arith.constant 23 : index
    %c0_288 = arith.constant 0 : index
    %c0_289 = arith.constant 0 : index
    %376 = vector.load %arg6[%c23_287, %c0_288, %c0_289] : memref<25x32x16xf32, #tpu.memory_space<vmem>>, vector<1x32x16xf32>
    %377 = vector.shape_cast %376 : vector<1x32x16xf32> to vector<32x16xf32>
    %378 = vector.extract_strided_slice %261 {offsets = [0, 75], sizes = [16, 252], strides = [1, 1]} : vector<16x384xf32> to vector<16x252xf32>
    %cst_290 = arith.constant dense<0.000000e+00> : vector<32x252xf32>
    %379 = tpu.matmul %377, %378, %cst_290 {dimension_numbers = #tpu.dot_dimension_numbers<[1], [0], [0], [1], [0, 0, 1, 1], [], []>} : vector<32x16xf32>, vector<16x252xf32>, vector<32x252xf32> -> vector<32x252xf32>
    %380 = arith.addf %375, %379 : vector<32x252xf32>
    %c24_291 = arith.constant 24 : index
    %c0_292 = arith.constant 0 : index
    %c0_293 = arith.constant 0 : index
    %381 = vector.load %arg6[%c24_291, %c0_292, %c0_293] : memref<25x32x16xf32, #tpu.memory_space<vmem>>, vector<1x32x16xf32>
    %382 = vector.shape_cast %381 : vector<1x32x16xf32> to vector<32x16xf32>
    %383 = vector.extract_strided_slice %261 {offsets = [0, 76], sizes = [16, 252], strides = [1, 1]} : vector<16x384xf32> to vector<16x252xf32>
    %cst_294 = arith.constant dense<0.000000e+00> : vector<32x252xf32>
    %384 = tpu.matmul %382, %383, %cst_294 {dimension_numbers = #tpu.dot_dimension_numbers<[1], [0], [0], [1], [0, 0, 1, 1], [], []>} : vector<32x16xf32>, vector<16x252xf32>, vector<32x252xf32> -> vector<32x252xf32>
    %385 = arith.addf %380, %384 : vector<32x252xf32>
    %c0_295 = arith.constant 0 : index
    %c0_296 = arith.constant 0 : index
    %386 = vector.load %arg7[%c0_295, %c0_296] : memref<32x1xf32, #tpu.memory_space<vmem>>, vector<32x1xf32>
    %387 = vector.broadcast %386 : vector<32x1xf32> to vector<32x252xf32>
    %388 = arith.mulf %385, %387 : vector<32x252xf32>
    %c0_297 = arith.constant 0 : index
    %c0_298 = arith.constant 0 : index
    %389 = vector.load %arg8[%c0_297, %c0_298] : memref<32x1xf32, #tpu.memory_space<vmem>>, vector<32x1xf32>
    %390 = vector.broadcast %389 : vector<32x1xf32> to vector<32x252xf32>
    %391 = arith.addf %388, %390 : vector<32x252xf32>
    %cst_299 = arith.constant 0.000000e+00 : f32
    %392 = vector.broadcast %cst_299 : f32 to vector<32x252xf32>
    %393 = arith.maximumf %391, %392 : vector<32x252xf32>
    %394 = vector.extract_strided_slice %393 {offsets = [0, 0], sizes = [32, 233], strides = [1, 1]} : vector<32x252xf32> to vector<32x233xf32>
    %395 = vector.extract_strided_slice %393 {offsets = [0, 1], sizes = [32, 233], strides = [1, 1]} : vector<32x252xf32> to vector<32x233xf32>
    %396 = arith.maximumf %394, %395 : vector<32x233xf32>
    %397 = vector.extract_strided_slice %393 {offsets = [0, 18], sizes = [32, 233], strides = [1, 1]} : vector<32x252xf32> to vector<32x233xf32>
    %398 = vector.extract_strided_slice %393 {offsets = [0, 19], sizes = [32, 233], strides = [1, 1]} : vector<32x252xf32> to vector<32x233xf32>
    %399 = arith.maximumf %397, %398 : vector<32x233xf32>
    %400 = arith.maximumf %396, %399 : vector<32x233xf32>
    %c0_300 = arith.constant 0 : index
    %c0_301 = arith.constant 0 : index
    %401 = vector.load %arg9[%c0_300, %c0_301] : memref<233x49xf32, #tpu.memory_space<vmem>>, vector<233x49xf32>
    %cst_302 = arith.constant dense<0.000000e+00> : vector<32x49xf32>
    %402 = tpu.matmul %400, %401, %cst_302 {dimension_numbers = #tpu.dot_dimension_numbers<[1], [0], [0], [1], [0, 0, 1, 1], [], []>} : vector<32x233xf32>, vector<233x49xf32>, vector<32x49xf32> -> vector<32x49xf32>
    %c0_303 = arith.constant 0 : index
    %c0_304 = arith.constant 0 : index
    %403 = vector.load %arg10[%c0_303, %c0_304] : memref<49x320xf32, #tpu.memory_space<vmem>>, vector<49x320xf32>
    %cst_305 = arith.constant dense<0.000000e+00> : vector<32x320xf32>
    %404 = tpu.matmul %402, %403, %cst_305 {dimension_numbers = #tpu.dot_dimension_numbers<[1], [0], [0], [1], [0, 0, 1, 1], [], []>} : vector<32x49xf32>, vector<49x320xf32>, vector<32x320xf32> -> vector<32x320xf32>
    %c0_306 = arith.constant 0 : index
    %c0_307 = arith.constant 0 : index
    %405 = vector.load %arg11[%c0_306, %c0_307] : memref<32x320xf32, #tpu.memory_space<vmem>>, vector<32x320xf32>
    %406 = arith.mulf %404, %405 : vector<32x320xf32>
    %c0_308 = arith.constant 0 : index
    %c0_309 = arith.constant 0 : index
    %407 = vector.load %arg12[%c0_308, %c0_309] : memref<320x10xf32, #tpu.memory_space<vmem>>, vector<320x10xf32>
    %cst_310 = arith.constant dense<0.000000e+00> : vector<32x10xf32>
    %408 = tpu.matmul %406, %407, %cst_310 {dimension_numbers = #tpu.dot_dimension_numbers<[1], [0], [0], [1], [0, 0, 1, 1], [], []>} : vector<32x320xf32>, vector<320x10xf32>, vector<32x10xf32> -> vector<32x10xf32>
    %cst_311 = arith.constant dense<0.000000e+00> : vector<10xf32>
    %409 = vector.multi_reduction <add>, %408, %cst_311 [0] : vector<32x10xf32> to vector<10xf32>
    %c0_312 = arith.constant 0 : index
    %c0_313 = arith.constant 0 : index
    %410 = vector.load %arg13[%c0_312, %c0_313] : memref<1x10xf32, #tpu.memory_space<vmem>>, vector<1x10xf32>
    %411 = vector.shape_cast %410 : vector<1x10xf32> to vector<10xf32>
    %412 = arith.addf %409, %411 : vector<10xf32>
    %c0_314 = arith.constant 0 : index
    %c1_315 = arith.constant 1 : index
    %c0_316 = arith.constant 0 : index
    %413 = vector.load %arg14[%c0_314, %c1_315, %c0_316] : memref<1x2x10xf32, #tpu.memory_space<vmem>>, vector<1x1x10xf32>
    %414 = vector.shape_cast %413 : vector<1x1x10xf32> to vector<10xf32>
    %415 = vector.shape_cast %412 : vector<10xf32> to vector<1x1x10xf32>
    tpu.vector_store %arg14[%c0_314, %c1_315, %c0_316], %415 {strides = array<i32>} : memref<1x2x10xf32, #tpu.memory_space<vmem>>, vector<1x1x10xf32>,
    return
  }
  func.func @transform_0(%arg0: i32) -> (i32, i32, i32, i32) {
    %c0_i32 = arith.constant 0 : i32
    %c0_i32_0 = arith.constant 0 : i32
    %c0_i32_1 = arith.constant 0 : i32
    %c0_i32_2 = arith.constant 0 : i32
    return %arg0, %c0_i32, %c0_i32_0, %c0_i32_1 : i32, i32, i32, i32
  }
  func.func @transform_1(%arg0: i32) -> (i32, i32) {
    %c0_i32 = arith.constant 0 : i32
    %c0_i32_0 = arith.constant 0 : i32
    %c0_i32_1 = arith.constant 0 : i32
    return %c0_i32, %c0_i32_0 : i32, i32
  }
  func.func @transform_2(%arg0: i32) -> (i32, i32) {
    %c0_i32 = arith.constant 0 : i32
    %c0_i32_0 = arith.constant 0 : i32
    %c0_i32_1 = arith.constant 0 : i32
    return %c0_i32, %c0_i32_0 : i32, i32
  }
  func.func @transform_3(%arg0: i32) -> (i32, i32) {
    %c0_i32 = arith.constant 0 : i32
    %c0_i32_0 = arith.constant 0 : i32
    %c0_i32_1 = arith.constant 0 : i32
    return %c0_i32, %c0_i32_0 : i32, i32
  }
  func.func @transform_4(%arg0: i32) -> (i32, i32) {
    %c0_i32 = arith.constant 0 : i32
    %c0_i32_0 = arith.constant 0 : i32
    %c0_i32_1 = arith.constant 0 : i32
    return %c0_i32, %c0_i32_0 : i32, i32
  }
  func.func @transform_5(%arg0: i32) -> (i32, i32, i32) {
    %c0_i32 = arith.constant 0 : i32
    %c0_i32_0 = arith.constant 0 : i32
    %c0_i32_1 = arith.constant 0 : i32
    %c0_i32_2 = arith.constant 0 : i32
    return %c0_i32, %c0_i32_0, %c0_i32_1 : i32, i32, i32
  }
  func.func @transform_6(%arg0: i32) -> (i32, i32) {
    %c0_i32 = arith.constant 0 : i32
    %c0_i32_0 = arith.constant 0 : i32
    %c0_i32_1 = arith.constant 0 : i32
    return %c0_i32, %c0_i32_0 : i32, i32
  }
  func.func @transform_7(%arg0: i32) -> (i32, i32) {
    %c0_i32 = arith.constant 0 : i32
    %c0_i32_0 = arith.constant 0 : i32
    %c0_i32_1 = arith.constant 0 : i32
    return %c0_i32, %c0_i32_0 : i32, i32
  }
  func.func @transform_8(%arg0: i32) -> (i32, i32) {
    %c0_i32 = arith.constant 0 : i32
    %c0_i32_0 = arith.constant 0 : i32
    %c0_i32_1 = arith.constant 0 : i32
    return %c0_i32, %c0_i32_0 : i32, i32
  }
  func.func @transform_9(%arg0: i32) -> (i32, i32) {
    %c0_i32 = arith.constant 0 : i32
    %c0_i32_0 = arith.constant 0 : i32
    %c0_i32_1 = arith.constant 0 : i32
    return %c0_i32, %c0_i32_0 : i32, i32
  }
  func.func @transform_10(%arg0: i32) -> (i32, i32) {
    %c0_i32 = arith.constant 0 : i32
    %c0_i32_0 = arith.constant 0 : i32
    %c0_i32_1 = arith.constant 0 : i32
    return %c0_i32, %c0_i32_0 : i32, i32
  }
  func.func @transform_11(%arg0: i32) -> (i32, i32) {
    %c0_i32 = arith.constant 0 : i32
    %c0_i32_0 = arith.constant 0 : i32
    %c0_i32_1 = arith.constant 0 : i32
    return %c0_i32, %c0_i32_0 : i32, i32
  }
  func.func @transform_12(%arg0: i32) -> (i32, i32) {
    %c0_i32 = arith.constant 0 : i32
    %c0_i32_0 = arith.constant 0 : i32
    %c0_i32_1 = arith.constant 0 : i32
    return %c0_i32, %c0_i32_0 : i32, i32
  }
  func.func @transform_13(%arg0: i32) -> (i32, i32, i32) {
    %c0_i32 = arith.constant 0 : i32
    %c0_i32_0 = arith.constant 0 : i32
    %c0_i32_1 = arith.constant 0 : i32
    return %arg0, %c0_i32, %c0_i32_0 : i32, i32, i32
  }
}

</mosaic_0001>

<bundles_post_ra>
// kernel: squeeze.3
= control target key start
LH: loop header
LB: loop body
LE: loop exit
PB: predicated region body
PF: predicated region fallthrough
CT: control target
= control target key end

     0   :  { %vm3_vm0 = vcmask 130048   ;;  %s73_s0 = inlined_call_operand.vmem [shape: f32[16,5,5], index: 0, kind: input, shape index: {}]   ;;  %s74_s1 = inlined_call_operand.vmem [shape: f32[16,25], index: 1, kind: output, shape index: {}]  }
   0x1   :  { %v2_v0 = vld [vmem:[%s73_s0] sm:$0x1f]   ;;  %v25_v1 = vld [vmem:[%s73_s0 + $0x8] sm:$0x1f]   ;;  %v27_v2 = vld [vmem:[%s73_s0 + $0x10] sm:$0x1f]  }
   0x2   :  { %4 = vst.msk [vmem:[%s74_s1] sm:$0x1f] %vm3_vm0, %v2_v0   ;;  %v29_v3 = vld [vmem:[%s73_s0 + $0x18] sm:$0x1f]   ;;  %v31_v4 = vld [vmem:[%s73_s0 + $0x20] sm:$0x1f]  }
   0x3   :  { %26 = vst.msk [vmem:[%s74_s1 + $0x5] sm:$0x1f] %vm3_vm0, %v25_v1  }
   0x4   :  { %28 = vst.msk [vmem:[%s74_s1 + $0xa] sm:$0x1f] %vm3_vm0, %v27_v2  }
   0x5   :  { %30 = vst.msk [vmem:[%s74_s1 + $0xf] sm:$0x1f] %vm3_vm0, %v29_v3  }
   0x6   :  { %32 = vst.msk [vmem:[%s74_s1 + $0x14] sm:$0x1f] %vm3_vm0, %v31_v4  }

// kernel: convnet_forward.1
= control target key start
LH: loop header
LB: loop body
LE: loop exit
PB: predicated region body
PF: predicated region fallthrough
CT: control target
= control target key end

     0   :  { %s13175_s0 = inlined_call_operand.vmem [shape: f32[2,4,25,768], index: 0, kind: input, shape index: {}]   ;;  %s13176_s1 = inlined_call_operand.vmem [shape: f32[16,25], index: 1, kind: input, shape index: {}]   ;;  %s13177_s2 = inlined_call_operand.vmem [shape: f32[16,1], index: 2, kind: input, shape index: {}]   ;;  %s13178_s3 = inlined_call_operand.vmem [shape: f32[16,1], index: 3, kind: input, shape index: {}]   ;;  %s13179_s4 = inlined_call_operand.vmem [shape: f32[1,384], index: 4, kind: input, shape index: {}]   ;;  %s13180_s5 = inlined_call_operand.vmem [shape: f32[25,32,16], index: 5, kind: input, shape index: {}]   ;;  %s13181_s6 = inlined_call_operand.vmem [shape: f32[32,1], index: 6, kind: input, shape index: {}]   ;;  %s13182_s7 = inlined_call_operand.vmem [shape: f32[32,1], index: 7, kind: input, shape index: {}]   ;;  %s13183_s8 = inlined_call_operand.vmem [shape: f32[233,49], index: 8, kind: input, shape index: {}]   ;;  %s13184_s9 = inlined_call_operand.vmem [shape: f32[49,320], index: 9, kind: input, shape index: {}]   ;;  %s13185_s10 = inlined_call_operand.vmem [shape: f32[32,320], index: 10, kind: input, shape index: {}]   ;;  %s13186_s11 = inlined_call_operand.vmem [shape: f32[320,10], index: 11, kind: input, shape index: {}]   ;;  %s13187_s12 = inlined_call_operand.vmem [shape: f32[1,10], index: 12, kind: input, shape index: {}]   ;;  %s13188_s13 = inlined_call_operand.hbm [shape: f32[2,2,10], index: 13, kind: output, shape index: {}]  }
   0x1   :  { %13257 = sst [smem:[#allocation40_spill]] %s13175_s0 }
   0x2   :  { %18 = vsyncpa [#allocation3], 0 }
   0x3   :  { %20 = vsyncpa [#allocation3 + $0x1], 0  ;;  %s9400_s25 = smov 0   ;;  %s9402_s26 = smov 0  }
   0x4   :  { %s9404_s27 = smov 0   ;;  %s9406_s28 = smov 0  }
   0x5 LB: > { %13258 = sst [smem:[#allocation5_spill]] %s9291_s25  ;;  %s9421_s29 = sadd.s32 4294967295, %s9303_s28   ;;  %s9303_s28 = sphi %s9406_s28, %s13420_s28   ;;  %s9299_s27 = sphi %s9404_s27, %s13422_s27   ;;  %s9295_s26 = sphi %s9402_s26, %s13424_s26   ;;  %s9291_s25 = sphi %s9400_s25, %s13423_s25  }
   0x6   : > { %13259 = sst [smem:[#allocation6_spill]] %s9299_s27  ;;  %s7699_s30 = sadd.s32 4294967294, %s9303_s28  }
   0x7   : > { %s9425_s14 = sadd.s32 1, %s9303_s28   ;;  %s311_s15 = sadd.s32 1, %s9299_s27 }
   0x8   : > { %13260 = sst [smem:[#allocation7_spill]] %s9425_s14  ;;  %s308_s16 = ssub.s32 %s9303_s28, %s9425_s14 }
   0x9   : > { %p321_p0 = scmp.ne.s32.totalorder %s9299_s27, %s9295_s26  ;;  %p309_p1 = scmp.eq.s32.totalorder %s308_s16, 0 }
   0xa   : > { %p322_p2 = scmp.eq.s32.totalorder %s9421_s29, 1  ;;  %p327_p3 = scmp.ne.s32.totalorder %s9295_s26, %s9291_s25 }
   0xb   : > { %p328_p4 = scmp.eq.s32.totalorder %s7699_s30, 1  ;;  %p7702_p7 = scmp.ge.s32.totalorder %s9303_s28, 1 }
   0xc   : > { %s9436_s17 = scalar_select %p309_p1, %s9299_s27, %s311_s15  }
   0xd   : > { %p9438_p5 = por %p322_p2, %p321_p0  ;;  %p9442_p6 = por %p328_p4, %p327_p3 }
   0xe   : > { %13261 = sst [smem:[#allocation8_spill]] %s9436_s17  ;;  %p390_p8 = scmp.lt.s32.totalorder %s9303_s28, 3 }
   0xf   : > { %s13263_s19 = scalar_select %p9442_p6, 1, 0 }
  0x10   : > { %p391_p9 = pnand %p7702_p7, %p390_p8 }
  0x11   : > { %13264 = sst [smem:[#allocation9_spill]] %s13263_s19 }
  0x12   : > { %394 = sbr.rel (%p391_p9) target bundleno = 2897 (0xb51), region = 72 }
  0x17   : > { %p434_p10 = scmp.lt.s32.totalorder %s9421_s29, 1  ;;  %v9305_v0 = vmov 0   ;;  %v540_v1 = vld [vmem:[%s13177_s2 + $0x8] sm:$0xff]  ;;  %vm460_vm0 = vcmask 1040384   ;;  %s13265_s0 = sld [smem:[#allocation40_spill]]  ;;  %v539_v7 = vld [vmem:[%s13177_s2] sm:$0xff] }
  0x18   : > { %8558 = vset.pattern.permute.xlu0 %v9305_v0  ;;  %8559 = vset.pattern.permute.xlu1 %v9305_v0  ;;  %v558_v2 = vld [vmem:[%s13178_s3 + $0x8] sm:$0xff]  ;;  %v557_v12 = vld [vmem:[%s13178_s3] sm:$0xff]  ;;  %vm453_vm1 = vcmask 203776   ;;  %s13193_s22 = smov 126   ;;  %s13191_s23 = smov 124   ;;  %vm968_vm2 = vcmask 130048  }
  0x19   : > { %s435_s24 = scalar_select %p434_p10, %s9421_s29, 1  ;;  %548 = vperm.xlu0 %8558, %v540_v1   ;;  %566 = vperm.xlu1 %8559, %v558_v2   ;;  %v9483_v15 = vld [vmem:[%s13176_s1] sm:$0xff]  ;;  %v9510_v29 = vld [vmem:[%s13176_s1 + $0x8] sm:$0xff]  ;;  %vm961_vm3 = vcmask 1039360   ;;  %vm1220_vm4 = vcmask 1022976   ;;  %vm1122_vm5 = vcmask 1031168  }
  0x1a   : > { %8900 = vset.pattern.permute.xlu2 %v9305_v0  ;;  %s13189_s15 = smov 125   ;;  %s13195_s16 = smov 109   ;;  %vm1318_vm6 = vcmask 1014784   ;;  %vm1422_vm7 = vcmask 900096   ;;  %vm1526_vm8 = vcmask 891904   ;;  %vm1630_vm9 = vcmask 883712  }
  0x1b   : > { %s8493_s30 = smul.u32 768, %s435_s24  ;;  %s13199_s24 = smov 127   ;;  %vm1838_vm10 = vcmask 867328   ;;  %vm1734_vm11 = vcmask 875520   ;;  %vm2046_vm12 = vcmask 744448   ;;  %vm1942_vm13 = vcmask 752640  }
  0x1c   : > { %s13203_s20 = smov 108   ;;  %s13201_s21 = smov 107   ;;  %vm13240_vm14 = vcmask 728064   ;;  %vm13237_vm15 = vcmask 736256  }
  0x1d   : > { %s9459_s17 = scalar_lea.vmem %s13265_s0, %s8493_s30  ;;  %s13197_s30 = smov 110  }
  0x1e   : > { %v450_v3 = vld [vmem:[%s9459_s17 + $0x90] sm:$0x1]  ;;  %v451_v4 = vld [vmem:[%s9459_s17 + $0x98] sm:$0x1]  ;;  %v447_v5 = vld [vmem:[%s9459_s17 + $0x60] sm:$0xff]  ;;  %s13331_s0 = smov 124  }
  0x1f   : > { %7705 = vmatpush.msk.msra.mxu2 %vm460_vm0, %v450_v3  ;;  %7708 = vmatpush.msk.msra.mxu3 %vm460_vm0, %v451_v4  ;;  %v448_v6 = vld [vmem:[%s9459_s17 + $0x68] sm:$0xff]  ;;  %v444_v8 = vld [vmem:[%s9459_s17 + $0x30] sm:$0xff]  ;;  %v445_v9 = vld [vmem:[%s9459_s17 + $0x38] sm:$0xff]  ;;  %s13332_s27 = smov 109   ;;  %s13335_s25 = smov 106  }
  0x20   : > { %v7724_v10 = vld [vmem:[%s9459_s17 + $0x158] sm:$0x1]  ;;  %v7721_v11 = vld [vmem:[%s9459_s17 + $0x128] sm:$0xff]  ;;  %v441_v13 = vld [vmem:[%s9459_s17] sm:$0xff] }
  0x21   : > { %483 = vmatpush.msra.mxu2 %v447_v5  ;;  %506 = vmatpush.msra.mxu3 %v448_v6  ;;  %v442_v14 = vld [vmem:[%s9459_s17 + $0x8] sm:$0xff]  ;;  %v7718_v16 = vld [vmem:[%s9459_s17 + $0xf8] sm:$0xff]  ;;  %v452_v17 = vld [vmem:[%s9459_s17 + $0xa0] sm:$0x1] }
  0x22   : > { %7729 = vmatpush.msk.msra.mxu0 %vm460_vm0, %v7724_v10  ;;  %543 = vperm.xlu0 %8558, %v539_v7   ;;  %v7723_v18 = vld [vmem:[%s9459_s17 + $0x150] sm:$0x1]  ;;  %v7725_v19 = vld [vmem:[%s9459_s17 + $0x160] sm:$0x1]  ;;  %v7715_v20 = vld [vmem:[%s9459_s17 + $0xc8] sm:$0xff] }
  0x23   : > { %484 = vmatpush.msra.mxu2 %v444_v8  ;;  %507 = vmatpush.msra.mxu3 %v445_v9  ;;  %v449_v21 = vld [vmem:[%s9459_s17 + $0x70] sm:$0xff]  ;;  %v7720_v22 = vld [vmem:[%s9459_s17 + $0x120] sm:$0xff]  ;;  %v7745_v35 = vld [vmem:[%s9459_s17 + $0x218] sm:$0x1] }
  0x24   : > { %639 = vmatpush.msra.mxu0 %v7721_v11  ;;  %561 = vperm.xlu1 %8559, %v557_v12   ;;  %v446_v23 = vld [vmem:[%s9459_s17 + $0x40] sm:$0xff]  ;;  %v7722_v24 = vld [vmem:[%s9459_s17 + $0x130] sm:$0xff]  ;;  %v7742_v38 = vld [vmem:[%s9459_s17 + $0x1e8] sm:$0xff] }
  0x25   : > { %485 = vmatpush.msra.mxu2 %v441_v13  ;;  %508 = vmatpush.msra.mxu3 %v442_v14  ;;  %v7717_v25 = vld [vmem:[%s9459_s17 + $0xf0] sm:$0xff]  ;;  %v7746_v26 = vld [vmem:[%s9459_s17 + $0x220] sm:$0x1]  ;;  %v7739_v41 = vld [vmem:[%s9459_s17 + $0x1b8] sm:$0xff] }
  0x26   : > { %7706 = vmatmul.msk.f32.vlgmr.msra.gmra.mxu2 %vm453_vm1, %v9483_v15  ;;  %7709 = vmatmul.msk.f32.vlgmr.msra.gmra.mxu3 %vm453_vm1, %v9483_v15  ;;  %v443_v27 = vld [vmem:[%s9459_s17 + $0x10] sm:$0xff]  ;;  %v7719_v28 = vld [vmem:[%s9459_s17 + $0x100] sm:$0xff]  ;;  %v7766_v44 = vld [vmem:[%s9459_s17 + $0x2d8] sm:$0x1] }
  0x27   : > { %640 = vmatpush.msra.mxu0 %v7718_v16  ;;  %7711 = vmatpush.msk.msrb.mxu2 %vm460_vm0, %v452_v17  ;;  %v7714_v30 = vld [vmem:[%s9459_s17 + $0xc0] sm:$0xff]  ;;  %v7743_v31 = vld [vmem:[%s9459_s17 + $0x1f0] sm:$0xff]  ;;  %v7736_v45 = vld [vmem:[%s9459_s17 + $0x188] sm:$0xff] }
  0x28   : > { %7726 = vmatpush.msk.msrb.mxu3 %vm460_vm0, %v7723_v18  ;;  %7732 = vmatpush.msk.msra.mxu1 %vm460_vm0, %v7725_v19  ;;  %v7716_v32 = vld [vmem:[%s9459_s17 + $0xd0] sm:$0xff]  ;;  %v7740_v34 = vld [vmem:[%s9459_s17 + $0x1c0] sm:$0xff]  ;;  %v7763_v48 = vld [vmem:[%s9459_s17 + $0x2a8] sm:$0xff] }
  0x29   : > { %641 = vmatpush.msra.mxu0 %v7715_v20  ;;  %529 = vmatpush.msrb.mxu2 %v449_v21  ;;  %v7744_v33 = vld [vmem:[%s9459_s17 + $0x210] sm:$0x1]  ;;  %v7741_v37 = vld [vmem:[%s9459_s17 + $0x1e0] sm:$0xff]  ;;  %v7760_v51 = vld [vmem:[%s9459_s17 + $0x278] sm:$0xff] }
  0x2a   : > { %7730 = vmatmul.msk.f32.vlgmr.msra.gmra.mxu0 %vm453_vm1, %v9483_v15  ;;  %616 = vmatpush.msrb.mxu3 %v7720_v22  ;;  %v7737_v36 = vld [vmem:[%s9459_s17 + $0x190] sm:$0xff]  ;;  %v7735_v42 = vld [vmem:[%s9459_s17 + $0x180] sm:$0xff]  ;;  %v7757_v53 = vld [vmem:[%s9459_s17 + $0x248] sm:$0xff] }
  0x2b   : > { %530 = vmatpush.msrb.mxu2 %v446_v23  ;;  %662 = vmatpush.msra.mxu1 %v7722_v24  ;;  %v7765_v39 = vld [vmem:[%s9459_s17 + $0x2d0] sm:$0x1]  ;;  %v7762_v43 = vld [vmem:[%s9459_s17 + $0x2a0] sm:$0xff] }
  0x2c   : > { %617 = vmatpush.msrb.mxu3 %v7717_v25  ;;  %7753 = vmatpush.msk.msrb.mxu0 %vm460_vm0, %v7746_v26  ;;  %v7738_v40 = vld [vmem:[%s9459_s17 + $0x1b0] sm:$0xff]  ;;  %v7767_v47 = vld [vmem:[%s9459_s17 + $0x2e0] sm:$0x1] }
  0x2d   : > { %531 = vmatpush.msrb.mxu2 %v443_v27  ;;  %663 = vmatpush.msra.mxu1 %v7719_v28  ;;  %v7759_v46 = vld [vmem:[%s9459_s17 + $0x270] sm:$0xff]  ;;  %v7756_v49 = vld [vmem:[%s9459_s17 + $0x240] sm:$0xff] }
  0x2e   : > { %7707 = vmatmul.msk.f32.gmra.mxu2 %vm453_vm1, %v9510_v29  ;;  %7710 = vmatmul.msk.f32.gmra.mxu3 %vm453_vm1, %v9510_v29  ;;  %v7764_v50 = vld [vmem:[%s9459_s17 + $0x2b0] sm:$0xff]  ;;  %v7761_v52 = vld [vmem:[%s9459_s17 + $0x280] sm:$0xff] }
  0x2f   : > { %618 = vmatpush.msrb.mxu3 %v7714_v30  ;;  %777 = vmatpush.msrb.mxu0 %v7743_v31  ;;  %v7758_v54 = vld [vmem:[%s9459_s17 + $0x250] sm:$0xff] }
  0x30   : > { %664 = vmatpush.msra.mxu1 %v7716_v32  ;;  %7747 = vmatpush.msk.msra.mxu2 %vm460_vm0, %v7744_v33 }
  0x31   : > { %778 = vmatpush.msrb.mxu0 %v7740_v34  ;;  %7733 = vmatmul.msk.f32.vlgmr.msra.gmra.mxu1 %vm453_vm1, %v9483_v15 }
  0x32   : > { %7731 = vmatmul.msk.f32.gmra.mxu0 %vm453_vm1, %v9510_v29  ;;  %7750 = vmatpush.msk.msra.mxu3 %vm460_vm0, %v7745_v35 }
  0x33   : > { %779 = vmatpush.msrb.mxu0 %v7737_v36  ;;  %731 = vmatpush.msra.mxu2 %v7741_v37 }
  0x34   : > { %754 = vmatpush.msra.mxu3 %v7742_v38  ;;  %7768 = vmatpush.msk.msrb.mxu1 %vm460_vm0, %v7765_v39 }
  0x35   : > { %732 = vmatpush.msra.mxu2 %v7738_v40 }
  0x36   : > { %7712 = vmatmul.msk.f32.vlgmr.msrb.gmra.mxu2 %vm453_vm1, %v9483_v15  ;;  %7727 = vmatmul.msk.f32.vlgmr.msrb.gmra.mxu3 %vm453_vm1, %v9483_v15 }
  0x37   : > { %755 = vmatpush.msra.mxu3 %v7739_v41  ;;  %733 = vmatpush.msra.mxu2 %v7735_v42 }
  0x38   : > { %846 = vmatpush.msrb.mxu1 %v7762_v43 }
  0x39   : > { %7771 = vmatpush.msk.msrb.mxu2 %vm460_vm0, %v7766_v44  ;;  %7734 = vmatmul.msk.f32.gmra.mxu1 %vm453_vm1, %v9510_v29 }
  0x3a   : > { %756 = vmatpush.msra.mxu3 %v7736_v45  ;;  %7754 = vmatmul.msk.f32.vlgmr.msrb.gmra.mxu0 %vm453_vm1, %v9483_v15 }
  0x3b   : > { %847 = vmatpush.msrb.mxu1 %v7759_v46  ;;  %869 = vmatpush.msrb.mxu2 %v7763_v48 }
  0x3c   : > { %7774 = vmatpush.msk.msrb.mxu3 %vm460_vm0, %v7767_v47 }
  0x3d   : > { %848 = vmatpush.msrb.mxu1 %v7756_v49  ;;  %870 = vmatpush.msrb.mxu2 %v7760_v51 }
  0x3e   : > { %892 = vmatpush.msrb.mxu3 %v7764_v50  ;;  %7713 = vmatmul.msk.f32.gmra.mxu2 %vm453_vm1, %v9510_v29 }
  0x3f   : > { %7728 = vmatmul.msk.f32.gmra.mxu3 %vm453_vm1, %v9510_v29  ;;  %871 = vmatpush.msrb.mxu2 %v7757_v53 }
  0x40   : > { %893 = vmatpush.msrb.mxu3 %v7761_v52 }
  0x41   : > { %7769 = vmatmul.msk.f32.vlgmr.msrb.gmra.mxu1 %vm453_vm1, %v9483_v15 }
  0x42   : > { %894 = vmatpush.msrb.mxu3 %v7758_v54  ;;  %7755 = vmatmul.msk.f32.gmra.mxu0 %vm453_vm1, %v9510_v29  ;;  %v9628_v54 = vld [vmem:[%s13179_s4] sm:$0x7] }
  0x46   : > { %7748 = vmatmul.msk.f32.vlgmr.msra.gmra.mxu2 %vm453_vm1, %v9483_v15 }
  0x47   : > { %7751 = vmatmul.msk.f32.vlgmr.msra.gmra.mxu3 %vm453_vm1, %v9483_v15 }
  0x49   : > { %7770 = vmatmul.msk.f32.gmra.mxu1 %vm453_vm1, %v9510_v29 }
  0x4e   : > { %7749 = vmatmul.msk.f32.gmra.mxu2 %vm453_vm1, %v9510_v29 }
  0x4f   : > { %7752 = vmatmul.msk.f32.gmra.mxu3 %vm453_vm1, %v9510_v29 }
  0x56   : > { %7772 = vmatmul.msk.f32.vlgmr.msrb.gmra.mxu2 %vm453_vm1, %v9483_v15 }
  0x57   : > { %7775 = vmatmul.msk.f32.vlgmr.msrb.gmra.mxu3 %vm453_vm1, %v9483_v15 }
  0x5e   : > { %7773 = vmatmul.msk.f32.gmra.mxu2 %vm453_vm1, %v9510_v29 }
  0x5f   : > { %7776 = vmatmul.msk.f32.gmra.mxu3 %vm453_vm1, %v9510_v29 }
  0x8b   : > { %v9587_v0 = vpop.permute.xlu0 %548  ;;  %v9589_v1 = vpop.permute.xlu1 %566 }
  0x94   : > { %v9591_v6 = vpop.permute.xlu0 %543 }
  0x96   : > { %v9595_v11 = vpop.permute.xlu1 %561 }
  0xa7   : > { %v643_v60 = vpop.f32.mrf.mxu0 }
  0xa8   : > { %v673_v23 = vmul.f32 %v643_v60, %v9591_v6 }
  0xa9   : > { %v487_v55 = vpop.f32.mrf.mxu2  ;;  %v510_v56 = vpop.f32.mrf.mxu3 }
  0xaa   : > { %v551_v8 = vmul.f32 %v9591_v6, %v487_v55  ;;  %v552_v26 = vmul.f32 %v9591_v6, %v510_v56  ;;  %v679_v38 = vadd.f32 %v673_v23, %v9595_v11 }
  0xac   : > { %v569_v20 = vadd.f32 %v9595_v11, %v551_v8  ;;  %v570_v42 = vadd.f32 %v9595_v11, %v552_v26  ;;  %v685_v55 = vmax.f32 %v679_v38, 0.0 }
  0xae   : > { %v666_v57 = vpop.f32.mrf.mxu1  ;;  %v575_v32 = vmax.f32 %v569_v20, 0.0 }
  0xaf   : > { %v646_v5 = vpop.f32.mrf.mxu0  ;;  %v674_v15 = vmul.f32 %v666_v57, %v9591_v6 }
  0xb1   : > { %v490_v58 = vpop.f32.mrf.mxu2  ;;  %v9585_v59 = vpop.f32.mrf.mxu3  ;;  %v680_v28 = vadd.f32 %v674_v15, %v9595_v11 }
  0xb2   : > { %v554_v17 = vmul.f32 %v9587_v0, %v490_v58 }
  0xb3   : > { %v686_v44 = vmax.f32 %v680_v28, 0.0 }
  0xb4   : > { %v572_v29 = vadd.f32 %v9589_v1, %v554_v17 }
  0xb6   : > { %v669_v61 = vpop.f32.mrf.mxu1  ;;  %v578_v46 = vmax.f32 %v572_v29, 0.0 }
  0xb7   : > { %v781_v19 = vpop.f32.mrf.mxu0  ;;  %v677_v45 = vmul.f32 %v669_v61, %v9587_v0  ;;  %v576_v61 = vmax.f32 %v570_v42, 0.0 }
  0xb8   : > { %v789_v31 = vmul.f32 %v781_v19, %v9591_v6 }
  0xb9   : > { %v533_v62 = vpop.f32.mrf.mxu2  ;;  %v620_v63 = vpop.f32.mrf.mxu3 }
  0xba   : > { %v672_v7 = vmul.f32 %v620_v63, %v9591_v6  ;;  %v553_v18 = vmul.f32 %v9591_v6, %v533_v62  ;;  %v795_v48 = vadd.f32 %v789_v31, %v9595_v11  ;;  %v555_v62 = vmul.f32 %v9587_v0, %v9585_v59 }
  0xbb   : > { %v676_v63 = vmul.f32 %v646_v5, %v9587_v0 }
  0xbc   : > { %v678_v14 = vadd.f32 %v672_v7, %v9595_v11  ;;  %v571_v30 = vadd.f32 %v9595_v11, %v553_v18  ;;  %v928_v7 = vperm.slane %v9628_v54, 0  ;;  %v691_v18 = vmax.f32 %v576_v61, %v685_v55  ;;  %v941_v61 = vld [vmem:[%s13180_s5 + $0x8] sm:$0xff] }
  0xbd   : > { %v573_v19 = vadd.f32 %v9589_v1, %v555_v62  ;;  %v682_v20 = vadd.f32 %v676_v63, %v9589_v1  ;;  %v942_v62 = vld [vmem:[%s13180_s5 + $0x10] sm:$0xff]  ;;  %v943_v63 = vld [vmem:[%s13180_s5 + $0x18] sm:$0xff] }
  0xbe   : > { %v850_v2 = vpop.f32.mrf.mxu1  ;;  %v684_v27 = vmax.f32 %v678_v14, 0.0  ;;  %v577_v47 = vmax.f32 %v571_v30, 0.0 }
  0xbf   : > { %v902_v22 = vmul.f32 %v850_v2, %v9591_v6  ;;  %v784_v57 = vpop.f32.mrf.mxu0  ;;  %v683_v2 = vadd.f32 %v677_v45, %v9589_v1 }
  0xc0   : > { %v690_v43 = vmax.f32 %v575_v32, %v684_v27 }
  0xc1   : > { %v536_v3 = vpop.f32.mrf.mxu2  ;;  %v908_v35 = vadd.f32 %v902_v22, %v9595_v11 }
  0xc2   : > { %v623_v4 = vpop.f32.mrf.mxu3  ;;  %v556_v50 = vmul.f32 %v9587_v0, %v536_v3  ;;  %v692_v3 = vmax.f32 %v577_v47, %v686_v44 }
  0xc3   : > { %v675_v12 = vmul.f32 %v623_v4, %v9587_v0  ;;  %v914_v53 = vmax.f32 %v908_v35, 0.0  ;;  %v801_v4 = vmax.f32 %v795_v48, 0.0 }
  0xc5   : > { %v681_v24 = vadd.f32 %v675_v12, %v9589_v1  ;;  %v807_v26 = vmax.f32 %v692_v3, %v801_v4 }
  0xc6   : > { %v853_v16 = vpop.f32.mrf.mxu1 }
  0xc7   : > { %v905_v25 = vmul.f32 %v853_v16, %v9587_v0  ;;  %v687_v39 = vmax.f32 %v681_v24, 0.0  ;;  %v929_v24 = vperm.slane %v9628_v54, 1 }
  0xc9   : > { %v735_v9 = vpop.f32.mrf.mxu2  ;;  %v911_v41 = vadd.f32 %v905_v25, %v9589_v1  ;;  %v693_v56 = vmax.f32 %v578_v46, %v687_v39 }
  0xca   : > { %v758_v10 = vpop.f32.mrf.mxu3  ;;  %v787_v13 = vmul.f32 %v735_v9, %v9591_v6  ;;  %v574_v9 = vadd.f32 %v9589_v1, %v556_v50 }
  0xcb   : > { %v788_v34 = vmul.f32 %v758_v10, %v9591_v6  ;;  %v917_v60 = vmax.f32 %v911_v41, 0.0  ;;  %v792_v10 = vmul.f32 %v784_v57, %v9587_v0 }
  0xcc   : > { %v793_v21 = vadd.f32 %v787_v13, %v9595_v11  ;;  %v580_v27 = vmax.f32 %v574_v9, 0.0 }
  0xcd   : > { %v794_v52 = vadd.f32 %v788_v34, %v9595_v11  ;;  %v798_v28 = vadd.f32 %v792_v10, %v9589_v1  ;;  %v688_v34 = vmax.f32 %v682_v20, 0.0 }
  0xce   : > { %v799_v33 = vmax.f32 %v793_v21, 0.0  ;;  %v689_v21 = vmax.f32 %v683_v2, 0.0 }
  0xcf   : > { %v800_v12 = vmax.f32 %v794_v52, 0.0 }
  0xd0   : > { %v805_v51 = vmax.f32 %v690_v43, %v799_v33  ;;  %v579_v33 = vmax.f32 %v573_v19, 0.0  ;;  %v695_v38 = vmax.f32 %v580_v27, %v689_v21 }
  0xd1   : > { %v738_v36 = vpop.f32.mrf.mxu2  ;;  %v806_v29 = vmax.f32 %v691_v18, %v800_v12  ;;  %v7777_v12 = vld [vmem:[%s13180_s5 + $0x20] sm:$0xff] }
  0xd2   : > { %v761_v37 = vpop.f32.mrf.mxu3  ;;  %v790_v40 = vmul.f32 %v738_v36, %v9587_v0  ;;  %v920_v13 = vmax.f32 %v805_v51, %v914_v53  ;;  %v694_v45 = vmax.f32 %v579_v33, %v688_v34 }
  0xd3   : > { %v791_v16 = vmul.f32 %v761_v37, %v9587_v0  ;;  %v930_v37 = vperm.slane %v9628_v54, 2 }
  0xd4   : > { %v796_v49 = vadd.f32 %v790_v40, %v9589_v1  ;;  %v934_v30 = vmul.f32 %v928_v7, %v920_v13 }
  0xd6   : > { %v802_v58 = vmax.f32 %v796_v49, 0.0 }
  0xd8   : > { %v808_v8 = vmax.f32 %v693_v56, %v802_v58 }
  0xd9   : > { %v873_v14 = vpop.f32.mrf.mxu2 }
  0xda   : > { %v896_v15 = vpop.f32.mrf.mxu3  ;;  %v923_v59 = vmax.f32 %v808_v8, %v917_v60  ;;  %v903_v5 = vmul.f32 %v873_v14, %v9591_v6  ;;  %v940_v60 = vld [vmem:[%s13180_s5] sm:$0xff] }
  0xdb   : > { %v904_v17 = vmul.f32 %v896_v15, %v9591_v6  ;;  %v797_v6 = vadd.f32 %v791_v16, %v9589_v1 }
  0xdc   : > { %v937_v22 = vmul.f32 %v928_v7, %v923_v59  ;;  %v909_v23 = vadd.f32 %v903_v5, %v9595_v11  ;;  %v7778_v5 = vld [vmem:[%s13180_s5 + $0x28] sm:$0xff] }
  0xdd   : > { %v910_v25 = vadd.f32 %v904_v17, %v9595_v11  ;;  %v804_v11 = vmax.f32 %v798_v28, 0.0  ;;  %v803_v41 = vmax.f32 %v797_v6, 0.0 }
  0xde   : > { %v915_v31 = vmax.f32 %v909_v23, 0.0  ;;  %1065 = vmatpush.msra.mxu2 %v937_v22  ;;  %v7779_v23 = vld [vmem:[%s13180_s5 + $0x30] sm:$0xff] }
  0xdf   : > { %v916_v32 = vmax.f32 %v910_v25, 0.0  ;;  %v810_v50 = vmax.f32 %v695_v38, %v804_v11  ;;  %v809_v51 = vmax.f32 %v694_v45, %v803_v41  ;;  %v7809_v11 = vld [vmem:[%s13180_s5 + $0x60] sm:$0xff] }
  0xe0   : > { %v921_v35 = vmax.f32 %v806_v29, %v915_v31  ;;  %1066 = vmatpush.msra.mxu2 %v934_v30  ;;  %v7797_v45 = vld [vmem:[%s13180_s5 + $0x40] sm:$0xff] }
  0xe1   : > { %v922_v36 = vmax.f32 %v807_v26, %v916_v32  ;;  %v876_v39 = vpop.f32.mrf.mxu2  ;;  %7789 = vmatmul.msk.f32.vlgmr.msra.gmra.mxu2 %vm968_vm2, %v940_v60 }
  0xe2   : > { %v899_v40 = vpop.f32.mrf.mxu3  ;;  %v935_v42 = vmul.f32 %v929_v24, %v921_v35  ;;  %v906_v43 = vmul.f32 %v876_v39, %v9587_v0 }
  0xe3   : > { %v907_v44 = vmul.f32 %v899_v40, %v9587_v0  ;;  %v936_v46 = vmul.f32 %v930_v37, %v922_v36 }
  0xe4   : > { %v912_v47 = vadd.f32 %v906_v43, %v9589_v1  ;;  %v8575_v49 = vpack.i.bf16 %v935_v42, %v934_v30 }
  0xe5   : > { %v913_v48 = vadd.f32 %v907_v44, %v9589_v1  ;;  %v9653_v56 = vpack.i.bf16 %v936_v46, %v935_v42  ;;  %v7810_v46 = vld [vmem:[%s13180_s5 + $0x68] sm:$0xff] }
  0xe6   : > { %v918_v52 = vmax.f32 %v912_v47, 0.0  ;;  %8576 = vrot.lane.b32.xlu1 %v8575_v49, %s13193_s22 }
  0xe7   : > { %v919_v53 = vmax.f32 %v913_v48, 0.0 }
  0xe8   : > { %v924_v54 = vmax.f32 %v809_v51, %v918_v52 }
  0xe9   : > { %v925_v55 = vmax.f32 %v810_v50, %v919_v53  ;;  %7790 = vmatmul.msk.f32.gmra.mxu2 %vm968_vm2, %v941_v61 }
  0xea   : > { %v938_v57 = vmul.f32 %v929_v24, %v924_v54 }
  0xeb   : > { %v939_v58 = vmul.f32 %v930_v37, %v925_v55  ;;  %v7780_v37 = vld [vmem:[%s13180_s5 + $0x38] sm:$0xff] }
  0xec   : > { %1094 = vmatpush.msra.mxu3 %v938_v57  ;;  %v9655_v0 = vpack.i.bf16 %v938_v57, %v937_v22 }
  0xed   : > { %v9663_v1 = vpack.i.bf16 %v934_v30, %v939_v58 }
  0xee   : > { %1095 = vmatpush.msra.mxu3 %v935_v42  ;;  %8591 = vrot.lane.b32.xlu1 %v9655_v0, %s13191_s23 }
  0xef   : > { %8571 = vrot.lane.b32.xlu0 %v9655_v0, %s13193_s22  ;;  %8561 = vrot.lane.b32.xlu2 %v9655_v0, %s13199_s24  ;;  %s13219_s22 = smov 91  }
  0xf0   : > { %7793 = vmatmul.msk.f32.vlgmr.msra.gmra.mxu3 %vm968_vm2, %v940_v60 }
  0xf1   : > { %7791 = vmatmul.msk.f32.gmra.mxu2 %vm968_vm2, %v942_v62 }
  0xf6   : > { %8611 = vrot.lane.b32.xlu1 %v9663_v1, %s13197_s30 }
  0xf7   : > { %8586 = vrot.lane.b32.xlu0 %v8575_v49, %s13189_s15  ;;  %8566 = vrot.lane.b32.xlu2 %v8575_v49, %s13199_s24  ;;  %s13209_s24 = smov 90  }
  0xf8   : > { %7794 = vmatmul.msk.f32.gmra.mxu3 %vm968_vm2, %v941_v61  ;;  %v7798_v61 = vld [vmem:[%s13180_s5 + $0x48] sm:$0xff] }
  0xf9   : > { %7792 = vmatmul.msk.f32.gmra.mxu2 %vm968_vm2, %v943_v63 }
  0xfe   : > { %8621 = vrot.lane.b32.xlu1 %v9663_v1, %s13195_s16 }
  0xff   : > { %8606 = vrot.lane.b32.xlu0 %v9655_v0, %s13197_s30  ;;  %8581 = vrot.lane.b32.xlu2 %v9655_v0, %s13189_s15  ;;  %s13205_s15 = smov 106  }
 0x100   : > { %7795 = vmatmul.msk.f32.gmra.mxu3 %vm968_vm2, %v942_v62 }
 0x106   : > { %8641 = vrot.lane.b32.xlu1 %v9663_v1, %s13203_s20 }
 0x107   : > { %8616 = vrot.lane.b32.xlu0 %v9655_v0, %s13195_s16  ;;  %8596 = vrot.lane.b32.xlu2 %v8575_v49, %s13191_s23  ;;  %s13207_s23 = smov 92  }
 0x108   : > { %7796 = vmatmul.msk.f32.gmra.mxu3 %vm968_vm2, %v943_v63  ;;  %v7811_v63 = vld [vmem:[%s13180_s5 + $0x70] sm:$0xff] }
 0x10e   : > { %8651 = vrot.lane.b32.xlu1 %v9663_v1, %s13201_s21 }
 0x10f   : > { %8636 = vrot.lane.b32.xlu0 %v9655_v0, %s13203_s20  ;;  %8601 = vrot.lane.b32.xlu2 %v9653_v56, %s13197_s30  ;;  %s13211_s30 = smov 89  }
 0x116   : > { %8671 = vrot.lane.b32.xlu1 %v9663_v1, %s13205_s15 }
 0x117   : > { %8646 = vrot.lane.b32.xlu0 %v9655_v0, %s13201_s21  ;;  %8626 = vrot.lane.b32.xlu2 %v9653_v56, %s13195_s16  ;;  %s13223_s16 = smov 70  }
 0x11e   : > { %8681 = vrot.lane.b32.xlu1 %v9663_v1, %s13207_s23 }
 0x11f   : > { %8666 = vrot.lane.b32.xlu0 %v9655_v0, %s13205_s15  ;;  %8631 = vrot.lane.b32.xlu2 %v9653_v56, %s13203_s20  ;;  %s13217_s20 = smov 88  }
 0x126   : > { %8701 = vrot.lane.b32.xlu1 %v9663_v1, %s13219_s22 }
 0x127   : > { %8676 = vrot.lane.b32.xlu0 %v9655_v0, %s13207_s23  ;;  %8656 = vrot.lane.b32.xlu2 %v9653_v56, %s13201_s21  ;;  %s13323_s21 = smov 127  }
 0x12e   : > { %8711 = vrot.lane.b32.xlu1 %v9663_v1, %s13209_s24 }
 0x12f   : > { %8696 = vrot.lane.b32.xlu0 %v9655_v0, %s13219_s22  ;;  %8661 = vrot.lane.b32.xlu2 %v9653_v56, %s13205_s15  ;;  %s13215_s15 = smov 74  }
 0x136   : > { %8731 = vrot.lane.b32.xlu1 %v9663_v1, %s13211_s30 }
 0x137   : > { %8706 = vrot.lane.b32.xlu0 %v9655_v0, %s13209_s24  ;;  %8686 = vrot.lane.b32.xlu2 %v9653_v56, %s13207_s23  ;;  %s13213_s23 = smov 73  }
 0x13e   : > { %8741 = vrot.lane.b32.xlu1 %v9663_v1, %s13217_s20 }
 0x13f   : > { %8726 = vrot.lane.b32.xlu0 %v9655_v0, %s13211_s30  ;;  %8691 = vrot.lane.b32.xlu2 %v9653_v56, %s13219_s22  ;;  %s13231_s22 = smov 55  }
 0x146   : > { %8761 = vrot.lane.b32.xlu1 %v9663_v1, %s13215_s15 }
 0x147   : > { %8736 = vrot.lane.b32.xlu0 %v9655_v0, %s13217_s20  ;;  %8716 = vrot.lane.b32.xlu2 %v9653_v56, %s13209_s24  ;;  %s13225_s24 = smov 72  }
 0x149   : > { %v8562_v2 = vpop.permute.xlu2 %8561 }
 0x14a   : > { %v8564_v3 = vunpack.i.h.bf16 %v8562_v2  ;;  %v8563_v4 = vunpack.i.l.bf16 %v8562_v2 }
 0x14c   : > { %1024 = vmatpush.msra.mxu1 %v8564_v3  ;;  %v963_v7 = vsel %vm961_vm3, %v8563_v4, %v8564_v3 }
 0x14d   : > { %995 = vmatpush.msra.mxu0 %v963_v7 }
 0x14e   : > { %8771 = vrot.lane.b32.xlu1 %v9663_v1, %s13213_s23 }
 0x14f   : > { %8756 = vrot.lane.b32.xlu0 %v9655_v0, %s13215_s15  ;;  %8721 = vrot.lane.b32.xlu2 %v9653_v56, %s13211_s30  ;;  %s13221_s30 = smov 71  }
 0x151   : > { %v8567_v8 = vpop.permute.xlu2 %8566 }
 0x152   : > { %v8569_v9 = vunpack.i.h.bf16 %v8567_v8  ;;  %v8568_v10 = vunpack.i.l.bf16 %v8567_v8 }
 0x154   : > { %1025 = vmatpush.msra.mxu1 %v8569_v9  ;;  %v962_v13 = vsel %vm961_vm3, %v8568_v10, %v8569_v9 }
 0x155   : > { %996 = vmatpush.msra.mxu0 %v962_v13  ;;  %7785 = vmatmul.msk.f32.vlgmr.msra.gmra.mxu1 %vm968_vm2, %v7777_v12 }
 0x156   : > { %7781 = vmatmul.msk.f32.vlgmr.msra.gmra.mxu0 %vm968_vm2, %v7777_v12  ;;  %8791 = vrot.lane.b32.xlu1 %v9663_v1, %s13225_s24 }
 0x157   : > { %8766 = vrot.lane.b32.xlu0 %v9655_v0, %s13213_s23  ;;  %8746 = vrot.lane.b32.xlu2 %v9653_v56, %s13217_s20  ;;  %s13227_s20 = smov 56  }
 0x158   : > { %v8577_v14 = vpop.permute.xlu1 %8576 }
 0x159   : > { %v8582_v15 = vpop.permute.xlu2 %8581  ;;  %v8579_v24 = vunpack.i.h.bf16 %v8577_v14  ;;  %v8578_v25 = vunpack.i.l.bf16 %v8577_v14 }
 0x15a   : > { %v8584_v16 = vunpack.i.h.bf16 %v8582_v15  ;;  %v8583_v59 = vunpack.i.l.bf16 %v8582_v15 }
 0x15b   : > { %v1123_v6 = vsel %vm1122_vm5, %v8578_v25, %v8579_v24 }
 0x15c   : > { %1282 = vmatpush.msrb.mxu3 %v8584_v16  ;;  %v1222_v17 = vsel %vm1220_vm4, %v8583_v59, %v8584_v16  ;;  %v7799_v59 = vld [vmem:[%s13180_s5 + $0x50] sm:$0xff] }
 0x15d   : > { %7786 = vmatmul.msk.f32.gmra.mxu1 %vm968_vm2, %v7778_v5  ;;  %1253 = vmatpush.msrb.mxu2 %v1222_v17 }
 0x15e   : > { %7782 = vmatmul.msk.f32.gmra.mxu0 %vm968_vm2, %v7778_v5  ;;  %8801 = vrot.lane.b32.xlu1 %v9663_v1, %s13221_s30  ;;  %v7812_v5 = vld [vmem:[%s13180_s5 + $0x78] sm:$0xff] }
 0x15f   : > { %8786 = vrot.lane.b32.xlu0 %v9655_v0, %s13225_s24  ;;  %8751 = vrot.lane.b32.xlu2 %v9653_v56, %s13215_s15  ;;  %s13235_s15 = smov 52  }
 0x160   : > { %v8592_v18 = vpop.permute.xlu1 %8591 }
 0x161   : > { %v8572_v19 = vpop.permute.xlu0 %8571  ;;  %v8597_v20 = vpop.permute.xlu2 %8596  ;;  %v8594_v26 = vunpack.i.h.bf16 %v8592_v18  ;;  %v8593_v27 = vunpack.i.l.bf16 %v8592_v18 }
 0x162   : > { %v8574_v21 = vunpack.i.h.bf16 %v8572_v19  ;;  %v8573_v22 = vunpack.i.l.bf16 %v8572_v19  ;;  %v8599_v29 = vunpack.i.h.bf16 %v8597_v20  ;;  %v8598_v30 = vunpack.i.l.bf16 %v8597_v20 }
 0x163   : > { %v1320_v31 = vsel %vm1318_vm6, %v8593_v27, %v8594_v26  ;;  %v7800_v27 = vld [vmem:[%s13180_s5 + $0x58] sm:$0xff] }
 0x164   : > { %1184 = vmatpush.msrb.mxu1 %v8574_v21  ;;  %v1124_v28 = vsel %vm1122_vm5, %v8573_v22, %v8574_v21  ;;  %v1319_v36 = vsel %vm1318_vm6, %v8598_v30, %v8599_v29 }
 0x165   : > { %7787 = vmatmul.msk.f32.gmra.mxu1 %vm968_vm2, %v7779_v23  ;;  %1155 = vmatpush.msrb.mxu0 %v1124_v28  ;;  %v7833_v28 = vld [vmem:[%s13180_s5 + $0xa0] sm:$0xff] }
 0x166   : > { %7783 = vmatmul.msk.f32.gmra.mxu0 %vm968_vm2, %v7779_v23  ;;  %1185 = vmatpush.msrb.mxu1 %v8579_v24 }
 0x167   : > { %8796 = vrot.lane.b32.xlu0 %v9655_v0, %s13221_s30  ;;  %8776 = vrot.lane.b32.xlu2 %v9653_v56, %s13213_s23  ;;  %s13329_s23 = smov 126  }
 0x168   : > { %1156 = vmatpush.msrb.mxu0 %v1123_v6  ;;  %1380 = vmatpush.msra.mxu1 %v8594_v26  ;;  %v8612_v32 = vpop.permute.xlu1 %8611 }
 0x169   : > { %8821 = vrot.lane.b32.xlu1 %v9663_v1, %s13223_s16  ;;  %v8587_v33 = vpop.permute.xlu0 %8586  ;;  %v8602_v38 = vpop.permute.xlu2 %8601  ;;  %v8613_v42 = vunpack.i.l.bf16 %v8612_v32  ;;  %v8614_v48 = vunpack.i.h.bf16 %v8612_v32 }
 0x16a   : > { %1351 = vmatpush.msra.mxu0 %v1320_v31  ;;  %v8589_v34 = vunpack.i.h.bf16 %v8587_v33  ;;  %v8588_v35 = vunpack.i.l.bf16 %v8587_v33  ;;  %1381 = vmatpush.msra.mxu1 %v8599_v29  ;;  %v8603_v47 = vunpack.i.l.bf16 %v8602_v38  ;;  %v8604_v51 = vunpack.i.h.bf16 %v8602_v38  ;;  %v7834_v38 = vld [vmem:[%s13180_s5 + $0xa8] sm:$0xff] }
 0x16c   : > { %1352 = vmatpush.msra.mxu0 %v1319_v36  ;;  %1283 = vmatpush.msrb.mxu3 %v8589_v34  ;;  %v1221_v39 = vsel %vm1220_vm4, %v8588_v35, %v8589_v34  ;;  %v1423_v53 = vsel %vm1422_vm7, %v8614_v48, %v8603_v47  ;;  %v1424_v54 = vsel %vm1422_vm7, %v8603_v47, %v8604_v51  ;;  %v7821_v34 = vld [vmem:[%s13180_s5 + $0x80] sm:$0xff]  ;;  %v7822_v51 = vld [vmem:[%s13180_s5 + $0x88] sm:$0xff] }
 0x16d   : > { %7788 = vmatmul.msk.f32.gmra.mxu1 %vm968_vm2, %v7780_v37  ;;  %1254 = vmatpush.msrb.mxu2 %v1221_v39  ;;  %v3517_v47 = vld [vmem:[%s13182_s7] sm:$0xff] }
 0x16e   : > { %7817 = vmatmul.msk.f32.vlgmr.msrb.gmra.mxu3 %vm968_vm2, %v7809_v11  ;;  %7784 = vmatmul.msk.f32.gmra.mxu0 %vm968_vm2, %v7780_v37 }
 0x16f   : > { %7813 = vmatmul.msk.f32.vlgmr.msrb.gmra.mxu2 %vm968_vm2, %v7809_v11  ;;  %8816 = vrot.lane.b32.xlu0 %v9655_v0, %s13223_s16 }
 0x170   : > { %8781 = vrot.lane.b32.xlu2 %v9653_v56, %s13225_s24  ;;  %v8622_v41 = vpop.permute.xlu1 %8621  ;;  %s13346_s24 = smov 56  }
 0x171   : > { %8831 = vrot.lane.b32.xlu1 %v9663_v1, %s13227_s20  ;;  %v8607_v40 = vpop.permute.xlu0 %8606  ;;  %v8627_v52 = vpop.permute.xlu2 %8626  ;;  %v8623_v57 = vunpack.i.l.bf16 %v8622_v41  ;;  %v8624_v3 = vunpack.i.h.bf16 %v8622_v41 }
 0x172   : > { %v8609_v43 = vunpack.i.h.bf16 %v8607_v40  ;;  %v8608_v44 = vunpack.i.l.bf16 %v8607_v40  ;;  %v8628_v2 = vunpack.i.l.bf16 %v8627_v52  ;;  %v8629_v8 = vunpack.i.h.bf16 %v8627_v52 }
 0x174   : > { %v1425_v49 = vsel %vm1422_vm7, %v8608_v44, %v8609_v43  ;;  %v1426_v50 = vsel %vm1422_vm7, %v8609_v43, %v8613_v42  ;;  %v1527_v10 = vsel %vm1526_vm8, %v8624_v3, %v8628_v2  ;;  %v1528_v12 = vsel %vm1526_vm8, %v8628_v2, %v8629_v8  ;;  %v3520_v2 = vld [vmem:[%s13182_s7 + $0x18] sm:$0xff] }
 0x175   : > { %7805 = vmatmul.msk.f32.vlgmr.msrb.gmra.mxu1 %vm968_vm2, %v7797_v45  ;;  %1457 = vmatpush.msra.mxu2 %v1425_v49  ;;  %v7824_v8 = vld [vmem:[%s13180_s5 + $0x98] sm:$0xff] }
 0x176   : > { %7818 = vmatmul.msk.f32.gmra.mxu3 %vm968_vm2, %v7810_v46  ;;  %7801 = vmatmul.msk.f32.vlgmr.msrb.gmra.mxu0 %vm968_vm2, %v7797_v45 }
 0x177   : > { %1486 = vmatpush.msra.mxu3 %v1426_v50  ;;  %7814 = vmatmul.msk.f32.gmra.mxu2 %vm968_vm2, %v7810_v46 }
 0x178   : > { %8826 = vrot.lane.b32.xlu0 %v9655_v0, %s13227_s20  ;;  %8806 = vrot.lane.b32.xlu2 %v9653_v56, %s13221_s30  ;;  %v8642_v62 = vpop.permute.xlu1 %8641  ;;  %s13229_s30 = smov 54  }
 0x179   : > { %8851 = vrot.lane.b32.xlu1 %v9663_v1, %s13231_s22  ;;  %1458 = vmatpush.msra.mxu2 %v1423_v53  ;;  %v8617_v55 = vpop.permute.xlu0 %8616  ;;  %v8632_v9 = vpop.permute.xlu2 %8631  ;;  %v8643_v14 = vunpack.i.l.bf16 %v8642_v62  ;;  %v8644_v21 = vunpack.i.h.bf16 %v8642_v62  ;;  %v3518_v62 = vld [vmem:[%s13182_s7 + $0x8] sm:$0xff] }
 0x17a   : > { %1487 = vmatpush.msra.mxu3 %v1424_v54  ;;  %v8619_v58 = vunpack.i.h.bf16 %v8617_v55  ;;  %v8618_v60 = vunpack.i.l.bf16 %v8617_v55  ;;  %v8634_v19 = vunpack.i.h.bf16 %v8632_v9  ;;  %v8633_v20 = vunpack.i.l.bf16 %v8632_v9  ;;  %v3485_v54 = vld [vmem:[%s13181_s6] sm:$0xff] }
 0x17b   : > { %v7857_v9 = vld [vmem:[%s13180_s5 + $0xe0] sm:$0xff] }
 0x17c   : > { %v1529_v4 = vsel %vm1526_vm8, %v8618_v60, %v8619_v58  ;;  %v1530_v7 = vsel %vm1526_vm8, %v8619_v58, %v8623_v57  ;;  %v1631_v24 = vsel %vm1630_vm9, %v8644_v21, %v8633_v20  ;;  %v1632_v25 = vsel %vm1630_vm9, %v8633_v20, %v8634_v19  ;;  %v3487_v57 = vld [vmem:[%s13181_s6 + $0x10] sm:$0xff]  ;;  %v7845_v19 = vld [vmem:[%s13180_s5 + $0xc0] sm:$0xff] }
 0x17d   : > { %7806 = vmatmul.msk.f32.gmra.mxu1 %vm968_vm2, %v7798_v61  ;;  %1561 = vmatpush.msrb.mxu0 %v1529_v4  ;;  %v7823_v60 = vld [vmem:[%s13180_s5 + $0x90] sm:$0xff] }
 0x17e   : > { %7819 = vmatmul.msk.f32.gmra.mxu3 %vm968_vm2, %v7811_v63  ;;  %1590 = vmatpush.msrb.mxu1 %v1530_v7 }
 0x17f   : > { %7802 = vmatmul.msk.f32.gmra.mxu0 %vm968_vm2, %v7798_v61  ;;  %7815 = vmatmul.msk.f32.gmra.mxu2 %vm968_vm2, %v7811_v63  ;;  %v7836_v61 = vld [vmem:[%s13180_s5 + $0xb8] sm:$0xff] }
 0x180   : > { %8846 = vrot.lane.b32.xlu0 %v9655_v0, %s13231_s22  ;;  %8811 = vrot.lane.b32.xlu2 %v9653_v56, %s13223_s16  ;;  %v9859_v22 = vpop.permute.xlu1 %8651  ;;  %s13233_s16 = smov 53  }
 0x181   : > { %8861 = vrot.lane.b32.xlu1 %v9663_v1, %s13229_s30  ;;  %1562 = vmatpush.msrb.mxu0 %v1527_v10  ;;  %v8637_v13 = vpop.permute.xlu0 %8636  ;;  %v9867_v23 = vpop.permute.xlu2 %8656  ;;  %v8653_v35 = vunpack.i.l.bf16 %v9859_v22  ;;  %v8654_v45 = vunpack.i.h.bf16 %v9859_v22  ;;  %v7858_v22 = vld [vmem:[%s13180_s5 + $0xe8] sm:$0xff] }
 0x182   : > { %1591 = vmatpush.msrb.mxu1 %v1528_v12  ;;  %v8639_v15 = vunpack.i.h.bf16 %v8637_v13  ;;  %v8638_v16 = vunpack.i.l.bf16 %v8637_v13  ;;  %v8659_v39 = vunpack.i.h.bf16 %v9867_v23  ;;  %v8658_v40 = vunpack.i.l.bf16 %v9867_v23 }
 0x184   : > { %v1633_v17 = vsel %vm1630_vm9, %v8638_v16, %v8639_v15  ;;  %v1634_v18 = vsel %vm1630_vm9, %v8639_v15, %v8643_v14  ;;  %v1736_v48 = vsel %vm1734_vm11, %v8658_v40, %v8659_v39  ;;  %v1735_v52 = vsel %vm1734_vm11, %v8654_v45, %v8658_v40  ;;  %v3488_v16 = vld [vmem:[%s13181_s6 + $0x18] sm:$0xff]  ;;  %v7881_v40 = vld [vmem:[%s13180_s5 + $0x120] sm:$0xff] }
 0x185   : > { %7807 = vmatmul.msk.f32.gmra.mxu1 %vm968_vm2, %v7799_v59  ;;  %1665 = vmatpush.msrb.mxu2 %v1633_v17  ;;  %v7848_v39 = vld [vmem:[%s13180_s5 + $0xd8] sm:$0xff] }
 0x186   : > { %7820 = vmatmul.msk.f32.gmra.mxu3 %vm968_vm2, %v7812_v5 }
 0x187   : > { %1694 = vmatpush.msrb.mxu3 %v1634_v18  ;;  %7803 = vmatmul.msk.f32.gmra.mxu0 %vm968_vm2, %v7799_v59 }
 0x188   : > { %7816 = vmatmul.msk.f32.gmra.mxu2 %vm968_vm2, %v7812_v5  ;;  %8856 = vrot.lane.b32.xlu0 %v9655_v0, %s13229_s30  ;;  %v8672_v29 = vpop.permute.xlu1 %8671 }
 0x189   : > { %8836 = vrot.lane.b32.xlu2 %v9653_v56, %s13227_s20  ;;  %8881 = vrot.lane.b32.xlu1 %v9663_v1, %s13233_s16  ;;  %v8647_v26 = vpop.permute.xlu0 %8646  ;;  %v8673_v31 = vunpack.i.l.bf16 %v8672_v29  ;;  %v8662_v37 = vpop.permute.xlu2 %8661  ;;  %v8674_v44 = vunpack.i.h.bf16 %v8672_v29  ;;  %s13266_s20 = smov 52  }
 0x18a   : > { %1666 = vmatpush.msrb.mxu2 %v1631_v24  ;;  %1695 = vmatpush.msrb.mxu3 %v1632_v25  ;;  %v8649_v30 = vunpack.i.h.bf16 %v8647_v26  ;;  %v8648_v36 = vunpack.i.l.bf16 %v8647_v26  ;;  %v8664_v42 = vunpack.i.h.bf16 %v8662_v37  ;;  %v8663_v43 = vunpack.i.l.bf16 %v8662_v37 }
 0x18c   : > { %v1738_v41 = vsel %vm1734_vm11, %v8649_v30, %v8653_v35  ;;  %v1737_v46 = vsel %vm1734_vm11, %v8648_v36, %v8649_v30  ;;  %v1839_v49 = vsel %vm1838_vm10, %v8674_v44, %v8663_v43  ;;  %v1840_v50 = vsel %vm1838_vm10, %v8663_v43, %v8664_v42  ;;  %v7846_v30 = vld [vmem:[%s13180_s5 + $0xc8] sm:$0xff]  ;;  %v7860_v35 = vld [vmem:[%s13180_s5 + $0xf8] sm:$0xff] }
 0x18d   : > { %7808 = vmatmul.msk.f32.gmra.mxu1 %vm968_vm2, %v7800_v27 }
 0x18e   : > { %7841 = vmatmul.msk.f32.vlgmr.msra.gmra.mxu3 %vm968_vm2, %v7833_v28 }
 0x18f   : > { %7804 = vmatmul.msk.f32.gmra.mxu0 %vm968_vm2, %v7800_v27 }
 0x190   : > { %7837 = vmatmul.msk.f32.vlgmr.msra.gmra.mxu2 %vm968_vm2, %v7833_v28  ;;  %8876 = vrot.lane.b32.xlu0 %v9655_v0, %s13233_s16  ;;  %v9933_v55 = vpop.permute.xlu1 %8681 }
 0x191   : > { %8841 = vrot.lane.b32.xlu2 %v9653_v56, %s13231_s22  ;;  %8891 = vrot.lane.b32.xlu1 %v9663_v1, %s13235_s15  ;;  %v8667_v6 = vpop.permute.xlu0 %8666  ;;  %v9939_v58 = vpop.permute.xlu2 %8686  ;;  %v8683_v20 = vunpack.i.l.bf16 %v9933_v55  ;;  %v8684_v25 = vunpack.i.h.bf16 %v9933_v55  ;;  %s13328_s22 = smov 110  }
 0x192   : > { %v8669_v32 = vunpack.i.h.bf16 %v8667_v6  ;;  %v8668_v33 = vunpack.i.l.bf16 %v8667_v6  ;;  %v8689_v23 = vunpack.i.h.bf16 %v9939_v58  ;;  %v8688_v24 = vunpack.i.l.bf16 %v9939_v58  ;;  %v7859_v6 = vld [vmem:[%s13180_s5 + $0xf0] sm:$0xff] }
 0x194   : > { %v1841_v1 = vsel %vm1838_vm10, %v8668_v33, %v8669_v32  ;;  %v1842_v11 = vsel %vm1838_vm10, %v8669_v32, %v8673_v31  ;;  %v1944_v28 = vsel %vm1942_vm13, %v8688_v24, %v8689_v23  ;;  %v1943_v29 = vsel %vm1942_vm13, %v8684_v25, %v8688_v24  ;;  %v7872_v25 = vld [vmem:[%s13180_s5 + $0x118] sm:$0xff] }
 0x195   : > { %7829 = vmatmul.msk.f32.vlgmr.msra.gmra.mxu1 %vm968_vm2, %v7821_v34  ;;  %1873 = vmatpush.msra.mxu2 %v1841_v1  ;;  %v10019_v1 = vpop.f32.mrf.mxu3 }
 0x196   : > { %7842 = vmatmul.msk.f32.gmra.mxu3 %vm968_vm2, %v7834_v38  ;;  %1798 = vmatpush.msra.mxu1 %v1738_v41 }
 0x197   : > { %1902 = vmatpush.msra.mxu3 %v1842_v11  ;;  %7825 = vmatmul.msk.f32.vlgmr.msra.gmra.mxu0 %vm968_vm2, %v7821_v34  ;;  %v7847_v34 = vld [vmem:[%s13180_s5 + $0xd0] sm:$0xff] }
 0x198   : > { %7838 = vmatmul.msk.f32.gmra.mxu2 %vm968_vm2, %v7834_v38  ;;  %1769 = vmatpush.msra.mxu0 %v1737_v46  ;;  %v8702_v3 = vpop.permute.xlu1 %8701 }
 0x199   : > { %8886 = vrot.lane.b32.xlu0 %v9655_v0, %s13235_s15  ;;  %8866 = vrot.lane.b32.xlu2 %v9653_v56, %s13229_s30  ;;  %v7835_v0 = vld [vmem:[%s13180_s5 + $0xb0] sm:$0xff]  ;;  %v9926_v53 = vpop.permute.xlu0 %8676  ;;  %v8692_v4 = vpop.permute.xlu2 %8691  ;;  %v8703_v10 = vunpack.i.l.bf16 %v8702_v3  ;;  %v8704_v15 = vunpack.i.h.bf16 %v8702_v3  ;;  %s13334_s15 = smov 107   ;;  %s13336_s30 = smov 92  }
 0x19a   : > { %3523 = vperm.xlu1 %8559, %v3517_v47   ;;  %1799 = vmatpush.msra.mxu1 %v1736_v48  ;;  %v8694_v13 = vunpack.i.h.bf16 %v8692_v4  ;;  %v8693_v14 = vunpack.i.l.bf16 %v8692_v4  ;;  %v8679_v5 = vunpack.i.h.bf16 %v9926_v53  ;;  %v8678_v21 = vunpack.i.l.bf16 %v9926_v53  ;;  %v10030_v47 = vpop.f32.mrf.mxu2 }
 0x19b   : > { %1874 = vmatpush.msra.mxu2 %v1839_v49  ;;  %1903 = vmatpush.msra.mxu3 %v1840_v50 }
 0x19c   : > { %1770 = vmatpush.msra.mxu0 %v1735_v52  ;;  %v2048_v17 = vsel %vm2046_vm12, %v8693_v14, %v8694_v13  ;;  %v2047_v18 = vsel %vm2046_vm12, %v8704_v15, %v8693_v14  ;;  %v1946_v26 = vsel %vm1942_vm13, %v8679_v5, %v8683_v20  ;;  %v1945_v27 = vsel %vm1942_vm13, %v8678_v21, %v8679_v5  ;;  %v7871_v5 = vld [vmem:[%s13180_s5 + $0x110] sm:$0xff] }
 0x19d   : > { %7830 = vmatmul.msk.f32.gmra.mxu1 %vm968_vm2, %v7822_v51  ;;  %v10047_v58 = vpop.f32.mrf.mxu3 }
 0x19e   : > { %7843 = vmatmul.msk.f32.gmra.mxu3 %vm968_vm2, %v7835_v0 }
 0x19f   : > { %7826 = vmatmul.msk.f32.gmra.mxu0 %vm968_vm2, %v7822_v51 }
 0x1a0   : > { %7839 = vmatmul.msk.f32.gmra.mxu2 %vm968_vm2, %v7835_v0  ;;  %v8712_v32 = vpop.permute.xlu1 %8711  ;;  %v7869_v0 = vld [vmem:[%s13180_s5 + $0x100] sm:$0xff] }
 0x1a1   : > { %3491 = vperm.xlu0 %8558, %v3485_v54   ;;  %8871 = vrot.lane.b32.xlu2 %v9653_v56, %s13233_s16  ;;  %v8697_v63 = vpop.permute.xlu0 %8696  ;;  %v8717_v33 = vpop.permute.xlu2 %8716  ;;  %v8713_v53 = vunpack.i.l.bf16 %v8712_v32  ;;  %s13330_s16 = smov 125  }
 0x1a2   : > { %3501 = vperm.xlu1 %8559, %v3487_v57   ;;  %v8699_v7 = vunpack.i.h.bf16 %v8697_v63  ;;  %v8698_v12 = vunpack.i.l.bf16 %v8697_v63  ;;  %v7882_v57 = vld [vmem:[%s13180_s5 + $0x128] sm:$0xff]  ;;  %v10056_v4 = vpop.f32.mrf.mxu2 }
 0x1a4   : > { %v2049_v59 = vsel %vm2046_vm12, %v8698_v12, %v8699_v7  ;;  %v7883_v12 = vld [vmem:[%s13180_s5 + $0x130] sm:$0xff] }
 0x1a5   : > { %7831 = vmatmul.msk.f32.gmra.mxu1 %vm968_vm2, %v7823_v60  ;;  %v10072_v14 = vpop.f32.mrf.mxu3 }
 0x1a6   : > { %7844 = vmatmul.msk.f32.gmra.mxu3 %vm968_vm2, %v7836_v61 }
 0x1a7   : > { %7827 = vmatmul.msk.f32.gmra.mxu0 %vm968_vm2, %v7823_v60  ;;  %v8719_v60 = vunpack.i.h.bf16 %v8717_v33 }
 0x1a8   : > { %7840 = vmatmul.msk.f32.gmra.mxu2 %vm968_vm2, %v7836_v61  ;;  %v8732_v37 = vpop.permute.xlu1 %8731  ;;  %v8718_v61 = vunpack.i.l.bf16 %v8717_v33 }
 0x1a9   : > { %3528 = vperm.xlu0 %8558, %v3518_v62   ;;  %8896 = vrot.lane.b32.xlu2 %v9653_v56, %s13266_s20  ;;  %v2050_v56 = vsel %vm2046_vm12, %v8699_v7, %v8703_v10  ;;  %v8707_v31 = vpop.permute.xlu0 %8706  ;;  %v8722_v38 = vpop.permute.xlu2 %8721  ;;  %v8733_v43 = vunpack.i.l.bf16 %v8732_v37  ;;  %v8734_v45 = vunpack.i.h.bf16 %v8732_v37  ;;  %v8714_v62 = vunpack.i.h.bf16 %v8712_v32 }
 0x1aa   : > { %3538 = vperm.xlu1 %8559, %v3520_v2   ;;  %v8724_v41 = vunpack.i.h.bf16 %v8722_v38  ;;  %v8723_v42 = vunpack.i.l.bf16 %v8722_v38  ;;  %v8709_v50 = vunpack.i.h.bf16 %v8707_v31  ;;  %v8708_v54 = vunpack.i.l.bf16 %v8707_v31 }
 0x1ab   : > { %v2152_v3 = vsel %vm13237_vm15, %v8718_v61, %v8719_v60  ;;  %v2151_v7 = vsel %vm13237_vm15, %v8714_v62, %v8718_v61  ;;  %v7907_v60 = vld [vmem:[%s13180_s5 + $0x170] sm:$0xff] }
 0x1ac   : > { %v2256_v49 = vsel %vm13240_vm14, %v8723_v42, %v8724_v41  ;;  %v2255_v51 = vsel %vm13240_vm14, %v8734_v45, %v8723_v42  ;;  %v2154_v63 = vsel %vm13237_vm15, %v8709_v50, %v8713_v53  ;;  %v2153_v2 = vsel %vm13237_vm15, %v8708_v54, %v8709_v50  ;;  %v7906_v42 = vld [vmem:[%s13180_s5 + $0x168] sm:$0xff] }
 0x1ad   : > { %7832 = vmatmul.msk.f32.gmra.mxu1 %vm968_vm2, %v7824_v8  ;;  %v10096_v20 = vpop.f32.mrf.mxu3  ;;  %vm13238_vm15 = vcmask 605184  }
 0x1ae   : > { %7865 = vmatmul.msk.f32.vlgmr.msrb.gmra.mxu3 %vm968_vm2, %v7857_v9 }
 0x1af   : > { %2110 = vmatpush.msrb.mxu3 %v2050_v56  ;;  %7828 = vmatmul.msk.f32.gmra.mxu0 %vm968_vm2, %v7824_v8 }
 0x1b0   : > { %7861 = vmatmul.msk.f32.vlgmr.msrb.gmra.mxu2 %vm968_vm2, %v7857_v9  ;;  %v7870_v9 = vld [vmem:[%s13180_s5 + $0x108] sm:$0xff]  ;;  %v10077_v56 = vpop.permute.xlu1 %8741 }
 0x1b1   : > { %2081 = vmatpush.msrb.mxu2 %v2049_v59  ;;  %3506 = vperm.xlu0 %8558, %v3488_v16   ;;  %v8727_v36 = vpop.permute.xlu0 %8726  ;;  %v10075_v15 = vpop.permute.xlu2 %8746 }
 0x1b2   : > { %2111 = vmatpush.msrb.mxu3 %v2048_v17  ;;  %v8729_v11 = vunpack.i.h.bf16 %v8727_v36  ;;  %v8728_v44 = vunpack.i.l.bf16 %v8727_v36  ;;  %v10083_v59 = vpop.f32.mrf.mxu2  ;;  %v7884_v17 = vld [vmem:[%s13180_s5 + $0x138] sm:$0xff] }
 0x1b3   : > { %2082 = vmatpush.msrb.mxu2 %v2047_v18 }
 0x1b4   : > { %v2258_v46 = vsel %vm13240_vm14, %v8729_v11, %v8733_v43  ;;  %v2257_v48 = vsel %vm13240_vm14, %v8728_v44, %v8729_v11  ;;  %v8749_v43 = vunpack.i.h.bf16 %v10075_v15  ;;  %v8748_v44 = vunpack.i.l.bf16 %v10075_v15 }
 0x1b5   : > { %7853 = vmatmul.msk.f32.vlgmr.msrb.gmra.mxu1 %vm968_vm2, %v7845_v19  ;;  %vm13241_vm14 = vcmask 596992  }
 0x1b6   : > { %7866 = vmatmul.msk.f32.gmra.mxu3 %vm968_vm2, %v7858_v22  ;;  %2006 = vmatpush.msrb.mxu1 %v1946_v26  ;;  %v7905_v26 = vld [vmem:[%s13180_s5 + $0x160] sm:$0xff] }
 0x1b7   : > { %7849 = vmatmul.msk.f32.vlgmr.msrb.gmra.mxu0 %vm968_vm2, %v7845_v19 }
 0x1b8   : > { %7862 = vmatmul.msk.f32.gmra.mxu2 %vm968_vm2, %v7858_v22  ;;  %1977 = vmatpush.msrb.mxu0 %v1945_v27  ;;  %v8762_v22 = vpop.permute.xlu1 %8761 }
 0x1b9   : > { %2007 = vmatpush.msrb.mxu1 %v1944_v28  ;;  %v10069_v13 = vpop.permute.xlu0 %8736  ;;  %v8752_v21 = vpop.permute.xlu2 %8751  ;;  %v8764_v32 = vunpack.i.h.bf16 %v8762_v22 }
 0x1ba   : > { %1978 = vmatpush.msrb.mxu0 %v1943_v29  ;;  %v8754_v27 = vunpack.i.h.bf16 %v8752_v21  ;;  %v8753_v28 = vunpack.i.l.bf16 %v8752_v21  ;;  %v8763_v29 = vunpack.i.l.bf16 %v8762_v22  ;;  %v10109_v31 = vpop.f32.mrf.mxu2  ;;  %v8739_v36 = vunpack.i.h.bf16 %v10069_v13 }
 0x1bb   : > { %v8738_v41 = vunpack.i.l.bf16 %v10069_v13  ;;  %v7908_v13 = vld [vmem:[%s13180_s5 + $0x178] sm:$0xff] }
 0x1bc   : > { %v2463_v38 = vsel %vm13238_vm15, %v8764_v32, %v8753_v28 }
 0x1bd   : > { %7854 = vmatmul.msk.f32.gmra.mxu1 %vm968_vm2, %v7846_v30 }
 0x1be   : > { %7867 = vmatmul.msk.f32.gmra.mxu3 %vm968_vm2, %v7859_v6 }
 0x1bf   : > { %7850 = vmatmul.msk.f32.gmra.mxu0 %vm968_vm2, %v7846_v30 }
 0x1c0   : > { %7863 = vmatmul.msk.f32.gmra.mxu2 %vm968_vm2, %v7859_v6 }
 0x1c1   : > { %v8757_v19 = vpop.permute.xlu0 %8756 }
 0x1c2   : > { %v8759_v23 = vunpack.i.h.bf16 %v8757_v19  ;;  %v8758_v30 = vunpack.i.l.bf16 %v8757_v19 }
 0x1c4   : > { %v2466_v33 = vsel %vm13238_vm15, %v8759_v23, %v8763_v29 }
 0x1c5   : > { %7855 = vmatmul.msk.f32.gmra.mxu1 %vm968_vm2, %v7847_v34 }
 0x1c6   : > { %7868 = vmatmul.msk.f32.gmra.mxu3 %vm968_vm2, %v7860_v35 }
 0x1c7   : > { %7851 = vmatmul.msk.f32.gmra.mxu0 %vm968_vm2, %v7847_v34  ;;  %v2465_v34 = vsel %vm13238_vm15, %v8758_v30, %v8759_v23  ;;  %v7929_v30 = vld [vmem:[%s13180_s5 + $0x1a0] sm:$0xff] }
 0x1c8   : > { %7864 = vmatmul.msk.f32.gmra.mxu2 %vm968_vm2, %v7860_v35  ;;  %v2464_v35 = vsel %vm13238_vm15, %v8753_v28, %v8754_v27  ;;  %vm13239_vm15 = vcmask 719872  }
 0x1c9   : > { %v2361_v50 = vsel %vm13239_vm15, %v8738_v41, %v8739_v36 }
 0x1cd   : > { %7856 = vmatmul.msk.f32.gmra.mxu1 %vm968_vm2, %v7848_v39 }
 0x1ce   : > { %7889 = vmatmul.msk.f32.vlgmr.msra.gmra.mxu3 %vm968_vm2, %v7881_v40 }
 0x1cf   : > { %2318 = vmatpush.msra.mxu3 %v2258_v46  ;;  %7852 = vmatmul.msk.f32.gmra.mxu0 %vm968_vm2, %v7848_v39  ;;  %v7893_v39 = vld [vmem:[%s13180_s5 + $0x140] sm:$0xff] }
 0x1d0   : > { %7885 = vmatmul.msk.f32.vlgmr.msra.gmra.mxu2 %vm968_vm2, %v7881_v40  ;;  %v8743_v40 = vunpack.i.l.bf16 %v10077_v56 }
 0x1d1   : > { %2289 = vmatpush.msra.mxu2 %v2257_v48  ;;  %2319 = vmatpush.msra.mxu3 %v2256_v49  ;;  %v8744_v48 = vunpack.i.h.bf16 %v10077_v56 }
 0x1d2   : > { %v10037_v52 = vpop.f32.mrf.mxu1  ;;  %v2362_v49 = vsel %vm13239_vm15, %v8739_v36, %v8743_v40 }
 0x1d3   : > { %2290 = vmatpush.msra.mxu2 %v2255_v51  ;;  %v10042_v55 = vpop.f32.mrf.mxu0  ;;  %v2360_v51 = vsel %vm13239_vm15, %v8748_v44, %v8749_v43  ;;  %v1098_v27 = vadd.f32 %v10019_v1, %v10037_v52 }
 0x1d5   : > { %7877 = vmatmul.msk.f32.vlgmr.msra.gmra.mxu1 %vm968_vm2, %v7869_v0 }
 0x1d6   : > { %7890 = vmatmul.msk.f32.gmra.mxu3 %vm968_vm2, %v7882_v57  ;;  %2214 = vmatpush.msra.mxu1 %v2154_v63  ;;  %v10161_v63 = vpop.permute.xlu0 %8766 }
 0x1d7   : > { %7873 = vmatmul.msk.f32.vlgmr.msra.gmra.mxu0 %vm968_vm2, %v7869_v0  ;;  %v2359_v0 = vsel %vm13239_vm15, %v8744_v48, %v8748_v44  ;;  %vm2670_vm15 = vcmask 588800   ;;  %v7917_v48 = vld [vmem:[%s13180_s5 + $0x180] sm:$0xff] }
 0x1d8   : > { %7886 = vmatmul.msk.f32.gmra.mxu2 %vm968_vm2, %v7882_v57  ;;  %2185 = vmatpush.msra.mxu0 %v2153_v2  ;;  %v7894_v57 = vld [vmem:[%s13180_s5 + $0x148] sm:$0xff]  ;;  %v10164_v2 = vpop.permute.xlu1 %8771 }
 0x1d9   : > { %2215 = vmatpush.msra.mxu1 %v2152_v3  ;;  %v10167_v3 = vpop.permute.xlu2 %8776  ;;  %v8773_v43 = vunpack.i.l.bf16 %v10164_v2 }
 0x1da   : > { %2186 = vmatpush.msra.mxu0 %v2151_v7  ;;  %v10059_v8 = vpop.f32.mrf.mxu1 }
 0x1db   : > { %v10064_v10 = vpop.f32.mrf.mxu0 }
 0x1dd   : > { %7878 = vmatmul.msk.f32.gmra.mxu1 %vm968_vm2, %v7870_v9 }
 0x1de   : > { %7891 = vmatmul.msk.f32.gmra.mxu3 %vm968_vm2, %v7883_v12 }
 0x1df   : > { %7874 = vmatmul.msk.f32.gmra.mxu0 %vm968_vm2, %v7870_v9 }
 0x1e0   : > { %7887 = vmatmul.msk.f32.gmra.mxu2 %vm968_vm2, %v7883_v12  ;;  %v7895_v12 = vld [vmem:[%s13180_s5 + $0x150] sm:$0xff] }
 0x1e1   : > { %v8782_v19 = vpop.permute.xlu2 %8781 }
 0x1e2   : > { %v10081_v16 = vpop.f32.mrf.mxu1 }
 0x1e3   : > { %v10091_v18 = vpop.f32.mrf.mxu0 }
 0x1e5   : > { %7879 = vmatmul.msk.f32.gmra.mxu1 %vm968_vm2, %v7871_v5 }
 0x1e6   : > { %7892 = vmatmul.msk.f32.gmra.mxu3 %vm968_vm2, %v7884_v17 }
 0x1e7   : > { %7875 = vmatmul.msk.f32.gmra.mxu0 %vm968_vm2, %v7871_v5  ;;  %v8787_v5 = vpop.permute.xlu0 %8786 }
 0x1e8   : > { %7888 = vmatmul.msk.f32.gmra.mxu2 %vm968_vm2, %v7884_v17  ;;  %v8792_v17 = vpop.permute.xlu1 %8791  ;;  %v8789_v23 = vunpack.i.h.bf16 %v8787_v5 }
 0x1e9   : > { %v8793_v32 = vunpack.i.l.bf16 %v8792_v17 }
 0x1ea   : > { %v10099_v24 = vpop.f32.mrf.mxu1 }
 0x1eb   : > { %v10107_v6 = vpop.f32.mrf.mxu0  ;;  %v1107_v21 = vadd.f32 %v10096_v20, %v10099_v24  ;;  %v8784_v20 = vunpack.i.h.bf16 %v8782_v19  ;;  %v8783_v24 = vunpack.i.l.bf16 %v8782_v19 }
 0x1ec   : > { %v1078_v28 = vadd.f32 %v10109_v31, %v10107_v6  ;;  %v8794_v31 = vunpack.i.h.bf16 %v8792_v17 }
 0x1ed   : > { %7880 = vmatmul.msk.f32.gmra.mxu1 %vm968_vm2, %v7872_v25 }
 0x1ee   : > { %7913 = vmatmul.msk.f32.vlgmr.msrb.gmra.mxu3 %vm968_vm2, %v7905_v26  ;;  %v2671_v44 = vsel %vm2670_vm15, %v8794_v31, %v8783_v24 }
 0x1ef   : > { %2526 = vmatpush.msrb.mxu3 %v2466_v33  ;;  %7876 = vmatmul.msk.f32.gmra.mxu0 %vm968_vm2, %v7872_v25  ;;  %v8788_v33 = vunpack.i.l.bf16 %v8787_v5 }
 0x1f0   : > { %7909 = vmatmul.msk.f32.vlgmr.msrb.gmra.mxu2 %vm968_vm2, %v7905_v26  ;;  %v7896_v26 = vld [vmem:[%s13180_s5 + $0x158] sm:$0xff] }
 0x1f1   : > { %2497 = vmatpush.msrb.mxu2 %v2465_v34  ;;  %2527 = vmatpush.msrb.mxu3 %v2464_v35  ;;  %v10119_v37 = vpop.f32.mrf.mxu3  ;;  %v1069_v35 = vadd.f32 %v10030_v47, %v10042_v55  ;;  %v8769_v47 = vunpack.i.h.bf16 %v10161_v63  ;;  %v2673_v55 = vsel %vm2670_vm15, %v8788_v33, %v8789_v23 }
 0x1f2   : > { %v10122_v11 = vpop.f32.mrf.mxu1  ;;  %v10136_v46 = vpop.f32.mrf.mxu2 }
 0x1f3   : > { %2498 = vmatpush.msrb.mxu2 %v2463_v38  ;;  %v10134_v45 = vpop.f32.mrf.mxu0  ;;  %v1200_v36 = vadd.f32 %v10122_v11, %v1098_v27  ;;  %v2674_v38 = vsel %vm2670_vm15, %v8789_v23, %v8793_v32  ;;  %v2672_v11 = vsel %vm2670_vm15, %v8783_v24, %v8784_v20  ;;  %v1104_v23 = vadd.f32 %v10072_v14, %v10081_v16  ;;  %v10267_v14 = vpop.permute.xlu2 %8806 }
 0x1f4   : > { %v10270_v16 = vpop.permute.xlu1 %8801 }
 0x1f5   : > { %7901 = vmatmul.msk.f32.vlgmr.msrb.gmra.mxu1 %vm968_vm2, %v7893_v39  ;;  %v1298_v41 = vadd.f32 %v10119_v37, %v1200_v36 }
 0x1f6   : > { %7914 = vmatmul.msk.f32.gmra.mxu3 %vm968_vm2, %v7906_v42  ;;  %2422 = vmatpush.msrb.mxu1 %v2362_v49  ;;  %v8768_v49 = vunpack.i.l.bf16 %v10161_v63  ;;  %v2570_v63 = vsel %vm13241_vm14, %v8769_v47, %v8773_v43 }
 0x1f7   : > { %7897 = vmatmul.msk.f32.vlgmr.msrb.gmra.mxu0 %vm968_vm2, %v7893_v39  ;;  %v1199_v39 = vadd.f32 %v10134_v45, %v1069_v35 }
 0x1f8   : > { %7910 = vmatmul.msk.f32.gmra.mxu2 %vm968_vm2, %v7906_v42  ;;  %2393 = vmatpush.msrb.mxu0 %v2361_v50  ;;  %v1101_v50 = vadd.f32 %v10047_v58, %v10059_v8  ;;  %v1072_v58 = vadd.f32 %v10056_v4, %v10064_v10  ;;  %v2569_v19 = vsel %vm13241_vm14, %v8768_v49, %v8769_v47 }
 0x1f9   : > { %2423 = vmatpush.msrb.mxu1 %v2360_v51  ;;  %v10147_v53 = vpop.f32.mrf.mxu3  ;;  %v1297_v37 = vadd.f32 %v10136_v46, %v1199_v39 }
 0x1fa   : > { %2394 = vmatpush.msrb.mxu0 %v2359_v0  ;;  %v10149_v54 = vpop.f32.mrf.mxu1  ;;  %v10159_v62 = vpop.f32.mrf.mxu2  ;;  %v7930_v0 = vld [vmem:[%s13180_s5 + $0x1a8] sm:$0xff] }
 0x1fb   : > { %v1202_v8 = vadd.f32 %v10149_v54, %v1101_v50 }
 0x1fc   : > { %v10157_v61 = vpop.f32.mrf.mxu0  ;;  %v8822_v47 = vpop.permute.xlu1 %8821 }
 0x1fd   : > { %7902 = vmatmul.msk.f32.gmra.mxu1 %vm968_vm2, %v7894_v57  ;;  %v1300_v10 = vadd.f32 %v10147_v53, %v1202_v8  ;;  %v7931_v53 = vld [vmem:[%s13180_s5 + $0x1b0] sm:$0xff]  ;;  %v8823_v49 = vunpack.i.l.bf16 %v8822_v47 }
 0x1fe   : > { %7915 = vmatmul.msk.f32.gmra.mxu3 %vm968_vm2, %v7907_v60 }
 0x1ff   : > { %7898 = vmatmul.msk.f32.gmra.mxu0 %vm968_vm2, %v7894_v57  ;;  %v8779_v57 = vunpack.i.h.bf16 %v10167_v3 }
 0x200   : > { %7911 = vmatmul.msk.f32.gmra.mxu2 %vm968_vm2, %v7907_v60  ;;  %v8778_v60 = vunpack.i.l.bf16 %v10167_v3  ;;  %v1201_v3 = vadd.f32 %v10157_v61, %v1072_v58  ;;  %v7918_v61 = vld [vmem:[%s13180_s5 + $0x188] sm:$0xff] }
 0x201   : > { %v10171_v7 = vpop.f32.mrf.mxu3 }
 0x202   : > { %v10173_v9 = vpop.f32.mrf.mxu1  ;;  %v10183_v56 = vpop.f32.mrf.mxu2  ;;  %v2568_v4 = vsel %vm13241_vm14, %v8778_v60, %v8779_v57 }
 0x204   : > { %v10181_v15 = vpop.f32.mrf.mxu0 }
 0x205   : > { %7903 = vmatmul.msk.f32.gmra.mxu1 %vm968_vm2, %v7895_v12 }
 0x206   : > { %7916 = vmatmul.msk.f32.gmra.mxu3 %vm968_vm2, %v7908_v13 }
 0x207   : > { %7899 = vmatmul.msk.f32.gmra.mxu0 %vm968_vm2, %v7895_v12  ;;  %v8774_v12 = vunpack.i.h.bf16 %v10164_v2 }
 0x208   : > { %7912 = vmatmul.msk.f32.gmra.mxu2 %vm968_vm2, %v7908_v13 }
 0x209   : > { %v1294_v22 = vpop.f32.mrf.mxu3  ;;  %v2567_v54 = vsel %vm13241_vm14, %v8774_v12, %v8778_v60  ;;  %vm13242_vm14 = vcmask 572416   ;;  %v8824_v60 = vunpack.i.h.bf16 %v8822_v47 }
 0x20a   : > { %v1196_v25 = vpop.f32.mrf.mxu1 }
 0x20b   : > { %v1206_v29 = vadd.f32 %v1196_v25, %v1107_v21  ;;  %v1265_v6 = vpop.f32.mrf.mxu2  ;;  %v1299_v25 = vadd.f32 %v10159_v62, %v1201_v3  ;;  %v8803_v3 = vunpack.i.l.bf16 %v10270_v16 }
 0x20c   : > { %v1167_v34 = vpop.f32.mrf.mxu0 }
 0x20d   : > { %v1205_v1 = vadd.f32 %v1167_v34, %v1078_v28  ;;  %v10204_v52 = vadd.f32 %v1294_v22, %v1206_v29  ;;  %7904 = vmatmul.msk.f32.gmra.mxu1 %vm968_vm2, %v7896_v26  ;;  %v10259_v28 = vpop.permute.xlu0 %8796  ;;  %v1075_v29 = vadd.f32 %v10083_v59, %v10091_v18  ;;  %v7919_v34 = vld [vmem:[%s13180_s5 + $0x190] sm:$0xff] }
 0x20e   : > { %7937 = vmatmul.msk.f32.vlgmr.msra.gmra.mxu3 %vm968_vm2, %v7929_v30 }
 0x20f   : > { %v10210_v40 = vadd.f32 %v1265_v6, %v1205_v1  ;;  %2734 = vmatpush.msra.mxu3 %v2674_v38  ;;  %7900 = vmatmul.msk.f32.gmra.mxu0 %vm968_vm2, %v7896_v26  ;;  %v1203_v62 = vadd.f32 %v10181_v15, %v1075_v29  ;;  %v7932_v15 = vld [vmem:[%s13180_s5 + $0x1b8] sm:$0xff] }
 0x210   : > { %7933 = vmatmul.msk.f32.vlgmr.msra.gmra.mxu2 %vm968_vm2, %v7929_v30  ;;  %v1204_v30 = vadd.f32 %v10173_v9, %v1104_v23 }
 0x211   : > { %2705 = vmatpush.msra.mxu2 %v2673_v55  ;;  %2735 = vmatpush.msra.mxu3 %v2672_v11  ;;  %v1489_v42 = vpop.f32.mrf.mxu3  ;;  %v1301_v35 = vadd.f32 %v10183_v56, %v1203_v62  ;;  %v8812_v56 = vpop.permute.xlu2 %8811 }
 0x212   : > { %v1383_v45 = vpop.f32.mrf.mxu1  ;;  %v1302_v59 = vadd.f32 %v10171_v7, %v1204_v30 }
 0x213   : > { %2706 = vmatpush.msra.mxu2 %v2671_v44  ;;  %v1396_v51 = vadd.f32 %v1383_v45, %v1298_v41  ;;  %v1460_v17 = vpop.f32.mrf.mxu2  ;;  %v7953_v44 = vld [vmem:[%s13180_s5 + $0x1e0] sm:$0xff]  ;;  %v8814_v45 = vunpack.i.h.bf16 %v8812_v56 }
 0x214   : > { %v1354_v13 = vpop.f32.mrf.mxu0 }
 0x215   : > { %v1395_v46 = vadd.f32 %v1354_v13, %v1297_v37  ;;  %v10237_v5 = vadd.f32 %v1489_v42, %v1396_v51  ;;  %7925 = vmatmul.msk.f32.vlgmr.msra.gmra.mxu1 %vm968_vm2, %v7917_v48  ;;  %v8817_v7 = vpop.permute.xlu0 %8816  ;;  %v7920_v42 = vld [vmem:[%s13180_s5 + $0x198] sm:$0xff] }
 0x216   : > { %7938 = vmatmul.msk.f32.gmra.mxu3 %vm968_vm2, %v7930_v0  ;;  %2630 = vmatpush.msra.mxu1 %v2570_v63  ;;  %v8819_v11 = vunpack.i.h.bf16 %v8817_v7  ;;  %v8818_v50 = vunpack.i.l.bf16 %v8817_v7  ;;  %v8799_v63 = vunpack.i.h.bf16 %v10259_v28 }
 0x217   : > { %v10242_v2 = vadd.f32 %v1460_v17, %v1395_v46  ;;  %7921 = vmatmul.msk.f32.vlgmr.msra.gmra.mxu0 %vm968_vm2, %v7917_v48  ;;  %v8813_v48 = vunpack.i.l.bf16 %v8812_v56  ;;  %v7941_v17 = vld [vmem:[%s13180_s5 + $0x1c0] sm:$0xff] }
 0x218   : > { %7934 = vmatmul.msk.f32.gmra.mxu2 %vm968_vm2, %v7930_v0  ;;  %2601 = vmatpush.msra.mxu0 %v2569_v19  ;;  %v8798_v19 = vunpack.i.l.bf16 %v10259_v28 }
 0x219   : > { %2631 = vmatpush.msra.mxu1 %v2568_v4  ;;  %v1492_v21 = vpop.f32.mrf.mxu3  ;;  %v2880_v13 = vsel %vm13242_vm14, %v8813_v48, %v8814_v45  ;;  %v2879_v8 = vsel %vm13242_vm14, %v8824_v60, %v8813_v48  ;;  %v7977_v48 = vld [vmem:[%s13180_s5 + $0x220] sm:$0xff] }
 0x21a   : > { %2602 = vmatpush.msra.mxu0 %v2567_v54  ;;  %v1386_v22 = vpop.f32.mrf.mxu1  ;;  %v8809_v54 = vunpack.i.h.bf16 %v10267_v14 }
 0x21b   : > { %v1398_v26 = vadd.f32 %v1386_v22, %v1300_v10  ;;  %v1463_v32 = vpop.f32.mrf.mxu2  ;;  %v7954_v10 = vld [vmem:[%s13180_s5 + $0x1e8] sm:$0xff] }
 0x21c   : > { %v1357_v27 = vpop.f32.mrf.mxu0 }
 0x21d   : > { %v1397_v20 = vadd.f32 %v1357_v27, %v1299_v25  ;;  %v10264_v24 = vadd.f32 %v1492_v21, %v1398_v26  ;;  %7926 = vmatmul.msk.f32.gmra.mxu1 %vm968_vm2, %v7918_v61  ;;  %v8808_v21 = vunpack.i.l.bf16 %v10267_v14  ;;  %v7955_v14 = vld [vmem:[%s13180_s5 + $0x1f0] sm:$0xff]  ;;  %v10346_v62 = vpop.permute.xlu0 %8826 }
 0x21e   : > { %7939 = vmatmul.msk.f32.gmra.mxu3 %vm968_vm2, %v7931_v53 }
 0x21f   : > { %v10273_v33 = vadd.f32 %v1463_v32, %v1397_v20  ;;  %7922 = vmatmul.msk.f32.gmra.mxu0 %vm968_vm2, %v7918_v61  ;;  %v8804_v61 = vunpack.i.h.bf16 %v10270_v16  ;;  %v7942_v20 = vld [vmem:[%s13180_s5 + $0x1c8] sm:$0xff] }
 0x220   : > { %7935 = vmatmul.msk.f32.gmra.mxu2 %vm968_vm2, %v7931_v53 }
 0x221   : > { %v1495_v18 = vpop.f32.mrf.mxu3 }
 0x222   : > { %v1389_v9 = vpop.f32.mrf.mxu1 }
 0x223   : > { %v1400_v36 = vadd.f32 %v1389_v9, %v1302_v59  ;;  %v1466_v38 = vpop.f32.mrf.mxu2 }
 0x224   : > { %v1360_v1 = vpop.f32.mrf.mxu0 }
 0x225   : > { %v1399_v6 = vadd.f32 %v1360_v1, %v1301_v35  ;;  %v10285_v31 = vadd.f32 %v1495_v18, %v1400_v36  ;;  %7927 = vmatmul.msk.f32.gmra.mxu1 %vm968_vm2, %v7919_v34  ;;  %v10355_v35 = vpop.permute.xlu1 %8831 }
 0x226   : > { %7940 = vmatmul.msk.f32.gmra.mxu3 %vm968_vm2, %v7932_v15 }
 0x227   : > { %v10289_v39 = vadd.f32 %v1466_v38, %v1399_v6  ;;  %7923 = vmatmul.msk.f32.gmra.mxu0 %vm968_vm2, %v7919_v34  ;;  %v10352_v34 = vpop.permute.xlu2 %8836  ;;  %v7956_v6 = vld [vmem:[%s13180_s5 + $0x1f8] sm:$0xff] }
 0x228   : > { %7936 = vmatmul.msk.f32.gmra.mxu2 %vm968_vm2, %v7932_v15 }
 0x229   : > { %v1498_v55 = vpop.f32.mrf.mxu3 }
 0x22a   : > { %v1392_v41 = vpop.f32.mrf.mxu1 }
 0x22b   : > { %v1402_v43 = vadd.f32 %v1392_v41, %v10204_v52  ;;  %v1469_v57 = vpop.f32.mrf.mxu2  ;;  %v2882_v52 = vsel %vm13242_vm14, %v8819_v11, %v8823_v49 }
 0x22c   : > { %v1363_v37 = vpop.f32.mrf.mxu0 }
 0x22d   : > { %v1401_v51 = vadd.f32 %v1363_v37, %v10210_v40  ;;  %v10301_v0 = vadd.f32 %v1498_v55, %v1402_v43  ;;  %7928 = vmatmul.msk.f32.gmra.mxu1 %vm968_vm2, %v7920_v42  ;;  %v2881_v40 = vsel %vm13242_vm14, %v8818_v50, %v8819_v11  ;;  %vm13243_vm14 = vcmask 580608   ;;  %v8847_v55 = vpop.permute.xlu0 %8846  ;;  %v8852_v41 = vpop.permute.xlu1 %8851 }
 0x22e   : > { %7961 = vmatmul.msk.f32.vlgmr.msrb.gmra.mxu3 %vm968_vm2, %v7953_v44  ;;  %v2777_v27 = vsel %vm13243_vm14, %v8798_v19, %v8799_v63  ;;  %v2775_v28 = vsel %vm13243_vm14, %v8804_v61, %v8808_v21  ;;  %v8849_v43 = vunpack.i.h.bf16 %v8847_v55  ;;  %v8853_v37 = vunpack.i.l.bf16 %v8852_v41  ;;  %v7965_v19 = vld [vmem:[%s13180_s5 + $0x200] sm:$0xff] }
 0x22f   : > { %v10306_v12 = vadd.f32 %v1469_v57, %v1401_v51  ;;  %2942 = vmatpush.msrb.mxu3 %v2882_v52  ;;  %7924 = vmatmul.msk.f32.gmra.mxu0 %vm968_vm2, %v7920_v42  ;;  %v8848_v51 = vunpack.i.l.bf16 %v8847_v55  ;;  %v8838_v61 = vunpack.i.l.bf16 %v10352_v34 }
 0x230   : > { %7957 = vmatmul.msk.f32.vlgmr.msrb.gmra.mxu2 %vm968_vm2, %v7953_v44 }
 0x231   : > { %2913 = vmatpush.msrb.mxu2 %v2881_v40  ;;  %2943 = vmatpush.msrb.mxu3 %v2880_v13  ;;  %v1697_v58 = vpop.f32.mrf.mxu3  ;;  %v8854_v13 = vunpack.i.h.bf16 %v8852_v41 }
 0x232   : > { %v1593_v46 = vpop.f32.mrf.mxu1 }
 0x233   : > { %2914 = vmatpush.msrb.mxu2 %v2879_v8  ;;  %v1606_v4 = vadd.f32 %v1593_v46, %v10237_v5  ;;  %v1668_v26 = vpop.f32.mrf.mxu2  ;;  %v2778_v5 = vsel %vm13243_vm14, %v8799_v63, %v8803_v3  ;;  %v8829_v8 = vunpack.i.h.bf16 %v10346_v62 }
 0x234   : > { %v1564_v22 = vpop.f32.mrf.mxu0 }
 0x235   : > { %v1605_v23 = vadd.f32 %v1564_v22, %v10242_v2  ;;  %v10327_v25 = vadd.f32 %v1697_v58, %v1606_v4  ;;  %7949 = vmatmul.msk.f32.vlgmr.msrb.gmra.mxu1 %vm968_vm2, %v7941_v17  ;;  %v2776_v2 = vsel %vm13243_vm14, %v8808_v21, %v8809_v54  ;;  %vm13244_vm14 = vcmask 449536   ;;  %v7978_v21 = vld [vmem:[%s13180_s5 + $0x228] sm:$0xff] }
 0x236   : > { %7962 = vmatmul.msk.f32.gmra.mxu3 %vm968_vm2, %v7954_v10  ;;  %2838 = vmatpush.msrb.mxu1 %v2778_v5  ;;  %v8833_v4 = vunpack.i.l.bf16 %v10355_v35  ;;  %v8839_v22 = vunpack.i.h.bf16 %v10352_v34 }
 0x237   : > { %v10332_v53 = vadd.f32 %v1668_v26, %v1605_v23  ;;  %7945 = vmatmul.msk.f32.vlgmr.msrb.gmra.mxu0 %vm968_vm2, %v7941_v17  ;;  %v8834_v26 = vunpack.i.h.bf16 %v10355_v35 }
 0x238   : > { %7958 = vmatmul.msk.f32.gmra.mxu2 %vm968_vm2, %v7954_v10  ;;  %2809 = vmatpush.msrb.mxu0 %v2777_v27  ;;  %v8828_v10 = vunpack.i.l.bf16 %v10346_v62  ;;  %v7979_v62 = vld [vmem:[%s13180_s5 + $0x230] sm:$0xff] }
 0x239   : > { %2839 = vmatpush.msrb.mxu1 %v2776_v2  ;;  %v1700_v29 = vpop.f32.mrf.mxu3 }
 0x23a   : > { %2810 = vmatpush.msrb.mxu0 %v2775_v28  ;;  %v1596_v30 = vpop.f32.mrf.mxu1 }
 0x23b   : > { %v1608_v32 = vadd.f32 %v1596_v30, %v10264_v24  ;;  %v1671_v9 = vpop.f32.mrf.mxu2 }
 0x23c   : > { %v1567_v16 = vpop.f32.mrf.mxu0 }
 0x23d   : > { %v1607_v59 = vadd.f32 %v1567_v16, %v10273_v33  ;;  %v10349_v18 = vadd.f32 %v1700_v29, %v1608_v32  ;;  %7950 = vmatmul.msk.f32.gmra.mxu1 %vm968_vm2, %v7942_v20  ;;  %v7943_v33 = vld [vmem:[%s13180_s5 + $0x1d0] sm:$0xff] }
 0x23e   : > { %7963 = vmatmul.msk.f32.gmra.mxu3 %vm968_vm2, %v7955_v14 }
 0x23f   : > { %v10357_v24 = vadd.f32 %v1671_v9, %v1607_v59  ;;  %7946 = vmatmul.msk.f32.gmra.mxu0 %vm968_vm2, %v7942_v20  ;;  %v10430_v9 = vpop.permute.xlu0 %8856 }
 0x240   : > { %7959 = vmatmul.msk.f32.gmra.mxu2 %vm968_vm2, %v7955_v14  ;;  %v7966_v14 = vld [vmem:[%s13180_s5 + $0x208] sm:$0xff] }
 0x241   : > { %v1703_v36 = vpop.f32.mrf.mxu3 }
 0x242   : > { %v1599_v15 = vpop.f32.mrf.mxu1 }
 0x243   : > { %v1610_v1 = vadd.f32 %v1599_v15, %v10285_v31  ;;  %v1674_v47 = vpop.f32.mrf.mxu2  ;;  %v8842_v31 = vpop.permute.xlu2 %8841 }
 0x244   : > { %v1570_v38 = vpop.f32.mrf.mxu0  ;;  %v8844_v49 = vunpack.i.h.bf16 %v8842_v31  ;;  %v8843_v50 = vunpack.i.l.bf16 %v8842_v31 }
 0x245   : > { %v1609_v7 = vadd.f32 %v1570_v38, %v10289_v39  ;;  %v10369_v56 = vadd.f32 %v1703_v36, %v1610_v1  ;;  %7951 = vmatmul.msk.f32.gmra.mxu1 %vm968_vm2, %v7943_v33  ;;  %v7944_v39 = vld [vmem:[%s13180_s5 + $0x1d8] sm:$0xff] }
 0x246   : > { %7964 = vmatmul.msk.f32.gmra.mxu3 %vm968_vm2, %v7956_v6  ;;  %v3088_v58 = vsel %vm13244_vm14, %v8843_v50, %v8844_v49  ;;  %v3087_v17 = vsel %vm13244_vm14, %v8854_v13, %v8843_v50  ;;  %v8001_v50 = vld [vmem:[%s13180_s5 + $0x260] sm:$0xff] }
 0x247   : > { %v10373_v11 = vadd.f32 %v1674_v47, %v1609_v7  ;;  %7947 = vmatmul.msk.f32.gmra.mxu0 %vm968_vm2, %v7943_v33  ;;  %v10439_v33 = vpop.permute.xlu1 %8861  ;;  %v7980_v7 = vld [vmem:[%s13180_s5 + $0x238] sm:$0xff] }
 0x248   : > { %7960 = vmatmul.msk.f32.gmra.mxu2 %vm968_vm2, %v7956_v6 }
 0x249   : > { %v1706_v42 = vpop.f32.mrf.mxu3 }
 0x24a   : > { %v1602_v44 = vpop.f32.mrf.mxu1 }
 0x24b   : > { %v1612_v45 = vadd.f32 %v1602_v44, %v10301_v0  ;;  %v1677_v40 = vpop.f32.mrf.mxu2  ;;  %v3090_v0 = vsel %vm13244_vm14, %v8849_v43, %v8853_v37  ;;  %v10436_v15 = vpop.permute.xlu2 %8866 }
 0x24c   : > { %v1573_v57 = vpop.f32.mrf.mxu0 }
 0x24d   : > { %v1611_v60 = vadd.f32 %v1573_v57, %v10306_v12  ;;  %v10385_v52 = vadd.f32 %v1706_v42, %v1612_v45  ;;  %7952 = vmatmul.msk.f32.gmra.mxu1 %vm968_vm2, %v7944_v39  ;;  %v3089_v12 = vsel %vm13244_vm14, %v8848_v51, %v8849_v43  ;;  %vm13245_vm14 = vcmask 457728   ;;  %v8877_v42 = vpop.permute.xlu0 %8876 }
 0x24e   : > { %7985 = vmatmul.msk.f32.vlgmr.msra.gmra.mxu3 %vm968_vm2, %v7977_v48  ;;  %v2985_v29 = vsel %vm13245_vm14, %v8828_v10, %v8829_v8  ;;  %v2983_v30 = vsel %vm13245_vm14, %v8834_v26, %v8838_v61  ;;  %v8879_v45 = vunpack.i.h.bf16 %v8877_v42  ;;  %v8002_v26 = vld [vmem:[%s13180_s5 + $0x268] sm:$0xff] }
 0x24f   : > { %v10390_v63 = vadd.f32 %v1677_v40, %v1611_v60  ;;  %3150 = vmatpush.msra.mxu3 %v3090_v0  ;;  %7948 = vmatmul.msk.f32.gmra.mxu0 %vm968_vm2, %v7944_v39  ;;  %v8882_v44 = vpop.permute.xlu1 %8881  ;;  %v8878_v60 = vunpack.i.l.bf16 %v8877_v42 }
 0x250   : > { %7981 = vmatmul.msk.f32.vlgmr.msra.gmra.mxu2 %vm968_vm2, %v7977_v48  ;;  %v8883_v57 = vunpack.i.l.bf16 %v8882_v44 }
 0x251   : > { %3121 = vmatpush.msra.mxu2 %v3089_v12  ;;  %3151 = vmatpush.msra.mxu3 %v3088_v58  ;;  %v1905_v46 = vpop.f32.mrf.mxu3  ;;  %v8884_v58 = vunpack.i.h.bf16 %v8882_v44  ;;  %v7992_v44 = vld [vmem:[%s13180_s5 + $0x258] sm:$0xff] }
 0x252   : > { %v1801_v3 = vpop.f32.mrf.mxu1 }
 0x253   : > { %3122 = vmatpush.msra.mxu2 %v3087_v17  ;;  %v1814_v54 = vadd.f32 %v1801_v3, %v10327_v25  ;;  %v1876_v2 = vpop.f32.mrf.mxu2  ;;  %v2986_v25 = vsel %vm13245_vm14, %v8829_v8, %v8833_v4  ;;  %v8859_v17 = vunpack.i.h.bf16 %v10430_v9 }
 0x254   : > { %v1772_v23 = vpop.f32.mrf.mxu0 }
 0x255   : > { %v1813_v5 = vadd.f32 %v1772_v23, %v10332_v53  ;;  %v10411_v27 = vadd.f32 %v1905_v46, %v1814_v54  ;;  %7973 = vmatmul.msk.f32.vlgmr.msra.gmra.mxu1 %vm968_vm2, %v7965_v19  ;;  %v2984_v53 = vsel %vm13245_vm14, %v8838_v61, %v8839_v22  ;;  %vm13246_vm14 = vcmask 433152   ;;  %v7989_v54 = vld [vmem:[%s13180_s5 + $0x240] sm:$0xff] }
 0x256   : > { %7986 = vmatmul.msk.f32.gmra.mxu3 %vm968_vm2, %v7978_v21  ;;  %3046 = vmatpush.msra.mxu1 %v2986_v25  ;;  %v8863_v22 = vunpack.i.l.bf16 %v10439_v33  ;;  %v8858_v61 = vunpack.i.l.bf16 %v10430_v9  ;;  %v8003_v9 = vld [vmem:[%s13180_s5 + $0x270] sm:$0xff] }
 0x257   : > { %v10416_v28 = vadd.f32 %v1876_v2, %v1813_v5  ;;  %7969 = vmatmul.msk.f32.vlgmr.msra.gmra.mxu0 %vm968_vm2, %v7965_v19  ;;  %v8869_v19 = vunpack.i.h.bf16 %v10436_v15  ;;  %v8864_v2 = vunpack.i.h.bf16 %v10439_v33 }
 0x258   : > { %7982 = vmatmul.msk.f32.gmra.mxu2 %vm968_vm2, %v7978_v21  ;;  %3017 = vmatpush.msra.mxu0 %v2985_v29  ;;  %v8868_v21 = vunpack.i.l.bf16 %v10436_v15 }
 0x259   : > { %3047 = vmatpush.msra.mxu1 %v2984_v53  ;;  %v1908_v20 = vpop.f32.mrf.mxu3 }
 0x25a   : > { %3018 = vmatpush.msra.mxu0 %v2983_v30  ;;  %v1804_v32 = vpop.f32.mrf.mxu1 }
 0x25b   : > { %v1816_v16 = vadd.f32 %v1804_v32, %v10349_v18  ;;  %v1879_v36 = vpop.f32.mrf.mxu2 }
 0x25c   : > { %v1775_v59 = vpop.f32.mrf.mxu0 }
 0x25d   : > { %v1815_v34 = vadd.f32 %v1775_v59, %v10357_v24  ;;  %v10433_v35 = vadd.f32 %v1908_v20, %v1816_v16  ;;  %7974 = vmatmul.msk.f32.gmra.mxu1 %vm968_vm2, %v7966_v14  ;;  %v7967_v24 = vld [vmem:[%s13180_s5 + $0x210] sm:$0xff] }
 0x25e   : > { %7987 = vmatmul.msk.f32.gmra.mxu3 %vm968_vm2, %v7979_v62 }
 0x25f   : > { %v10441_v18 = vadd.f32 %v1879_v36, %v1815_v34  ;;  %7970 = vmatmul.msk.f32.gmra.mxu0 %vm968_vm2, %v7966_v14 }
 0x260   : > { %7983 = vmatmul.msk.f32.gmra.mxu2 %vm968_vm2, %v7979_v62  ;;  %v7990_v62 = vld [vmem:[%s13180_s5 + $0x248] sm:$0xff] }
 0x261   : > { %v1911_v1 = vpop.f32.mrf.mxu3 }
 0x262   : > { %v1807_v6 = vpop.f32.mrf.mxu1 }
 0x263   : > { %v1818_v38 = vadd.f32 %v1807_v6, %v10369_v56  ;;  %v1882_v41 = vpop.f32.mrf.mxu2  ;;  %v8872_v56 = vpop.permute.xlu2 %8871 }
 0x264   : > { %v1778_v47 = vpop.f32.mrf.mxu0  ;;  %v8874_v37 = vunpack.i.h.bf16 %v8872_v56  ;;  %v8873_v51 = vunpack.i.l.bf16 %v8872_v56 }
 0x265   : > { %v1817_v55 = vadd.f32 %v1778_v47, %v10373_v11  ;;  %v10453_v31 = vadd.f32 %v1911_v1, %v1818_v38  ;;  %7975 = vmatmul.msk.f32.gmra.mxu1 %vm968_vm2, %v7967_v24  ;;  %v7968_v11 = vld [vmem:[%s13180_s5 + $0x218] sm:$0xff] }
 0x266   : > { %7988 = vmatmul.msk.f32.gmra.mxu3 %vm968_vm2, %v7980_v7  ;;  %v3296_v46 = vsel %vm13246_vm14, %v8873_v51, %v8874_v37  ;;  %v3295_v4 = vsel %vm13246_vm14, %v8884_v58, %v8873_v51  ;;  %v8004_v38 = vld [vmem:[%s13180_s5 + $0x278] sm:$0xff] }
 0x267   : > { %v10457_v43 = vadd.f32 %v1882_v41, %v1817_v55  ;;  %7971 = vmatmul.msk.f32.gmra.mxu0 %vm968_vm2, %v7967_v24  ;;  %v7991_v24 = vld [vmem:[%s13180_s5 + $0x250] sm:$0xff] }
 0x268   : > { %7984 = vmatmul.msk.f32.gmra.mxu2 %vm968_vm2, %v7980_v7 }
 0x269   : > { %v1914_v39 = vpop.f32.mrf.mxu3 }
 0x26a   : > { %v1810_v48 = vpop.f32.mrf.mxu1 }
 0x26b   : > { %v1820_v49 = vadd.f32 %v1810_v48, %v10385_v52  ;;  %v1885_v12 = vpop.f32.mrf.mxu2  ;;  %v3298_v52 = vsel %vm13246_vm14, %v8879_v45, %v8883_v57  ;;  %v8897_v51 = vpop.permute.xlu2 %8896 }
 0x26c   : > { %v1781_v40 = vpop.f32.mrf.mxu0  ;;  %v8892_v57 = vpop.permute.xlu1 %8891  ;;  %v8898_v58 = vunpack.i.l.bf16 %v8897_v51 }
 0x26d   : > { %v1819_v13 = vadd.f32 %v1781_v40, %v10390_v63  ;;  %v10469_v0 = vadd.f32 %v1914_v39, %v1820_v49  ;;  %7976 = vmatmul.msk.f32.gmra.mxu1 %vm968_vm2, %v7968_v11  ;;  %v3297_v63 = vsel %vm13246_vm14, %v8878_v60, %v8879_v45  ;;  %vm13247_vm14 = vcmask 441344   ;;  %v8025_v39 = vld [vmem:[%s13180_s5 + $0x2a0] sm:$0xff] }
 0x26e   : > { %8009 = vmatmul.msk.f32.vlgmr.msrb.gmra.mxu3 %vm968_vm2, %v8001_v50  ;;  %v3194_v30 = vsel %vm13247_vm14, %v8859_v17, %v8863_v22  ;;  %v3193_v20 = vsel %vm13247_vm14, %v8858_v61, %v8859_v17  ;;  %v3192_v32 = vsel %vm13247_vm14, %v8868_v21, %v8869_v19  ;;  %v8894_v17 = vunpack.i.h.bf16 %v8892_v57  ;;  %v8014_v61 = vld [vmem:[%s13180_s5 + $0x288] sm:$0xff] }
 0x26f   : > { %v10474_v8 = vadd.f32 %v1885_v12, %v1819_v13  ;;  %3358 = vmatpush.msrb.mxu3 %v3298_v52  ;;  %7972 = vmatmul.msk.f32.gmra.mxu0 %vm968_vm2, %v7968_v11  ;;  %v8899_v12 = vunpack.i.h.bf16 %v8897_v51  ;;  %v8893_v52 = vunpack.i.l.bf16 %v8892_v57  ;;  %v8040_v51 = vld [vmem:[%s13180_s5 + $0x2d8] sm:$0xff] }
 0x270   : > { %8005 = vmatmul.msk.f32.vlgmr.msrb.gmra.mxu2 %vm968_vm2, %v8001_v50  ;;  %v8887_v50 = vpop.permute.xlu0 %8886 }
 0x271   : > { %3329 = vmatpush.msrb.mxu2 %v3297_v63  ;;  %3359 = vmatpush.msrb.mxu3 %v3296_v46  ;;  %v2113_v3 = vpop.f32.mrf.mxu3  ;;  %v8889_v60 = vunpack.i.h.bf16 %v8887_v50  ;;  %v8026_v63 = vld [vmem:[%s13180_s5 + $0x2a8] sm:$0xff] }
 0x272   : > { %v2009_v10 = vpop.f32.mrf.mxu1 }
 0x273   : > { %3330 = vmatpush.msrb.mxu2 %v3295_v4  ;;  %v2022_v23 = vadd.f32 %v2009_v10, %v10411_v27  ;;  %v2084_v53 = vpop.f32.mrf.mxu2 }
 0x274   : > { %v1980_v5 = vpop.f32.mrf.mxu0 }
 0x275   : > { %v2021_v25 = vadd.f32 %v1980_v5, %v10416_v28  ;;  %v10495_v29 = vadd.f32 %v2113_v3, %v2022_v23  ;;  %7997 = vmatmul.msk.f32.vlgmr.msrb.gmra.mxu1 %vm968_vm2, %v7989_v54  ;;  %v3191_v28 = vsel %vm13247_vm14, %v8864_v2, %v8868_v21  ;;  %vm13253_vm14 = vcmask 424960   ;;  %v8027_v23 = vld [vmem:[%s13180_s5 + $0x2b0] sm:$0xff] }
 0x276   : > { %3254 = vmatpush.msrb.mxu1 %v3194_v30  ;;  %8010 = vmatmul.msk.f32.gmra.mxu3 %vm968_vm2, %v8002_v26  ;;  %v3402_v19 = vsel %vm13253_vm14, %v8889_v60, %v8893_v52  ;;  %v3400_v10 = vsel %vm13253_vm14, %v8898_v58, %v8899_v12  ;;  %v8028_v30 = vld [vmem:[%s13180_s5 + $0x2b8] sm:$0xff] }
 0x277   : > { %v10500_v27 = vadd.f32 %v2084_v53, %v2021_v25  ;;  %7993 = vmatmul.msk.f32.vlgmr.msrb.gmra.mxu0 %vm968_vm2, %v7989_v54  ;;  %v3399_v54 = vsel %vm13253_vm14, %v8894_v17, %v8898_v58  ;;  %v8015_v53 = vld [vmem:[%s13180_s5 + $0x290] sm:$0xff]  ;;  %v8061_v58 = vld [vmem:[%s13180_s5 + $0x300] sm:$0xff] }
 0x278   : > { %3225 = vmatpush.msrb.mxu0 %v3193_v20  ;;  %3255 = vmatpush.msrb.mxu1 %v3192_v32 }
 0x279   : > { %8006 = vmatmul.msk.f32.gmra.mxu2 %vm968_vm2, %v8002_v26  ;;  %v2116_v14 = vpop.f32.mrf.mxu3 }
 0x27a   : > { %3226 = vmatpush.msrb.mxu0 %v3191_v28  ;;  %v2012_v16 = vpop.f32.mrf.mxu1 }
 0x27b   : > { %v2024_v59 = vadd.f32 %v2012_v16, %v10433_v35  ;;  %v2087_v33 = vpop.f32.mrf.mxu2  ;;  %v8016_v16 = vld [vmem:[%s13180_s5 + $0x298] sm:$0xff] }
 0x27c   : > { %v1983_v34 = vpop.f32.mrf.mxu0 }
 0x27d   : > { %v2023_v36 = vadd.f32 %v1983_v34, %v10441_v18  ;;  %v10515_v15 = vadd.f32 %v2116_v14, %v2024_v59  ;;  %7998 = vmatmul.msk.f32.gmra.mxu1 %vm968_vm2, %v7990_v62 }
 0x27e   : > { %8011 = vmatmul.msk.f32.gmra.mxu3 %vm968_vm2, %v8003_v9 }
 0x27f   : > { %v10519_v1 = vadd.f32 %v2087_v33, %v2023_v36  ;;  %7994 = vmatmul.msk.f32.gmra.mxu0 %vm968_vm2, %v7990_v62  ;;  %v8049_v62 = vld [vmem:[%s13180_s5 + $0x2e0] sm:$0xff] }
 0x280   : > { %v8037_v33 = vld [vmem:[%s13180_s5 + $0x2c0] sm:$0xff] }
 0x281   : > { %8007 = vmatmul.msk.f32.gmra.mxu2 %vm968_vm2, %v8003_v9  ;;  %v2119_v35 = vpop.f32.mrf.mxu3 }
 0x282   : > { %v2015_v6 = vpop.f32.mrf.mxu1 }
 0x283   : > { %v2026_v18 = vadd.f32 %v2015_v6, %v10453_v31  ;;  %v2090_v41 = vpop.f32.mrf.mxu2 }
 0x284   : > { %v1986_v7 = vpop.f32.mrf.mxu0 }
 0x285   : > { %v2025_v47 = vadd.f32 %v1986_v7, %v10457_v43  ;;  %v10531_v55 = vadd.f32 %v2119_v35, %v2026_v18  ;;  %7999 = vmatmul.msk.f32.gmra.mxu1 %vm968_vm2, %v7991_v24  ;;  %v8050_v35 = vld [vmem:[%s13180_s5 + $0x2e8] sm:$0xff] }
 0x286   : > { %8012 = vmatmul.msk.f32.gmra.mxu3 %vm968_vm2, %v8004_v38  ;;  %v8038_v7 = vld [vmem:[%s13180_s5 + $0x2c8] sm:$0xff] }
 0x287   : > { %v10535_v42 = vadd.f32 %v2090_v41, %v2025_v47  ;;  %7995 = vmatmul.msk.f32.gmra.mxu0 %vm968_vm2, %v7991_v24  ;;  %v8051_v47 = vld [vmem:[%s13180_s5 + $0x2f0] sm:$0xff] }
 0x289   : > { %8008 = vmatmul.msk.f32.gmra.mxu2 %vm968_vm2, %v8004_v38  ;;  %v2122_v31 = vpop.f32.mrf.mxu3 }
 0x28a   : > { %v2018_v56 = vpop.f32.mrf.mxu1 }
 0x28b   : > { %v2028_v43 = vadd.f32 %v2018_v56, %v10469_v0  ;;  %v2093_v49 = vpop.f32.mrf.mxu2  ;;  %v8013_v0 = vld [vmem:[%s13180_s5 + $0x280] sm:$0xff] }
 0x28c   : > { %v1989_v45 = vpop.f32.mrf.mxu0 }
 0x28d   : > { %v2027_v48 = vadd.f32 %v1989_v45, %v10474_v8  ;;  %v10547_v11 = vadd.f32 %v2122_v31, %v2028_v43  ;;  %8000 = vmatmul.msk.f32.gmra.mxu1 %vm968_vm2, %v7992_v44  ;;  %v8888_v8 = vunpack.i.l.bf16 %v8887_v50  ;;  %v8039_v43 = vld [vmem:[%s13180_s5 + $0x2d0] sm:$0xff] }
 0x28e   : > { %8033 = vmatmul.msk.f32.vlgmr.msra.gmra.mxu3 %vm968_vm2, %v8025_v39 }
 0x28f   : > { %v10551_v37 = vadd.f32 %v2093_v49, %v2027_v48  ;;  %7996 = vmatmul.msk.f32.gmra.mxu0 %vm968_vm2, %v7992_v44  ;;  %v3401_v4 = vsel %vm13253_vm14, %v8888_v8, %v8889_v60  ;;  %vm13254_vm14 = vcmask 859136  }
 0x291   : > { %8029 = vmatmul.msk.f32.vlgmr.msra.gmra.mxu2 %vm968_vm2, %v8025_v39  ;;  %v10555_v40 = vpop.f32.mrf.mxu3  ;;  %v8052_v39 = vld [vmem:[%s13180_s5 + $0x2f8] sm:$0xff] }
 0x292   : > { %v10557_v13 = vpop.f32.mrf.mxu1 }
 0x293   : > { %v10567_v3 = vpop.f32.mrf.mxu2 }
 0x294   : > { %v10565_v46 = vpop.f32.mrf.mxu0 }
 0x295   : > { %8021 = vmatmul.msk.f32.vlgmr.msra.gmra.mxu1 %vm968_vm2, %v8013_v0 }
 0x296   : > { %3462 = vmatpush.msra.mxu1 %v3402_v19  ;;  %8034 = vmatmul.msk.f32.gmra.mxu3 %vm968_vm2, %v8026_v63  ;;  %v8062_v19 = vld [vmem:[%s13180_s5 + $0x308] sm:$0xff] }
 0x297   : > { %8017 = vmatmul.msk.f32.vlgmr.msra.gmra.mxu0 %vm968_vm2, %v8013_v0 }
 0x298   : > { %3433 = vmatpush.msra.mxu0 %v3401_v4  ;;  %3463 = vmatpush.msra.mxu1 %v3400_v10 }
 0x299   : > { %8030 = vmatmul.msk.f32.gmra.mxu2 %vm968_vm2, %v8026_v63  ;;  %v10577_v21 = vpop.f32.mrf.mxu3 }
 0x29a   : > { %3434 = vmatpush.msra.mxu0 %v3399_v54  ;;  %v10579_v22 = vpop.f32.mrf.mxu1  ;;  %v3486_v54 = vld [vmem:[%s13181_s6 + $0x8] sm:$0xff] }
 0x29b   : > { %v10589_v5 = vpop.f32.mrf.mxu2  ;;  %3496 = vperm.xlu2 %8900, %v3486_v54  }
 0x29c   : > { %v10587_v26 = vpop.f32.mrf.mxu0 }
 0x29d   : > { %8022 = vmatmul.msk.f32.gmra.mxu1 %vm968_vm2, %v8014_v61 }
 0x29e   : > { %8035 = vmatmul.msk.f32.gmra.mxu3 %vm968_vm2, %v8027_v23 }
 0x29f   : > { %8018 = vmatmul.msk.f32.gmra.mxu0 %vm968_vm2, %v8014_v61 }
 0x2a1   : > { %8031 = vmatmul.msk.f32.gmra.mxu2 %vm968_vm2, %v8027_v23  ;;  %v10595_v2 = vpop.f32.mrf.mxu3  ;;  %v8063_v23 = vld [vmem:[%s13180_s5 + $0x310] sm:$0xff] }
 0x2a2   : > { %v10597_v25 = vpop.f32.mrf.mxu1 }
 0x2a3   : > { %v10607_v32 = vpop.f32.mrf.mxu2 }
 0x2a4   : > { %v10605_v20 = vpop.f32.mrf.mxu0 }
 0x2a5   : > { %8023 = vmatmul.msk.f32.gmra.mxu1 %vm968_vm2, %v8015_v53 }
 0x2a6   : > { %8036 = vmatmul.msk.f32.gmra.mxu3 %vm968_vm2, %v8028_v30 }
 0x2a7   : > { %8019 = vmatmul.msk.f32.gmra.mxu0 %vm968_vm2, %v8015_v53 }
 0x2a9   : > { %8032 = vmatmul.msk.f32.gmra.mxu2 %vm968_vm2, %v8028_v30  ;;  %v10613_v28 = vpop.f32.mrf.mxu3 }
 0x2aa   : > { %v10615_v14 = vpop.f32.mrf.mxu1 }
 0x2ab   : > { %v10625_v9 = vpop.f32.mrf.mxu2 }
 0x2ac   : > { %v10623_v59 = vpop.f32.mrf.mxu0 }
 0x2ad   : > { %8024 = vmatmul.msk.f32.gmra.mxu1 %vm968_vm2, %v8016_v16 }
 0x2ae   : > { %8057 = vmatmul.msk.f32.vlgmr.msrb.gmra.mxu3 %vm968_vm2, %v8049_v62 }
 0x2af   : > { %8020 = vmatmul.msk.f32.gmra.mxu0 %vm968_vm2, %v8016_v16  ;;  %v3519_v16 = vld [vmem:[%s13182_s7 + $0x10] sm:$0xff] }
 0x2b0   : > { %3533 = vperm.xlu2 %8900, %v3519_v16  }
 0x2b1   : > { %8053 = vmatmul.msk.f32.vlgmr.msrb.gmra.mxu2 %vm968_vm2, %v8049_v62  ;;  %v10631_v34 = vpop.f32.mrf.mxu3 }
 0x2b2   : > { %v10633_v36 = vpop.f32.mrf.mxu1 }
 0x2b3   : > { %v10643_v24 = vpop.f32.mrf.mxu2 }
 0x2b4   : > { %v10641_v6 = vpop.f32.mrf.mxu0 }
 0x2b5   : > { %8045 = vmatmul.msk.f32.vlgmr.msrb.gmra.mxu1 %vm968_vm2, %v8037_v33 }
 0x2b6   : > { %8058 = vmatmul.msk.f32.gmra.mxu3 %vm968_vm2, %v8050_v35 }
 0x2b7   : > { %8041 = vmatmul.msk.f32.vlgmr.msrb.gmra.mxu0 %vm968_vm2, %v8037_v33 }
 0x2b9   : > { %8054 = vmatmul.msk.f32.gmra.mxu2 %vm968_vm2, %v8050_v35  ;;  %v10649_v18 = vpop.f32.mrf.mxu3  ;;  %v8064_v35 = vld [vmem:[%s13180_s5 + $0x318] sm:$0xff] }
 0x2ba   : > { %v10651_v38 = vpop.f32.mrf.mxu1 }
 0x2bb   : > { %v10661_v31 = vpop.f32.mrf.mxu2 }
 0x2bc   : > { %v10659_v41 = vpop.f32.mrf.mxu0 }
 0x2bd   : > { %8046 = vmatmul.msk.f32.gmra.mxu1 %vm968_vm2, %v8038_v7 }
 0x2be   : > { %8059 = vmatmul.msk.f32.gmra.mxu3 %vm968_vm2, %v8051_v47 }
 0x2bf   : > { %8042 = vmatmul.msk.f32.gmra.mxu0 %vm968_vm2, %v8038_v7 }
 0x2c1   : > { %8055 = vmatmul.msk.f32.gmra.mxu2 %vm968_vm2, %v8051_v47  ;;  %v10667_v56 = vpop.f32.mrf.mxu3 }
 0x2c2   : > { %v10669_v44 = vpop.f32.mrf.mxu1 }
 0x2c3   : > { %v10679_v48 = vpop.f32.mrf.mxu2 }
 0x2c4   : > { %v10677_v45 = vpop.f32.mrf.mxu0 }
 0x2c5   : > { %8047 = vmatmul.msk.f32.gmra.mxu1 %vm968_vm2, %v8039_v43 }
 0x2c6   : > { %8060 = vmatmul.msk.f32.gmra.mxu3 %vm968_vm2, %v8052_v39 }
 0x2c7   : > { %8043 = vmatmul.msk.f32.gmra.mxu0 %vm968_vm2, %v8039_v43 }
 0x2c9   : > { %8056 = vmatmul.msk.f32.gmra.mxu2 %vm968_vm2, %v8052_v39  ;;  %v10685_v49 = vpop.f32.mrf.mxu3 }
 0x2ca   : > { %13267 = vst [vmem:[#allocation10_spill] sm:$0xff] %v10685_v49  ;;  %v10687_v50 = vpop.f32.mrf.mxu1 }
 0x2cb   : > { %13268 = vst [vmem:[#allocation11_spill] sm:$0xff] %v10687_v50  ;;  %v10694_v60 = vpop.f32.mrf.mxu2 }
 0x2cc   : > { %v10692_v57 = vpop.f32.mrf.mxu0  ;;  %13270 = vst [vmem:[#allocation13_spill] sm:$0xff] %v10694_v60 }
 0x2cd   : > { %13269 = vst [vmem:[#allocation12_spill] sm:$0xff] %v10692_v57  ;;  %8048 = vmatmul.msk.f32.gmra.mxu1 %vm968_vm2, %v8040_v51 }
 0x2cf   : > { %8044 = vmatmul.msk.f32.gmra.mxu0 %vm968_vm2, %v8040_v51 }
 0x2d1   : > { %v10698_v0 = vpop.f32.mrf.mxu3 }
 0x2d2   : > { %v10700_v12 = vpop.f32.mrf.mxu1 }
 0x2d3   : > { %v10707_v8 = vpop.f32.mrf.mxu2 }
 0x2d4   : > { %v10705_v52 = vpop.f32.mrf.mxu0 }
 0x2d5   : > { %8069 = vmatmul.msk.f32.vlgmr.msra.gmra.mxu1 %vm968_vm2, %v8061_v58 }
 0x2d7   : > { %8065 = vmatmul.msk.f32.vlgmr.msra.gmra.mxu0 %vm968_vm2, %v8061_v58 }
 0x2d9   : > { %v10713_v17 = vpop.f32.mrf.mxu3 }
 0x2da   : > { %v10711_v63 = vpop.f32.mrf.mxu1 }
 0x2db   : > { %v10720_v10 = vpop.f32.mrf.mxu2 }
 0x2dc   : > { %v10718_v4 = vpop.f32.mrf.mxu0 }
 0x2dd   : > { %8070 = vmatmul.msk.f32.gmra.mxu1 %vm968_vm2, %v8062_v19 }
 0x2df   : > { %8066 = vmatmul.msk.f32.gmra.mxu0 %vm968_vm2, %v8062_v19 }
 0x2e1   : > { %v10734_v30 = vpop.f32.mrf.mxu3 }
 0x2e2   : > { %v10727_v61 = vpop.f32.mrf.mxu1  ;;  %13272 = vst [vmem:[#allocation15_spill] sm:$0xff] %v10734_v30 }
 0x2e3   : > { %v10740_v62 = vpop.f32.mrf.mxu2 }
 0x2e4   : > { %v10732_v53 = vpop.f32.mrf.mxu0  ;;  %13273 = vst [vmem:[#allocation16_spill] sm:$0xff] %v10740_v62 }
 0x2e5   : > { %13271 = vst [vmem:[#allocation14_spill] sm:$0xff] %v10732_v53  ;;  %8071 = vmatmul.msk.f32.gmra.mxu1 %vm968_vm2, %v8063_v23 }
 0x2e7   : > { %8067 = vmatmul.msk.f32.gmra.mxu0 %vm968_vm2, %v8063_v23 }
 0x2e9   : > { %v10751_v47 = vpop.f32.mrf.mxu3 }
 0x2ea   : > { %v10743_v33 = vpop.f32.mrf.mxu1  ;;  %13276 = vst [vmem:[#allocation19_spill] sm:$0xff] %v10751_v47 }
 0x2eb   : > { %13274 = vst [vmem:[#allocation17_spill] sm:$0xff] %v10743_v33  ;;  %v10754_v43 = vpop.f32.mrf.mxu2 }
 0x2ec   : > { %v10748_v7 = vpop.f32.mrf.mxu0  ;;  %13277 = vst [vmem:[#allocation20_spill] sm:$0xff] %v10754_v43 }
 0x2ed   : > { %13275 = vst [vmem:[#allocation18_spill] sm:$0xff] %v10748_v7  ;;  %8072 = vmatmul.msk.f32.gmra.mxu1 %vm968_vm2, %v8064_v35 }
 0x2ef   : > { %8068 = vmatmul.msk.f32.gmra.mxu0 %vm968_vm2, %v8064_v35 }
 0x2f1   : > { %v10756_v58 = vpop.f32.mrf.mxu3 }
 0x2f2   : > { %v2841_v39 = vpop.f32.mrf.mxu1 }
 0x2f3   : > { %v10758_v19 = vpop.f32.mrf.mxu2 }
 0x2f4   : > { %v2812_v51 = vpop.f32.mrf.mxu0 }
 0x2f9   : > { %v10764_v16 = vpop.f32.mrf.mxu3 }
 0x2fa   : > { %v10760_v54 = vpop.f32.mrf.mxu1  ;;  %13278 = vst [vmem:[#allocation21_spill] sm:$0xff] %v10764_v16 }
 0x2fc   : > { %v10762_v23 = vpop.f32.mrf.mxu0  ;;  %v10768_v33 = vpop.f32.mrf.mxu2 }
 0x2fd   : > { %13280 = vst [vmem:[#allocation23_spill] sm:$0xff] %v10768_v33 }
 0x301   : > { %v10774_v43 = vpop.f32.mrf.mxu3 }
 0x302   : > { %v10766_v7 = vpop.f32.mrf.mxu1  ;;  %13283 = vst [vmem:[#allocation26_spill] sm:$0xff] %v10774_v43 }
 0x303   : > { %13279 = vst [vmem:[#allocation22_spill] sm:$0xff] %v10766_v7 }
 0x304   : > { %v10770_v47 = vpop.f32.mrf.mxu0  ;;  %v10778_v62 = vpop.f32.mrf.mxu2 }
 0x305   : > { %13281 = vst [vmem:[#allocation24_spill] sm:$0xff] %v10770_v47 }
 0x306   : > { %13285 = vst [vmem:[#allocation28_spill] sm:$0xff] %v10778_v62 }
 0x309   : > { %v10782_v57 = vpop.f32.mrf.mxu3 }
 0x30a   : > { %v10772_v35 = vpop.f32.mrf.mxu1  ;;  %13286 = vst [vmem:[#allocation29_spill] sm:$0xff] %v10782_v57 }
 0x30b   : > { %13282 = vst [vmem:[#allocation25_spill] sm:$0xff] %v10772_v35 }
 0x30c   : > { %v10776_v60 = vpop.f32.mrf.mxu0  ;;  %v10784_v16 = vpop.f32.mrf.mxu2 }
 0x30d   : > { %13284 = vst [vmem:[#allocation27_spill] sm:$0xff] %v10776_v60 }
 0x30e   : > { %13287 = vst [vmem:[#allocation30_spill] sm:$0xff] %v10784_v16  ;;  %v2230_v16 = vadd.f32 %v10557_v13, %v10495_v29 }
 0x311   : > { %v10790_v47 = vpop.f32.mrf.mxu3 }
 0x312   : > { %v3049_v49 = vpop.f32.mrf.mxu1 }
 0x314   : > { %v10780_v30 = vpop.f32.mrf.mxu0  ;;  %v10792_v35 = vpop.f32.mrf.mxu2 }
 0x315   : > { %13290 = vst [vmem:[#allocation33_spill] sm:$0xff] %v10792_v35  ;;  %v2334_v35 = vadd.f32 %v10555_v40, %v2230_v16 }
 0x319   : > { %v10798_v62 = vpop.f32.mrf.mxu3 }
 0x31a   : > { %v10786_v7 = vpop.f32.mrf.mxu1  ;;  %13293 = vst [vmem:[#allocation36_spill] sm:$0xff] %v10798_v62 }
 0x31b   : > { %13288 = vst [vmem:[#allocation31_spill] sm:$0xff] %v10786_v7 }
 0x31c   : > { %v10788_v33 = vpop.f32.mrf.mxu0  ;;  %v10802_v50 = vpop.f32.mrf.mxu2 }
 0x31d   : > { %13289 = vst [vmem:[#allocation32_spill] sm:$0xff] %v10788_v33  ;;  %v2229_v33 = vadd.f32 %v10565_v46, %v10500_v27  ;;  %v2231_v27 = vadd.f32 %v10587_v26, %v10519_v1  ;;  %v2234_v1 = vadd.f32 %v10597_v25, %v10531_v55 }
 0x31e   : > { %13295 = vst [vmem:[#allocation38_spill] sm:$0xff] %v10802_v50 }
 0x31f   : > { %v2333_v62 = vadd.f32 %v10567_v3, %v2229_v33  ;;  %v2335_v16 = vadd.f32 %v10589_v5, %v2231_v27 }
 0x321   : > { %v2437_v29 = vadd.f32 %v10641_v6, %v2333_v62  ;;  %v2233_v6 = vadd.f32 %v10605_v20, %v10535_v42 }
 0x322   : > { %v10794_v43 = vpop.f32.mrf.mxu1 }
 0x323   : > { %13291 = vst [vmem:[#allocation34_spill] sm:$0xff] %v10794_v43  ;;  %v10811_v43 = vpop.f32.mrf.mxu3  ;;  %v2541_v3 = vadd.f32 %v10643_v24, %v2437_v29 }
 0x324   : > { %v10796_v60 = vpop.f32.mrf.mxu0  ;;  %v10817_v50 = vpop.f32.mrf.mxu2 }
 0x325   : > { %13292 = vst [vmem:[#allocation35_spill] sm:$0xff] %v10796_v60 }
 0x32a   : > { %v10800_v53 = vpop.f32.mrf.mxu1 }
 0x32b   : > { %13294 = vst [vmem:[#allocation37_spill] sm:$0xff] %v10800_v53  ;;  %v2438_v53 = vadd.f32 %v10633_v36, %v2334_v35  ;;  %v10837_v26 = vpop.f32.mrf.mxu3 }
 0x32c   : > { %v10804_v57 = vpop.f32.mrf.mxu0  ;;  %v10843_v24 = vpop.f32.mrf.mxu2 }
 0x32d   : > { %13296 = vst [vmem:[#allocation39_spill] sm:$0xff] %v10804_v57  ;;  %v2232_v57 = vadd.f32 %v10579_v22, %v10515_v15  ;;  %v2542_v40 = vadd.f32 %v10631_v34, %v2438_v53  ;;  %v2645_v22 = vadd.f32 %v10705_v52, %v2541_v3  ;;  %v2439_v34 = vadd.f32 %v10659_v41, %v2335_v16  ;;  %v13302_v3 = vld [vmem:[#allocation15_spill] sm:$0xff] }
 0x32f   : > { %v2336_v46 = vadd.f32 %v10577_v21, %v2232_v57  ;;  %v2646_v36 = vadd.f32 %v10700_v12, %v2542_v40  ;;  %v2338_v12 = vadd.f32 %v10595_v2, %v2234_v1  ;;  %v2543_v55 = vadd.f32 %v10661_v31, %v2439_v34  ;;  %v13301_v40 = vld [vmem:[#allocation12_spill] sm:$0xff] }
 0x330   : > { %v2236_v2 = vadd.f32 %v10615_v14, %v10547_v11  ;;  %v13306_v34 = vld [vmem:[#allocation16_spill] sm:$0xff] }
 0x331   : > { %v2440_v15 = vadd.f32 %v10651_v38, %v2336_v46  ;;  %v2750_v21 = vadd.f32 %v10698_v0, %v2646_v36  ;;  %v2749_v38 = vadd.f32 %v10707_v8, %v2645_v22  ;;  %v2337_v0 = vadd.f32 %v10607_v32, %v2233_v6  ;;  %v13305_v22 = vld [vmem:[#allocation10_spill] sm:$0xff] }
 0x332   : > { %v3257_v7 = vpop.f32.mrf.mxu1  ;;  %v2442_v42 = vadd.f32 %v10669_v44, %v2338_v12  ;;  %v2235_v32 = vadd.f32 %v10623_v59, %v10551_v37  ;;  %v2340_v11 = vadd.f32 %v10613_v28, %v2236_v2  ;;  %v13299_v28 = vld [vmem:[#allocation21_spill] sm:$0xff]  ;;  %v13307_v6 = vld [vmem:[#allocation22_spill] sm:$0xff]  ;;  %v3492_v2 = vpop.permute.xlu0 %3491 }
 0x333   : > { %v2544_v5 = vadd.f32 %v10649_v18, %v2440_v15  ;;  %v2854_v57 = vadd.f32 %v2841_v39, %v2750_v21  ;;  %v2853_v41 = vadd.f32 %v2812_v51, %v2749_v38  ;;  %v2647_v18 = vadd.f32 %v10718_v4, %v2543_v55  ;;  %v3361_v39 = vpop.f32.mrf.mxu3  ;;  %v13308_v38 = vld [vmem:[#allocation32_spill] sm:$0xff] }
 0x334   : > { %v10813_v60 = vpop.f32.mrf.mxu0  ;;  %v2441_v53 = vadd.f32 %v10677_v45, %v2337_v0  ;;  %v2546_v44 = vadd.f32 %v10667_v56, %v2442_v42  ;;  %v2339_v56 = vadd.f32 %v10625_v9, %v2235_v32  ;;  %v13311_v0 = vld [vmem:[#allocation24_spill] sm:$0xff] }
 0x335   : > { %v2648_v25 = vadd.f32 %v10711_v63, %v2544_v5  ;;  %v2958_v8 = vadd.f32 %v10756_v58, %v2854_v57  ;;  %v2957_v63 = vadd.f32 %v10758_v19, %v2853_v41  ;;  %v2751_v4 = vadd.f32 %v10720_v10, %v2647_v18  ;;  %v13297_v10 = vld [vmem:[#allocation11_spill] sm:$0xff] }
 0x336   : > { %v2545_v14 = vadd.f32 %v10679_v48, %v2441_v53  ;;  %v2650_v45 = vadd.f32 %v10727_v61, %v2546_v44  ;;  %v2444_v19 = vadd.f32 %v13297_v10, %v2340_v11  ;;  %v13300_v48 = vld [vmem:[#allocation33_spill] sm:$0xff]  ;;  %v2443_v46 = vadd.f32 %v13301_v40, %v2339_v56  ;;  %v13312_v53 = vld [vmem:[#allocation36_spill] sm:$0xff]  ;;  %v13314_v44 = vld [vmem:[#allocation26_spill] sm:$0xff] }
 0x337   : > { %v2752_v31 = vadd.f32 %v10713_v17, %v2648_v25  ;;  %v3062_v62 = vadd.f32 %v3049_v49, %v2958_v8  ;;  %v3061_v58 = vadd.f32 %v10780_v30, %v2957_v63  ;;  %v3332_v17 = vpop.f32.mrf.mxu2  ;;  %v2855_v37 = vadd.f32 %v10762_v23, %v2751_v4  ;;  %v13303_v23 = vld [vmem:[#allocation23_spill] sm:$0xff]  ;;  %v13310_v25 = vld [vmem:[#allocation17_spill] sm:$0xff] }
 0x338   : > { %v2754_v36 = vadd.f32 %v13302_v3, %v2650_v45  ;;  %v2548_v1 = vadd.f32 %v13305_v22, %v2444_v19  ;;  %v13316_v56 = vld [vmem:[#allocation19_spill] sm:$0xff]  ;;  %v13317_v19 = vld [vmem:[#allocation28_spill] sm:$0xff]  ;;  %v13320_v40 = vld [vmem:[#allocation25_spill] sm:$0xff] }
 0x339   : > { %v2856_v51 = vadd.f32 %v10760_v54, %v2752_v31  ;;  %v3166_v59 = vadd.f32 %v10790_v47, %v3062_v62  ;;  %v13298_v54 = vld [vmem:[#allocation14_spill] sm:$0xff]  ;;  %v3165_v27 = vadd.f32 %v13300_v48, %v3061_v58  ;;  %v2959_v16 = vadd.f32 %v13303_v23, %v2855_v37  ;;  %v13304_v47 = vld [vmem:[#allocation31_spill] sm:$0xff] }
 0x33a   : > { %v10825_v13 = vpop.f32.mrf.mxu1  ;;  %v2649_v35 = vadd.f32 %v13298_v54, %v2545_v14  ;;  %v2858_v5 = vadd.f32 %v13307_v6, %v2754_v36  ;;  %v2652_v41 = vadd.f32 %v13310_v25, %v2548_v1  ;;  %v13313_v62 = vld [vmem:[#allocation18_spill] sm:$0xff]  ;;  %v13321_v3 = vld [vmem:[#allocation35_spill] sm:$0xff]  ;;  %v3497_v1 = vpop.permute.xlu2 %3496  ;;  %v13324_v6 = vld [vmem:[#allocation29_spill] sm:$0xff] }
 0x33b   : > { %v2960_v29 = vadd.f32 %v13299_v28, %v2856_v51  ;;  %v3270_v61 = vadd.f32 %v3257_v7, %v3166_v59  ;;  %v3269_v9 = vadd.f32 %v10813_v60, %v3165_v27  ;;  %v3063_v57 = vadd.f32 %v13308_v38, %v2959_v16  ;;  %v13309_v7 = vld [vmem:[#allocation13_spill] sm:$0xff]  ;;  %v3364_v18 = vpop.f32.mrf.mxu3  ;;  %v3524_v59 = vpop.permute.xlu1 %3523  ;;  %v13319_v27 = vld [vmem:[#allocation20_spill] sm:$0xff] }
 0x33c   : > { %v10830_v33 = vpop.f32.mrf.mxu0  ;;  %v2753_v21 = vadd.f32 %v13306_v34, %v2649_v35  ;;  %v2547_v55 = vadd.f32 %v13309_v7, %v2443_v46  ;;  %v2962_v4 = vadd.f32 %v13314_v44, %v2858_v5  ;;  %v2756_v10 = vadd.f32 %v13316_v56, %v2652_v41  ;;  %v13318_v35 = vld [vmem:[#allocation34_spill] sm:$0xff] }
 0x33d   : > { %v3064_v15 = vadd.f32 %v13304_v47, %v2960_v29  ;;  %v3374_v12 = vadd.f32 %v3361_v39, %v3270_v61  ;;  %v3373_v31 = vadd.f32 %v3332_v17, %v3269_v9  ;;  %v13315_v39 = vld [vmem:[#allocation38_spill] sm:$0xff]  ;;  %v13322_v47 = vld [vmem:[#allocation27_spill] sm:$0xff] }
 0x33e   : > { %v2857_v42 = vadd.f32 %v13311_v0, %v2753_v21  ;;  %v2651_v32 = vadd.f32 %v13313_v62, %v2547_v55  ;;  %v3167_v11 = vadd.f32 %v13315_v39, %v3063_v57  ;;  %v3066_v17 = vadd.f32 %v13318_v35, %v2962_v4  ;;  %v13325_v41 = vld [vmem:[#allocation30_spill] sm:$0xff] }
 0x33f   : > { %v3168_v60 = vadd.f32 %v13312_v53, %v3064_v15  ;;  %v3335_v51 = vpop.f32.mrf.mxu2  ;;  %v2860_v46 = vadd.f32 %v13320_v40, %v2756_v10 }
 0x340   : > { %v2961_v54 = vadd.f32 %v13317_v19, %v2857_v42  ;;  %v3271_v28 = vadd.f32 %v10830_v33, %v3167_v11  ;;  %v2755_v61 = vadd.f32 %v13319_v27, %v2651_v32  ;;  %v3170_v22 = vadd.f32 %v10811_v43, %v3066_v17  ;;  %v3529_v43 = vpop.permute.xlu0 %3528 }
 0x341   : > { %v3272_v14 = vadd.f32 %v10825_v13, %v3168_v60  ;;  %v2964_v5 = vadd.f32 %v13324_v6, %v2860_v46 }
 0x342   : > { %v10848_v52 = vpop.f32.mrf.mxu1  ;;  %v3065_v13 = vadd.f32 %v13321_v3, %v2961_v54  ;;  %v2859_v15 = vadd.f32 %v13322_v47, %v2755_v61  ;;  %v3375_v33 = vadd.f32 %v3335_v51, %v3271_v28  ;;  %v3534_v56 = vpop.permute.xlu2 %3533 }
 0x343   : > { %v3376_v36 = vadd.f32 %v3364_v18, %v3272_v14  ;;  %v3367_v38 = vpop.f32.mrf.mxu3  ;;  %v3274_v7 = vadd.f32 %v10848_v52, %v3170_v22  ;;  %v13326_v18 = vld [vmem:[#allocation37_spill] sm:$0xff]  ;;  %v3502_v39 = vpop.permute.xlu1 %3501 }
 0x344   : > { %v10854_v20 = vpop.f32.mrf.mxu0  ;;  %v2963_v0 = vadd.f32 %v13325_v41, %v2859_v15  ;;  %v3669_v41 = vld [vmem:[%s13183_s8 + $0xc0] sm:$0xff] }
 0x347   : > { %v3338_v42 = vpop.f32.mrf.mxu2 }
 0x348   : > { %v3507_v61 = vpop.permute.xlu0 %3506 }
 0x34a   : > { %v10872_v49 = vpop.f32.mrf.mxu1 }
 0x34c   : > { %v10879_v30 = vpop.f32.mrf.mxu0 }
 0x34f   : > { %v3341_v54 = vpop.f32.mrf.mxu2 }
 0x352   : > { %v3465_v8 = vpop.f32.mrf.mxu1 }
 0x353   : > { %v3478_v63 = vadd.f32 %v3465_v8, %v3374_v12  ;;  %v3169_v12 = vadd.f32 %v10817_v50, %v3065_v13  ;;  %v3068_v8 = vadd.f32 %v13326_v18, %v2964_v5  ;;  %v3539_v13 = vpop.permute.xlu1 %3538 }
 0x354   : > { %v3436_v58 = vpop.f32.mrf.mxu0 }
 0x355   : > { %v3510_v45 = vmul.f32 %v3492_v2, %v3478_v63  ;;  %v3477_v37 = vadd.f32 %v3436_v58, %v3373_v31  ;;  %v13327_v31 = vld [vmem:[#allocation39_spill] sm:$0xff]  ;;  %v3378_v63 = vadd.f32 %v3367_v38, %v3274_v7  ;;  %v3172_v44 = vadd.f32 %v10837_v26, %v3068_v8  ;;  %v3674_v38 = vld [vmem:[%s13183_s8 + $0xe8] sm:$0x1] }
 0x356   : > { %v3067_v50 = vadd.f32 %v13327_v31, %v2963_v0  ;;  %8073 = vmatpush.msk.msra.mxu3 %vm460_vm0, %v3674_v38  ;;  %v3671_v7 = vld [vmem:[%s13183_s8 + $0xd0] sm:$0xff]  ;;  %v3668_v0 = vld [vmem:[%s13183_s8 + $0xb8] sm:$0xff]  ;;  %v3666_v31 = vld [vmem:[%s13183_s8 + $0xa8] sm:$0xff] }
 0x357   : > { %v3509_v29 = vmul.f32 %v3492_v2, %v3477_v37  ;;  %v10904_v48 = vadd.f32 %v3524_v59, %v3510_v45  ;;  %v3273_v2 = vadd.f32 %v10854_v20, %v3169_v12  ;;  %v3276_v20 = vadd.f32 %v10872_v49, %v3172_v44 }
 0x358   : > { %v3171_v11 = vadd.f32 %v10843_v24, %v3067_v50  ;;  %v3665_v50 = vld [vmem:[%s13183_s8 + $0xa0] sm:$0xff] }
 0x359   : > { %v3550_v23 = vmax.f32 %v10904_v48, 0.0  ;;  %v10910_v16 = vadd.f32 %v3524_v59, %v3509_v29  ;;  %v3377_v4 = vadd.f32 %v3338_v42, %v3273_v2  ;;  %v3370_v59 = vpop.f32.mrf.mxu3  ;;  %v3673_v48 = vld [vmem:[%s13183_s8 + $0xe0] sm:$0xff] }
 0x35a   : > { %v3468_v9 = vpop.f32.mrf.mxu1  ;;  %v3275_v26 = vadd.f32 %v10879_v30, %v3171_v11  ;;  %v3380_v35 = vadd.f32 %v3370_v59, %v3276_v20  ;;  %3723 = vmatpush.msra.mxu3 %v3673_v48  ;;  %v4177_v11 = vld [vmem:[%s13178_s3] sm:$0xff] }
 0x35b   : > { %v3480_v34 = vadd.f32 %v3468_v9, %v3376_v36  ;;  %3567 = vrot.lane.b32.xlu0 %v3550_v23, %s13323_s21  ;;  %v3549_v21 = vmax.f32 %v10910_v16, 0.0  ;;  %v4159_v20 = vld [vmem:[%s13177_s2] sm:$0xff] }
 0x35c   : > { %v3439_v57 = vpop.f32.mrf.mxu0  ;;  %v3379_v29 = vadd.f32 %v3341_v54, %v3275_v26  ;;  %v3657_v59 = vld [vmem:[%s13183_s8 + $0x60] sm:$0xff]  ;;  %v3655_v26 = vld [vmem:[%s13183_s8 + $0x50] sm:$0xff]  ;;  %v3652_v54 = vld [vmem:[%s13183_s8 + $0x38] sm:$0xff] }
 0x35d   : > { %v3512_v55 = vmul.f32 %v3497_v1, %v3480_v34  ;;  %v3479_v25 = vadd.f32 %v3439_v57, %v3375_v33  ;;  %3565 = vrot.lane.b32.xlu2 %v3549_v21, %s13323_s21  ;;  %v3660_v57 = vld [vmem:[%s13183_s8 + $0x78] sm:$0xff] }
 0x35e   : > { %3691 = vmatpush.msra.mxu2 %v3660_v57  ;;  %v3768_v57 = vld [vmem:[%s13184_s9 + $0x98] sm:$0x1] }
 0x35f   : > { %v3511_v53 = vmul.f32 %v3497_v1, %v3479_v25  ;;  %v3544_v60 = vadd.f32 %v3529_v43, %v3512_v55  ;;  %v3659_v55 = vld [vmem:[%s13183_s8 + $0x70] sm:$0xff]  ;;  %8083 = vmatpush.msk.msrb.mxu1 %vm460_vm0, %v3768_v57  ;;  %v3912_v57 = vld [vmem:[%s13186_s11 + $0x48] sm:$0xff] }
 0x360   : > { %3692 = vmatpush.msra.mxu2 %v3659_v55  ;;  %v3765_v55 = vld [vmem:[%s13184_s9 + $0x80] sm:$0xff] }
 0x361   : > { %v10928_v52 = vadd.f32 %v3529_v43, %v3511_v53  ;;  %v3552_v62 = vmax.f32 %v3544_v60, 0.0  ;;  %v3670_v43 = vld [vmem:[%s13183_s8 + $0xc8] sm:$0xff]  ;;  %v3667_v60 = vld [vmem:[%s13183_s8 + $0xb0] sm:$0xff]  ;;  %3831 = vmatpush.msrb.mxu1 %v3765_v55  ;;  %v3911_v55 = vld [vmem:[%s13186_s11 + $0x40] sm:$0xff] }
 0x362   : > { %v3471_v32 = vpop.f32.mrf.mxu1 }
 0x363   : > { %v3482_v51 = vadd.f32 %v3471_v32, %v3378_v63  ;;  %v3551_v58 = vmax.f32 %v10928_v52, 0.0 }
 0x364   : > { %v3442_v14 = vpop.f32.mrf.mxu0 }
 0x365   : > { %v3514_v45 = vmul.f32 %v3502_v39, %v3482_v51  ;;  %v3481_v37 = vadd.f32 %v3442_v14, %v3377_v4  ;;  %3569 = vrot.lane.b32.xlu1 %v3551_v58, %s13323_s21  ;;  %3571 = vrot.lane.b32.xlu2 %v3552_v62, %s13323_s21  ;;  %v4160_v4 = vld [vmem:[%s13177_s2 + $0x8] sm:$0xff] }
 0x366   : > { %v4178_v14 = vld [vmem:[%s13178_s3 + $0x8] sm:$0xff] }
 0x367   : > { %v3513_v10 = vmul.f32 %v3502_v39, %v3481_v37  ;;  %v3546_v19 = vadd.f32 %v3534_v56, %v3514_v45  ;;  %v3662_v39 = vld [vmem:[%s13183_s8 + $0x88] sm:$0xff]  ;;  %v3661_v37 = vld [vmem:[%s13183_s8 + $0x80] sm:$0xff] }
 0x368   : > { %v3658_v45 = vld [vmem:[%s13183_s8 + $0x68] sm:$0xff] }
 0x369   : > { %v3545_v17 = vadd.f32 %v3534_v56, %v3513_v10  ;;  %v3554_v28 = vmax.f32 %v3546_v19, 0.0  ;;  %3693 = vmatpush.msra.mxu2 %v3658_v45  ;;  %v3656_v56 = vld [vmem:[%s13183_s8 + $0x58] sm:$0xff]  ;;  %v3654_v10 = vld [vmem:[%s13183_s8 + $0x48] sm:$0xff]  ;;  %v3653_v19 = vld [vmem:[%s13183_s8 + $0x40] sm:$0xff] }
 0x36a   : > { %v3474_v24 = vpop.f32.mrf.mxu1 }
 0x36b   : > { %v3484_v27 = vadd.f32 %v3474_v24, %v3380_v35  ;;  %v3553_v49 = vmax.f32 %v3545_v17, 0.0  ;;  %3694 = vmatpush.msra.mxu2 %v3657_v59  ;;  %v3651_v35 = vld [vmem:[%s13183_s8 + $0x30] sm:$0xff]  ;;  %v3650_v17 = vld [vmem:[%s13183_s8 + $0x28] sm:$0xff]  ;;  %v3648_v24 = vld [vmem:[%s13183_s8 + $0x18] sm:$0xff] }
 0x36c   : > { %v3445_v40 = vpop.f32.mrf.mxu0  ;;  %v4074_v59 = vld [vmem:[%s9459_s17 + $0xb8] sm:$0x1] }
 0x36d   : > { %v3516_v46 = vmul.f32 %v3507_v61, %v3484_v27  ;;  %v3483_v3 = vadd.f32 %v3445_v40, %v3379_v29  ;;  %3573 = vrot.lane.b32.xlu0 %v3553_v49, %s13323_s21  ;;  %3575 = vrot.lane.b32.xlu1 %v3554_v28, %s13323_s21  ;;  %v3647_v29 = vld [vmem:[%s13183_s8 + $0x10] sm:$0xff]  ;;  %v3646_v27 = vld [vmem:[%s13183_s8 + $0x8] sm:$0xff] }
 0x36e   : > { %3695 = vmatpush.msra.mxu2 %v3656_v56  ;;  %v4071_v56 = vld [vmem:[%s9459_s17 + $0x88] sm:$0xff] }
 0x36f   : > { %v3515_v30 = vmul.f32 %v3507_v61, %v3483_v3  ;;  %v3548_v36 = vadd.f32 %v3539_v13, %v3516_v46 }
 0x370   : > { %3696 = vmatpush.msra.mxu2 %v3655_v26 }
 0x371   : > { %v3547_v47 = vadd.f32 %v3539_v13, %v3515_v30  ;;  %v3556_v15 = vmax.f32 %v3548_v36, 0.0 }
 0x372   : > { %3697 = vmatpush.msra.mxu2 %v3654_v10  ;;  %v4068_v10 = vld [vmem:[%s9459_s17 + $0x58] sm:$0xff] }
 0x373   : > { %v3555_v9 = vmax.f32 %v3547_v47, 0.0 }
 0x374   : > { %3698 = vmatpush.msra.mxu2 %v3653_v19 }
 0x375   : > { %3577 = vrot.lane.b32.xlu2 %v3555_v9, %s13323_s21  ;;  %3579 = vrot.lane.b32.xlu0 %v3556_v15, %s13323_s21 }
 0x376   : > { %3699 = vmatpush.msra.mxu2 %v3652_v54 }
 0x378   : > { %3700 = vmatpush.msra.mxu2 %v3651_v35  ;;  %v4065_v35 = vld [vmem:[%s9459_s17 + $0x28] sm:$0xff] }
 0x37a   : > { %3701 = vmatpush.msra.mxu2 %v3650_v17 }
 0x3b7   : > { %v3566_v22 = vpop.permute.xlu2 %3565 }
 0x3bf   : > { %v3572_v5 = vpop.permute.xlu2 %3571 }
 0x3c0   : > { %v10964_v16 = vmax.f32 %v3552_v62, %v3572_v5  ;;  %v3664_v62 = vld [vmem:[%s13183_s8 + $0x98] sm:$0xff] }
 0x3cd   : > { %v3568_v33 = vpop.permute.xlu0 %3567 }
 0x3ce   : > { %v3581_v1 = vsel %vm961_vm3, %v3566_v22, %v3568_v33  ;;  %v10944_v34 = vmax.f32 %v3550_v23, %v3568_v33  ;;  %v3672_v23 = vld [vmem:[%s13183_s8 + $0xd8] sm:$0xff] }
 0x3cf   : > { %v10948_v6 = vmax.f32 %v3549_v21, %v3581_v1  ;;  %3724 = vmatpush.msra.mxu3 %v3672_v23  ;;  %v3578_v63 = vpop.permute.xlu2 %3577 }
 0x3d0   : > { %3611 = vrot.lane.b32.xlu2 %v10944_v34, %s13328_s22 }
 0x3d1   : > { %3609 = vrot.lane.b32.xlu1 %v10948_v6, %s13328_s22  ;;  %3725 = vmatpush.msra.mxu3 %v3671_v7  ;;  %v3764_v7 = vld [vmem:[%s13184_s9 + $0x78] sm:$0xff] }
 0x3d3   : > { %3726 = vmatpush.msra.mxu3 %v3670_v43  ;;  %v3761_v43 = vld [vmem:[%s13184_s9 + $0x60] sm:$0xff] }
 0x3d5   : > { %3727 = vmatpush.msra.mxu3 %v3669_v41  ;;  %v3762_v41 = vld [vmem:[%s13184_s9 + $0x68] sm:$0xff] }
 0x3d6   : > { %3832 = vmatpush.msrb.mxu1 %v3762_v41  ;;  %v3926_v41 = vld [vmem:[%s13186_s11 + $0xb8] sm:$0xff] }
 0x3d7   : > { %v3570_v21 = vpop.permute.xlu1 %3569  ;;  %3728 = vmatpush.msra.mxu3 %v3668_v0  ;;  %v3763_v0 = vld [vmem:[%s13184_s9 + $0x70] sm:$0xff] }
 0x3d8   : > { %v3582_v12 = vsel %vm961_vm3, %v3570_v21, %v3572_v5  ;;  %v3767_v21 = vld [vmem:[%s13184_s9 + $0x90] sm:$0x1] }
 0x3d9   : > { %v10976_v25 = vmax.f32 %v3551_v58, %v3582_v12  ;;  %3615 = vrot.lane.b32.xlu1 %v10964_v16, %s13328_s22  ;;  %3729 = vmatpush.msra.mxu3 %v3667_v60  ;;  %v3663_v58 = vld [vmem:[%s13183_s8 + $0x90] sm:$0xff]  ;;  %v3769_v12 = vld [vmem:[%s13184_s9 + $0xa0] sm:$0x1] }
 0x3da   : > { %8078 = vmatpush.msk.msrb.mxu0 %vm460_vm0, %v3767_v21  ;;  %v3757_v60 = vld [vmem:[%s13184_s9 + $0x40] sm:$0xff]  ;;  %v3941_v21 = vld [vmem:[%s13186_s11 + $0x130] sm:$0xff] }
 0x3db   : > { %3613 = vrot.lane.b32.xlu0 %v10976_v25, %s13328_s22  ;;  %3730 = vmatpush.msra.mxu3 %v3666_v31  ;;  %v3752_v31 = vld [vmem:[%s13184_s9 + $0x18] sm:$0xff] }
 0x3dc   : > { %3802 = vmatpush.msrb.mxu0 %v3764_v7  ;;  %v3940_v7 = vld [vmem:[%s13186_s11 + $0x128] sm:$0xff] }
 0x3dd   : > { %3731 = vmatpush.msra.mxu3 %v3665_v50  ;;  %v3753_v50 = vld [vmem:[%s13184_s9 + $0x20] sm:$0xff] }
 0x3de   : > { %3803 = vmatpush.msrb.mxu0 %v3761_v43  ;;  %v3910_v43 = vld [vmem:[%s13186_s11 + $0x38] sm:$0xff] }
 0x3df   : > { %v3574_v42 = vpop.permute.xlu0 %3573  ;;  %v3576_v18 = vpop.permute.xlu1 %3575  ;;  %3732 = vmatpush.msra.mxu3 %v3664_v62  ;;  %v3750_v62 = vld [vmem:[%s13184_s9 + $0x8] sm:$0xff] }
 0x3e0   : > { %v3583_v8 = vsel %vm961_vm3, %v3574_v42, %v3576_v18  ;;  %v10992_v2 = vmax.f32 %v3554_v28, %v3576_v18  ;;  %v3649_v28 = vld [vmem:[%s13183_s8 + $0x20] sm:$0xff]  ;;  %v3758_v42 = vld [vmem:[%s13184_s9 + $0x48] sm:$0xff]  ;;  %v3759_v18 = vld [vmem:[%s13184_s9 + $0x50] sm:$0xff] }
 0x3e1   : > { %v10994_v53 = vmax.f32 %v3553_v49, %v3583_v8  ;;  %3733 = vmatpush.msra.mxu3 %v3663_v58  ;;  %3702 = vmatpush.msra.mxu2 %v3649_v28  ;;  %v3645_v49 = vld [vmem:[%s13183_s8] sm:$0xff]  ;;  %v3760_v8 = vld [vmem:[%s13184_s9 + $0x58] sm:$0xff] }
 0x3e2   : > { %3804 = vmatpush.msrb.mxu0 %v3758_v42  ;;  %3833 = vmatpush.msrb.mxu1 %v3759_v18  ;;  %v3925_v42 = vld [vmem:[%s13186_s11 + $0xb0] sm:$0xff]  ;;  %v3908_v18 = vld [vmem:[%s13186_s11 + $0x28] sm:$0xff] }
 0x3e3   : > { %3617 = vrot.lane.b32.xlu2 %v10994_v53, %s13328_s22  ;;  %3619 = vrot.lane.b32.xlu0 %v10992_v2, %s13328_s22 }
 0x3e4   : > { %3734 = vmatpush.msra.mxu3 %v3662_v39  ;;  %3703 = vmatpush.msra.mxu2 %v3648_v24 }
 0x3e6   : > { %3735 = vmatpush.msra.mxu3 %v3661_v37  ;;  %3704 = vmatpush.msra.mxu2 %v3647_v29  ;;  %v11191_v29 = vld [vmem:[%s13176_s1] sm:$0xff] }
 0x3e7   : > { %v3580_v52 = vpop.permute.xlu0 %3579 }
 0x3e8   : > { %v3584_v32 = vsel %vm961_vm3, %v3578_v63, %v3580_v52  ;;  %v11013_v44 = vmax.f32 %v3556_v15, %v3580_v52  ;;  %3705 = vmatpush.msra.mxu2 %v3646_v27  ;;  %v3754_v63 = vld [vmem:[%s13184_s9 + $0x28] sm:$0xff]  ;;  %v3749_v52 = vld [vmem:[%s13184_s9] sm:$0xff] }
 0x3e9   : > { %v11018_v51 = vmax.f32 %v3555_v9, %v3584_v32  ;;  %v3751_v32 = vld [vmem:[%s13184_s9 + $0x10] sm:$0xff]  ;;  %v8136_v27 = vld [vmem:[%s9459_s17 + $0x228] sm:$0x1] }
 0x3ea   : > { %3706 = vmatpush.msra.mxu2 %v3645_v49  ;;  %v8133_v49 = vld [vmem:[%s9459_s17 + $0x1f8] sm:$0xff] }
 0x3eb   : > { %4168 = vperm.xlu0 %8558, %v4160_v4   ;;  %3623 = vrot.lane.b32.xlu2 %v11013_v44, %s13328_s22  ;;  %v4072_v4 = vld [vmem:[%s9459_s17 + $0xa8] sm:$0x1] }
 0x3ec   : > { %3621 = vrot.lane.b32.xlu1 %v11018_v51, %s13328_s22  ;;  %8088 = vmatpush.msk.msrb.mxu2 %vm460_vm0, %v3769_v12  ;;  %v3928_v12 = vld [vmem:[%s13186_s11 + $0xc8] sm:$0xff] }
 0x3f3   : > { %4181 = vperm.xlu0 %8558, %v4177_v11   ;;  %4186 = vperm.xlu2 %8900, %v4178_v14   ;;  %v4066_v11 = vld [vmem:[%s9459_s17 + $0x48] sm:$0xff]  ;;  %v4063_v14 = vld [vmem:[%s9459_s17 + $0x18] sm:$0xff] }
 0x3f4   : > { %4163 = vperm.xlu1 %8559, %v4159_v20  }
 0x42a   : > { %v3612_v61 = vpop.permute.xlu2 %3611 }
 0x42b   : > { %v3638_v40 = vmax.f32 %v10944_v34, %v3612_v61 }
 0x42d   : > { %8074 = vmatmul.msk.f32.vlgmr.msra.gmra.mxu3 %vm13254_vm14, %v3638_v40  ;;  %v8127_v40 = vld [vmem:[%s9459_s17 + $0x198] sm:$0xff] }
 0x43d   : > { %v3618_v22 = vpop.permute.xlu2 %3617 }
 0x443   : > { %v3610_v46 = vpop.permute.xlu1 %3609 }
 0x444   : > { %v3625_v3 = vsel %vm1422_vm7, %v3610_v46, %v3612_v61  ;;  %v8130_v61 = vld [vmem:[%s9459_s17 + $0x1c8] sm:$0xff] }
 0x445   : > { %v3637_v13 = vmax.f32 %v10948_v6, %v3625_v3  ;;  %v3624_v5 = vpop.permute.xlu2 %3623  ;;  %v11203_v46 = vld [vmem:[%s13176_s1 + $0x8] sm:$0xff]  ;;  %v8158_v3 = vld [vmem:[%s9459_s17 + $0x2f0] sm:$0x1] }
 0x446   : > { %v3644_v38 = vmax.f32 %v11013_v44, %v3624_v5 }
 0x447   : > { %3707 = vmatmul.f32.vlgmr.msra.gmra.mxu2 %v3637_v13  ;;  %v8155_v13 = vld [vmem:[%s9459_s17 + $0x2c0] sm:$0xff] }
 0x44b   : > { %v3616_v30 = vpop.permute.xlu1 %3615 }
 0x44c   : > { %v3640_v36 = vmax.f32 %v10964_v16, %v3616_v30 }
 0x44d   : > { %v3614_v47 = vpop.permute.xlu0 %3613 }
 0x44e   : > { %v3626_v15 = vsel %vm1422_vm7, %v3614_v47, %v3616_v30  ;;  %8075 = vmatmul.msk.f32.gmra.mxu3 %vm13254_vm14, %v3640_v36  ;;  %v8152_v30 = vld [vmem:[%s9459_s17 + $0x290] sm:$0xff]  ;;  %v8149_v36 = vld [vmem:[%s9459_s17 + $0x260] sm:$0xff]  ;;  %v3918_v47 = vld [vmem:[%s13186_s11 + $0x78] sm:$0xff] }
 0x44f   : > { %v3639_v9 = vmax.f32 %v10976_v25, %v3626_v15  ;;  %v3766_v25 = vld [vmem:[%s13184_s9 + $0x88] sm:$0xff]  ;;  %v3934_v15 = vld [vmem:[%s13186_s11 + $0xf8] sm:$0xff]  ;;  %3956 = vmatpush.msrb.mxu3 %v3918_v47 }
 0x450   : > { %3860 = vmatpush.msrb.mxu2 %v3766_v25  ;;  %v3927_v25 = vld [vmem:[%s13186_s11 + $0xc0] sm:$0xff] }
 0x451   : > { %3710 = vmatmul.f32.gmra.mxu2 %v3639_v9  ;;  %v3917_v9 = vld [vmem:[%s13186_s11 + $0x70] sm:$0xff] }
 0x452   : > { %3861 = vmatpush.msrb.mxu2 %v3763_v0  ;;  %3957 = vmatpush.msrb.mxu3 %v3917_v9  ;;  %v3909_v0 = vld [vmem:[%s13186_s11 + $0x30] sm:$0xff] }
 0x454   : > { %3862 = vmatpush.msrb.mxu2 %v3760_v8  ;;  %v3924_v8 = vld [vmem:[%s13186_s11 + $0xa8] sm:$0xff] }
 0x455   : > { %v3620_v33 = vpop.permute.xlu0 %3619 }
 0x456   : > { %v3627_v1 = vsel %vm1422_vm7, %v3618_v22, %v3620_v33  ;;  %v3642_v34 = vmax.f32 %v10992_v2, %v3620_v33  ;;  %v3755_v2 = vld [vmem:[%s13184_s9 + $0x30] sm:$0xff]  ;;  %3863 = vmatpush.msrb.mxu2 %v3757_v60  ;;  %v3916_v33 = vld [vmem:[%s13186_s11 + $0x68] sm:$0xff]  ;;  %v3906_v60 = vld [vmem:[%s13186_s11 + $0x18] sm:$0xff] }
 0x457   : > { %v3641_v6 = vmax.f32 %v10994_v53, %v3627_v1  ;;  %v3756_v53 = vld [vmem:[%s13184_s9 + $0x38] sm:$0xff]  ;;  %3805 = vmatpush.msrb.mxu0 %v3755_v2  ;;  %v3933_v22 = vld [vmem:[%s13186_s11 + $0xf0] sm:$0xff]  ;;  %v3932_v1 = vld [vmem:[%s13186_s11 + $0xe8] sm:$0xff]  ;;  %3958 = vmatpush.msrb.mxu3 %v3916_v33 }
 0x458   : > { %8076 = vmatmul.msk.f32.gmra.mxu3 %vm13254_vm14, %v3642_v34  ;;  %3834 = vmatpush.msrb.mxu1 %v3756_v53  ;;  %v3915_v34 = vld [vmem:[%s13186_s11 + $0x60] sm:$0xff]  ;;  %v8111_v33 = vld [vmem:[%s9459_s17 + $0x118] sm:$0xff] }
 0x459   : > { %3713 = vmatmul.f32.gmra.mxu2 %v3641_v6  ;;  %3806 = vmatpush.msrb.mxu0 %v3752_v31  ;;  %v3931_v6 = vld [vmem:[%s13186_s11 + $0xe0] sm:$0xff]  ;;  %v3922_v31 = vld [vmem:[%s13186_s11 + $0x98] sm:$0xff] }
 0x45a   : > { %3835 = vmatpush.msrb.mxu1 %v3753_v50  ;;  %3864 = vmatpush.msrb.mxu2 %v3754_v63  ;;  %v3907_v2 = vld [vmem:[%s13186_s11 + $0x20] sm:$0xff]  ;;  %v3905_v50 = vld [vmem:[%s13186_s11 + $0x10] sm:$0xff] }
 0x45b   : > { %3807 = vmatpush.msrb.mxu0 %v3749_v52  ;;  %3959 = vmatpush.msrb.mxu3 %v3915_v34  ;;  %v3923_v53 = vld [vmem:[%s13186_s11 + $0xa0] sm:$0xff]  ;;  %v3921_v63 = vld [vmem:[%s13186_s11 + $0x90] sm:$0xff]  ;;  %v3904_v52 = vld [vmem:[%s13186_s11 + $0x8] sm:$0xff] }
 0x45c   : > { %3836 = vmatpush.msrb.mxu1 %v3750_v62  ;;  %3865 = vmatpush.msrb.mxu2 %v3751_v32  ;;  %v3920_v62 = vld [vmem:[%s13186_s11 + $0x88] sm:$0xff]  ;;  %v3939_v32 = vld [vmem:[%s13186_s11 + $0x120] sm:$0xff] }
 0x45d   : > { %3985 = vmatpush.msra.mxu0 %v3934_v15  ;;  %v8115_v34 = vld [vmem:[%s9459_s17 + $0x168] sm:$0x1] }
 0x45e   : > { %v3622_v48 = vpop.permute.xlu1 %3621  ;;  %8097 = vmatpush.msk.msra.mxu2 %vm460_vm0, %v4072_v4  ;;  %v3919_v4 = vld [vmem:[%s13186_s11 + $0x80] sm:$0xff] }
 0x45f   : > { %v3628_v23 = vsel %vm1422_vm7, %v3622_v48, %v3624_v5  ;;  %3986 = vmatpush.msra.mxu0 %v3933_v22  ;;  %v3914_v5 = vld [vmem:[%s13186_s11 + $0x58] sm:$0xff]  ;;  %v3913_v48 = vld [vmem:[%s13186_s11 + $0x50] sm:$0xff]  ;;  %v3884_v22 = vld [vmem:[%s13185_s10 + $0x28] sm:$0xff] }
 0x460   : > { %v3643_v16 = vmax.f32 %v11018_v51, %v3628_v23  ;;  %8077 = vmatmul.msk.f32.gmra.mxu3 %vm13254_vm14, %v3644_v38  ;;  %v4069_v51 = vld [vmem:[%s9459_s17 + $0x78] sm:$0xff]  ;;  %vm13255_vm14 = vcmask 400384   ;;  %v3929_v23 = vld [vmem:[%s13186_s11 + $0xd0] sm:$0xff] }
 0x461   : > { %4103 = vmatpush.msra.mxu2 %v4069_v51  ;;  %3987 = vmatpush.msra.mxu0 %v3932_v1  ;;  %v3930_v38 = vld [vmem:[%s13186_s11 + $0xd8] sm:$0xff]  ;;  %v8108_v1 = vld [vmem:[%s9459_s17 + $0xe8] sm:$0xff] }
 0x462   : > { %3716 = vmatmul.f32.gmra.mxu2 %v3643_v16  ;;  %v3942_v16 = vld [vmem:[%s13186_s11 + $0x138] sm:$0xff]  ;;  %3960 = vmatpush.msrb.mxu3 %v3914_v5 }
 0x463   : > { %4104 = vmatpush.msra.mxu2 %v4066_v11  ;;  %3988 = vmatpush.msra.mxu0 %v3931_v6  ;;  %v3938_v51 = vld [vmem:[%s13186_s11 + $0x118] sm:$0xff]  ;;  %v3935_v11 = vld [vmem:[%s13186_s11 + $0x100] sm:$0xff]  ;;  %v3885_v6 = vld [vmem:[%s13185_s10 + $0x30] sm:$0xff] }
 0x464   : > { %4022 = vmatpush.msra.mxu1 %v3942_v16  ;;  %3961 = vmatpush.msrb.mxu3 %v3913_v48  ;;  %v3886_v5 = vld [vmem:[%s13185_s10 + $0x38] sm:$0xff] }
 0x465   : > { %4105 = vmatpush.msra.mxu2 %v4063_v14  ;;  %3989 = vmatpush.msra.mxu0 %v3930_v38  ;;  %v4073_v14 = vld [vmem:[%s9459_s17 + $0xb0] sm:$0x1]  ;;  %v8138_v38 = vld [vmem:[%s9459_s17 + $0x238] sm:$0x1] }
 0x466   : > { %4023 = vmatpush.msra.mxu1 %v3941_v21  ;;  %3962 = vmatpush.msrb.mxu3 %v3912_v57 }
 0x467   : > { %3990 = vmatpush.msra.mxu0 %v3929_v23 }
 0x468   : > { %4024 = vmatpush.msra.mxu1 %v3940_v7  ;;  %3963 = vmatpush.msrb.mxu3 %v3911_v55  ;;  %v3887_v7 = vld [vmem:[%s13185_s10 + $0x40] sm:$0xff]  ;;  %v8112_v55 = vld [vmem:[%s9459_s17 + $0x138] sm:$0xff] }
 0x469   : > { %3991 = vmatpush.msra.mxu0 %v3928_v12 }
 0x46a   : > { %3964 = vmatpush.msrb.mxu3 %v3910_v43  ;;  %4025 = vmatpush.msra.mxu1 %v3939_v32  ;;  %v8109_v43 = vld [vmem:[%s9459_s17 + $0x108] sm:$0xff] }
 0x46b   : > { %3992 = vmatpush.msra.mxu0 %v3927_v25  ;;  %v8135_v25 = vld [vmem:[%s9459_s17 + $0x208] sm:$0xff] }
 0x46c   : > { %3965 = vmatpush.msrb.mxu3 %v3909_v0  ;;  %4026 = vmatpush.msra.mxu1 %v3938_v51  ;;  %v8132_v0 = vld [vmem:[%s9459_s17 + $0x1d8] sm:$0xff]  ;;  %v8151_v32 = vld [vmem:[%s9459_s17 + $0x288] sm:$0xff] }
 0x46d   : > { %3993 = vmatpush.msra.mxu0 %v3926_v41  ;;  %v3888_v41 = vld [vmem:[%s13185_s10 + $0x48] sm:$0xff] }
 0x46e   : > { %3966 = vmatpush.msrb.mxu3 %v3908_v18  ;;  %v3889_v18 = vld [vmem:[%s13185_s10 + $0x50] sm:$0xff] }
 0x46f   : > { %3994 = vmatpush.msra.mxu0 %v3925_v42 }
 0x470   : > { %3967 = vmatpush.msrb.mxu3 %v3907_v2  ;;  %v8157_v2 = vld [vmem:[%s9459_s17 + $0x2e8] sm:$0x1] }
 0x471   : > { %3995 = vmatpush.msra.mxu0 %v3924_v8  ;;  %v8106_v8 = vld [vmem:[%s9459_s17 + $0xd8] sm:$0xff] }
 0x472   : > { %3968 = vmatpush.msrb.mxu3 %v3906_v60  ;;  %v8129_v60 = vld [vmem:[%s9459_s17 + $0x1a8] sm:$0xff] }
 0x473   : > { %3996 = vmatpush.msra.mxu0 %v3923_v53 }
 0x474   : > { %3969 = vmatpush.msrb.mxu3 %v3905_v50 }
 0x475   : > { %3997 = vmatpush.msra.mxu0 %v3922_v31  ;;  %v8154_v31 = vld [vmem:[%s9459_s17 + $0x2b8] sm:$0xff] }
 0x476   : > { %3970 = vmatpush.msrb.mxu3 %v3904_v52 }
 0x477   : > { %3998 = vmatpush.msra.mxu0 %v3921_v63 }
 0x479   : > { %3999 = vmatpush.msra.mxu0 %v3920_v62 }
 0x47b   : > { %4000 = vmatpush.msra.mxu0 %v3919_v4  ;;  %v3890_v4 = vld [vmem:[%s13185_s10 + $0x58] sm:$0xff] }
 0x4b0   : > { %v3737_v44 = vpop.f32.mrf.mxu3 }
 0x4ca   : > { %v3708_v58 = vpop.f32.mrf.mxu2 }
 0x4cb   : > { %v3738_v39 = vadd.f32 %v3737_v44, %v3708_v58  ;;  %v3903_v44 = vld [vmem:[%s13186_s11] sm:$0xff]  ;;  %v3937_v58 = vld [vmem:[%s13186_s11 + $0x110] sm:$0xff] }
 0x4cc   : > { %3971 = vmatpush.msrb.mxu3 %v3903_v44  ;;  %4027 = vmatpush.msra.mxu1 %v3937_v58  ;;  %v8148_v44 = vld [vmem:[%s9459_s17 + $0x258] sm:$0xff] }
 0x4cd   : > { %8079 = vmatmul.msk.f32.vlgmr.msrb.gmra.mxu0 %vm13255_vm14, %v3738_v39  ;;  %8084 = vmatmul.msk.f32.vlgmr.msrb.gmra.mxu1 %vm13255_vm14, %v3738_v39 }
 0x4ce   : > { %8089 = vmatmul.msk.f32.vlgmr.msrb.gmra.mxu2 %vm13255_vm14, %v3738_v39  ;;  %v3936_v39 = vld [vmem:[%s13186_s11 + $0x108] sm:$0xff]  ;;  %8100 = vmatpush.msk.msra.mxu3 %vm460_vm0, %v4073_v14  ;;  %v8131_v14 = vld [vmem:[%s9459_s17 + $0x1d0] sm:$0xff] }
 0x4cf   : > { %8103 = vmatpush.msk.msrb.mxu2 %vm460_vm0, %v4074_v59  ;;  %4028 = vmatpush.msra.mxu1 %v3936_v39  ;;  %v8116_v59 = vld [vmem:[%s9459_s17 + $0x170] sm:$0x1] }
 0x4d0   : > { %8121 = vmatpush.msk.msrb.mxu0 %vm460_vm0, %v8116_v59  ;;  %v8137_v39 = vld [vmem:[%s9459_s17 + $0x230] sm:$0x1]  ;;  %v8153_v59 = vld [vmem:[%s9459_s17 + $0x298] sm:$0xff] }
 0x4d1   : > { %v3740_v20 = vpop.f32.mrf.mxu3  ;;  %4149 = vmatpush.msrb.mxu2 %v4071_v56  ;;  %4029 = vmatpush.msra.mxu1 %v3935_v11  ;;  %v8134_v11 = vld [vmem:[%s9459_s17 + $0x200] sm:$0xff] }
 0x4d3   : > { %4150 = vmatpush.msrb.mxu2 %v4068_v10 }
 0x4d4   : > { %v3711_v45 = vpop.f32.mrf.mxu2 }
 0x4d5   : > { %v3741_v37 = vadd.f32 %v3740_v20, %v3711_v45  ;;  %4151 = vmatpush.msrb.mxu2 %v4065_v35  ;;  %v4070_v20 = vld [vmem:[%s9459_s17 + $0x80] sm:$0xff]  ;;  %v4067_v35 = vld [vmem:[%s9459_s17 + $0x50] sm:$0xff] }
 0x4d6   : > { %4126 = vmatpush.msra.mxu3 %v4070_v20  ;;  %v3879_v45 = vld [vmem:[%s13185_s10] sm:$0xff] }
 0x4d7   : > { %8080 = vmatmul.msk.f32.gmra.mxu0 %vm13255_vm14, %v3741_v37  ;;  %8085 = vmatmul.msk.f32.gmra.mxu1 %vm13255_vm14, %v3741_v37  ;;  %v8128_v20 = vld [vmem:[%s9459_s17 + $0x1a0] sm:$0xff] }
 0x4d8   : > { %8090 = vmatmul.msk.f32.gmra.mxu2 %vm13255_vm14, %v3741_v37  ;;  %v3880_v37 = vld [vmem:[%s13185_s10 + $0x8] sm:$0xff]  ;;  %4127 = vmatpush.msra.mxu3 %v4067_v35 }
 0x4db   : > { %v3743_v26 = vpop.f32.mrf.mxu3 }
 0x4dc   : > { %v3714_v19 = vpop.f32.mrf.mxu2 }
 0x4dd   : > { %v3744_v54 = vadd.f32 %v3743_v26, %v3714_v19 }
 0x4df   : > { %8081 = vmatmul.msk.f32.gmra.mxu0 %vm13255_vm14, %v3744_v54  ;;  %8086 = vmatmul.msk.f32.gmra.mxu1 %vm13255_vm14, %v3744_v54 }
 0x4e0   : > { %8091 = vmatmul.msk.f32.gmra.mxu2 %vm13255_vm14, %v3744_v54  ;;  %v8113_v54 = vld [vmem:[%s9459_s17 + $0x140] sm:$0xff] }
 0x4e1   : > { %4258 = vmatpush.msrb.mxu0 %v8113_v54 }
 0x4e3   : > { %v3746_v17 = vpop.f32.mrf.mxu3 }
 0x4e5   : > { %v3717_v28 = vpop.f32.mrf.mxu2 }
 0x4e6   : > { %v3747_v24 = vadd.f32 %v3746_v17, %v3717_v28  ;;  %v8110_v17 = vld [vmem:[%s9459_s17 + $0x110] sm:$0xff] }
 0x4e7   : > { %v3881_v28 = vld [vmem:[%s13185_s10 + $0x10] sm:$0xff]  ;;  %4259 = vmatpush.msrb.mxu0 %v8110_v17 }
 0x4e8   : > { %8082 = vmatmul.msk.f32.gmra.mxu0 %vm13255_vm14, %v3747_v24  ;;  %8087 = vmatmul.msk.f32.gmra.mxu1 %vm13255_vm14, %v3747_v24 }
 0x4e9   : > { %8092 = vmatmul.msk.f32.gmra.mxu2 %vm13255_vm14, %v3747_v24  ;;  %v4064_v24 = vld [vmem:[%s9459_s17 + $0x20] sm:$0xff]  ;;  %vm3943_vm14 = vcmask 523264  }
 0x4ea   : > { %4128 = vmatpush.msra.mxu3 %v4064_v24 }
 0x4f1   : > { %8098 = vmatmul.msk.f32.vlgmr.msra.gmra.mxu2 %vm453_vm1, %v11191_v29 }
 0x4f2   : > { %8139 = vmatpush.msk.msra.mxu2 %vm460_vm0, %v8136_v27  ;;  %v8107_v27 = vld [vmem:[%s9459_s17 + $0xe0] sm:$0xff] }
 0x4f3   : > { %4260 = vmatpush.msrb.mxu0 %v8107_v27 }
 0x4f4   : > { %4349 = vmatpush.msra.mxu2 %v8133_v49  ;;  %v8117_v49 = vld [vmem:[%s9459_s17 + $0x178] sm:$0x1] }
 0x4f5   : > { %8124 = vmatpush.msk.msrb.mxu1 %vm460_vm0, %v8117_v49 }
 0x4f6   : > { %4350 = vmatpush.msra.mxu2 %v8130_v61  ;;  %v8114_v61 = vld [vmem:[%s9459_s17 + $0x148] sm:$0xff] }
 0x4f7   : > { %4281 = vmatpush.msrb.mxu1 %v8114_v61 }
 0x4f8   : > { %4351 = vmatpush.msra.mxu2 %v8127_v40 }
 0x4f9   : > { %8099 = vmatmul.msk.f32.gmra.mxu2 %vm453_vm1, %v11203_v46  ;;  %4282 = vmatpush.msrb.mxu1 %v8111_v33 }
 0x4fb   : > { %4283 = vmatpush.msrb.mxu1 %v8108_v1 }
 0x501   : > { %8104 = vmatmul.msk.f32.vlgmr.msrb.gmra.mxu2 %vm453_vm1, %v11191_v29 }
 0x502   : > { %8163 = vmatpush.msk.msrb.mxu2 %vm460_vm0, %v8158_v3 }
 0x504   : > { %4486 = vmatpush.msrb.mxu2 %v8155_v13  ;;  %v3882_v13 = vld [vmem:[%s13185_s10 + $0x18] sm:$0xff] }
 0x506   : > { %4487 = vmatpush.msrb.mxu2 %v8152_v30  ;;  %v3883_v30 = vld [vmem:[%s13185_s10 + $0x20] sm:$0xff] }
 0x508   : > { %4488 = vmatpush.msrb.mxu2 %v8149_v36 }
 0x509   : > { %8105 = vmatmul.msk.f32.gmra.mxu2 %vm453_vm1, %v11203_v46 }
 0x511   : > { %8140 = vmatmul.msk.f32.vlgmr.msra.gmra.mxu2 %vm453_vm1, %v11191_v29 }
 0x519   : > { %8141 = vmatmul.msk.f32.gmra.mxu2 %vm453_vm1, %v11203_v46 }
 0x521   : > { %8164 = vmatmul.msk.f32.vlgmr.msrb.gmra.mxu2 %vm453_vm1, %v11191_v29 }
 0x529   : > { %8165 = vmatmul.msk.f32.gmra.mxu2 %vm453_vm1, %v11203_v46 }
 0x54a   : > { %v3809_v56 = vpop.f32.mrf.mxu0  ;;  %v3838_v26 = vpop.f32.mrf.mxu1 }
 0x54b   : > { %v3891_v10 = vmul.f32 %v3879_v45, %v3809_v56  ;;  %v3892_v19 = vmul.f32 %v3880_v37, %v3838_v26  ;;  %v8159_v45 = vld [vmem:[%s9459_s17 + $0x2f8] sm:$0x1]  ;;  %v8156_v37 = vld [vmem:[%s9459_s17 + $0x2c8] sm:$0xff] }
 0x54c   : > { %v8150_v56 = vld [vmem:[%s9459_s17 + $0x268] sm:$0xff]  ;;  %s431_s17 = sand.u32 1, %s9295_s26  }
 0x54d   : > { %3972 = vmatmul.f32.vlgmr.msrb.gmra.mxu3 %v3891_v10  ;;  %4001 = vmatmul.f32.vlgmr.msra.gmra.mxu0 %v3892_v19  ;;  %s7703_s14 = sshll.u32 %s431_s17, 1 }
 0x54e   : > { %8118 = vmatpush.msk.msrb.mxu3 %vm460_vm0, %v8115_v34  ;;  %8145 = vmatpush.msk.msra.mxu0 %vm460_vm0, %v8138_v38  ;;  %s11476_s19 = scalar_lea.vmem [#allocation2], %s7703_s14  ;;  %s13333_s14 = smov 108  }
 0x550   : > { %4235 = vmatpush.msrb.mxu3 %v8112_v55  ;;  %4395 = vmatpush.msra.mxu0 %v8135_v25 }
 0x551   : > { %v3867_v40 = vpop.f32.mrf.mxu2 }
 0x552   : > { %v3893_v3 = vmul.f32 %v3881_v28, %v3867_v40  ;;  %4236 = vmatpush.msrb.mxu3 %v8109_v43  ;;  %4396 = vmatpush.msra.mxu0 %v8132_v0 }
 0x554   : > { %v3812_v36 = vpop.f32.mrf.mxu0  ;;  %v3841_v47 = vpop.f32.mrf.mxu1  ;;  %8093 = vmatmul.msk.f32.vlgmr.msra.gmra.mxu1 %vm3943_vm14, %v3893_v3  ;;  %4237 = vmatpush.msrb.mxu3 %v8106_v8  ;;  %v4057_v8 = vld [vmem:[%s13187_s12] sm:$0x1] }
 0x555   : > { %v3894_v15 = vmul.f32 %v3882_v13, %v3812_v36  ;;  %v3895_v9 = vmul.f32 %v3883_v30, %v3841_v47  ;;  %8160 = vmatpush.msk.msra.mxu1 %vm460_vm0, %v8157_v2  ;;  %4397 = vmatpush.msra.mxu0 %v8129_v60 }
 0x557   : > { %3975 = vmatmul.f32.gmra.mxu3 %v3894_v15  ;;  %4004 = vmatmul.f32.gmra.mxu0 %v3895_v9 }
 0x558   : > { %4463 = vmatpush.msra.mxu1 %v8154_v31 }
 0x55a   : > { %4464 = vmatpush.msra.mxu1 %v8151_v32 }
 0x55b   : > { %v3870_v48 = vpop.f32.mrf.mxu2 }
 0x55c   : > { %v3896_v23 = vmul.f32 %v3884_v22, %v3870_v48  ;;  %v3815_v16 = vpop.f32.mrf.mxu0  ;;  %v3844_v21 = vpop.f32.mrf.mxu1  ;;  %4465 = vmatpush.msra.mxu1 %v8148_v44 }
 0x55d   : > { %v3897_v57 = vmul.f32 %v3885_v6, %v3815_v16  ;;  %v3898_v12 = vmul.f32 %v3886_v5, %v3844_v21 }
 0x55e   : > { %8094 = vmatmul.msk.f32.gmra.mxu1 %vm3943_vm14, %v3896_v23 }
 0x55f   : > { %3978 = vmatmul.f32.gmra.mxu3 %v3897_v57  ;;  %4007 = vmatmul.f32.gmra.mxu0 %v3898_v12 }
 0x563   : > { %v3873_v42 = vpop.f32.mrf.mxu2 }
 0x564   : > { %v3899_v53 = vmul.f32 %v3887_v7, %v3873_v42 }
 0x565   : > { %v3818_v50 = vpop.f32.mrf.mxu0  ;;  %v3847_v63 = vpop.f32.mrf.mxu1 }
 0x566   : > { %v3900_v52 = vmul.f32 %v3888_v41, %v3818_v50  ;;  %v3901_v62 = vmul.f32 %v3889_v18, %v3847_v63  ;;  %8095 = vmatmul.msk.f32.gmra.mxu1 %vm3943_vm14, %v3899_v53  ;;  %v11467_v41 = vpop.permute.xlu0 %4168  ;;  %v11480_v50 = vpop.permute.xlu1 %4163 }
 0x568   : > { %3981 = vmatmul.f32.gmra.mxu3 %v3900_v52  ;;  %4010 = vmatmul.f32.gmra.mxu0 %v3901_v62 }
 0x56c   : > { %v3876_v51 = vpop.f32.mrf.mxu2 }
 0x56d   : > { %v3902_v58 = vmul.f32 %v3890_v4, %v3876_v51 }
 0x56e   : > { %v11484_v44 = vpop.permute.xlu0 %4181 }
 0x56f   : > { %8096 = vmatmul.msk.f32.gmra.mxu1 %vm3943_vm14, %v3902_v58 }
 0x570   : > { %8101 = vmatmul.msk.f32.vlgmr.msra.gmra.mxu3 %vm453_vm1, %v11191_v29  ;;  %8122 = vmatmul.msk.f32.vlgmr.msrb.gmra.mxu0 %vm453_vm1, %v11191_v29 }
 0x571   : > { %8142 = vmatpush.msk.msra.mxu3 %vm460_vm0, %v8137_v39 }
 0x573   : > { %4372 = vmatpush.msra.mxu3 %v8134_v11  ;;  %v11490_v11 = vpop.permute.xlu2 %4186 }
 0x574   : > { %v4107_v10 = vpop.f32.mrf.mxu2 }
 0x575   : > { %4373 = vmatpush.msra.mxu3 %v8131_v14  ;;  %v4171_v52 = vmul.f32 %v11480_v50, %v4107_v10 }
 0x577   : > { %8125 = vmatmul.msk.f32.vlgmr.msrb.gmra.mxu1 %vm453_vm1, %v11191_v29  ;;  %4374 = vmatpush.msra.mxu3 %v8128_v20  ;;  %v4189_v58 = vadd.f32 %v11484_v44, %v4171_v52 }
 0x578   : > { %8102 = vmatmul.msk.f32.gmra.mxu3 %vm453_vm1, %v11203_v46  ;;  %8123 = vmatmul.msk.f32.gmra.mxu0 %vm453_vm1, %v11203_v46 }
 0x57c   : > { %v4110_v17 = vpop.f32.mrf.mxu2 }
 0x57d   : > { %v4174_v51 = vmul.f32 %v11467_v41, %v4110_v17 }
 0x57f   : > { %8126 = vmatmul.msk.f32.gmra.mxu1 %vm453_vm1, %v11203_v46 }
 0x580   : > { %8119 = vmatmul.msk.f32.vlgmr.msrb.gmra.mxu3 %vm453_vm1, %v11191_v29  ;;  %8146 = vmatmul.msk.f32.vlgmr.msra.gmra.mxu0 %vm453_vm1, %v11191_v29 }
 0x581   : > { %8166 = vmatpush.msk.msrb.mxu3 %vm460_vm0, %v8159_v45  ;;  %v4192_v45 = vadd.f32 %v11490_v11, %v4174_v51 }
 0x583   : > { %4509 = vmatpush.msrb.mxu3 %v8156_v37 }
 0x584   : > { %v11456_v40 = vpop.f32.mrf.mxu2 }
 0x585   : > { %4510 = vmatpush.msrb.mxu3 %v8153_v59 }
 0x587   : > { %8161 = vmatmul.msk.f32.vlgmr.msra.gmra.mxu1 %vm453_vm1, %v11191_v29  ;;  %4511 = vmatpush.msrb.mxu3 %v8150_v56 }
 0x588   : > { %8120 = vmatmul.msk.f32.gmra.mxu3 %vm453_vm1, %v11203_v46  ;;  %8147 = vmatmul.msk.f32.gmra.mxu0 %vm453_vm1, %v11203_v46 }
 0x58c   : > { %v11461_v6 = vpop.f32.mrf.mxu2 }
 0x58f   : > { %8162 = vmatmul.msk.f32.gmra.mxu1 %vm453_vm1, %v11203_v46 }
 0x590   : > { %8143 = vmatmul.msk.f32.vlgmr.msra.gmra.mxu3 %vm453_vm1, %v11191_v29 }
 0x594   : > { %v4353_v55 = vpop.f32.mrf.mxu2 }
 0x595   : > { %v4405_v39 = vmul.f32 %v4353_v55, %v11480_v50 }
 0x597   : > { %v4411_v10 = vadd.f32 %v4405_v39, %v11484_v44 }
 0x598   : > { %8144 = vmatmul.msk.f32.gmra.mxu3 %vm453_vm1, %v11203_v46 }
 0x59c   : > { %v4356_v60 = vpop.f32.mrf.mxu2 }
 0x59d   : > { %v4408_v14 = vmul.f32 %v4356_v60, %v11467_v41 }
 0x5a0   : > { %8167 = vmatmul.msk.f32.vlgmr.msrb.gmra.mxu3 %vm453_vm1, %v11191_v29 }
 0x5a4   : > { %v4490_v37 = vpop.f32.mrf.mxu2 }
 0x5a8   : > { %8168 = vmatmul.msk.f32.gmra.mxu3 %vm453_vm1, %v11203_v46  ;;  %vm13256_vm1 = vcmask 80896  }
 0x5ca   : > { %v4002_v26 = vpop.f32.mrf.mxu0 }
 0x5d0   : > { %v3973_v19 = vpop.f32.mrf.mxu3 }
 0x5d1   : > { %v4031_v54 = vpop.f32.mrf.mxu1  ;;  %v4003_v13 = vadd.f32 %v4002_v26, %v3973_v19  ;;  %v4195_v26 = vmax.f32 %v4189_v58, 0.0 }
 0x5d3   : > { %v4032_v36 = vadd.f32 %v4031_v54, %v4003_v13 }
 0x5d4   : > { %v4005_v35 = vpop.f32.mrf.mxu0 }
 0x5d5   : > { %v4044_v22 = vsel %vm13256_vm1, %v4032_v36, 0.0 }
 0x5da   : > { %v3976_v28 = vpop.f32.mrf.mxu3 }
 0x5db   : > { %v4034_v24 = vpop.f32.mrf.mxu1  ;;  %v4006_v49 = vadd.f32 %v4005_v35, %v3976_v28 }
 0x5dc   : > { %v4008_v27 = vpop.f32.mrf.mxu0 }
 0x5dd   : > { %v4035_v29 = vadd.f32 %v4034_v24, %v4006_v49 }
 0x5df   : > { %v4045_v46 = vsel %vm13256_vm1, %v4035_v29, 0.0 }
 0x5e0   : > { %v4046_v5 = vadd.f32 %v4045_v46, %v4044_v22  ;;  %v4520_v46 = vmul.f32 %v4490_v37, %v11480_v50 }
 0x5e2   : > { %v3979_v61 = vpop.f32.mrf.mxu3 }
 0x5e3   : > { %v4037_v3 = vpop.f32.mrf.mxu1  ;;  %v4009_v30 = vadd.f32 %v4008_v27, %v3979_v61  ;;  %v4414_v27 = vadd.f32 %v4408_v14, %v11490_v11  ;;  %v4173_v14 = vmul.f32 %v11480_v50, %v11456_v40 }
 0x5e5   : > { %v4038_v47 = vadd.f32 %v4037_v3, %v4009_v30  ;;  %v4011_v15 = vpop.f32.mrf.mxu0  ;;  %v4198_v3 = vmax.f32 %v4192_v45, 0.0  ;;  %v4417_v30 = vmax.f32 %v4411_v10, 0.0 }
 0x5e7   : > { %v4047_v33 = vsel %vm13256_vm1, %v4038_v47, 0.0 }
 0x5e8   : > { %v4048_v48 = vadd.f32 %v4047_v33, %v4046_v5  ;;  %v11510_v33 = vld [vmem:[%s13179_s4] sm:$0x7] }
 0x5e9   : > { %v4545_v55 = vperm.slane %v11510_v33, 0  ;;  %v4546_v39 = vperm.slane %v11510_v33, 1 }
 0x5eb   : > { %v3982_v9 = vpop.f32.mrf.mxu3 }
 0x5ec   : > { %v4012_v1 = vadd.f32 %v4011_v15, %v3982_v9  ;;  %v4040_v34 = vpop.f32.mrf.mxu1  ;;  %v4420_v9 = vmax.f32 %v4414_v27, 0.0 }
 0x5ed   : > { %v4262_v31 = vpop.f32.mrf.mxu0 }
 0x5ee   : > { %v4041_v38 = vadd.f32 %v4040_v34, %v4012_v1  ;;  %v4292_v28 = vmul.f32 %v4262_v31, %v11480_v50 }
 0x5f0   : > { %v4049_v23 = vsel %vm13256_vm1, %v4041_v38, 0.0  ;;  %vm4059_vm1 = vcmask 73728   ;;  %v4298_v15 = vadd.f32 %v4292_v28, %v11484_v44 }
 0x5f1   : > { %v4050_v16 = vadd.f32 %v4049_v23, %v4048_v48 }
 0x5f3   : > { %v4051_v21 = vrot.slane %v4050_v16, 4  ;;  %v4130_v57 = vpop.f32.mrf.mxu3 }
 0x5f4   : > { %v11464_v12 = vpop.f32.mrf.mxu1  ;;  %v4172_v59 = vmul.f32 %v11480_v50, %v4130_v57  ;;  %v4526_v57 = vadd.f32 %v4520_v46, %v11484_v44 }
 0x5f5   : > { %v4052_v7 = vadd.f32 %v4051_v21, %v4050_v16  ;;  %v4265_v19 = vpop.f32.mrf.mxu0 }
 0x5f6   : > { %v4190_v13 = vadd.f32 %v11484_v44, %v4172_v59  ;;  %v4532_v52 = vmax.f32 %v4526_v57, 0.0 }
 0x5f7   : > { %v4053_v25 = vrot.slane %v4052_v7, 2 }
 0x5f8   : > { %v4196_v34 = vmax.f32 %v4190_v13, 0.0 }
 0x5f9   : > { %v4054_v43 = vadd.f32 %v4053_v25, %v4052_v7  ;;  %v4304_v7 = vmax.f32 %v4298_v15, 0.0  ;;  %v4493_v25 = vpop.f32.mrf.mxu2 }
 0x5fb   : > { %v4055_v0 = vrot.slane %v4054_v43, 1  ;;  %v4133_v42 = vpop.f32.mrf.mxu3 }
 0x5fc   : > { %v11471_v18 = vpop.f32.mrf.mxu1  ;;  %v4175_v5 = vmul.f32 %v11467_v41, %v4133_v42  ;;  %v4310_v42 = vmax.f32 %v4196_v34, %v4304_v7 }
 0x5fd   : > { %v4056_v2 = vadd.f32 %v4055_v0, %v4054_v43  ;;  %v4295_v43 = vmul.f32 %v4265_v19, %v11467_v41  ;;  %v4399_v0 = vpop.f32.mrf.mxu0  ;;  %v4296_v40 = vmul.f32 %v11471_v18, %v11467_v41 }
 0x5fe   : > { %v4193_v60 = vadd.f32 %v11490_v11, %v4175_v5 }
 0x5ff   : > { %v4058_v53 = vadd.f32 %v4057_v8, %v4056_v2 }
 0x600   : > { %v4199_v37 = vmax.f32 %v4193_v60, 0.0 }
 0x601   : > { %4060 = vst.msk [vmem:[%s11476_s19] sm:$0x1] %vm4059_vm1, %v4058_v53 }
 0x603   : > { %v4239_v63 = vpop.f32.mrf.mxu3 }
 0x604   : > { %v4291_v62 = vmul.f32 %v4239_v63, %v11480_v50  ;;  %v4467_v32 = vpop.f32.mrf.mxu1 }
 0x605   : > { %v4519_v54 = vmul.f32 %v4467_v32, %v11480_v50  ;;  %v4293_v32 = vmul.f32 %v11464_v12, %v11480_v50 }
 0x606   : > { %v4297_v4 = vadd.f32 %v4291_v62, %v11484_v44  ;;  %v4523_v62 = vmul.f32 %v4493_v25, %v11467_v41 }
 0x607   : > { %v4525_v29 = vadd.f32 %v4519_v54, %v11484_v44  ;;  %v4299_v12 = vadd.f32 %v4293_v32, %v11484_v44 }
 0x608   : > { %v4303_v20 = vmax.f32 %v4297_v4, 0.0  ;;  %v4301_v4 = vadd.f32 %v4295_v43, %v11490_v11 }
 0x609   : > { %v4531_v48 = vmax.f32 %v4525_v29, 0.0 }
 0x60a   : > { %v4309_v49 = vmax.f32 %v4195_v26, %v4303_v20  ;;  %v4407_v20 = vmul.f32 %v4399_v0, %v11480_v50  ;;  %v4529_v26 = vadd.f32 %v4523_v62, %v11490_v11  ;;  %v4307_v10 = vmax.f32 %v4301_v4, 0.0 }
 0x60b   : > { %v4242_v56 = vpop.f32.mrf.mxu3 }
 0x60c   : > { %v4294_v35 = vmul.f32 %v4242_v56, %v11467_v41  ;;  %v4470_v17 = vpop.f32.mrf.mxu1  ;;  %v4423_v22 = vmax.f32 %v4309_v49, %v4417_v30  ;;  %v4313_v28 = vmax.f32 %v4199_v37, %v4307_v10  ;;  %v4535_v13 = vmax.f32 %v4529_v26, 0.0  ;;  %v8169_v10 = vld [vmem:[%s13180_s5 + $0x20] sm:$0xff] }
 0x60d   : > { %v4522_v24 = vmul.f32 %v4470_v17, %v11467_v41  ;;  %v4413_v17 = vadd.f32 %v4407_v20, %v11484_v44 }
 0x60e   : > { %v4300_v61 = vadd.f32 %v4294_v35, %v11490_v11  ;;  %v4537_v8 = vmax.f32 %v4423_v22, %v4531_v48  ;;  %v4191_v35 = vadd.f32 %v11484_v44, %v4173_v14 }
 0x60f   : > { %v4528_v47 = vadd.f32 %v4522_v24, %v11490_v11  ;;  %v4402_v24 = vpop.f32.mrf.mxu0 }
 0x610   : > { %v4306_v36 = vmax.f32 %v4300_v61, 0.0  ;;  %v11523_v51 = vmul.f32 %v4545_v55, %v4537_v8  ;;  %v4176_v61 = vmul.f32 %v11467_v41, %v11461_v6  ;;  %v4197_v29 = vmax.f32 %v4191_v35, 0.0 }
 0x611   : > { %v4534_v16 = vmax.f32 %v4528_v47, 0.0  ;;  %v4419_v47 = vmax.f32 %v4413_v17, 0.0  ;;  %v4410_v18 = vmul.f32 %v4402_v24, %v11467_v41 }
 0x612   : > { %v4312_v1 = vmax.f32 %v4198_v3, %v4306_v36  ;;  %v4305_v3 = vmax.f32 %v4299_v12, 0.0  ;;  %v4302_v36 = vadd.f32 %v4296_v40, %v11490_v11  ;;  %v4194_v22 = vadd.f32 %v11490_v11, %v4176_v61 }
 0x613   : > { %v4376_v38 = vpop.f32.mrf.mxu3  ;;  %v4416_v48 = vadd.f32 %v4410_v18, %v11490_v11 }
 0x614   : > { %v4426_v23 = vmax.f32 %v4312_v1, %v4420_v9  ;;  %v4406_v21 = vmul.f32 %v4376_v38, %v11480_v50  ;;  %v4311_v1 = vmax.f32 %v4197_v29, %v4305_v3  ;;  %v4308_v5 = vmax.f32 %v4302_v36, 0.0 }
 0x615   : > { %v4200_v57 = vmax.f32 %v4194_v22, 0.0 }
 0x616   : > { %v4540_v2 = vmax.f32 %v4426_v23, %v4534_v16  ;;  %v4412_v53 = vadd.f32 %v4406_v21, %v11484_v44  ;;  %v4425_v38 = vmax.f32 %v4311_v1, %v4419_v47  ;;  %v4547_v23 = vperm.slane %v11510_v33, 2 }
 0x618   : > { %v4554_v31 = vmul.f32 %v4545_v55, %v4540_v2  ;;  %v4418_v63 = vmax.f32 %v4412_v53, 0.0 }
 0x61a   : > { %v4424_v58 = vmax.f32 %v4310_v42, %v4418_v63  ;;  %4679 = vmatpush.msra.mxu2 %v4554_v31 }
 0x61b   : > { %v4379_v45 = vpop.f32.mrf.mxu3 }
 0x61c   : > { %v4538_v59 = vmax.f32 %v4424_v58, %v4532_v52  ;;  %v4409_v56 = vmul.f32 %v4379_v45, %v11467_v41  ;;  %4680 = vmatpush.msra.mxu2 %v11523_v51  ;;  %v4560_v52 = vld [vmem:[%s13180_s5 + $0x18] sm:$0xff] }
 0x61e   : > { %v4552_v19 = vmul.f32 %v4546_v39, %v4538_v59  ;;  %v4415_v54 = vadd.f32 %v4409_v56, %v11490_v11 }
 0x620   : > { %v4421_v27 = vmax.f32 %v4415_v54, 0.0  ;;  %v8906_v49 = vpack.i.bf16 %v4552_v19, %v11523_v51 }
 0x622   : > { %v4427_v30 = vmax.f32 %v4313_v28, %v4421_v27  ;;  %8907 = vrot.lane.b32.xlu2 %v8906_v49, %s13323_s21 }
 0x623   : > { %v4513_v46 = vpop.f32.mrf.mxu3 }
 0x624   : > { %v4541_v15 = vmax.f32 %v4427_v30, %v4535_v13  ;;  %v4521_v9 = vmul.f32 %v4513_v46, %v11480_v50  ;;  %v4314_v50 = vmax.f32 %v4200_v57, %v4308_v5  ;;  %v8170_v30 = vld [vmem:[%s13180_s5 + $0x28] sm:$0xff] }
 0x626   : > { %v4555_v34 = vmul.f32 %v4546_v39, %v4541_v15  ;;  %v4527_v6 = vadd.f32 %v4521_v9, %v11484_v44  ;;  %v4422_v44 = vmax.f32 %v4416_v48, 0.0  ;;  %v8202_v9 = vld [vmem:[%s13180_s5 + $0x68] sm:$0xff] }
 0x628   : > { %v4533_v16 = vmax.f32 %v4527_v6, 0.0  ;;  %4708 = vmatpush.msra.mxu3 %v4555_v34  ;;  %v11549_v21 = vpack.i.bf16 %v4555_v34, %v4554_v31  ;;  %v4428_v0 = vmax.f32 %v4314_v50, %v4422_v44  ;;  %v4559_v31 = vld [vmem:[%s13180_s5 + $0x10] sm:$0xff] }
 0x62a   : > { %v4539_v7 = vmax.f32 %v4425_v38, %v4533_v16  ;;  %8912 = vrot.lane.b32.xlu0 %v11549_v21, %s13329_s23  ;;  %8902 = vrot.lane.b32.xlu1 %v11549_v21, %s13323_s21  ;;  %v8171_v38 = vld [vmem:[%s13180_s5 + $0x30] sm:$0xff] }
 0x62b   : > { %4709 = vmatpush.msra.mxu3 %v4552_v19  ;;  %8922 = vrot.lane.b32.xlu2 %v11549_v21, %s13330_s16  ;;  %v4516_v55 = vpop.f32.mrf.mxu3 }
 0x62c   : > { %v4553_v33 = vmul.f32 %v4547_v23, %v4539_v7  ;;  %v4524_v25 = vmul.f32 %v4516_v55, %v11467_v41  ;;  %v4557_v41 = vld [vmem:[%s13180_s5] sm:$0xff]  ;;  %v8203_v55 = vld [vmem:[%s13180_s5 + $0x70] sm:$0xff] }
 0x62d   : > { %8185 = vmatmul.msk.f32.vlgmr.msra.gmra.mxu3 %vm968_vm2, %v4557_v41  ;;  %8181 = vmatmul.msk.f32.vlgmr.msra.gmra.mxu2 %vm968_vm2, %v4557_v41 }
 0x62e   : > { %v4530_v43 = vadd.f32 %v4524_v25, %v11490_v11  ;;  %v11559_v2 = vpack.i.bf16 %v4553_v33, %v4552_v19  ;;  %v4558_v11 = vld [vmem:[%s13180_s5 + $0x8] sm:$0xff] }
 0x630   : > { %v4536_v8 = vmax.f32 %v4530_v43, 0.0  ;;  %v8172_v43 = vld [vmem:[%s13180_s5 + $0x38] sm:$0xff] }
 0x632   : > { %v4542_v53 = vmax.f32 %v4428_v0, %v4536_v8  ;;  %8927 = vrot.lane.b32.xlu0 %v8906_v49, %s13330_s16  ;;  %8917 = vrot.lane.b32.xlu1 %v8906_v49, %s13329_s23  ;;  %s13337_s16 = smov 91   ;;  %s13348_s23 = smov 54  }
 0x633   : > { %8937 = vrot.lane.b32.xlu2 %v8906_v49, %s13331_s0  ;;  %v8201_v49 = vld [vmem:[%s13180_s5 + $0x60] sm:$0xff] }
 0x634   : > { %v4556_v42 = vmul.f32 %v4547_v23, %v4542_v53 }
 0x635   : > { %8186 = vmatmul.msk.f32.gmra.mxu3 %vm968_vm2, %v4558_v11  ;;  %8182 = vmatmul.msk.f32.gmra.mxu2 %vm968_vm2, %v4558_v11 }
 0x636   : > { %v11565_v60 = vpack.i.bf16 %v11523_v51, %v4556_v42 }
 0x63a   : > { %8942 = vrot.lane.b32.xlu0 %v11549_v21, %s13328_s22  ;;  %8932 = vrot.lane.b32.xlu1 %v11549_v21, %s13331_s0  ;;  %s13341_s0 = smov 74  }
 0x63b   : > { %8952 = vrot.lane.b32.xlu2 %v11559_v2, %s13328_s22 }
 0x63d   : > { %8187 = vmatmul.msk.f32.gmra.mxu3 %vm968_vm2, %v4559_v31  ;;  %8183 = vmatmul.msk.f32.gmra.mxu2 %vm968_vm2, %v4559_v31  ;;  %v8204_v31 = vld [vmem:[%s13180_s5 + $0x78] sm:$0xff] }
 0x642   : > { %8947 = vrot.lane.b32.xlu0 %v11549_v21, %s13332_s27  ;;  %8957 = vrot.lane.b32.xlu1 %v11565_v60, %s13328_s22 }
 0x643   : > { %8967 = vrot.lane.b32.xlu2 %v11559_v2, %s13332_s27 }
 0x645   : > { %8188 = vmatmul.msk.f32.gmra.mxu3 %vm968_vm2, %v4560_v52  ;;  %8184 = vmatmul.msk.f32.gmra.mxu2 %vm968_vm2, %v4560_v52 }
 0x64a   : > { %8972 = vrot.lane.b32.xlu0 %v11549_v21, %s13333_s14  ;;  %8962 = vrot.lane.b32.xlu1 %v11565_v60, %s13332_s27  ;;  %s13342_s27 = smov 73  }
 0x64b   : > { %8977 = vrot.lane.b32.xlu2 %v11559_v2, %s13333_s14 }
 0x652   : > { %8982 = vrot.lane.b32.xlu0 %v11549_v21, %s13334_s15  ;;  %8987 = vrot.lane.b32.xlu1 %v11565_v60, %s13333_s14  ;;  %s13338_s14 = smov 90  }
 0x653   : > { %8997 = vrot.lane.b32.xlu2 %v11559_v2, %s13334_s15 }
 0x65a   : > { %9002 = vrot.lane.b32.xlu0 %v11549_v21, %s13335_s25  ;;  %8992 = vrot.lane.b32.xlu1 %v11565_v60, %s13334_s15  ;;  %s13349_s15 = smov 53  }
 0x65b   : > { %9007 = vrot.lane.b32.xlu2 %v11559_v2, %s13335_s25 }
 0x662   : > { %9012 = vrot.lane.b32.xlu0 %v11549_v21, %s13336_s30  ;;  %9017 = vrot.lane.b32.xlu1 %v11565_v60, %s13335_s25 }
 0x663   : > { %9027 = vrot.lane.b32.xlu2 %v11559_v2, %s13336_s30 }
 0x66a   : > { %9032 = vrot.lane.b32.xlu0 %v11549_v21, %s13337_s16  ;;  %9022 = vrot.lane.b32.xlu1 %v11565_v60, %s13336_s30  ;;  %s13339_s30 = smov 89  }
 0x66b   : > { %9037 = vrot.lane.b32.xlu2 %v11559_v2, %s13337_s16 }
 0x672   : > { %9042 = vrot.lane.b32.xlu0 %v11549_v21, %s13338_s14  ;;  %9047 = vrot.lane.b32.xlu1 %v11565_v60, %s13337_s16  ;;  %s13340_s16 = smov 88  }
 0x673   : > { %9057 = vrot.lane.b32.xlu2 %v11559_v2, %s13338_s14 }
 0x67a   : > { %9062 = vrot.lane.b32.xlu0 %v11549_v21, %s13339_s30  ;;  %9052 = vrot.lane.b32.xlu1 %v11565_v60, %s13338_s14  ;;  %s13343_s14 = smov 72  }
 0x67b   : > { %9067 = vrot.lane.b32.xlu2 %v11559_v2, %s13339_s30 }
 0x67c   : > { %v8908_v63 = vpop.permute.xlu2 %8907 }
 0x67d   : > { %v8910_v37 = vunpack.i.h.bf16 %v8908_v63  ;;  %v8909_v59 = vunpack.i.l.bf16 %v8908_v63 }
 0x67f   : > { %v4577_v19 = vsel %vm961_vm3, %v8909_v59, %v8910_v37 }
 0x682   : > { %9072 = vrot.lane.b32.xlu0 %v11549_v21, %s13340_s16  ;;  %9077 = vrot.lane.b32.xlu1 %v11565_v60, %s13339_s30  ;;  %s13344_s30 = smov 71  }
 0x683   : > { %9087 = vrot.lane.b32.xlu2 %v11559_v2, %s13340_s16 }
 0x685   : > { %v8923_v62 = vpop.permute.xlu2 %8922 }
 0x686   : > { %v8925_v32 = vunpack.i.h.bf16 %v8923_v62  ;;  %v8924_v4 = vunpack.i.l.bf16 %v8923_v62 }
 0x688   : > { %4892 = vmatpush.msrb.mxu3 %v8925_v32  ;;  %v4832_v51 = vsel %vm1220_vm4, %v8924_v4, %v8925_v32  ;;  %v8189_v4 = vld [vmem:[%s13180_s5 + $0x40] sm:$0xff] }
 0x689   : > { %4863 = vmatpush.msrb.mxu2 %v4832_v51 }
 0x68a   : > { %9092 = vrot.lane.b32.xlu0 %v11549_v21, %s13341_s0  ;;  %9082 = vrot.lane.b32.xlu1 %v11565_v60, %s13340_s16 }
 0x68b   : > { %9097 = vrot.lane.b32.xlu2 %v11559_v2, %s13341_s0 }
 0x68d   : > { %v11666_v14 = vpop.permute.xlu2 %8937 }
 0x68e   : > { %v8940_v22 = vunpack.i.h.bf16 %v11666_v14  ;;  %v8939_v1 = vunpack.i.l.bf16 %v11666_v14 }
 0x690   : > { %v4927_v48 = vsel %vm1318_vm6, %v8939_v1, %v8940_v22 }
 0x692   : > { %9102 = vrot.lane.b32.xlu0 %v11549_v21, %s13342_s27  ;;  %9107 = vrot.lane.b32.xlu1 %v11565_v60, %s13341_s0 }
 0x693   : > { %9117 = vrot.lane.b32.xlu2 %v11559_v2, %s13342_s27 }
 0x695   : > { %v8953_v61 = vpop.permute.xlu2 %8952 }
 0x696   : > { %v8955_v57 = vunpack.i.h.bf16 %v8953_v61  ;;  %v8954_v7 = vunpack.i.l.bf16 %v8953_v61 }
 0x698   : > { %v5030_v0 = vsel %vm1422_vm7, %v8954_v7, %v8955_v57  ;;  %v7086_v57 = vld [vmem:[%s13182_s7 + $0x8] sm:$0xff] }
 0x69a   : > { %9122 = vrot.lane.b32.xlu0 %v11549_v21, %s13343_s14  ;;  %9112 = vrot.lane.b32.xlu1 %v11565_v60, %s13342_s27  ;;  %s13345_s27 = smov 70  }
 0x69b   : > { %9127 = vrot.lane.b32.xlu2 %v11559_v2, %s13343_s14 }
 0x69c   : > { %v8903_v58 = vpop.permute.xlu1 %8902  ;;  %v8913_v39 = vpop.permute.xlu0 %8912 }
 0x69d   : > { %v8905_v20 = vunpack.i.h.bf16 %v8903_v58  ;;  %v8904_v45 = vunpack.i.l.bf16 %v8903_v58  ;;  %v8915_v12 = vunpack.i.h.bf16 %v8913_v39  ;;  %v8914_v26 = vunpack.i.l.bf16 %v8913_v39  ;;  %v11707_v5 = vpop.permute.xlu2 %8967 }
 0x69e   : > { %v8970_v51 = vunpack.i.h.bf16 %v11707_v5  ;;  %v8969_v58 = vunpack.i.l.bf16 %v11707_v5  ;;  %v8192_v5 = vld [vmem:[%s13180_s5 + $0x58] sm:$0xff] }
 0x69f   : > { %4638 = vmatpush.msrb.mxu1 %v8905_v20  ;;  %v4578_v56 = vsel %vm961_vm3, %v8904_v45, %v8905_v20  ;;  %v4736_v54 = vsel %vm1122_vm5, %v8914_v26, %v8915_v12 }
 0x6a0   : > { %4609 = vmatpush.msrb.mxu0 %v4578_v56 }
 0x6a1   : > { %4639 = vmatpush.msrb.mxu1 %v8910_v37 }
 0x6a2   : > { %9132 = vrot.lane.b32.xlu0 %v11549_v21, %s13344_s30  ;;  %9137 = vrot.lane.b32.xlu1 %v11565_v60, %s13343_s14  ;;  %s13347_s14 = smov 55  }
 0x6a3   : > { %9147 = vrot.lane.b32.xlu2 %v11559_v2, %s13344_s30  ;;  %4610 = vmatpush.msrb.mxu0 %v4577_v19  ;;  %v8225_v19 = vld [vmem:[%s13180_s5 + $0xa0] sm:$0xff] }
 0x6a4   : > { %8177 = vmatmul.msk.f32.vlgmr.msrb.gmra.mxu1 %vm968_vm2, %v8169_v10  ;;  %8173 = vmatmul.msk.f32.vlgmr.msrb.gmra.mxu0 %vm968_vm2, %v8169_v10  ;;  %v8918_v35 = vpop.permute.xlu1 %8917  ;;  %v8928_v40 = vpop.permute.xlu0 %8927  ;;  %v5132_v10 = vsel %vm1526_vm8, %v8969_v58, %v8970_v51 }
 0x6a5   : > { %4796 = vmatpush.msra.mxu1 %v8915_v12  ;;  %4767 = vmatpush.msra.mxu0 %v4736_v54  ;;  %v8920_v17 = vunpack.i.h.bf16 %v8918_v35  ;;  %v8919_v28 = vunpack.i.l.bf16 %v8918_v35  ;;  %v8930_v24 = vunpack.i.h.bf16 %v8928_v40  ;;  %v8929_v27 = vunpack.i.l.bf16 %v8928_v40  ;;  %v8978_v8 = vpop.permute.xlu2 %8977 }
 0x6a6   : > { %v8979_v37 = vunpack.i.l.bf16 %v8978_v8  ;;  %v8980_v54 = vunpack.i.h.bf16 %v8978_v8 }
 0x6a7   : > { %4797 = vmatpush.msra.mxu1 %v8920_v17  ;;  %4893 = vmatpush.msrb.mxu3 %v8930_v24  ;;  %v4735_v3 = vsel %vm1122_vm5, %v8919_v28, %v8920_v17  ;;  %v4831_v13 = vsel %vm1220_vm4, %v8929_v27, %v8930_v24  ;;  %v8190_v28 = vld [vmem:[%s13180_s5 + $0x48] sm:$0xff]  ;;  %vm13350_vm4 = vcmask 728064  }
 0x6a8   : > { %4768 = vmatpush.msra.mxu0 %v4735_v3  ;;  %4864 = vmatpush.msrb.mxu2 %v4831_v13  ;;  %v5234_v24 = vsel %vm1630_vm9, %v8979_v37, %v8980_v54  ;;  %v8226_v13 = vld [vmem:[%s13180_s5 + $0xa8] sm:$0xff]  ;;  %v8251_v54 = vld [vmem:[%s13180_s5 + $0xf0] sm:$0xff]  ;;  %vm13351_vm5 = vmmov %vm13350_vm4 }
 0x6a9   : > { %8209 = vmatmul.msk.f32.vlgmr.msrb.gmra.mxu3 %vm968_vm2, %v8201_v49  ;;  %8205 = vmatmul.msk.f32.vlgmr.msrb.gmra.mxu2 %vm968_vm2, %v8201_v49 }
 0x6aa   : > { %9152 = vrot.lane.b32.xlu0 %v11549_v21, %s13345_s27  ;;  %9142 = vrot.lane.b32.xlu1 %v11565_v60, %s13344_s30 }
 0x6ab   : > { %9157 = vrot.lane.b32.xlu2 %v11559_v2, %s13345_s27 }
 0x6ac   : > { %8178 = vmatmul.msk.f32.gmra.mxu1 %vm968_vm2, %v8170_v30  ;;  %8174 = vmatmul.msk.f32.gmra.mxu0 %vm968_vm2, %v8170_v30  ;;  %v8933_v29 = vpop.permute.xlu1 %8932  ;;  %v8943_v36 = vpop.permute.xlu0 %8942 }
 0x6ad   : > { %v8935_v47 = vunpack.i.h.bf16 %v8933_v29  ;;  %v8934_v18 = vunpack.i.l.bf16 %v8933_v29  ;;  %v8945_v46 = vunpack.i.h.bf16 %v8943_v36  ;;  %v8944_v15 = vunpack.i.l.bf16 %v8943_v36  ;;  %v11765_v26 = vpop.permute.xlu2 %8997  ;;  %v8191_v36 = vld [vmem:[%s13180_s5 + $0x50] sm:$0xff] }
 0x6af   : > { %4988 = vmatpush.msrb.mxu1 %v8935_v47  ;;  %v4928_v34 = vsel %vm1318_vm6, %v8934_v18, %v8935_v47  ;;  %v5031_v6 = vsel %vm1422_vm7, %v8944_v15, %v8945_v46  ;;  %vm13352_vm6 = vmmov %vm13350_vm4 }
 0x6b0   : > { %4959 = vmatpush.msrb.mxu0 %v4928_v34  ;;  %5063 = vmatpush.msra.mxu2 %v5031_v6  ;;  %v7054_v6 = vld [vmem:[%s13181_s6 + $0x8] sm:$0xff] }
 0x6b1   : > { %8210 = vmatmul.msk.f32.gmra.mxu3 %vm968_vm2, %v8202_v9  ;;  %8206 = vmatmul.msk.f32.gmra.mxu2 %vm968_vm2, %v8202_v9 }
 0x6b2   : > { %4989 = vmatpush.msrb.mxu1 %v8940_v22  ;;  %9162 = vrot.lane.b32.xlu0 %v11549_v21, %s13346_s24  ;;  %v8227_v22 = vld [vmem:[%s13180_s5 + $0xb0] sm:$0xff] }
 0x6b3   : > { %9167 = vrot.lane.b32.xlu1 %v11565_v60, %s13345_s27  ;;  %9177 = vrot.lane.b32.xlu2 %v11559_v2, %s13346_s24  ;;  %s7637_s27 = sshll.u32 %s11476_s19, 4  ;;  %s7638_s27 = int_to_ptr.vmem [resolvable:$true] %s7637_s27 }
 0x6b4   : > { %8179 = vmatmul.msk.f32.gmra.mxu1 %vm968_vm2, %v8171_v38  ;;  %4960 = vmatpush.msrb.mxu0 %v4927_v48  ;;  %v8958_v23 = vpop.permute.xlu1 %8957  ;;  %v8948_v16 = vpop.permute.xlu0 %8947 }
 0x6b5   : > { %8175 = vmatmul.msk.f32.gmra.mxu0 %vm968_vm2, %v8171_v38  ;;  %v8960_v50 = vunpack.i.h.bf16 %v8958_v23  ;;  %v8959_v44 = vunpack.i.l.bf16 %v8958_v23  ;;  %v8950_v62 = vunpack.i.h.bf16 %v8948_v16  ;;  %v8949_v32 = vunpack.i.l.bf16 %v8948_v16  ;;  %v9008_v29 = vpop.permute.xlu2 %9007  ;;  %v8228_v16 = vld [vmem:[%s13180_s5 + $0xb8] sm:$0xff] }
 0x6b6   : > { %v9010_v18 = vunpack.i.h.bf16 %v9008_v29 }
 0x6b7   : > { %v5029_v33 = vsel %vm1422_vm7, %v8960_v50, %v8954_v7  ;;  %v5032_v25 = vsel %vm1422_vm7, %v8945_v46, %v8959_v44  ;;  %v5133_v59 = vsel %vm1526_vm8, %v8949_v32, %v8950_v62  ;;  %v9009_v46 = vunpack.i.l.bf16 %v9008_v29  ;;  %v7087_v50 = vld [vmem:[%s13182_s7 + $0x10] sm:$0xff]  ;;  %v8249_v32 = vld [vmem:[%s13180_s5 + $0xe0] sm:$0xff] }
 0x6b8   : > { %5064 = vmatpush.msra.mxu2 %v5029_v33  ;;  %5092 = vmatpush.msra.mxu3 %v5032_v25  ;;  %v8213_v33 = vld [vmem:[%s13180_s5 + $0x80] sm:$0xff]  ;;  %v9000_v25 = vunpack.i.h.bf16 %v11765_v26 }
 0x6b9   : > { %8211 = vmatmul.msk.f32.gmra.mxu3 %vm968_vm2, %v8203_v55  ;;  %8207 = vmatmul.msk.f32.gmra.mxu2 %vm968_vm2, %v8203_v55  ;;  %v5438_v38 = vsel %vm1838_vm10, %v9009_v46, %v9010_v18 }
 0x6ba   : > { %9182 = vrot.lane.b32.xlu0 %v11549_v21, %s13347_s14  ;;  %5093 = vmatpush.msra.mxu3 %v5030_v0 }
 0x6bb   : > { %9172 = vrot.lane.b32.xlu1 %v11565_v60, %s13346_s24  ;;  %9187 = vrot.lane.b32.xlu2 %v11559_v2, %s13347_s14 }
 0x6bc   : > { %8180 = vmatmul.msk.f32.gmra.mxu1 %vm968_vm2, %v8172_v43  ;;  %v8963_v53 = vpop.permute.xlu1 %8962  ;;  %v8973_v42 = vpop.permute.xlu0 %8972 }
 0x6bd   : > { %8176 = vmatmul.msk.f32.gmra.mxu0 %vm968_vm2, %v8172_v43  ;;  %v8975_v41 = vunpack.i.h.bf16 %v8973_v42  ;;  %v8974_v11 = vunpack.i.l.bf16 %v8973_v42  ;;  %v8964_v52 = vunpack.i.l.bf16 %v8963_v53  ;;  %v8965_v39 = vunpack.i.h.bf16 %v8963_v53  ;;  %v11826_v48 = vpop.permute.xlu2 %9027 }
 0x6be   : > { %v8999_v43 = vunpack.i.l.bf16 %v11765_v26  ;;  %v8250_v26 = vld [vmem:[%s13180_s5 + $0xe8] sm:$0xff] }
 0x6bf   : > { %v5235_v63 = vsel %vm1630_vm9, %v8974_v11, %v8975_v41  ;;  %v5134_v14 = vsel %vm1526_vm8, %v8950_v62, %v8964_v52  ;;  %v5131_v35 = vsel %vm1526_vm8, %v8965_v39, %v8969_v58  ;;  %vm13353_vm8 = vmmov %vm13350_vm4 }
 0x6c0   : > { %5267 = vmatpush.msrb.mxu2 %v5235_v63  ;;  %v5336_v62 = vsel %vm1734_vm11, %v8999_v43, %v9000_v25 }
 0x6c1   : > { %8212 = vmatmul.msk.f32.gmra.mxu3 %vm968_vm2, %v8204_v31  ;;  %8208 = vmatmul.msk.f32.gmra.mxu2 %vm968_vm2, %v8204_v31 }
 0x6c2   : > { %9192 = vrot.lane.b32.xlu0 %v11549_v21, %s13348_s23 }
 0x6c3   : > { %9197 = vrot.lane.b32.xlu1 %v11565_v60, %s13347_s14  ;;  %9207 = vrot.lane.b32.xlu2 %v11559_v2, %s13348_s23 }
 0x6c4   : > { %8197 = vmatmul.msk.f32.vlgmr.msra.gmra.mxu1 %vm968_vm2, %v8189_v4  ;;  %v8988_v20 = vpop.permute.xlu1 %8987  ;;  %v11761_v45 = vpop.permute.xlu0 %8982 }
 0x6c5   : > { %5194 = vmatpush.msra.mxu1 %v5134_v14  ;;  %8193 = vmatmul.msk.f32.vlgmr.msra.gmra.mxu0 %vm968_vm2, %v8189_v4  ;;  %v8990_v56 = vunpack.i.h.bf16 %v8988_v20  ;;  %v8989_v12 = vunpack.i.l.bf16 %v8988_v20  ;;  %v8985_v44 = vunpack.i.h.bf16 %v11761_v45  ;;  %v8984_v55 = vunpack.i.l.bf16 %v11761_v45  ;;  %v9038_v53 = vpop.permute.xlu2 %9037  ;;  %v7056_v20 = vld [vmem:[%s13181_s6 + $0x18] sm:$0xff]  ;;  %v7055_v45 = vld [vmem:[%s13181_s6 + $0x10] sm:$0xff] }
 0x6c6   : > { %5165 = vmatpush.msra.mxu0 %v5133_v59  ;;  %v9040_v4 = vunpack.i.h.bf16 %v9038_v53  ;;  %v9039_v51 = vunpack.i.l.bf16 %v9038_v53  ;;  %v8214_v59 = vld [vmem:[%s13180_s5 + $0x88] sm:$0xff] }
 0x6c7   : > { %5195 = vmatpush.msra.mxu1 %v5132_v10  ;;  %v5233_v40 = vsel %vm1630_vm9, %v8990_v56, %v8979_v37  ;;  %v5236_v17 = vsel %vm1630_vm9, %v8975_v41, %v8989_v12  ;;  %v5337_v63 = vsel %vm1734_vm11, %v8984_v55, %v8985_v44  ;;  %v7088_v10 = vld [vmem:[%s13182_s7 + $0x18] sm:$0xff]  ;;  %vm13354_vm9 = vcmask 736256  }
 0x6c8   : > { %5166 = vmatpush.msra.mxu0 %v5131_v35  ;;  %5268 = vmatpush.msrb.mxu2 %v5233_v40  ;;  %v5642_v56 = vsel %vm2046_vm12, %v9039_v51, %v9040_v4 }
 0x6c9   : > { %8233 = vmatmul.msk.f32.vlgmr.msra.gmra.mxu3 %vm968_vm2, %v8225_v19  ;;  %8229 = vmatmul.msk.f32.vlgmr.msra.gmra.mxu2 %vm968_vm2, %v8225_v19  ;;  %v8215_v19 = vld [vmem:[%s13180_s5 + $0x90] sm:$0xff] }
 0x6ca   : > { %5296 = vmatpush.msrb.mxu3 %v5236_v17  ;;  %9212 = vrot.lane.b32.xlu0 %v11549_v21, %s13349_s15  ;;  %v8216_v17 = vld [vmem:[%s13180_s5 + $0x98] sm:$0xff] }
 0x6cb   : > { %9202 = vrot.lane.b32.xlu1 %v11565_v60, %s13348_s23  ;;  %9217 = vrot.lane.b32.xlu2 %v11559_v2, %s13349_s15 }
 0x6cc   : > { %8198 = vmatmul.msk.f32.gmra.mxu1 %vm968_vm2, %v8190_v28  ;;  %5297 = vmatpush.msrb.mxu3 %v5234_v24  ;;  %v11787_v27 = vpop.permute.xlu1 %8992  ;;  %v9003_v49 = vpop.permute.xlu0 %9002  ;;  %v8252_v24 = vld [vmem:[%s13180_s5 + $0xf8] sm:$0xff] }
 0x6cd   : > { %8194 = vmatmul.msk.f32.gmra.mxu0 %vm968_vm2, %v8190_v28  ;;  %v9005_v61 = vunpack.i.h.bf16 %v9003_v49  ;;  %v9004_v3 = vunpack.i.l.bf16 %v9003_v49  ;;  %v8994_v7 = vunpack.i.l.bf16 %v11787_v27  ;;  %v8995_v8 = vunpack.i.h.bf16 %v11787_v27  ;;  %v11908_v28 = vpop.permute.xlu2 %9057 }
 0x6cf   : > { %v5439_v30 = vsel %vm1838_vm10, %v9004_v3, %v9005_v61  ;;  %v5338_v42 = vsel %vm1734_vm11, %v8985_v44, %v8994_v7  ;;  %v5335_v58 = vsel %vm1734_vm11, %v8995_v8, %v8999_v43  ;;  %v8237_v3 = vld [vmem:[%s13180_s5 + $0xc0] sm:$0xff]  ;;  %v8238_v7 = vld [vmem:[%s13180_s5 + $0xc8] sm:$0xff]  ;;  %vm13356_vm11 = vmmov %vm13354_vm9 }
 0x6d0   : > { %5471 = vmatpush.msra.mxu2 %v5439_v30  ;;  %v9029_v30 = vunpack.i.l.bf16 %v11826_v48  ;;  %v8274_v44 = vld [vmem:[%s13180_s5 + $0x128] sm:$0xff] }
 0x6d1   : > { %8234 = vmatmul.msk.f32.gmra.mxu3 %vm968_vm2, %v8226_v13  ;;  %8230 = vmatmul.msk.f32.gmra.mxu2 %vm968_vm2, %v8226_v13  ;;  %v9030_v13 = vunpack.i.h.bf16 %v11826_v48 }
 0x6d2   : > { %9222 = vrot.lane.b32.xlu0 %v11549_v21, %s13266_s20 }
 0x6d3   : > { %9227 = vrot.lane.b32.xlu1 %v11565_v60, %s13349_s15  ;;  %9237 = vrot.lane.b32.xlu2 %v11559_v2, %s13266_s20  ;;  %v7053_v2 = vld [vmem:[%s13181_s6] sm:$0xff] }
 0x6d4   : > { %8199 = vmatmul.msk.f32.gmra.mxu1 %vm968_vm2, %v8191_v36  ;;  %v9018_v47 = vpop.permute.xlu1 %9017  ;;  %v11815_v34 = vpop.permute.xlu0 %9012 }
 0x6d5   : > { %8195 = vmatmul.msk.f32.gmra.mxu0 %vm968_vm2, %v8191_v36  ;;  %v9020_v15 = vunpack.i.h.bf16 %v9018_v47  ;;  %v9019_v9 = vunpack.i.l.bf16 %v9018_v47  ;;  %v9015_v49 = vunpack.i.h.bf16 %v11815_v34  ;;  %v9068_v18 = vpop.permute.xlu2 %9067 }
 0x6d7   : > { %v5437_v21 = vsel %vm1838_vm10, %v9020_v15, %v9009_v46  ;;  %v5440_v1 = vsel %vm1838_vm10, %v9005_v61, %v9019_v9  ;;  %v9014_v61 = vunpack.i.l.bf16 %v11815_v34  ;;  %v11928_v15 = vpop.f32.mrf.mxu3  ;;  %v8273_v34 = vld [vmem:[%s13180_s5 + $0x120] sm:$0xff]  ;;  %vm13355_vm10 = vmmov %vm13354_vm9 }
 0x6d8   : > { %5472 = vmatpush.msra.mxu2 %v5437_v21  ;;  %5500 = vmatpush.msra.mxu3 %v5440_v1 }
 0x6d9   : > { %8235 = vmatmul.msk.f32.gmra.mxu3 %vm968_vm2, %v8227_v22  ;;  %8231 = vmatmul.msk.f32.gmra.mxu2 %vm968_vm2, %v8227_v22  ;;  %v5541_v1 = vsel %vm1942_vm13, %v9014_v61, %v9015_v49 }
 0x6da   : > { %7059 = vperm.xlu0 %8558, %v7053_v2   ;;  %5501 = vmatpush.msra.mxu3 %v5438_v38  ;;  %v5540_v2 = vsel %vm1942_vm13, %v9029_v30, %v9030_v13 }
 0x6db   : > { %9232 = vrot.lane.b32.xlu1 %v11565_v60, %s13266_s20  ;;  %7064 = vperm.xlu2 %8900, %v7054_v6   ;;  %v7085_v60 = vld [vmem:[%s13182_s7] sm:$0xff]  ;;  %v9070_v6 = vunpack.i.h.bf16 %v9068_v18 }
 0x6dc   : > { %8200 = vmatmul.msk.f32.gmra.mxu1 %vm968_vm2, %v8192_v5  ;;  %v11831_v23 = vpop.permute.xlu1 %9022  ;;  %v9033_v0 = vpop.permute.xlu0 %9032 }
 0x6dd   : > { %8196 = vmatmul.msk.f32.gmra.mxu0 %vm968_vm2, %v8192_v5  ;;  %v9035_v11 = vunpack.i.h.bf16 %v9033_v0  ;;  %v9034_v31 = vunpack.i.l.bf16 %v9033_v0  ;;  %v9024_v27 = vunpack.i.l.bf16 %v11831_v23  ;;  %v9025_v47 = vunpack.i.h.bf16 %v11831_v23  ;;  %v11937_v23 = vpop.f32.mrf.mxu2  ;;  %v8275_v0 = vld [vmem:[%s13180_s5 + $0x130] sm:$0xff] }
 0x6de   : > { %v9069_v5 = vunpack.i.l.bf16 %v9068_v18  ;;  %v8298_v18 = vld [vmem:[%s13180_s5 + $0x168] sm:$0xff] }
 0x6df   : > { %v5643_v37 = vsel %vm2046_vm12, %v9034_v31, %v9035_v11  ;;  %v5542_v46 = vsel %vm1942_vm13, %v9015_v49, %v9024_v27  ;;  %v5539_v38 = vsel %vm1942_vm13, %v9025_v47, %v9029_v30  ;;  %v11953_v55 = vpop.f32.mrf.mxu3  ;;  %v8276_v31 = vld [vmem:[%s13180_s5 + $0x138] sm:$0xff]  ;;  %vm13358_vm13 = vcmask 605184   ;;  %v8262_v30 = vld [vmem:[%s13180_s5 + $0x108] sm:$0xff] }
 0x6e1   : > { %8236 = vmatmul.msk.f32.gmra.mxu3 %vm968_vm2, %v8228_v16  ;;  %8232 = vmatmul.msk.f32.gmra.mxu2 %vm968_vm2, %v8228_v16 }
 0x6e2   : > { %7096 = vperm.xlu0 %8558, %v7086_v57  }
 0x6e3   : > { %7091 = vperm.xlu1 %8559, %v7085_v60   ;;  %7101 = vperm.xlu2 %8900, %v7087_v50   ;;  %v5846_v60 = vsel %vm13352_vm6, %v9069_v5, %v9070_v6 }
 0x6e4   : > { %8221 = vmatmul.msk.f32.vlgmr.msrb.gmra.mxu1 %vm968_vm2, %v8213_v33  ;;  %v9048_v41 = vpop.permute.xlu1 %9047  ;;  %v11899_v35 = vpop.permute.xlu0 %9042 }
 0x6e5   : > { %5398 = vmatpush.msrb.mxu1 %v5338_v42  ;;  %8217 = vmatmul.msk.f32.vlgmr.msrb.gmra.mxu0 %vm968_vm2, %v8213_v33  ;;  %v9049_v52 = vunpack.i.l.bf16 %v9048_v41  ;;  %v9050_v14 = vunpack.i.h.bf16 %v9048_v41  ;;  %v8239_v33 = vld [vmem:[%s13180_s5 + $0xd0] sm:$0xff]  ;;  %v11960_v25 = vpop.f32.mrf.mxu2  ;;  %v8240_v42 = vld [vmem:[%s13180_s5 + $0xd8] sm:$0xff]  ;;  %v11978_v41 = vpop.permute.xlu2 %9087 }
 0x6e6   : > { %5369 = vmatpush.msrb.mxu0 %v5337_v63 }
 0x6e7   : > { %5399 = vmatpush.msrb.mxu1 %v5336_v62  ;;  %v5644_v39 = vsel %vm2046_vm12, %v9035_v11, %v9049_v52  ;;  %v5641_v12 = vsel %vm2046_vm12, %v9050_v14, %v9039_v51  ;;  %v11971_v53 = vpop.f32.mrf.mxu3  ;;  %v9045_v62 = vunpack.i.h.bf16 %v11899_v35  ;;  %v9059_v14 = vunpack.i.l.bf16 %v11908_v28  ;;  %vm13357_vm12 = vmmov %vm13354_vm9 }
 0x6e8   : > { %5370 = vmatpush.msrb.mxu0 %v5335_v58  ;;  %v8261_v58 = vld [vmem:[%s13180_s5 + $0x100] sm:$0xff] }
 0x6e9   : > { %8257 = vmatmul.msk.f32.vlgmr.msrb.gmra.mxu3 %vm968_vm2, %v8249_v32  ;;  %8253 = vmatmul.msk.f32.vlgmr.msrb.gmra.mxu2 %vm968_vm2, %v8249_v32  ;;  %v9044_v32 = vunpack.i.l.bf16 %v11899_v35  ;;  %v8297_v35 = vld [vmem:[%s13180_s5 + $0x160] sm:$0xff] }
 0x6ea   : > { %5704 = vmatpush.msrb.mxu3 %v5644_v39  ;;  %5675 = vmatpush.msrb.mxu2 %v5643_v37  ;;  %v9060_v39 = vunpack.i.h.bf16 %v11908_v28 }
 0x6eb   : > { %7074 = vperm.xlu0 %8558, %v7056_v20   ;;  %7069 = vperm.xlu1 %8559, %v7055_v45  }
 0x6ec   : > { %8222 = vmatmul.msk.f32.gmra.mxu1 %vm968_vm2, %v8214_v59  ;;  %5705 = vmatpush.msrb.mxu3 %v5642_v56  ;;  %v11901_v40 = vpop.permute.xlu1 %9052  ;;  %v9063_v29 = vpop.permute.xlu0 %9062 }
 0x6ed   : > { %8218 = vmatmul.msk.f32.gmra.mxu0 %vm968_vm2, %v8214_v59  ;;  %5676 = vmatpush.msrb.mxu2 %v5641_v12  ;;  %v9065_v9 = vunpack.i.h.bf16 %v9063_v29  ;;  %v9064_v22 = vunpack.i.l.bf16 %v9063_v29  ;;  %v11981_v11 = vpop.f32.mrf.mxu2  ;;  %v9054_v63 = vunpack.i.l.bf16 %v11901_v40  ;;  %v9055_v37 = vunpack.i.h.bf16 %v11901_v40  ;;  %v9098_v59 = vpop.permute.xlu2 %9097 }
 0x6ee   : > { %v9099_v28 = vunpack.i.l.bf16 %v9098_v59 }
 0x6ef   : > { %v5847_v57 = vsel %vm13351_vm5, %v9064_v22, %v9065_v9  ;;  %v12001_v45 = vpop.f32.mrf.mxu3  ;;  %v5746_v56 = vsel %vm13354_vm9, %v9045_v62, %v9054_v63  ;;  %v8263_v22 = vld [vmem:[%s13180_s5 + $0x110] sm:$0xff] }
 0x6f1   : > { %8258 = vmatmul.msk.f32.gmra.mxu3 %vm968_vm2, %v8250_v26  ;;  %8254 = vmatmul.msk.f32.gmra.mxu2 %vm968_vm2, %v8250_v26 }
 0x6f3   : > { %7106 = vperm.xlu1 %8559, %v7088_v10  }
 0x6f4   : > { %8223 = vmatmul.msk.f32.gmra.mxu1 %vm968_vm2, %v8215_v19  ;;  %v9078_v36 = vpop.permute.xlu1 %9077  ;;  %v11964_v43 = vpop.permute.xlu0 %9072 }
 0x6f5   : > { %8219 = vmatmul.msk.f32.gmra.mxu0 %vm968_vm2, %v8215_v19  ;;  %v9079_v21 = vunpack.i.l.bf16 %v9078_v36  ;;  %v9080_v48 = vunpack.i.h.bf16 %v9078_v36  ;;  %v5745_v19 = vsel %vm13355_vm10, %v9044_v32, %v9045_v62  ;;  %v12012_v40 = vpop.f32.mrf.mxu2  ;;  %v8285_v62 = vld [vmem:[%s13180_s5 + $0x140] sm:$0xff]  ;;  %v9089_v32 = vunpack.i.l.bf16 %v11978_v41 }
 0x6f7   : > { %v5848_v16 = vsel %vm13350_vm4, %v9065_v9, %v9079_v21  ;;  %v5845_v50 = vsel %vm13353_vm8, %v9080_v48, %v9069_v5  ;;  %vm13359_vm4 = vmmov %vm13358_vm13  ;;  %v8264_v48 = vld [vmem:[%s13180_s5 + $0x118] sm:$0xff]  ;;  %vm13362_vm8 = vcmask 719872  }
 0x6f8   : > { %vm13360_vm5 = vmmov %vm13359_vm4 }
 0x6f9   : > { %8259 = vmatmul.msk.f32.gmra.mxu3 %vm968_vm2, %v8251_v54  ;;  %8255 = vmatmul.msk.f32.gmra.mxu2 %vm968_vm2, %v8251_v54  ;;  %v5744_v54 = vsel %vm13356_vm11, %v9059_v14, %v9060_v39  ;;  %vm13361_vm6 = vmmov %vm13359_vm4 }
 0x6fa   : > { %vm13363_vm9 = vmmov %vm13362_vm8 }
 0x6fb   : > { %vm13364_vm10 = vmmov %vm13362_vm8 }
 0x6fc   : > { %8224 = vmatmul.msk.f32.gmra.mxu1 %vm968_vm2, %v8216_v17  ;;  %v11969_v8 = vpop.permute.xlu1 %9082  ;;  %v9093_v52 = vpop.permute.xlu0 %9092  ;;  %vm13365_vm11 = vmmov %vm13362_vm8 }
 0x6fd   : > { %8220 = vmatmul.msk.f32.gmra.mxu0 %vm968_vm2, %v8216_v17  ;;  %v9095_v12 = vunpack.i.h.bf16 %v9093_v52  ;;  %v9094_v26 = vunpack.i.l.bf16 %v9093_v52  ;;  %v9100_v17 = vunpack.i.h.bf16 %v9098_v59 }
 0x6ff   : > { %v6051_v13 = vsel %vm13359_vm4, %v9094_v26, %v9095_v12  ;;  %v6050_v29 = vsel %vm13360_vm5, %v9099_v28, %v9100_v17  ;;  %vm13370_vm5 = vcmask 572416  }
 0x701   : > { %8260 = vmatmul.msk.f32.gmra.mxu3 %vm968_vm2, %v8252_v24  ;;  %8256 = vmatmul.msk.f32.gmra.mxu2 %vm968_vm2, %v8252_v24  ;;  %v5743_v24 = vsel %vm13357_vm12, %v9055_v37, %v9059_v14 }
 0x704   : > { %8245 = vmatmul.msk.f32.vlgmr.msra.gmra.mxu1 %vm968_vm2, %v8237_v3  ;;  %v9108_v20 = vpop.permute.xlu1 %9107  ;;  %v12051_v6 = vpop.permute.xlu0 %9102 }
 0x705   : > { %5602 = vmatpush.msra.mxu1 %v5542_v46  ;;  %8241 = vmatmul.msk.f32.vlgmr.msra.gmra.mxu0 %vm968_vm2, %v8237_v3  ;;  %v9109_v10 = vunpack.i.l.bf16 %v9108_v20  ;;  %v9110_v27 = vunpack.i.h.bf16 %v9108_v20 }
 0x706   : > { %5573 = vmatpush.msra.mxu0 %v5541_v1 }
 0x707   : > { %5603 = vmatpush.msra.mxu1 %v5540_v2  ;;  %v6052_v3 = vsel %vm13358_vm13, %v9095_v12, %v9109_v10  ;;  %v6049_v36 = vsel %vm13361_vm6, %v9110_v27, %v9099_v28  ;;  %v8299_v2 = vld [vmem:[%s13180_s5 + $0x170] sm:$0xff]  ;;  %v8321_v10 = vld [vmem:[%s13180_s5 + $0x1a0] sm:$0xff]  ;;  %vm13371_vm6 = vmmov %vm13370_vm5 }
 0x708   : > { %5574 = vmatpush.msra.mxu0 %v5539_v38 }
 0x709   : > { %8281 = vmatmul.msk.f32.vlgmr.msra.gmra.mxu3 %vm968_vm2, %v8273_v34  ;;  %8277 = vmatmul.msk.f32.vlgmr.msra.gmra.mxu2 %vm968_vm2, %v8273_v34 }
 0x70a   : > { %5908 = vmatpush.msra.mxu3 %v5848_v16  ;;  %5879 = vmatpush.msra.mxu2 %v5847_v57  ;;  %v12062_v16 = vpop.permute.xlu2 %9117 }
 0x70c   : > { %8246 = vmatmul.msk.f32.gmra.mxu1 %vm968_vm2, %v8238_v7  ;;  %5909 = vmatpush.msra.mxu3 %v5846_v60  ;;  %v12053_v5 = vpop.permute.xlu1 %9112  ;;  %v8300_v60 = vld [vmem:[%s13180_s5 + $0x178] sm:$0xff] }
 0x70d   : > { %8242 = vmatmul.msk.f32.gmra.mxu0 %vm968_vm2, %v8238_v7  ;;  %5880 = vmatpush.msra.mxu2 %v5845_v50 }
 0x711   : > { %8282 = vmatmul.msk.f32.gmra.mxu3 %vm968_vm2, %v8274_v44  ;;  %8278 = vmatmul.msk.f32.gmra.mxu2 %vm968_vm2, %v8274_v44  ;;  %v9075_v44 = vunpack.i.h.bf16 %v11964_v43 }
 0x714   : > { %8247 = vmatmul.msk.f32.gmra.mxu1 %vm968_vm2, %v8239_v33 }
 0x715   : > { %8243 = vmatmul.msk.f32.gmra.mxu0 %vm968_vm2, %v8239_v33  ;;  %v9074_v33 = vunpack.i.l.bf16 %v11964_v43  ;;  %v9090_v43 = vunpack.i.h.bf16 %v11978_v41 }
 0x717   : > { %v5949_v37 = vsel %vm13363_vm9, %v9074_v33, %v9075_v44  ;;  %vm13373_vm9 = vmmov %vm13370_vm5 }
 0x719   : > { %8283 = vmatmul.msk.f32.gmra.mxu3 %vm968_vm2, %v8275_v0  ;;  %8279 = vmatmul.msk.f32.gmra.mxu2 %vm968_vm2, %v8275_v0  ;;  %v9084_v0 = vunpack.i.l.bf16 %v11969_v8 }
 0x71b   : > { %v5950_v20 = vsel %vm13362_vm8, %v9075_v44, %v9084_v0  ;;  %vm13372_vm8 = vmmov %vm13370_vm5 }
 0x71c   : > { %8248 = vmatmul.msk.f32.gmra.mxu1 %vm968_vm2, %v8240_v42 }
 0x71d   : > { %8244 = vmatmul.msk.f32.gmra.mxu0 %vm968_vm2, %v8240_v42 }
 0x721   : > { %v11990_v4 = vpop.f32.mrf.mxu1  ;;  %v11992_v51 = vpop.f32.mrf.mxu0  ;;  %8284 = vmatmul.msk.f32.gmra.mxu3 %vm968_vm2, %v8276_v31  ;;  %8280 = vmatmul.msk.f32.gmra.mxu2 %vm968_vm2, %v8276_v31 }
 0x722   : > { %v4712_v42 = vadd.f32 %v11928_v15, %v11990_v4  ;;  %v9123_v31 = vpop.permute.xlu0 %9122  ;;  %v4683_v63 = vadd.f32 %v11937_v23, %v11992_v51  ;;  %v9085_v4 = vunpack.i.h.bf16 %v11969_v8  ;;  %v9128_v23 = vpop.permute.xlu2 %9127  ;;  %v5948_v8 = vsel %vm13364_vm10, %v9089_v32, %v9090_v43 }
 0x723   : > { %v9124_v12 = vunpack.i.l.bf16 %v9123_v31  ;;  %vm13374_vm10 = vcmask 580608  }
 0x724   : > { %8269 = vmatmul.msk.f32.vlgmr.msrb.gmra.mxu1 %vm968_vm2, %v8261_v58  ;;  %v5947_v17 = vsel %vm13365_vm11, %v9085_v4, %v9089_v32  ;;  %v9105_v4 = vunpack.i.h.bf16 %v12051_v6  ;;  %vm13375_vm11 = vmmov %vm13374_vm10 }
 0x725   : > { %5806 = vmatpush.msrb.mxu1 %v5746_v56  ;;  %8265 = vmatmul.msk.f32.vlgmr.msrb.gmra.mxu0 %vm968_vm2, %v8261_v58  ;;  %v9138_v58 = vpop.permute.xlu1 %9137  ;;  %v9125_v56 = vunpack.i.h.bf16 %v9123_v31 }
 0x726   : > { %5777 = vmatpush.msrb.mxu0 %v5745_v19  ;;  %v9139_v41 = vunpack.i.l.bf16 %v9138_v58  ;;  %v9140_v28 = vunpack.i.h.bf16 %v9138_v58 }
 0x727   : > { %5807 = vmatpush.msrb.mxu1 %v5744_v54  ;;  %v9130_v54 = vunpack.i.h.bf16 %v9128_v23 }
 0x728   : > { %5778 = vmatpush.msrb.mxu0 %v5743_v24 }
 0x729   : > { %v12015_v49 = vpop.f32.mrf.mxu1  ;;  %v12017_v61 = vpop.f32.mrf.mxu0  ;;  %8305 = vmatmul.msk.f32.vlgmr.msrb.gmra.mxu3 %vm968_vm2, %v8297_v35  ;;  %8301 = vmatmul.msk.f32.vlgmr.msrb.gmra.mxu2 %vm968_vm2, %v8297_v35  ;;  %v9129_v35 = vunpack.i.l.bf16 %v9128_v23  ;;  %v9114_v23 = vunpack.i.l.bf16 %v12053_v5 }
 0x72a   : > { %6112 = vmatpush.msrb.mxu3 %v6052_v3  ;;  %6083 = vmatpush.msrb.mxu2 %v6051_v13  ;;  %v4715_v24 = vadd.f32 %v11953_v55, %v12015_v49  ;;  %v4686_v27 = vadd.f32 %v11960_v25, %v12017_v61  ;;  %v6256_v13 = vsel %vm2670_vm15, %v9125_v56, %v9139_v41  ;;  %v12153_v31 = vpop.permute.xlu0 %9132  ;;  %v12166_v43 = vpop.permute.xlu2 %9147 }
 0x72b   : > { %v6254_v25 = vsel %vm2670_vm15, %v9129_v35, %v9130_v54  ;;  %v6253_v61 = vsel %vm2670_vm15, %v9140_v28, %v9129_v35 }
 0x72c   : > { %8270 = vmatmul.msk.f32.gmra.mxu1 %vm968_vm2, %v8262_v30  ;;  %6113 = vmatpush.msrb.mxu3 %v6050_v29  ;;  %v4895_v47 = vpop.f32.mrf.mxu3  ;;  %v4866_v46 = vpop.f32.mrf.mxu2  ;;  %v8286_v29 = vld [vmem:[%s13180_s5 + $0x148] sm:$0xff] }
 0x72d   : > { %8266 = vmatmul.msk.f32.gmra.mxu0 %vm968_vm2, %v8262_v30  ;;  %6084 = vmatpush.msrb.mxu2 %v6049_v36  ;;  %v6255_v30 = vsel %vm2670_vm15, %v9124_v12, %v9125_v56  ;;  %v9120_v56 = vunpack.i.h.bf16 %v12062_v16  ;;  %v9119_v12 = vunpack.i.l.bf16 %v12062_v16  ;;  %vm13366_vm15 = vcmask 596992  }
 0x72e   : > { %vm13367_vm12 = vmmov %vm13366_vm15 }
 0x72f   : > { %vm13368_vm13 = vmmov %vm13367_vm12 }
 0x730   : > { %vm13369_vm4 = vmmov %vm13367_vm12 }
 0x731   : > { %v12033_v9 = vpop.f32.mrf.mxu1  ;;  %8306 = vmatmul.msk.f32.gmra.mxu3 %vm968_vm2, %v8298_v18  ;;  %8302 = vmatmul.msk.f32.gmra.mxu2 %vm968_vm2, %v8298_v18 }
 0x732   : > { %v12040_v21 = vpop.f32.mrf.mxu0  ;;  %v9158_v54 = vpop.permute.xlu2 %9157 }
 0x734   : > { %8271 = vmatmul.msk.f32.gmra.mxu1 %vm968_vm2, %v8263_v22  ;;  %v12043_v1 = vpop.f32.mrf.mxu3  ;;  %v12049_v34 = vpop.f32.mrf.mxu2 }
 0x735   : > { %8267 = vmatmul.msk.f32.gmra.mxu0 %vm968_vm2, %v8263_v22  ;;  %v8322_v22 = vld [vmem:[%s13180_s5 + $0x1a8] sm:$0xff] }
 0x739   : > { %v12055_v38 = vpop.f32.mrf.mxu1  ;;  %8307 = vmatmul.msk.f32.gmra.mxu3 %vm968_vm2, %v8299_v2  ;;  %8303 = vmatmul.msk.f32.gmra.mxu2 %vm968_vm2, %v8299_v2 }
 0x73a   : > { %v12064_v57 = vpop.f32.mrf.mxu0 }
 0x73c   : > { %8272 = vmatmul.msk.f32.gmra.mxu1 %vm968_vm2, %v8264_v48  ;;  %v12067_v7 = vpop.f32.mrf.mxu3  ;;  %v12073_v50 = vpop.f32.mrf.mxu2 }
 0x73d   : > { %8268 = vmatmul.msk.f32.gmra.mxu0 %vm968_vm2, %v8264_v48  ;;  %v4689_v48 = vadd.f32 %v11981_v11, %v12040_v21 }
 0x741   : > { %v4799_v52 = vpop.f32.mrf.mxu1  ;;  %8308 = vmatmul.msk.f32.gmra.mxu3 %vm968_vm2, %v8300_v60  ;;  %8304 = vmatmul.msk.f32.gmra.mxu2 %vm968_vm2, %v8300_v60 }
 0x742   : > { %v4812_v39 = vadd.f32 %v4799_v52, %v4712_v42  ;;  %v4770_v15 = vpop.f32.mrf.mxu0  ;;  %v4692_v52 = vadd.f32 %v12012_v40, %v12064_v57 }
 0x743   : > { %v4811_v14 = vadd.f32 %v4770_v15, %v4683_v63  ;;  %v12155_v63 = vpop.permute.xlu1 %9142 }
 0x744   : > { %v12090_v51 = vadd.f32 %v4895_v47, %v4812_v39  ;;  %8293 = vmatmul.msk.f32.vlgmr.msra.gmra.mxu1 %vm968_vm2, %v8285_v62  ;;  %v12095_v59 = vpop.f32.mrf.mxu3  ;;  %v4875_v19 = vpop.f32.mrf.mxu2 }
 0x745   : > { %v12097_v26 = vadd.f32 %v4866_v46, %v4811_v14  ;;  %6010 = vmatpush.msra.mxu1 %v5950_v20  ;;  %8289 = vmatmul.msk.f32.vlgmr.msra.gmra.mxu0 %vm968_vm2, %v8285_v62  ;;  %v8288_v62 = vld [vmem:[%s13180_s5 + $0x158] sm:$0xff]  ;;  %v9104_v14 = vunpack.i.l.bf16 %v12051_v6  ;;  %v9153_v20 = vpop.permute.xlu0 %9152 }
 0x746   : > { %5981 = vmatpush.msra.mxu0 %v5949_v37  ;;  %v9155_v16 = vunpack.i.h.bf16 %v9153_v20 }
 0x747   : > { %6011 = vmatpush.msra.mxu1 %v5948_v8  ;;  %v6153_v28 = vsel %vm13367_vm12, %v9104_v14, %v9105_v4  ;;  %vm13377_vm12 = vmmov %vm13374_vm10 }
 0x748   : > { %5982 = vmatpush.msra.mxu0 %v5947_v17  ;;  %v6154_v17 = vsel %vm13366_vm15, %v9105_v4, %v9114_v23  ;;  %vm13376_vm15 = vmmov %vm13374_vm10 }
 0x749   : > { %v4802_v3 = vpop.f32.mrf.mxu1  ;;  %8329 = vmatmul.msk.f32.vlgmr.msra.gmra.mxu3 %vm968_vm2, %v8321_v10  ;;  %8325 = vmatmul.msk.f32.vlgmr.msra.gmra.mxu2 %vm968_vm2, %v8321_v10  ;;  %v9115_v10 = vunpack.i.h.bf16 %v12053_v5  ;;  %v6152_v5 = vsel %vm13368_vm13, %v9119_v12, %v9120_v56  ;;  %vm13378_vm13 = vcmask 449536  }
 0x74a   : > { %v4814_v36 = vadd.f32 %v4802_v3, %v4715_v24  ;;  %v4773_v47 = vpop.f32.mrf.mxu0  ;;  %6316 = vmatpush.msra.mxu3 %v6256_v13  ;;  %6287 = vmatpush.msra.mxu2 %v6255_v30  ;;  %v9160_v30 = vunpack.i.h.bf16 %v9158_v54 }
 0x74b   : > { %v4813_v55 = vadd.f32 %v4773_v47, %v4686_v27  ;;  %v9168_v41 = vpop.permute.xlu1 %9167  ;;  %v9154_v27 = vunpack.i.l.bf16 %v9153_v20 }
 0x74c   : > { %v12118_v49 = vadd.f32 %v12043_v1, %v4814_v36  ;;  %8294 = vmatmul.msk.f32.gmra.mxu1 %vm968_vm2, %v8286_v29  ;;  %6317 = vmatpush.msra.mxu3 %v6254_v25  ;;  %v5095_v18 = vpop.f32.mrf.mxu3  ;;  %v5066_v2 = vpop.f32.mrf.mxu2  ;;  %v4718_v1 = vadd.f32 %v11971_v53, %v12033_v9  ;;  %v8323_v9 = vld [vmem:[%s13180_s5 + $0x1b0] sm:$0xff]  ;;  %v9169_v3 = vunpack.i.l.bf16 %v9168_v41  ;;  %v6151_v36 = vsel %vm13369_vm4, %v9115_v10, %v9119_v12  ;;  %vm13379_vm4 = vmmov %vm13378_vm13 }
 0x74d   : > { %v12123_v46 = vadd.f32 %v12049_v34, %v4813_v55  ;;  %8290 = vmatmul.msk.f32.gmra.mxu0 %vm968_vm2, %v8286_v29  ;;  %6288 = vmatpush.msra.mxu2 %v6253_v61  ;;  %v8287_v34 = vld [vmem:[%s13180_s5 + $0x150] sm:$0xff]  ;;  %v9159_v29 = vunpack.i.l.bf16 %v9158_v54  ;;  %v9170_v47 = vunpack.i.h.bf16 %v9168_v41  ;;  %v6459_v61 = vsel %vm13371_vm6, %v9154_v27, %v9155_v16  ;;  %vm13381_vm6 = vmmov %vm13379_vm4 }
 0x74e   : > { %v6460_v25 = vsel %vm13370_vm5, %v9155_v16, %v9169_v3  ;;  %v9144_v12 = vunpack.i.l.bf16 %v12155_v63  ;;  %v9150_v10 = vunpack.i.h.bf16 %v12166_v43  ;;  %vm13380_vm5 = vmmov %vm13379_vm4 }
 0x751   : > { %v4805_v60 = vpop.f32.mrf.mxu1  ;;  %8330 = vmatmul.msk.f32.gmra.mxu3 %vm968_vm2, %v8322_v22  ;;  %8326 = vmatmul.msk.f32.gmra.mxu2 %vm968_vm2, %v8322_v22 }
 0x752   : > { %v4816_v44 = vadd.f32 %v4805_v60, %v4718_v1  ;;  %v4776_v33 = vpop.f32.mrf.mxu0 }
 0x753   : > { %v4815_v0 = vadd.f32 %v4776_v33, %v4689_v48  ;;  %v6458_v48 = vsel %vm13372_vm8, %v9159_v29, %v9160_v30  ;;  %vm13382_vm8 = vcmask 457728  }
 0x754   : > { %v12139_v42 = vadd.f32 %v12067_v7, %v4816_v44  ;;  %8295 = vmatmul.msk.f32.gmra.mxu1 %vm968_vm2, %v8287_v34  ;;  %v12142_v53 = vpop.f32.mrf.mxu3  ;;  %v12151_v21 = vpop.f32.mrf.mxu2  ;;  %v4721_v7 = vadd.f32 %v12001_v45, %v12055_v38  ;;  %v8324_v38 = vld [vmem:[%s13180_s5 + $0x1b8] sm:$0xff] }
 0x755   : > { %v12145_v11 = vadd.f32 %v12073_v50, %v4815_v0  ;;  %8291 = vmatmul.msk.f32.gmra.mxu0 %vm968_vm2, %v8287_v34  ;;  %v6457_v34 = vsel %vm13373_vm9, %v9170_v47, %v9159_v29  ;;  %vm13383_vm9 = vmmov %vm13382_vm8 }
 0x759   : > { %v4808_v50 = vpop.f32.mrf.mxu1  ;;  %8331 = vmatmul.msk.f32.gmra.mxu3 %vm968_vm2, %v8323_v9  ;;  %8327 = vmatmul.msk.f32.gmra.mxu2 %vm968_vm2, %v8323_v9 }
 0x75a   : > { %v4818_v32 = vadd.f32 %v4808_v50, %v4721_v7  ;;  %v4779_v58 = vpop.f32.mrf.mxu0 }
 0x75b   : > { %v4817_v39 = vadd.f32 %v4779_v58, %v4692_v52  ;;  %v12254_v58 = vpop.permute.xlu0 %9162 }
 0x75c   : > { %v12169_v15 = vadd.f32 %v12095_v59, %v4818_v32  ;;  %8296 = vmatmul.msk.f32.gmra.mxu1 %vm968_vm2, %v8288_v62  ;;  %v12172_v45 = vpop.f32.mrf.mxu3  ;;  %v12180_v57 = vpop.f32.mrf.mxu2  ;;  %v8309_v59 = vld [vmem:[%s13180_s5 + $0x180] sm:$0xff]  ;;  %v8347_v32 = vld [vmem:[%s13180_s5 + $0x1f0] sm:$0xff] }
 0x75d   : > { %v12174_v40 = vadd.f32 %v4875_v19, %v4817_v39  ;;  %8292 = vmatmul.msk.f32.gmra.mxu0 %vm968_vm2, %v8288_v62 }
 0x761   : > { %v4991_v37 = vpop.f32.mrf.mxu1  ;;  %8332 = vmatmul.msk.f32.gmra.mxu3 %vm968_vm2, %v8324_v38  ;;  %8328 = vmatmul.msk.f32.gmra.mxu2 %vm968_vm2, %v8324_v38  ;;  %v12263_v38 = vpop.permute.xlu2 %9177 }
 0x762   : > { %v5004_v8 = vadd.f32 %v4991_v37, %v12090_v51  ;;  %v4962_v6 = vpop.f32.mrf.mxu0 }
 0x763   : > { %v5003_v19 = vadd.f32 %v4962_v6, %v12097_v26  ;;  %v8345_v26 = vld [vmem:[%s13180_s5 + $0x1e0] sm:$0xff]  ;;  %v9183_v41 = vpop.permute.xlu0 %9182 }
 0x764   : > { %v12195_v35 = vadd.f32 %v5095_v18, %v5004_v8  ;;  %8317 = vmatmul.msk.f32.vlgmr.msrb.gmra.mxu1 %vm968_vm2, %v8309_v59  ;;  %v12200_v24 = vpop.f32.mrf.mxu3  ;;  %v5075_v13 = vpop.f32.mrf.mxu2  ;;  %v8310_v18 = vld [vmem:[%s13180_s5 + $0x188] sm:$0xff]  ;;  %v8333_v6 = vld [vmem:[%s13180_s5 + $0x1c0] sm:$0xff] }
 0x765   : > { %v12202_v51 = vadd.f32 %v5066_v2, %v5003_v19  ;;  %6214 = vmatpush.msrb.mxu1 %v6154_v17  ;;  %8313 = vmatmul.msk.f32.vlgmr.msrb.gmra.mxu0 %vm968_vm2, %v8309_v59  ;;  %v8348_v59 = vld [vmem:[%s13180_s5 + $0x1f8] sm:$0xff]  ;;  %v9149_v19 = vunpack.i.l.bf16 %v12166_v43  ;;  %v9185_v43 = vunpack.i.h.bf16 %v9183_v41 }
 0x766   : > { %6185 = vmatpush.msrb.mxu0 %v6153_v28  ;;  %v9145_v28 = vunpack.i.h.bf16 %v12155_v63 }
 0x767   : > { %6215 = vmatpush.msrb.mxu1 %v6152_v5  ;;  %v6356_v63 = vsel %vm13376_vm15, %v9149_v19, %v9150_v10  ;;  %vm13386_vm15 = vcmask 433152  }
 0x768   : > { %6186 = vmatpush.msrb.mxu0 %v6151_v36 }
 0x769   : > { %v4994_v55 = vpop.f32.mrf.mxu1  ;;  %8353 = vmatmul.msk.f32.vlgmr.msrb.gmra.mxu3 %vm968_vm2, %v8345_v26  ;;  %8349 = vmatmul.msk.f32.vlgmr.msrb.gmra.mxu2 %vm968_vm2, %v8345_v26  ;;  %v9188_v16 = vpop.permute.xlu2 %9187 }
 0x76a   : > { %v5006_v22 = vadd.f32 %v4994_v55, %v12118_v49  ;;  %v4965_v2 = vpop.f32.mrf.mxu0  ;;  %6520 = vmatpush.msrb.mxu3 %v6460_v25  ;;  %6491 = vmatpush.msrb.mxu2 %v6459_v61  ;;  %v8346_v49 = vld [vmem:[%s13180_s5 + $0x1e8] sm:$0xff]  ;;  %v9190_v36 = vunpack.i.h.bf16 %v9188_v16  ;;  %v9189_v47 = vunpack.i.l.bf16 %v9188_v16  ;;  %v6355_v55 = vsel %vm13377_vm12, %v9145_v28, %v9149_v19  ;;  %vm13387_vm12 = vmmov %vm13386_vm15 }
 0x76b   : > { %v5005_v1 = vadd.f32 %v4965_v2, %v12123_v46  ;;  %v8334_v2 = vld [vmem:[%s13180_s5 + $0x1c8] sm:$0xff]  ;;  %v9180_v28 = vunpack.i.h.bf16 %v12263_v38 }
 0x76c   : > { %v12221_v60 = vadd.f32 %v12142_v53, %v5006_v22  ;;  %8318 = vmatmul.msk.f32.gmra.mxu1 %vm968_vm2, %v8310_v18  ;;  %6521 = vmatpush.msrb.mxu3 %v6458_v48  ;;  %v5299_v44 = vpop.f32.mrf.mxu3  ;;  %v5270_v46 = vpop.f32.mrf.mxu2  ;;  %v8311_v53 = vld [vmem:[%s13180_s5 + $0x190] sm:$0xff] }
 0x76d   : > { %v12226_v33 = vadd.f32 %v12151_v21, %v5005_v1  ;;  %8314 = vmatmul.msk.f32.gmra.mxu0 %vm968_vm2, %v8310_v18  ;;  %6492 = vmatpush.msrb.mxu2 %v6457_v34 }
 0x771   : > { %v4997_v0 = vpop.f32.mrf.mxu1  ;;  %8354 = vmatmul.msk.f32.gmra.mxu3 %vm968_vm2, %v8346_v49  ;;  %8350 = vmatmul.msk.f32.gmra.mxu2 %vm968_vm2, %v8346_v49 }
 0x772   : > { %v5008_v9 = vadd.f32 %v4997_v0, %v12139_v42  ;;  %v4968_v21 = vpop.f32.mrf.mxu0 }
 0x773   : > { %v5007_v7 = vadd.f32 %v4968_v21, %v12145_v11  ;;  %v12256_v11 = vpop.permute.xlu1 %9172  ;;  %v8335_v21 = vld [vmem:[%s13180_s5 + $0x1d0] sm:$0xff] }
 0x774   : > { %v12240_v52 = vadd.f32 %v12172_v45, %v5008_v9  ;;  %8319 = vmatmul.msk.f32.gmra.mxu1 %vm968_vm2, %v8311_v53  ;;  %v12243_v50 = vpop.f32.mrf.mxu3  ;;  %v12252_v42 = vpop.f32.mrf.mxu2  ;;  %v8312_v45 = vld [vmem:[%s13180_s5 + $0x198] sm:$0xff]  ;;  %v9174_v19 = vunpack.i.l.bf16 %v12256_v11 }
 0x775   : > { %v12246_v62 = vadd.f32 %v12180_v57, %v5007_v7  ;;  %8315 = vmatmul.msk.f32.gmra.mxu0 %vm968_vm2, %v8311_v53 }
 0x779   : > { %v5000_v39 = vpop.f32.mrf.mxu1  ;;  %8355 = vmatmul.msk.f32.gmra.mxu3 %vm968_vm2, %v8347_v32  ;;  %8351 = vmatmul.msk.f32.gmra.mxu2 %vm968_vm2, %v8347_v32 }
 0x77a   : > { %v5010_v57 = vadd.f32 %v5000_v39, %v12169_v15  ;;  %v4971_v4 = vpop.f32.mrf.mxu0  ;;  %v9135_v15 = vunpack.i.h.bf16 %v12153_v31 }
 0x77b   : > { %v5009_v14 = vadd.f32 %v4971_v4, %v12174_v40  ;;  %v9134_v40 = vunpack.i.l.bf16 %v12153_v31  ;;  %v9198_v54 = vpop.permute.xlu1 %9197  ;;  %v12353_v4 = vpop.permute.xlu0 %9192 }
 0x77c   : > { %v12268_v23 = vadd.f32 %v12200_v24, %v5010_v57  ;;  %8320 = vmatmul.msk.f32.gmra.mxu1 %vm968_vm2, %v8312_v45  ;;  %v12271_v20 = vpop.f32.mrf.mxu3  ;;  %v12279_v56 = vpop.f32.mrf.mxu2  ;;  %v6358_v3 = vsel %vm13374_vm10, %v9135_v15, %v9144_v12  ;;  %v9199_v30 = vunpack.i.l.bf16 %v9198_v54  ;;  %v9200_v25 = vunpack.i.h.bf16 %v9198_v54  ;;  %v8371_v57 = vld [vmem:[%s13180_s5 + $0x230] sm:$0xff]  ;;  %vm13384_vm10 = vmmov %vm13382_vm8 }
 0x77d   : > { %v12273_v37 = vadd.f32 %v5075_v13, %v5009_v14  ;;  %8316 = vmatmul.msk.f32.gmra.mxu0 %vm968_vm2, %v8312_v45  ;;  %v6357_v5 = vsel %vm13375_vm11, %v9134_v40, %v9135_v15  ;;  %v9184_v13 = vunpack.i.l.bf16 %v9183_v41  ;;  %vm13385_vm11 = vmmov %vm13382_vm8 }
 0x77e   : > { %v6664_v18 = vsel %vm13378_vm13, %v9185_v43, %v9199_v30  ;;  %vm13388_vm13 = vmmov %vm13387_vm12 }
 0x77f   : > { %v6663_v22 = vsel %vm13379_vm4, %v9184_v13, %v9185_v43  ;;  %vm13389_vm4 = vmmov %vm13387_vm12 }
 0x781   : > { %v5197_v8 = vpop.f32.mrf.mxu1  ;;  %8356 = vmatmul.msk.f32.gmra.mxu3 %vm968_vm2, %v8348_v59  ;;  %8352 = vmatmul.msk.f32.gmra.mxu2 %vm968_vm2, %v8348_v59  ;;  %v12362_v59 = vpop.permute.xlu2 %9207 }
 0x782   : > { %v5210_v17 = vadd.f32 %v5197_v8, %v12195_v35  ;;  %v5168_v31 = vpop.f32.mrf.mxu0 }
 0x783   : > { %v5209_v24 = vadd.f32 %v5168_v31, %v12202_v51  ;;  %v8369_v51 = vld [vmem:[%s13180_s5 + $0x220] sm:$0xff]  ;;  %v9213_v54 = vpop.permute.xlu0 %9212 }
 0x784   : > { %v12294_v27 = vadd.f32 %v5299_v44, %v5210_v17  ;;  %8341 = vmatmul.msk.f32.vlgmr.msra.gmra.mxu1 %vm968_vm2, %v8333_v6  ;;  %v12299_v26 = vpop.f32.mrf.mxu3  ;;  %v5279_v29 = vpop.f32.mrf.mxu2  ;;  %v6662_v44 = vsel %vm13380_vm5, %v9189_v47, %v9190_v36  ;;  %v8357_v31 = vld [vmem:[%s13180_s5 + $0x200] sm:$0xff]  ;;  %vm13390_vm5 = vcmask 441344  }
 0x785   : > { %v12301_v35 = vadd.f32 %v5270_v46, %v5209_v24  ;;  %6418 = vmatpush.msra.mxu1 %v6358_v3  ;;  %8337 = vmatmul.msk.f32.vlgmr.msra.gmra.mxu0 %vm968_vm2, %v8333_v6  ;;  %v6661_v46 = vsel %vm13381_vm6, %v9200_v25, %v9189_v47  ;;  %v8372_v6 = vld [vmem:[%s13180_s5 + $0x238] sm:$0xff]  ;;  %v9179_v24 = vunpack.i.l.bf16 %v12263_v38  ;;  %v9214_v38 = vunpack.i.l.bf16 %v9213_v54  ;;  %vm13391_vm6 = vmmov %vm13390_vm5 }
 0x786   : > { %6389 = vmatpush.msra.mxu0 %v6357_v5  ;;  %v9175_v5 = vunpack.i.h.bf16 %v12256_v11 }
 0x787   : > { %6419 = vmatpush.msra.mxu1 %v6356_v63  ;;  %v6560_v11 = vsel %vm13384_vm10, %v9179_v24, %v9180_v28  ;;  %v8381_v28 = vld [vmem:[%s13180_s5 + $0x240] sm:$0xff]  ;;  %vm13394_vm10 = vcmask 424960  }
 0x788   : > { %6390 = vmatpush.msra.mxu0 %v6355_v55 }
 0x789   : > { %v5200_v61 = vpop.f32.mrf.mxu1  ;;  %8377 = vmatmul.msk.f32.vlgmr.msra.gmra.mxu3 %vm968_vm2, %v8369_v51  ;;  %8373 = vmatmul.msk.f32.vlgmr.msra.gmra.mxu2 %vm968_vm2, %v8369_v51  ;;  %v9218_v43 = vpop.permute.xlu2 %9217 }
 0x78a   : > { %v5212_v1 = vadd.f32 %v5200_v61, %v12221_v60  ;;  %v5171_v48 = vpop.f32.mrf.mxu0  ;;  %6724 = vmatpush.msra.mxu3 %v6664_v18  ;;  %6695 = vmatpush.msra.mxu2 %v6663_v22  ;;  %v8370_v60 = vld [vmem:[%s13180_s5 + $0x228] sm:$0xff]  ;;  %v9220_v55 = vunpack.i.h.bf16 %v9218_v43  ;;  %v9219_v25 = vunpack.i.l.bf16 %v9218_v43  ;;  %v6559_v61 = vsel %vm13385_vm11, %v9175_v5, %v9179_v24  ;;  %vm13395_vm11 = vmmov %vm13394_vm10 }
 0x78b   : > { %v5211_v34 = vadd.f32 %v5171_v48, %v12226_v33  ;;  %v8358_v48 = vld [vmem:[%s13180_s5 + $0x208] sm:$0xff]  ;;  %v9210_v24 = vunpack.i.h.bf16 %v12362_v59 }
 0x78c   : > { %v12320_v49 = vadd.f32 %v12243_v50, %v5212_v1  ;;  %8342 = vmatmul.msk.f32.gmra.mxu1 %vm968_vm2, %v8334_v2  ;;  %6725 = vmatpush.msra.mxu3 %v6662_v44  ;;  %v5503_v0 = vpop.f32.mrf.mxu3  ;;  %v5474_v33 = vpop.f32.mrf.mxu2 }
 0x78d   : > { %v12325_v53 = vadd.f32 %v12252_v42, %v5211_v34  ;;  %8338 = vmatmul.msk.f32.gmra.mxu0 %vm968_vm2, %v8334_v2  ;;  %6696 = vmatpush.msra.mxu2 %v6661_v46 }
 0x791   : > { %v5203_v9 = vpop.f32.mrf.mxu1  ;;  %8378 = vmatmul.msk.f32.gmra.mxu3 %vm968_vm2, %v8370_v60  ;;  %8374 = vmatmul.msk.f32.gmra.mxu2 %vm968_vm2, %v8370_v60 }
 0x792   : > { %v5214_v7 = vadd.f32 %v5203_v9, %v12240_v52  ;;  %v5174_v50 = vpop.f32.mrf.mxu0 }
 0x793   : > { %v5213_v32 = vadd.f32 %v5174_v50, %v12246_v62  ;;  %v12355_v62 = vpop.permute.xlu1 %9202  ;;  %v8359_v50 = vld [vmem:[%s13180_s5 + $0x210] sm:$0xff] }
 0x794   : > { %v12339_v42 = vadd.f32 %v12271_v20, %v5214_v7  ;;  %8343 = vmatmul.msk.f32.gmra.mxu1 %vm968_vm2, %v8335_v21  ;;  %v12342_v39 = vpop.f32.mrf.mxu3  ;;  %v12351_v52 = vpop.f32.mrf.mxu2  ;;  %v8336_v20 = vld [vmem:[%s13180_s5 + $0x1d8] sm:$0xff]  ;;  %v9205_v5 = vunpack.i.h.bf16 %v12355_v62 }
 0x795   : > { %v12345_v45 = vadd.f32 %v12279_v56, %v5213_v32  ;;  %8339 = vmatmul.msk.f32.gmra.mxu0 %vm968_vm2, %v8335_v21 }
 0x799   : > { %v5206_v14 = vpop.f32.mrf.mxu1  ;;  %8379 = vmatmul.msk.f32.gmra.mxu3 %vm968_vm2, %v8371_v57  ;;  %8375 = vmatmul.msk.f32.gmra.mxu2 %vm968_vm2, %v8371_v57 }
 0x79a   : > { %v5216_v56 = vadd.f32 %v5206_v14, %v12268_v23  ;;  %v5177_v15 = vpop.f32.mrf.mxu0  ;;  %v9165_v23 = vunpack.i.h.bf16 %v12254_v58 }
 0x79b   : > { %v5215_v40 = vadd.f32 %v5177_v15, %v12273_v37  ;;  %v9164_v37 = vunpack.i.l.bf16 %v12254_v58  ;;  %v9228_v16 = vpop.permute.xlu1 %9227  ;;  %v8395_v15 = vld [vmem:[%s13180_s5 + $0x270] sm:$0xff] }
 0x79c   : > { %v12367_v12 = vadd.f32 %v12299_v26, %v5216_v56  ;;  %8344 = vmatmul.msk.f32.gmra.mxu1 %vm968_vm2, %v8336_v20  ;;  %v12370_v41 = vpop.f32.mrf.mxu3  ;;  %v12378_v10 = vpop.f32.mrf.mxu2  ;;  %v6562_v30 = vsel %vm13382_vm8, %v9165_v23, %v9174_v19  ;;  %v9229_v36 = vunpack.i.l.bf16 %v9228_v16  ;;  %v9230_v18 = vunpack.i.h.bf16 %v9228_v16  ;;  %vm13392_vm8 = vmmov %vm13390_vm5 }
 0x79d   : > { %v12372_v8 = vadd.f32 %v5279_v29, %v5215_v40  ;;  %8340 = vmatmul.msk.f32.gmra.mxu0 %vm968_vm2, %v8336_v20  ;;  %v6561_v63 = vsel %vm13383_vm9, %v9164_v37, %v9165_v23  ;;  %v9215_v29 = vunpack.i.h.bf16 %v9213_v54  ;;  %v8396_v54 = vld [vmem:[%s13180_s5 + $0x278] sm:$0xff]  ;;  %v9209_v16 = vunpack.i.l.bf16 %v12362_v59  ;;  %vm13393_vm9 = vmmov %vm13390_vm5 }
 0x79f   : > { %v6868_v2 = vsel %vm13386_vm15, %v9215_v29, %v9229_v36  ;;  %v6867_v1 = vsel %vm13387_vm12, %v9214_v38, %v9215_v29  ;;  %v6763_v29 = vsel %vm13393_vm9, %v9205_v5, %v9209_v16  ;;  %v8382_v36 = vld [vmem:[%s13180_s5 + $0x248] sm:$0xff]  ;;  %vm13396_vm15 = vmmov %vm13394_vm10 }
 0x7a0   : > { %vm13397_vm12 = vmmov %vm13394_vm10 }
 0x7a1   : > { %v5401_v17 = vpop.f32.mrf.mxu1  ;;  %8380 = vmatmul.msk.f32.gmra.mxu3 %vm968_vm2, %v8372_v6  ;;  %8376 = vmatmul.msk.f32.gmra.mxu2 %vm968_vm2, %v8372_v6 }
 0x7a2   : > { %v5414_v3 = vadd.f32 %v5401_v17, %v12294_v27  ;;  %v5372_v58 = vpop.f32.mrf.mxu0  ;;  %v8393_v27 = vld [vmem:[%s13180_s5 + $0x260] sm:$0xff]  ;;  %v9204_v17 = vunpack.i.l.bf16 %v12355_v62 }
 0x7a3   : > { %v5413_v26 = vadd.f32 %v5372_v58, %v12301_v35 }
 0x7a4   : > { %v12393_v13 = vadd.f32 %v5503_v0, %v5414_v3  ;;  %8365 = vmatmul.msk.f32.vlgmr.msrb.gmra.mxu1 %vm968_vm2, %v8357_v31  ;;  %v5512_v51 = vpop.f32.mrf.mxu3  ;;  %v5483_v35 = vpop.f32.mrf.mxu2  ;;  %v6866_v0 = vsel %vm13388_vm13, %v9219_v25, %v9220_v55 }
 0x7a5   : > { %v12398_v47 = vadd.f32 %v5474_v33, %v5413_v26  ;;  %6622 = vmatpush.msrb.mxu1 %v6562_v30  ;;  %8361 = vmatmul.msk.f32.vlgmr.msrb.gmra.mxu0 %vm968_vm2, %v8357_v31  ;;  %v6865_v33 = vsel %vm13389_vm4, %v9230_v18, %v9219_v25  ;;  %v8418_v18 = vld [vmem:[%s13180_s5 + $0x2a8] sm:$0xff] }
 0x7a6   : > { %6593 = vmatpush.msrb.mxu0 %v6561_v63 }
 0x7a7   : > { %6623 = vmatpush.msrb.mxu1 %v6560_v11 }
 0x7a8   : > { %6594 = vmatpush.msrb.mxu0 %v6559_v61 }
 0x7a9   : > { %v5404_v22 = vpop.f32.mrf.mxu1  ;;  %8401 = vmatmul.msk.f32.vlgmr.msrb.gmra.mxu3 %vm968_vm2, %v8393_v27  ;;  %8397 = vmatmul.msk.f32.vlgmr.msrb.gmra.mxu2 %vm968_vm2, %v8393_v27 }
 0x7aa   : > { %v5416_v34 = vadd.f32 %v5404_v22, %v12320_v49  ;;  %v5375_v44 = vpop.f32.mrf.mxu0  ;;  %6928 = vmatpush.msrb.mxu3 %v6868_v2  ;;  %6899 = vmatpush.msrb.mxu2 %v6867_v1  ;;  %v8383_v2 = vld [vmem:[%s13180_s5 + $0x250] sm:$0xff] }
 0x7ab   : > { %v5415_v46 = vadd.f32 %v5375_v44, %v12325_v53  ;;  %v8394_v53 = vld [vmem:[%s13180_s5 + $0x268] sm:$0xff] }
 0x7ac   : > { %v12417_v60 = vadd.f32 %v12342_v39, %v5416_v34  ;;  %8366 = vmatmul.msk.f32.gmra.mxu1 %vm968_vm2, %v8358_v48  ;;  %6929 = vmatpush.msrb.mxu3 %v6866_v0  ;;  %v5707_v9 = vpop.f32.mrf.mxu3  ;;  %v5678_v49 = vpop.f32.mrf.mxu2 }
 0x7ad   : > { %v12422_v21 = vadd.f32 %v12351_v52, %v5415_v46  ;;  %8362 = vmatmul.msk.f32.gmra.mxu0 %vm968_vm2, %v8358_v48  ;;  %6900 = vmatpush.msrb.mxu2 %v6865_v33  ;;  %v8419_v33 = vld [vmem:[%s13180_s5 + $0x2b0] sm:$0xff] }
 0x7b1   : > { %v5407_v7 = vpop.f32.mrf.mxu1  ;;  %8402 = vmatmul.msk.f32.gmra.mxu3 %vm968_vm2, %v8394_v53  ;;  %8398 = vmatmul.msk.f32.gmra.mxu2 %vm968_vm2, %v8394_v53 }
 0x7b2   : > { %v5418_v32 = vadd.f32 %v5407_v7, %v12339_v42  ;;  %v5378_v39 = vpop.f32.mrf.mxu0 }
 0x7b3   : > { %v5417_v57 = vadd.f32 %v5378_v39, %v12345_v45  ;;  %v8360_v45 = vld [vmem:[%s13180_s5 + $0x218] sm:$0xff] }
 0x7b4   : > { %v12436_v52 = vadd.f32 %v12370_v41, %v5418_v32  ;;  %8367 = vmatmul.msk.f32.gmra.mxu1 %vm968_vm2, %v8359_v50  ;;  %v5710_v14 = vpop.f32.mrf.mxu3  ;;  %v5681_v56 = vpop.f32.mrf.mxu2 }
 0x7b5   : > { %v12440_v20 = vadd.f32 %v12378_v10, %v5417_v57  ;;  %8363 = vmatmul.msk.f32.gmra.mxu0 %vm968_vm2, %v8359_v50  ;;  %v9233_v32 = vpop.permute.xlu1 %9232  ;;  %v9223_v57 = vpop.permute.xlu0 %9222 }
 0x7b9   : > { %v5410_v42 = vpop.f32.mrf.mxu1  ;;  %8403 = vmatmul.msk.f32.gmra.mxu3 %vm968_vm2, %v8395_v15  ;;  %8399 = vmatmul.msk.f32.gmra.mxu2 %vm968_vm2, %v8395_v15 }
 0x7ba   : > { %v5420_v40 = vadd.f32 %v5410_v42, %v12367_v12  ;;  %v5381_v41 = vpop.f32.mrf.mxu0  ;;  %v9195_v12 = vunpack.i.h.bf16 %v12353_v4  ;;  %v9225_v42 = vunpack.i.h.bf16 %v9223_v57 }
 0x7bb   : > { %v5419_v6 = vadd.f32 %v5381_v41, %v12372_v8  ;;  %v9194_v8 = vunpack.i.l.bf16 %v12353_v4  ;;  %v8405_v41 = vld [vmem:[%s13180_s5 + $0x280] sm:$0xff] }
 0x7bc   : > { %v12453_v10 = vadd.f32 %v5512_v51, %v5420_v40  ;;  %8368 = vmatmul.msk.f32.gmra.mxu1 %vm968_vm2, %v8360_v45  ;;  %v5713_v23 = vpop.f32.mrf.mxu3  ;;  %v5684_v19 = vpop.f32.mrf.mxu2  ;;  %v6766_v43 = vsel %vm13390_vm5, %v9195_v12, %v9204_v17  ;;  %v8417_v51 = vld [vmem:[%s13180_s5 + $0x2a0] sm:$0xff] }
 0x7bd   : > { %v12456_v37 = vadd.f32 %v5483_v35, %v5419_v6  ;;  %8364 = vmatmul.msk.f32.gmra.mxu0 %vm968_vm2, %v8360_v45  ;;  %v6765_v59 = vsel %vm13391_vm6, %v9194_v8, %v9195_v12  ;;  %v9224_v45 = vunpack.i.l.bf16 %v9223_v57  ;;  %v8441_v12 = vld [vmem:[%s13180_s5 + $0x2e0] sm:$0xff] }
 0x7c1   : > { %v5605_v31 = vpop.f32.mrf.mxu1  ;;  %8404 = vmatmul.msk.f32.gmra.mxu3 %vm968_vm2, %v8396_v54  ;;  %8400 = vmatmul.msk.f32.gmra.mxu2 %vm968_vm2, %v8396_v54  ;;  %v6969_v54 = vsel %vm13395_vm11, %v9224_v45, %v9225_v42 }
 0x7c2   : > { %v5618_v3 = vadd.f32 %v5605_v31, %v12393_v13  ;;  %v5576_v58 = vpop.f32.mrf.mxu0  ;;  %v6764_v13 = vsel %vm13392_vm8, %v9209_v16, %v9210_v24 }
 0x7c3   : > { %v5617_v4 = vadd.f32 %v5576_v58, %v12398_v47  ;;  %v8442_v58 = vld [vmem:[%s13180_s5 + $0x2e8] sm:$0xff] }
 0x7c4   : > { %v12475_v26 = vadd.f32 %v5707_v9, %v5618_v3  ;;  %8389 = vmatmul.msk.f32.vlgmr.msra.gmra.mxu1 %vm968_vm2, %v8381_v28  ;;  %v5716_v30 = vpop.f32.mrf.mxu3  ;;  %v5687_v62 = vpop.f32.mrf.mxu2 }
 0x7c5   : > { %v12479_v63 = vadd.f32 %v5678_v49, %v5617_v4  ;;  %6826 = vmatpush.msra.mxu1 %v6766_v43  ;;  %8385 = vmatmul.msk.f32.vlgmr.msra.gmra.mxu0 %vm968_vm2, %v8381_v28  ;;  %v8406_v28 = vld [vmem:[%s13180_s5 + $0x288] sm:$0xff]  ;;  %v8407_v4 = vld [vmem:[%s13180_s5 + $0x290] sm:$0xff] }
 0x7c6   : > { %6797 = vmatpush.msra.mxu0 %v6765_v59 }
 0x7c7   : > { %6827 = vmatpush.msra.mxu1 %v6764_v13  ;;  %v8443_v13 = vld [vmem:[%s13180_s5 + $0x2f0] sm:$0xff] }
 0x7c8   : > { %6798 = vmatpush.msra.mxu0 %v6763_v29 }
 0x7c9   : > { %v5608_v38 = vpop.f32.mrf.mxu1  ;;  %8425 = vmatmul.msk.f32.vlgmr.msra.gmra.mxu3 %vm968_vm2, %v8417_v51  ;;  %8421 = vmatmul.msk.f32.vlgmr.msra.gmra.mxu2 %vm968_vm2, %v8417_v51  ;;  %v8408_v51 = vld [vmem:[%s13180_s5 + $0x298] sm:$0xff] }
 0x7ca   : > { %v5620_v47 = vadd.f32 %v5608_v38, %v12417_v60  ;;  %v5579_v11 = vpop.f32.mrf.mxu0 }
 0x7cb   : > { %v5619_v27 = vadd.f32 %v5579_v11, %v12422_v21  ;;  %v8384_v21 = vld [vmem:[%s13180_s5 + $0x258] sm:$0xff] }
 0x7cc   : > { %v12495_v35 = vadd.f32 %v5710_v14, %v5620_v47  ;;  %8390 = vmatmul.msk.f32.gmra.mxu1 %vm968_vm2, %v8382_v36  ;;  %v12498_v55 = vpop.f32.mrf.mxu3  ;;  %v12503_v61 = vpop.f32.mrf.mxu2  ;;  %v8444_v47 = vld [vmem:[%s13180_s5 + $0x2f8] sm:$0xff] }
 0x7cd   : > { %v12500_v25 = vadd.f32 %v5681_v56, %v5619_v27  ;;  %8386 = vmatmul.msk.f32.gmra.mxu0 %vm968_vm2, %v8382_v36  ;;  %v9238_v14 = vpop.permute.xlu2 %9237  ;;  %v9234_v56 = vunpack.i.l.bf16 %v9233_v32  ;;  %v8429_v27 = vld [vmem:[%s13180_s5 + $0x2c0] sm:$0xff] }
 0x7ce   : > { %v9240_v6 = vunpack.i.h.bf16 %v9238_v14 }
 0x7d1   : > { %v5611_v22 = vpop.f32.mrf.mxu1  ;;  %8426 = vmatmul.msk.f32.gmra.mxu3 %vm968_vm2, %v8418_v18  ;;  %8422 = vmatmul.msk.f32.gmra.mxu2 %vm968_vm2, %v8418_v18 }
 0x7d2   : > { %v5622_v1 = vadd.f32 %v5611_v22, %v12436_v52  ;;  %v5582_v48 = vpop.f32.mrf.mxu0  ;;  %v8420_v52 = vld [vmem:[%s13180_s5 + $0x2b8] sm:$0xff] }
 0x7d3   : > { %v5621_v34 = vadd.f32 %v5582_v48, %v12440_v20  ;;  %v8430_v48 = vld [vmem:[%s13180_s5 + $0x2c8] sm:$0xff] }
 0x7d4   : > { %v12515_v44 = vadd.f32 %v5713_v23, %v5622_v1  ;;  %8391 = vmatmul.msk.f32.gmra.mxu1 %vm968_vm2, %v8383_v2  ;;  %v12521_v0 = vpop.f32.mrf.mxu3  ;;  %v12523_v60 = vpop.f32.mrf.mxu2 }
 0x7d5   : > { %v12518_v46 = vadd.f32 %v5684_v19, %v5621_v34  ;;  %8387 = vmatmul.msk.f32.gmra.mxu0 %vm968_vm2, %v8383_v2  ;;  %v6970_v19 = vsel %vm13394_vm10, %v9225_v42, %v9234_v56 }
 0x7d9   : > { %v5614_v9 = vpop.f32.mrf.mxu1  ;;  %8427 = vmatmul.msk.f32.gmra.mxu3 %vm968_vm2, %v8419_v33  ;;  %8423 = vmatmul.msk.f32.gmra.mxu2 %vm968_vm2, %v8419_v33 }
 0x7da   : > { %v5624_v49 = vadd.f32 %v5614_v9, %v12453_v10  ;;  %v5585_v53 = vpop.f32.mrf.mxu0  ;;  %v9239_v10 = vunpack.i.l.bf16 %v9238_v14  ;;  %v8431_v9 = vld [vmem:[%s13180_s5 + $0x2d0] sm:$0xff] }
 0x7db   : > { %v5623_v7 = vadd.f32 %v5585_v53, %v12456_v37  ;;  %v9235_v37 = vunpack.i.h.bf16 %v9233_v32 }
 0x7dc   : > { %v12535_v50 = vadd.f32 %v5716_v30, %v5624_v49  ;;  %8392 = vmatmul.msk.f32.gmra.mxu1 %vm968_vm2, %v8384_v21  ;;  %v12544_v20 = vpop.f32.mrf.mxu3  ;;  %v12546_v15 = vpop.f32.mrf.mxu2  ;;  %v6968_v17 = vsel %vm13396_vm15, %v9239_v10, %v9240_v6 }
 0x7dd   : > { %v12538_v39 = vadd.f32 %v5687_v62, %v5623_v7  ;;  %8388 = vmatmul.msk.f32.gmra.mxu0 %vm968_vm2, %v8384_v21  ;;  %v6967_v8 = vsel %vm13397_vm12, %v9235_v37, %v9239_v10 }
 0x7e1   : > { %v12548_v40 = vpop.f32.mrf.mxu1  ;;  %8428 = vmatmul.msk.f32.gmra.mxu3 %vm968_vm2, %v8420_v52  ;;  %8424 = vmatmul.msk.f32.gmra.mxu2 %vm968_vm2, %v8420_v52  ;;  %v8432_v52 = vld [vmem:[%s13180_s5 + $0x2d8] sm:$0xff] }
 0x7e2   : > { %v12555_v23 = vpop.f32.mrf.mxu0  ;;  %v5822_v7 = vadd.f32 %v12548_v40, %v12475_v26 }
 0x7e3   : > { %v5821_v32 = vadd.f32 %v12555_v23, %v12479_v63 }
 0x7e4   : > { %8413 = vmatmul.msk.f32.vlgmr.msrb.gmra.mxu1 %vm968_vm2, %v8405_v41  ;;  %v12571_v24 = vpop.f32.mrf.mxu3  ;;  %v12575_v3 = vpop.f32.mrf.mxu2  ;;  %v5924_v14 = vadd.f32 %v12498_v55, %v5822_v7  ;;  %v8453_v55 = vld [vmem:[%s13180_s5 + $0x300] sm:$0xff] }
 0x7e5   : > { %7030 = vmatpush.msrb.mxu1 %v6970_v19  ;;  %8409 = vmatmul.msk.f32.vlgmr.msrb.gmra.mxu0 %vm968_vm2, %v8405_v41  ;;  %v5923_v42 = vadd.f32 %v12503_v61, %v5821_v32 }
 0x7e6   : > { %7001 = vmatpush.msrb.mxu0 %v6969_v54 }
 0x7e7   : > { %7031 = vmatpush.msrb.mxu1 %v6968_v17 }
 0x7e8   : > { %7002 = vmatpush.msrb.mxu0 %v6967_v8 }
 0x7e9   : > { %v12566_v31 = vpop.f32.mrf.mxu1  ;;  %8449 = vmatmul.msk.f32.vlgmr.msrb.gmra.mxu3 %vm968_vm2, %v8441_v12  ;;  %8445 = vmatmul.msk.f32.vlgmr.msrb.gmra.mxu2 %vm968_vm2, %v8441_v12 }
 0x7ea   : > { %v5783_v16 = vpop.f32.mrf.mxu0  ;;  %v5824_v26 = vadd.f32 %v12566_v31, %v12495_v35 }
 0x7eb   : > { %v5823_v63 = vadd.f32 %v5783_v16, %v12500_v25 }
 0x7ec   : > { %8414 = vmatmul.msk.f32.gmra.mxu1 %vm968_vm2, %v8406_v28  ;;  %v6115_v30 = vpop.f32.mrf.mxu3  ;;  %v6086_v59 = vpop.f32.mrf.mxu2  ;;  %v5926_v61 = vadd.f32 %v12521_v0, %v5824_v26 }
 0x7ed   : > { %8410 = vmatmul.msk.f32.gmra.mxu0 %vm968_vm2, %v8406_v28  ;;  %v5925_v17 = vadd.f32 %v12523_v60, %v5823_v63 }
 0x7f1   : > { %v12582_v5 = vpop.f32.mrf.mxu1  ;;  %8450 = vmatmul.msk.f32.gmra.mxu3 %vm968_vm2, %v8442_v58  ;;  %8446 = vmatmul.msk.f32.gmra.mxu2 %vm968_vm2, %v8442_v58 }
 0x7f2   : > { %v12589_v43 = vpop.f32.mrf.mxu0  ;;  %v5826_v16 = vadd.f32 %v12582_v5, %v12515_v44 }
 0x7f3   : > { %v5825_v0 = vadd.f32 %v12589_v43, %v12518_v46 }
 0x7f4   : > { %8415 = vmatmul.msk.f32.gmra.mxu1 %vm968_vm2, %v8407_v4  ;;  %v6118_v38 = vpop.f32.mrf.mxu3  ;;  %v6089_v36 = vpop.f32.mrf.mxu2 }
 0x7f5   : > { %8411 = vmatmul.msk.f32.gmra.mxu0 %vm968_vm2, %v8407_v4 }
 0x7f9   : > { %v12596_v62 = vpop.f32.mrf.mxu1  ;;  %8451 = vmatmul.msk.f32.gmra.mxu3 %vm968_vm2, %v8443_v13  ;;  %8447 = vmatmul.msk.f32.gmra.mxu2 %vm968_vm2, %v8443_v13  ;;  %v5928_v13 = vadd.f32 %v12544_v20, %v5826_v16 }
 0x7fa   : > { %v12603_v29 = vpop.f32.mrf.mxu0  ;;  %v5828_v43 = vadd.f32 %v12596_v62, %v12535_v50 }
 0x7fc   : > { %8416 = vmatmul.msk.f32.gmra.mxu1 %vm968_vm2, %v8408_v51  ;;  %v12617_v22 = vpop.f32.mrf.mxu3  ;;  %v12619_v2 = vpop.f32.mrf.mxu2 }
 0x7fd   : > { %8412 = vmatmul.msk.f32.gmra.mxu0 %vm968_vm2, %v8408_v51 }
 0x801   : > { %v6013_v11 = vpop.f32.mrf.mxu1  ;;  %8452 = vmatmul.msk.f32.gmra.mxu3 %vm968_vm2, %v8444_v47  ;;  %8448 = vmatmul.msk.f32.gmra.mxu2 %vm968_vm2, %v8444_v47 }
 0x802   : > { %v5984_v18 = vpop.f32.mrf.mxu0  ;;  %v6026_v41 = vadd.f32 %v6013_v11, %v5924_v14  ;;  %v5927_v11 = vadd.f32 %v12546_v15, %v5825_v0 }
 0x803   : > { %v6025_v10 = vadd.f32 %v5984_v18, %v5923_v42 }
 0x804   : > { %8437 = vmatmul.msk.f32.vlgmr.msra.gmra.mxu1 %vm968_vm2, %v8429_v27  ;;  %v12629_v21 = vpop.f32.mrf.mxu3  ;;  %v12631_v53 = vpop.f32.mrf.mxu2  ;;  %v6128_v40 = vadd.f32 %v6115_v30, %v6026_v41 }
 0x805   : > { %8433 = vmatmul.msk.f32.vlgmr.msra.gmra.mxu0 %vm968_vm2, %v8429_v27  ;;  %v6127_v23 = vadd.f32 %v6086_v59, %v6025_v10  ;;  %v8454_v59 = vld [vmem:[%s13180_s5 + $0x308] sm:$0xff] }
 0x809   : > { %v6016_v1 = vpop.f32.mrf.mxu1 }
 0x80a   : > { %v5987_v34 = vpop.f32.mrf.mxu0  ;;  %v6028_v8 = vadd.f32 %v6016_v1, %v5926_v61 }
 0x80b   : > { %v6027_v35 = vadd.f32 %v5987_v34, %v5925_v17  ;;  %v8455_v34 = vld [vmem:[%s13180_s5 + $0x310] sm:$0xff] }
 0x80c   : > { %8438 = vmatmul.msk.f32.gmra.mxu1 %vm968_vm2, %v8430_v48  ;;  %v6319_v45 = vpop.f32.mrf.mxu3  ;;  %v6290_v6 = vpop.f32.mrf.mxu2  ;;  %v6130_v4 = vadd.f32 %v6118_v38, %v6028_v8  ;;  %v5827_v38 = vadd.f32 %v12603_v29, %v12538_v39 }
 0x80d   : > { %8434 = vmatmul.msk.f32.gmra.mxu0 %vm968_vm2, %v8430_v48  ;;  %v6129_v30 = vadd.f32 %v6089_v36, %v6027_v35 }
 0x80e   : > { %v5929_v50 = vadd.f32 %v12575_v3, %v5827_v38 }
 0x811   : > { %v6019_v33 = vpop.f32.mrf.mxu1 }
 0x812   : > { %v5990_v49 = vpop.f32.mrf.mxu0  ;;  %v6030_v18 = vadd.f32 %v6019_v33, %v5928_v13  ;;  %v5930_v33 = vadd.f32 %v12571_v24, %v5828_v43  ;;  %v8456_v24 = vld [vmem:[%s13180_s5 + $0x318] sm:$0xff] }
 0x813   : > { %v6029_v5 = vadd.f32 %v5990_v49, %v5927_v11 }
 0x814   : > { %8439 = vmatmul.msk.f32.gmra.mxu1 %vm968_vm2, %v8431_v9  ;;  %v6322_v31 = vpop.f32.mrf.mxu3  ;;  %v6293_v58 = vpop.f32.mrf.mxu2  ;;  %v6132_v36 = vadd.f32 %v12617_v22, %v6030_v18 }
 0x815   : > { %8435 = vmatmul.msk.f32.gmra.mxu0 %vm968_vm2, %v8431_v9  ;;  %v6131_v15 = vadd.f32 %v12619_v2, %v6029_v5 }
 0x819   : > { %v6022_v57 = vpop.f32.mrf.mxu1 }
 0x81a   : > { %v5993_v56 = vpop.f32.mrf.mxu0  ;;  %v6032_v7 = vadd.f32 %v6022_v57, %v5930_v33 }
 0x81b   : > { %v6031_v29 = vadd.f32 %v5993_v56, %v5929_v50 }
 0x81c   : > { %8440 = vmatmul.msk.f32.gmra.mxu1 %vm968_vm2, %v8432_v52  ;;  %v6325_v20 = vpop.f32.mrf.mxu3  ;;  %v6296_v1 = vpop.f32.mrf.mxu2  ;;  %v6134_v2 = vadd.f32 %v12629_v21, %v6032_v7 }
 0x81d   : > { %8436 = vmatmul.msk.f32.gmra.mxu0 %vm968_vm2, %v8432_v52  ;;  %v6133_v32 = vadd.f32 %v12631_v53, %v6031_v29 }
 0x821   : > { %v6217_v37 = vpop.f32.mrf.mxu1 }
 0x822   : > { %v6230_v19 = vadd.f32 %v6217_v37, %v6128_v40  ;;  %v6188_v54 = vpop.f32.mrf.mxu0 }
 0x823   : > { %v6229_v12 = vadd.f32 %v6188_v54, %v6127_v23 }
 0x824   : > { %v6332_v28 = vadd.f32 %v6319_v45, %v6230_v19  ;;  %8461 = vmatmul.msk.f32.vlgmr.msrb.gmra.mxu1 %vm968_vm2, %v8453_v55  ;;  %v6328_v14 = vpop.f32.mrf.mxu3  ;;  %v6299_v57 = vpop.f32.mrf.mxu2 }
 0x825   : > { %v6331_v25 = vadd.f32 %v6290_v6, %v6229_v12  ;;  %8457 = vmatmul.msk.f32.vlgmr.msrb.gmra.mxu0 %vm968_vm2, %v8453_v55 }
 0x829   : > { %v6220_v60 = vpop.f32.mrf.mxu1 }
 0x82a   : > { %v6232_v51 = vadd.f32 %v6220_v60, %v6130_v4  ;;  %v6191_v47 = vpop.f32.mrf.mxu0 }
 0x82b   : > { %v6231_v27 = vadd.f32 %v6191_v47, %v6129_v30 }
 0x82c   : > { %v6334_v44 = vadd.f32 %v6322_v31, %v6232_v51  ;;  %8462 = vmatmul.msk.f32.gmra.mxu1 %vm968_vm2, %v8454_v59  ;;  %v6523_v26 = vpop.f32.mrf.mxu3  ;;  %v6494_v63 = vpop.f32.mrf.mxu2 }
 0x82d   : > { %v6333_v46 = vadd.f32 %v6293_v58, %v6231_v27  ;;  %8458 = vmatmul.msk.f32.gmra.mxu0 %vm968_vm2, %v8454_v59 }
 0x831   : > { %v6223_v48 = vpop.f32.mrf.mxu1 }
 0x832   : > { %v6234_v9 = vadd.f32 %v6223_v48, %v6132_v36  ;;  %v6194_v49 = vpop.f32.mrf.mxu0 }
 0x833   : > { %v6233_v62 = vadd.f32 %v6194_v49, %v6131_v15 }
 0x834   : > { %v6336_v39 = vadd.f32 %v6325_v20, %v6234_v9  ;;  %8463 = vmatmul.msk.f32.gmra.mxu1 %vm968_vm2, %v8455_v34  ;;  %v6526_v61 = vpop.f32.mrf.mxu3  ;;  %v6497_v54 = vpop.f32.mrf.mxu2 }
 0x835   : > { %v6335_v22 = vadd.f32 %v6296_v1, %v6233_v62  ;;  %8459 = vmatmul.msk.f32.gmra.mxu0 %vm968_vm2, %v8455_v34 }
 0x839   : > { %v6226_v52 = vpop.f32.mrf.mxu1 }
 0x83a   : > { %v6236_v3 = vadd.f32 %v6226_v52, %v6134_v2  ;;  %v6197_v42 = vpop.f32.mrf.mxu0 }
 0x83b   : > { %v6235_v45 = vadd.f32 %v6197_v42, %v6133_v32 }
 0x83c   : > { %v6338_v41 = vadd.f32 %v6328_v14, %v6236_v3  ;;  %8464 = vmatmul.msk.f32.gmra.mxu1 %vm968_vm2, %v8456_v24  ;;  %v6529_v58 = vpop.f32.mrf.mxu3 }
 0x83d   : > { %v6337_v56 = vadd.f32 %v6299_v57, %v6235_v45  ;;  %8460 = vmatmul.msk.f32.gmra.mxu0 %vm968_vm2, %v8456_v24  ;;  %vm13398_vm2 = vcmask 859136  }
 0x83e   : > { %vm13400_vm13 = vmmov %vm13398_vm2 }
 0x83f   : > { %vm13401_vm4 = vmmov %vm13398_vm2 }
 0x841   : > { %v6421_v6 = vpop.f32.mrf.mxu1 }
 0x842   : > { %v6434_v21 = vadd.f32 %v6421_v6, %v6332_v28  ;;  %v6392_v10 = vpop.f32.mrf.mxu0 }
 0x843   : > { %v6433_v53 = vadd.f32 %v6392_v10, %v6331_v25  ;;  %v6500_v25 = vpop.f32.mrf.mxu2 }
 0x844   : > { %v12691_v30 = vpop.f32.mrf.mxu3  ;;  %v6536_v49 = vadd.f32 %v6523_v26, %v6434_v21 }
 0x845   : > { %v6535_v50 = vadd.f32 %v6494_v63, %v6433_v53 }
 0x849   : > { %v6424_v40 = vpop.f32.mrf.mxu1 }
 0x84a   : > { %v6436_v23 = vadd.f32 %v6424_v40, %v6334_v44  ;;  %v6395_v37 = vpop.f32.mrf.mxu0  ;;  %v7060_v40 = vpop.permute.xlu0 %7059 }
 0x84b   : > { %v6435_v55 = vadd.f32 %v6395_v37, %v6333_v46  ;;  %v12693_v60 = vpop.f32.mrf.mxu2 }
 0x84c   : > { %v6727_v51 = vpop.f32.mrf.mxu3  ;;  %v6538_v14 = vadd.f32 %v6526_v61, %v6436_v23  ;;  %v7092_v23 = vpop.permute.xlu1 %7091 }
 0x84d   : > { %v6537_v3 = vadd.f32 %v6497_v54, %v6435_v55 }
 0x851   : > { %v6427_v19 = vpop.f32.mrf.mxu1 }
 0x852   : > { %v6438_v17 = vadd.f32 %v6427_v19, %v6336_v39  ;;  %v6398_v12 = vpop.f32.mrf.mxu0 }
 0x853   : > { %v6437_v8 = vadd.f32 %v6398_v12, %v6335_v22  ;;  %v6698_v47 = vpop.f32.mrf.mxu2 }
 0x854   : > { %v6730_v18 = vpop.f32.mrf.mxu3  ;;  %v6540_v12 = vadd.f32 %v6529_v58, %v6438_v17 }
 0x855   : > { %v6539_v61 = vadd.f32 %v6500_v25, %v6437_v8  ;;  %v7065_v25 = vpop.permute.xlu2 %7064 }
 0x859   : > { %v6430_v35 = vpop.f32.mrf.mxu1 }
 0x85a   : > { %v12687_v31 = vadd.f32 %v6430_v35, %v6338_v41  ;;  %v6401_v16 = vpop.f32.mrf.mxu0 }
 0x85b   : > { %v12689_v28 = vadd.f32 %v6401_v16, %v6337_v56  ;;  %v6701_v5 = vpop.f32.mrf.mxu2 }
 0x85c   : > { %v6733_v20 = vpop.f32.mrf.mxu3 }
 0x861   : > { %v6625_v0 = vpop.f32.mrf.mxu1 }
 0x862   : > { %v6596_v4 = vpop.f32.mrf.mxu0  ;;  %v6638_v62 = vadd.f32 %v6625_v0, %v6536_v49 }
 0x863   : > { %v6704_v36 = vpop.f32.mrf.mxu2  ;;  %v6637_v7 = vadd.f32 %v6596_v4, %v6535_v50  ;;  %v7097_v50 = vpop.permute.xlu0 %7096 }
 0x864   : > { %v12699_v48 = vpop.f32.mrf.mxu3  ;;  %v6740_v2 = vadd.f32 %v6727_v51, %v6638_v62  ;;  %v6541_v62 = vadd.f32 %v12693_v60, %v12689_v28 }
 0x865   : > { %v6739_v52 = vadd.f32 %v6698_v47, %v6637_v7 }
 0x869   : > { %v6628_v59 = vpop.f32.mrf.mxu1 }
 0x86a   : > { %v6599_v13 = vpop.f32.mrf.mxu0  ;;  %v6640_v57 = vadd.f32 %v6628_v59, %v6538_v14 }
 0x86b   : > { %v12701_v34 = vpop.f32.mrf.mxu2  ;;  %v6639_v45 = vadd.f32 %v6599_v13, %v6537_v3 }
 0x86c   : > { %v6931_v39 = vpop.f32.mrf.mxu3  ;;  %v6742_v10 = vadd.f32 %v6730_v18, %v6640_v57 }
 0x86d   : > { %v6741_v37 = vadd.f32 %v6701_v5, %v6639_v45  ;;  %v7102_v45 = vpop.permute.xlu2 %7101 }
 0x871   : > { %v6631_v11 = vpop.f32.mrf.mxu1 }
 0x872   : > { %v6602_v27 = vpop.f32.mrf.mxu0  ;;  %v6642_v0 = vadd.f32 %v6631_v11, %v6540_v12 }
 0x873   : > { %v6902_v29 = vpop.f32.mrf.mxu2  ;;  %v6641_v59 = vadd.f32 %v6602_v27, %v6539_v61 }
 0x874   : > { %v6934_v6 = vpop.f32.mrf.mxu3  ;;  %v6744_v17 = vadd.f32 %v6733_v20, %v6642_v0 }
 0x875   : > { %v6743_v11 = vadd.f32 %v6704_v36, %v6641_v59  ;;  %v7242_v59 = vld [vmem:[%s13183_s8 + $0xe8] sm:$0x1] }
 0x876   : > { %8465 = vmatpush.msk.msra.mxu3 %vm460_vm0, %v7242_v59 }
 0x879   : > { %v12695_v44 = vpop.f32.mrf.mxu1 }
 0x87a   : > { %v12697_v46 = vpop.f32.mrf.mxu0 }
 0x87b   : > { %v6905_v53 = vpop.f32.mrf.mxu2 }
 0x881   : > { %v6829_v43 = vpop.f32.mrf.mxu1 }
 0x882   : > { %v6800_v38 = vpop.f32.mrf.mxu0  ;;  %v6842_v24 = vadd.f32 %v6829_v43, %v6740_v2  ;;  %v6643_v2 = vadd.f32 %v12697_v46, %v6541_v62  ;;  %v7233_v62 = vld [vmem:[%s13183_s8 + $0xa0] sm:$0xff] }
 0x883   : > { %v6841_v42 = vadd.f32 %v6800_v38, %v6739_v52  ;;  %v6937_v38 = vpop.f32.mrf.mxu3  ;;  %v6908_v49 = vpop.f32.mrf.mxu2 }
 0x884   : > { %v6944_v41 = vadd.f32 %v6931_v39, %v6842_v24 }
 0x885   : > { %v6943_v56 = vadd.f32 %v6902_v29, %v6841_v42 }
 0x889   : > { %v6832_v1 = vpop.f32.mrf.mxu1 }
 0x88a   : > { %v6803_v15 = vpop.f32.mrf.mxu0  ;;  %v6844_v35 = vadd.f32 %v6832_v1, %v6742_v10  ;;  %v6542_v1 = vadd.f32 %v12691_v30, %v12687_v31 }
 0x88b   : > { %v6843_v55 = vadd.f32 %v6803_v15, %v6741_v37 }
 0x88c   : > { %v6946_v51 = vadd.f32 %v6934_v6, %v6844_v35  ;;  %v6644_v36 = vadd.f32 %v12695_v44, %v6542_v1  ;;  %v6745_v44 = vadd.f32 %v12701_v34, %v6643_v2  ;;  %v6911_v6 = vpop.f32.mrf.mxu2  ;;  %v7235_v1 = vld [vmem:[%s13183_s8 + $0xb0] sm:$0xff] }
 0x88d   : > { %v6945_v18 = vadd.f32 %v6905_v53, %v6843_v55 }
 0x88e   : > { %v6746_v3 = vadd.f32 %v12699_v48, %v6644_v36 }
 0x891   : > { %v6835_v33 = vpop.f32.mrf.mxu1 }
 0x892   : > { %v6806_v9 = vpop.f32.mrf.mxu0  ;;  %v6846_v15 = vadd.f32 %v6835_v33, %v6744_v17  ;;  %v7228_v17 = vld [vmem:[%s13183_s8 + $0x78] sm:$0xff] }
 0x893   : > { %v6845_v7 = vadd.f32 %v6806_v9, %v6743_v11  ;;  %v7070_v9 = vpop.permute.xlu1 %7069  ;;  %7258 = vmatpush.msra.mxu2 %v7228_v17  ;;  %v7227_v11 = vld [vmem:[%s13183_s8 + $0x70] sm:$0xff] }
 0x894   : > { %v6948_v14 = vadd.f32 %v6937_v38, %v6846_v15 }
 0x895   : > { %v6947_v30 = vadd.f32 %v6908_v49, %v6845_v7  ;;  %7259 = vmatpush.msra.mxu2 %v7227_v11  ;;  %v7232_v7 = vld [vmem:[%s13183_s8 + $0x98] sm:$0xff] }
 0x896   : > { %v7331_v11 = vld [vmem:[%s13184_s9 + $0x78] sm:$0xff] }
 0x899   : > { %v12703_v22 = vpop.f32.mrf.mxu1 }
 0x89a   : > { %v12705_v32 = vpop.f32.mrf.mxu0  ;;  %v6848_v46 = vadd.f32 %v12703_v22, %v6746_v3 }
 0x89b   : > { %v6847_v48 = vadd.f32 %v12705_v32, %v6745_v44  ;;  %v7107_v35 = vpop.permute.xlu1 %7106  ;;  %v7225_v44 = vld [vmem:[%s13183_s8 + $0x60] sm:$0xff] }
 0x8a1   : > { %v7033_v21 = vpop.f32.mrf.mxu1 }
 0x8a2   : > { %v7046_v26 = vadd.f32 %v7033_v21, %v6944_v41  ;;  %v7004_v63 = vpop.f32.mrf.mxu0  ;;  %v6940_v41 = vpop.f32.mrf.mxu3 }
 0x8a3   : > { %v7045_v19 = vadd.f32 %v7004_v63, %v6943_v56  ;;  %v6950_v10 = vadd.f32 %v6940_v41, %v6848_v46  ;;  %v7223_v46 = vld [vmem:[%s13183_s8 + $0x50] sm:$0xff] }
 0x8a4   : > { %v7078_v16 = vmul.f32 %v7060_v40, %v7046_v26  ;;  %v6949_v26 = vadd.f32 %v6911_v6, %v6847_v48  ;;  %v7220_v48 = vld [vmem:[%s13183_s8 + $0x38] sm:$0xff]  ;;  %v7219_v41 = vld [vmem:[%s13183_s8 + $0x30] sm:$0xff]  ;;  %v7217_v6 = vld [vmem:[%s13183_s8 + $0x20] sm:$0xff] }
 0x8a5   : > { %v7077_v54 = vmul.f32 %v7060_v40, %v7045_v19  ;;  %v7075_v19 = vpop.permute.xlu0 %7074 }
 0x8a6   : > { %v12707_v4 = vadd.f32 %v7092_v23, %v7078_v16 }
 0x8a7   : > { %v12709_v13 = vadd.f32 %v7092_v23, %v7077_v54 }
 0x8a8   : > { %v7118_v47 = vmax.f32 %v12707_v4, 0.0  ;;  %v7238_v4 = vld [vmem:[%s13183_s8 + $0xc8] sm:$0xff] }
 0x8a9   : > { %v7117_v5 = vmax.f32 %v12709_v13, 0.0  ;;  %v7036_v43 = vpop.f32.mrf.mxu1 }
 0x8aa   : > { %v7048_v58 = vadd.f32 %v7036_v43, %v6946_v51  ;;  %7135 = vrot.lane.b32.xlu0 %v7118_v47, %s13323_s21  ;;  %v7007_v8 = vpop.f32.mrf.mxu0  ;;  %v7241_v51 = vld [vmem:[%s13183_s8 + $0xe0] sm:$0xff] }
 0x8ab   : > { %v7047_v27 = vadd.f32 %v7007_v8, %v6945_v18  ;;  %7133 = vrot.lane.b32.xlu2 %v7117_v5, %s13323_s21  ;;  %v7240_v18 = vld [vmem:[%s13183_s8 + $0xd8] sm:$0xff]  ;;  %7290 = vmatpush.msra.mxu3 %v7241_v51 }
 0x8ac   : > { %v7080_v20 = vmul.f32 %v7065_v25, %v7048_v58 }
 0x8ad   : > { %v7079_v39 = vmul.f32 %v7065_v25, %v7047_v27  ;;  %v7239_v25 = vld [vmem:[%s13183_s8 + $0xd0] sm:$0xff]  ;;  %7291 = vmatpush.msra.mxu3 %v7240_v18 }
 0x8ae   : > { %v12724_v29 = vadd.f32 %v7097_v50, %v7080_v20 }
 0x8af   : > { %v12727_v52 = vadd.f32 %v7097_v50, %v7079_v39  ;;  %7292 = vmatpush.msra.mxu3 %v7239_v25  ;;  %v7234_v50 = vld [vmem:[%s13183_s8 + $0xa8] sm:$0xff]  ;;  %v7335_v25 = vld [vmem:[%s13184_s9 + $0x98] sm:$0x1] }
 0x8b0   : > { %v7120_v31 = vmax.f32 %v12724_v29, 0.0  ;;  %v7231_v29 = vld [vmem:[%s13183_s8 + $0x90] sm:$0xff]  ;;  %8475 = vmatpush.msk.msra.mxu1 %vm460_vm0, %v7335_v25  ;;  %v7505_v25 = vld [vmem:[%s13186_s11 + $0x120] sm:$0xff] }
 0x8b1   : > { %v7119_v33 = vmax.f32 %v12727_v52, 0.0  ;;  %v7039_v24 = vpop.f32.mrf.mxu1  ;;  %7293 = vmatpush.msra.mxu3 %v7238_v4  ;;  %v7333_v4 = vld [vmem:[%s13184_s9 + $0x88] sm:$0xff] }
 0x8b2   : > { %v7050_v28 = vadd.f32 %v7039_v24, %v6948_v14  ;;  %v7010_v60 = vpop.f32.mrf.mxu0 }
 0x8b3   : > { %v7049_v42 = vadd.f32 %v7010_v60, %v6947_v30  ;;  %7139 = vrot.lane.b32.xlu2 %v7120_v31, %s13323_s21  ;;  %7137 = vrot.lane.b32.xlu1 %v7119_v33, %s13323_s21  ;;  %v7226_v60 = vld [vmem:[%s13183_s8 + $0x68] sm:$0xff] }
 0x8b4   : > { %v7082_v57 = vmul.f32 %v7070_v9, %v7050_v28  ;;  %7260 = vmatpush.msra.mxu2 %v7226_v60 }
 0x8b5   : > { %v7081_v56 = vmul.f32 %v7070_v9, %v7049_v42  ;;  %v7229_v9 = vld [vmem:[%s13183_s8 + $0x80] sm:$0xff]  ;;  %v7224_v42 = vld [vmem:[%s13183_s8 + $0x58] sm:$0xff] }
 0x8b6   : > { %v12741_v21 = vadd.f32 %v7102_v45, %v7082_v57  ;;  %7261 = vmatpush.msra.mxu2 %v7225_v44  ;;  %v7222_v57 = vld [vmem:[%s13183_s8 + $0x48] sm:$0xff]  ;;  %v7497_v44 = vld [vmem:[%s13186_s11 + $0xe0] sm:$0xff] }
 0x8b7   : > { %v12743_v34 = vadd.f32 %v7102_v45, %v7081_v56  ;;  %v7221_v45 = vld [vmem:[%s13183_s8 + $0x40] sm:$0xff]  ;;  %v7218_v56 = vld [vmem:[%s13183_s8 + $0x28] sm:$0xff] }
 0x8b8   : > { %v7122_v53 = vmax.f32 %v12741_v21, 0.0  ;;  %7262 = vmatpush.msra.mxu2 %v7224_v42  ;;  %v7216_v21 = vld [vmem:[%s13183_s8 + $0x18] sm:$0xff] }
 0x8b9   : > { %v7121_v63 = vmax.f32 %v12743_v34, 0.0  ;;  %v7042_v40 = vpop.f32.mrf.mxu1  ;;  %v7215_v34 = vld [vmem:[%s13183_s8 + $0x10] sm:$0xff]  ;;  %v7480_v42 = vld [vmem:[%s13186_s11 + $0x58] sm:$0xff] }
 0x8ba   : > { %v7052_v37 = vadd.f32 %v7042_v40, %v6950_v10  ;;  %v7013_v22 = vpop.f32.mrf.mxu0  ;;  %7263 = vmatpush.msra.mxu2 %v7223_v46  ;;  %v7214_v10 = vld [vmem:[%s13183_s8 + $0x8] sm:$0xff]  ;;  %v7496_v46 = vld [vmem:[%s13186_s11 + $0xd8] sm:$0xff] }
 0x8bb   : > { %v7051_v12 = vadd.f32 %v7013_v22, %v6949_v26  ;;  %7143 = vrot.lane.b32.xlu1 %v7122_v53, %s13323_s21  ;;  %7141 = vrot.lane.b32.xlu0 %v7121_v63, %s13323_s21 }
 0x8bc   : > { %v7084_v32 = vmul.f32 %v7075_v19, %v7052_v37  ;;  %7264 = vmatpush.msra.mxu2 %v7222_v57  ;;  %v7479_v57 = vld [vmem:[%s13186_s11 + $0x50] sm:$0xff] }
 0x8bd   : > { %v7083_v16 = vmul.f32 %v7075_v19, %v7051_v12 }
 0x8be   : > { %v7116_v23 = vadd.f32 %v7107_v35, %v7084_v32  ;;  %7265 = vmatpush.msra.mxu2 %v7221_v45  ;;  %v7508_v45 = vld [vmem:[%s13186_s11 + $0x138] sm:$0xff] }
 0x8bf   : > { %v7115_v61 = vadd.f32 %v7107_v35, %v7083_v16 }
 0x8c0   : > { %v7124_v55 = vmax.f32 %v7116_v23, 0.0  ;;  %7266 = vmatpush.msra.mxu2 %v7220_v48  ;;  %v7495_v48 = vld [vmem:[%s13186_s11 + $0xd0] sm:$0xff] }
 0x8c1   : > { %v7123_v54 = vmax.f32 %v7115_v61, 0.0 }
 0x8c2   : > { %7267 = vmatpush.msra.mxu2 %v7219_v41  ;;  %v7507_v41 = vld [vmem:[%s13186_s11 + $0x130] sm:$0xff] }
 0x8c3   : > { %7147 = vrot.lane.b32.xlu0 %v7124_v55, %s13323_s21  ;;  %7145 = vrot.lane.b32.xlu2 %v7123_v54, %s13323_s21 }
 0x8c4   : > { %7268 = vmatpush.msra.mxu2 %v7218_v56 }
 0x8c6   : > { %7269 = vmatpush.msra.mxu2 %v7217_v6  ;;  %v7478_v6 = vld [vmem:[%s13186_s11 + $0x48] sm:$0xff] }
 0x8c8   : > { %7270 = vmatpush.msra.mxu2 %v7216_v21  ;;  %v7506_v21 = vld [vmem:[%s13186_s11 + $0x128] sm:$0xff] }
 0x8ca   : > { %7271 = vmatpush.msra.mxu2 %v7215_v34  ;;  %v7494_v34 = vld [vmem:[%s13186_s11 + $0xc8] sm:$0xff] }
 0x8cc   : > { %7272 = vmatpush.msra.mxu2 %v7214_v10 }
 0x905   : > { %v7134_v0 = vpop.permute.xlu2 %7133 }
 0x90d   : > { %v7140_v13 = vpop.permute.xlu2 %7139 }
 0x90e   : > { %v12797_v15 = vmax.f32 %v7120_v31, %v7140_v13  ;;  %v7230_v31 = vld [vmem:[%s13183_s8 + $0x88] sm:$0xff] }
 0x91c   : > { %v7136_v43 = vpop.permute.xlu0 %7135 }
 0x91d   : > { %v7149_v58 = vsel %vm961_vm3, %v7134_v0, %v7136_v43  ;;  %v12767_v8 = vmax.f32 %v7118_v47, %v7136_v43  ;;  %v7237_v47 = vld [vmem:[%s13183_s8 + $0xc0] sm:$0xff]  ;;  %v7146_v30 = vpop.permute.xlu2 %7145 }
 0x91e   : > { %v12777_v38 = vmax.f32 %v7117_v5, %v7149_v58  ;;  %v7236_v5 = vld [vmem:[%s13183_s8 + $0xb8] sm:$0xff]  ;;  %7294 = vmatpush.msra.mxu3 %v7237_v47  ;;  %v7334_v58 = vld [vmem:[%s13184_s9 + $0x90] sm:$0x1]  ;;  %v7328_v47 = vld [vmem:[%s13184_s9 + $0x60] sm:$0xff] }
 0x91f   : > { %7179 = vrot.lane.b32.xlu2 %v12767_v8, %s13328_s22  ;;  %8470 = vmatpush.msk.msra.mxu0 %vm460_vm0, %v7334_v58  ;;  %v7470_v58 = vld [vmem:[%s13186_s11 + $0x8] sm:$0xff] }
 0x920   : > { %7177 = vrot.lane.b32.xlu1 %v12777_v38, %s13328_s22  ;;  %7295 = vmatpush.msra.mxu3 %v7236_v5  ;;  %v7329_v5 = vld [vmem:[%s13184_s9 + $0x68] sm:$0xff] }
 0x921   : > { %7368 = vmatpush.msra.mxu0 %v7331_v11  ;;  %v7469_v11 = vld [vmem:[%s13186_s11] sm:$0xff] }
 0x922   : > { %7296 = vmatpush.msra.mxu3 %v7235_v1  ;;  %v7327_v1 = vld [vmem:[%s13184_s9 + $0x58] sm:$0xff] }
 0x923   : > { %7369 = vmatpush.msra.mxu0 %v7328_v47  ;;  %v7503_v47 = vld [vmem:[%s13186_s11 + $0x110] sm:$0xff] }
 0x924   : > { %7297 = vmatpush.msra.mxu3 %v7234_v50  ;;  %v7323_v50 = vld [vmem:[%s13184_s9 + $0x38] sm:$0xff] }
 0x925   : > { %v7138_v27 = vpop.permute.xlu1 %7137 }
 0x926   : > { %v7150_v49 = vsel %vm961_vm3, %v7138_v27, %v7140_v13  ;;  %7298 = vmatpush.msra.mxu3 %v7233_v62  ;;  %v7330_v13 = vld [vmem:[%s13184_s9 + $0x70] sm:$0xff]  ;;  %v7325_v27 = vld [vmem:[%s13184_s9 + $0x48] sm:$0xff]  ;;  %v7319_v62 = vld [vmem:[%s13184_s9 + $0x18] sm:$0xff] }
 0x927   : > { %v12802_v20 = vmax.f32 %v7119_v33, %v7150_v49  ;;  %v7322_v49 = vld [vmem:[%s13184_s9 + $0x30] sm:$0xff]  ;;  %7370 = vmatpush.msra.mxu0 %v7325_v27  ;;  %v7445_v27 = vld [vmem:[%s13185_s10] sm:$0xff] }
 0x928   : > { %7183 = vrot.lane.b32.xlu1 %v12797_v15, %s13328_s22  ;;  %7299 = vmatpush.msra.mxu3 %v7232_v7  ;;  %v7320_v7 = vld [vmem:[%s13184_s9 + $0x20] sm:$0xff] }
 0x929   : > { %7181 = vrot.lane.b32.xlu0 %v12802_v20, %s13328_s22  ;;  %7371 = vmatpush.msra.mxu0 %v7322_v49 }
 0x92a   : > { %7300 = vmatpush.msra.mxu3 %v7231_v29  ;;  %v7317_v29 = vld [vmem:[%s13184_s9 + $0x8] sm:$0xff] }
 0x92b   : > { %7372 = vmatpush.msra.mxu0 %v7319_v62  ;;  %v7447_v62 = vld [vmem:[%s13185_s10 + $0x10] sm:$0xff] }
 0x92c   : > { %7301 = vmatpush.msra.mxu3 %v7230_v31  ;;  %v7483_v31 = vld [vmem:[%s13186_s11 + $0x70] sm:$0xff] }
 0x92d   : > { %v7144_v39 = vpop.permute.xlu1 %7143  ;;  %v7142_v36 = vpop.permute.xlu0 %7141 }
 0x92e   : > { %v12820_v2 = vmax.f32 %v7122_v53, %v7144_v39  ;;  %v7151_v52 = vsel %vm961_vm3, %v7142_v36, %v7144_v39  ;;  %7302 = vmatpush.msra.mxu3 %v7229_v9  ;;  %v7213_v53 = vld [vmem:[%s13183_s8] sm:$0xff]  ;;  %v7321_v39 = vld [vmem:[%s13184_s9 + $0x28] sm:$0xff] }
 0x92f   : > { %v12823_v14 = vmax.f32 %v7121_v63, %v7151_v52  ;;  %7273 = vmatpush.msra.mxu2 %v7213_v53  ;;  %v7316_v36 = vld [vmem:[%s13184_s9] sm:$0xff]  ;;  %v7484_v52 = vld [vmem:[%s13186_s11 + $0x78] sm:$0xff] }
 0x930   : > { %7373 = vmatpush.msra.mxu0 %v7316_v36  ;;  %7521 = vmatpush.msrb.mxu3 %v7484_v52  ;;  %v7481_v9 = vld [vmem:[%s13186_s11 + $0x60] sm:$0xff] }
 0x931   : > { %7187 = vrot.lane.b32.xlu0 %v12820_v2, %s13328_s22  ;;  %7185 = vrot.lane.b32.xlu2 %v12823_v14, %s13328_s22  ;;  %v7449_v36 = vld [vmem:[%s13185_s10 + $0x20] sm:$0xff] }
 0x932   : > { %7522 = vmatpush.msrb.mxu3 %v7483_v31 }
 0x935   : > { %v7148_v33 = vpop.permute.xlu0 %7147 }
 0x936   : > { %v7152_v24 = vsel %vm961_vm3, %v7146_v30, %v7148_v33  ;;  %v7168_v3 = vmax.f32 %v7124_v55, %v7148_v33  ;;  %vm13399_vm3 = vmmov %vm13398_vm2  ;;  %v7499_v30 = vld [vmem:[%s13186_s11 + $0xf0] sm:$0xff] }
 0x937   : > { %v7167_v28 = vmax.f32 %v7123_v54, %v7152_v24  ;;  %v7482_v24 = vld [vmem:[%s13186_s11 + $0x68] sm:$0xff] }
 0x938   : > { %7523 = vmatpush.msrb.mxu3 %v7482_v24  ;;  %v7452_v24 = vld [vmem:[%s13185_s10 + $0x38] sm:$0xff] }
 0x939   : > { %7191 = vrot.lane.b32.xlu2 %v7168_v3, %s13328_s22  ;;  %7189 = vrot.lane.b32.xlu1 %v7167_v28, %s13328_s22  ;;  %s8490_s22 = sshll.u32 %s9421_s29, 1  ;;  %s7625_s29 = scalar_lea.sflag [#allocation3], %s431_s17 }
 0x93a   : > { %7524 = vmatpush.msrb.mxu3 %v7481_v9  ;;  %s7635_s16 = scalar_lea.hbm %s13188_s13, %s8490_s22  ;;  %s9261_s22 = scalar_lea.hbm %s13188_s13, 4 }
 0x93b   : > { %s7639_s14 = sshll.u32 %s7635_s16, 4  ;;  %s7640_s14 = int_to_ptr.hbm [resolvable:$true] %s7639_s14 }
 0x93c   : > { %7525 = vmatpush.msrb.mxu3 %v7480_v42  ;;  %s9255_s15 = sshra.s32 %s7640_s14, 4  ;;  %s9256_s15 = int_to_ptr.hbm [resolvable:$true] %s9255_s15 }
 0x93d   : > { %s9257_s20 = scalar_lea.hbm %s9256_s15, 2  ;;  %p9262_p0 = scmp.lt.s32.totalorder %s9256_s15, %s13188_s13 }
 0x93e   : > { %7526 = vmatpush.msrb.mxu3 %v7479_v57  ;;  %v7454_v57 = vld [vmem:[%s13185_s10 + $0x48] sm:$0xff]  ;;  %p9258_p11 = scmp.ne.s32.totalorder %s9256_s15, %s9257_s20  ;;  %p9263_p1 = scmp.lt.s32.totalorder %s9261_s22, %s9257_s20 }
 0x940   : > { %7527 = vmatpush.msrb.mxu3 %v7478_v6  ;;  %p9259_p12 = pnand %p9258_p11, %p9438_p5  ;;  %p9264_p2 = por %p9263_p1, %p9262_p0 }
 0x942   : > { %p9260_p13 = pneg %p9259_p12 }
 0x944   : > { %p9265_p3 = pnand %p9264_p2, %p9260_p13 }
 0x979   : > { %v7180_v26 = vpop.permute.xlu2 %7179 }
 0x97a   : > { %v7206_v63 = vmax.f32 %v12767_v8, %v7180_v26  ;;  %v7336_v8 = vld [vmem:[%s13184_s9 + $0xa0] sm:$0x1] }
 0x97b   : > { %8480 = vmatpush.msk.msrb.mxu2 %vm460_vm0, %v7336_v8  ;;  %vm13402_vm0 = vcmask 400384   ;;  %v7486_v8 = vld [vmem:[%s13186_s11 + $0x88] sm:$0xff] }
 0x97c   : > { %8466 = vmatmul.msk.f32.vlgmr.msra.gmra.mxu3 %vm13398_vm2, %v7206_v63  ;;  %vm13404_vm5 = vmmov %vm13402_vm0  ;;  %v7493_v63 = vld [vmem:[%s13186_s11 + $0xc0] sm:$0xff] }
 0x97d   : > { %7426 = vmatpush.msrb.mxu2 %v7333_v4  ;;  %vm13405_vm6 = vmmov %vm13402_vm0  ;;  %v7504_v4 = vld [vmem:[%s13186_s11 + $0x118] sm:$0xff] }
 0x97e   : > { %vm13406_vm8 = vmmov %vm13402_vm0 }
 0x97f   : > { %7427 = vmatpush.msrb.mxu2 %v7330_v13  ;;  %vm13407_vm9 = vmmov %vm13402_vm0  ;;  %v7502_v13 = vld [vmem:[%s13186_s11 + $0x108] sm:$0xff] }
 0x980   : > { %vm13408_vm10 = vmmov %vm13402_vm0 }
 0x981   : > { %7428 = vmatpush.msrb.mxu2 %v7327_v1  ;;  %vm13409_vm11 = vmmov %vm13402_vm0  ;;  %v7446_v1 = vld [vmem:[%s13185_s10 + $0x8] sm:$0xff] }
 0x982   : > { %vm13410_vm15 = vmmov %vm13402_vm0 }
 0x983   : > { %vm13411_vm12 = vmmov %vm13402_vm0 }
 0x984   : > { %vm13412_vm2 = vmmov %vm13402_vm0 }
 0x98b   : > { %v7186_v23 = vpop.permute.xlu2 %7185 }
 0x992   : > { %v7178_v40 = vpop.permute.xlu1 %7177 }
 0x993   : > { %v7193_v37 = vsel %vm1422_vm7, %v7178_v40, %v7180_v26  ;;  %v7192_v59 = vpop.permute.xlu2 %7191  ;;  %v7477_v26 = vld [vmem:[%s13186_s11 + $0x40] sm:$0xff]  ;;  %v7476_v40 = vld [vmem:[%s13186_s11 + $0x38] sm:$0xff] }
 0x994   : > { %v7205_v22 = vmax.f32 %v12777_v38, %v7193_v37  ;;  %v7212_v18 = vmax.f32 %v7168_v3, %v7192_v59  ;;  %v7332_v38 = vld [vmem:[%s13184_s9 + $0x80] sm:$0xff]  ;;  %v7498_v3 = vld [vmem:[%s13186_s11 + $0xe8] sm:$0xff]  ;;  %7528 = vmatpush.msrb.mxu3 %v7477_v26  ;;  %v7492_v37 = vld [vmem:[%s13186_s11 + $0xb8] sm:$0xff] }
 0x995   : > { %7397 = vmatpush.msra.mxu1 %v7332_v38  ;;  %v7485_v38 = vld [vmem:[%s13186_s11 + $0x80] sm:$0xff] }
 0x996   : > { %7274 = vmatmul.f32.vlgmr.msra.gmra.mxu2 %v7205_v22  ;;  %v7475_v22 = vld [vmem:[%s13186_s11 + $0x30] sm:$0xff]  ;;  %7529 = vmatpush.msrb.mxu3 %v7476_v40 }
 0x997   : > { %7398 = vmatpush.msra.mxu1 %v7329_v5  ;;  %v7501_v5 = vld [vmem:[%s13186_s11 + $0x100] sm:$0xff] }
 0x998   : > { %7530 = vmatpush.msrb.mxu3 %v7475_v22 }
 0x99a   : > { %v7184_v19 = vpop.permute.xlu1 %7183 }
 0x99b   : > { %v7208_v12 = vmax.f32 %v12797_v15, %v7184_v19  ;;  %v7182_v32 = vpop.permute.xlu0 %7181  ;;  %v7326_v15 = vld [vmem:[%s13184_s9 + $0x50] sm:$0xff] }
 0x99c   : > { %v7194_v35 = vsel %vm1422_vm7, %v7182_v32, %v7184_v19  ;;  %7399 = vmatpush.msra.mxu1 %v7326_v15  ;;  %v7491_v19 = vld [vmem:[%s13186_s11 + $0xb0] sm:$0xff]  ;;  %v7474_v32 = vld [vmem:[%s13186_s11 + $0x28] sm:$0xff] }
 0x99d   : > { %v7207_v16 = vmax.f32 %v12802_v20, %v7194_v35  ;;  %8467 = vmatmul.msk.f32.gmra.mxu3 %vm13399_vm3, %v7208_v12  ;;  %v7324_v20 = vld [vmem:[%s13184_s9 + $0x40] sm:$0xff]  ;;  %vm13413_vm3 = vmmov %vm13402_vm0 }
 0x99e   : > { %7429 = vmatpush.msrb.mxu2 %v7324_v20  ;;  %7400 = vmatpush.msra.mxu1 %v7323_v50 }
 0x99f   : > { %7277 = vmatmul.f32.gmra.mxu2 %v7207_v16  ;;  %7531 = vmatpush.msrb.mxu3 %v7474_v32 }
 0x9a0   : > { %7401 = vmatpush.msra.mxu1 %v7320_v7  ;;  %7430 = vmatpush.msrb.mxu2 %v7321_v39  ;;  %v7448_v39 = vld [vmem:[%s13185_s10 + $0x18] sm:$0xff] }
 0x9a2   : > { %7402 = vmatpush.msra.mxu1 %v7317_v29 }
 0x9a3   : > { %v7188_v61 = vpop.permute.xlu0 %7187 }
 0x9a4   : > { %v7195_v55 = vsel %vm1422_vm7, %v7186_v23, %v7188_v61  ;;  %v7210_v54 = vmax.f32 %v12820_v2, %v7188_v61  ;;  %v7318_v2 = vld [vmem:[%s13184_s9 + $0x10] sm:$0xff]  ;;  %7587 = vmatpush.msrb.mxu1 %v7508_v45  ;;  %v7490_v23 = vld [vmem:[%s13186_s11 + $0xa8] sm:$0xff]  ;;  %v7473_v61 = vld [vmem:[%s13186_s11 + $0x20] sm:$0xff] }
 0x9a5   : > { %v7209_v0 = vmax.f32 %v12823_v14, %v7195_v55  ;;  %7431 = vmatpush.msrb.mxu2 %v7318_v2  ;;  %v7500_v14 = vld [vmem:[%s13186_s11 + $0xf8] sm:$0xff]  ;;  %v7489_v55 = vld [vmem:[%s13186_s11 + $0xa0] sm:$0xff]  ;;  %7532 = vmatpush.msrb.mxu3 %v7473_v61  ;;  %v7455_v45 = vld [vmem:[%s13185_s10 + $0x50] sm:$0xff] }
 0x9a6   : > { %8468 = vmatmul.msk.f32.gmra.mxu3 %vm13400_vm13, %v7210_v54  ;;  %7550 = vmatpush.msrb.mxu0 %v7500_v14  ;;  %v7472_v54 = vld [vmem:[%s13186_s11 + $0x18] sm:$0xff]  ;;  %vm13414_vm13 = vcmask 80896  }
 0x9a7   : > { %7280 = vmatmul.f32.gmra.mxu2 %v7209_v0  ;;  %7588 = vmatpush.msrb.mxu1 %v7507_v41  ;;  %v7488_v0 = vld [vmem:[%s13186_s11 + $0x98] sm:$0xff] }
 0x9a8   : > { %7551 = vmatpush.msrb.mxu0 %v7499_v30  ;;  %7533 = vmatpush.msrb.mxu3 %v7472_v54  ;;  %v7450_v30 = vld [vmem:[%s13185_s10 + $0x28] sm:$0xff] }
 0x9a9   : > { %7589 = vmatpush.msrb.mxu1 %v7506_v21 }
 0x9aa   : > { %7552 = vmatpush.msrb.mxu0 %v7498_v3 }
 0x9ab   : > { %v7190_v51 = vpop.permute.xlu1 %7189  ;;  %7590 = vmatpush.msrb.mxu1 %v7505_v25 }
 0x9ac   : > { %v7196_v43 = vsel %vm1422_vm7, %v7190_v51, %v7192_v59  ;;  %vm13403_vm7 = vmmov %vm13402_vm0  ;;  %7553 = vmatpush.msrb.mxu0 %v7497_v44  ;;  %v7471_v59 = vld [vmem:[%s13186_s11 + $0x10] sm:$0xff] }
 0x9ad   : > { %v7211_v17 = vmax.f32 %v7167_v28, %v7196_v43  ;;  %7534 = vmatpush.msrb.mxu3 %v7471_v59  ;;  %7591 = vmatpush.msrb.mxu1 %v7504_v4 }
 0x9ae   : > { %8469 = vmatmul.msk.f32.gmra.mxu3 %vm13401_vm4, %v7212_v18  ;;  %7554 = vmatpush.msrb.mxu0 %v7496_v46  ;;  %v7487_v18 = vld [vmem:[%s13186_s11 + $0x90] sm:$0xff]  ;;  %v7453_v46 = vld [vmem:[%s13185_s10 + $0x40] sm:$0xff]  ;;  %vm13416_vm4 = vmmov %vm13414_vm13 }
 0x9af   : > { %7283 = vmatmul.f32.gmra.mxu2 %v7211_v17  ;;  %7535 = vmatpush.msrb.mxu3 %v7470_v58 }
 0x9b0   : > { %7555 = vmatpush.msrb.mxu0 %v7495_v48  ;;  %7592 = vmatpush.msrb.mxu1 %v7503_v47 }
 0x9b1   : > { %7536 = vmatpush.msrb.mxu3 %v7469_v11 }
 0x9b2   : > { %7556 = vmatpush.msrb.mxu0 %v7494_v34  ;;  %7593 = vmatpush.msrb.mxu1 %v7502_v13 }
 0x9b4   : > { %7557 = vmatpush.msrb.mxu0 %v7493_v63  ;;  %7594 = vmatpush.msrb.mxu1 %v7501_v5 }
 0x9b6   : > { %7558 = vmatpush.msrb.mxu0 %v7492_v37 }
 0x9b8   : > { %7559 = vmatpush.msrb.mxu0 %v7491_v19 }
 0x9ba   : > { %7560 = vmatpush.msrb.mxu0 %v7490_v23 }
 0x9bc   : > { %7561 = vmatpush.msrb.mxu0 %v7489_v55 }
 0x9be   : > { %7562 = vmatpush.msrb.mxu0 %v7488_v0 }
 0x9c0   : > { %7563 = vmatpush.msrb.mxu0 %v7487_v18 }
 0x9c2   : > { %7564 = vmatpush.msrb.mxu0 %v7486_v8 }
 0x9c4   : > { %7565 = vmatpush.msrb.mxu0 %v7485_v38 }
 0x9ff   : > { %v7304_v33 = vpop.f32.mrf.mxu3 }
 0xa19   : > { %v7275_v28 = vpop.f32.mrf.mxu2 }
 0xa1a   : > { %v7305_v60 = vadd.f32 %v7304_v33, %v7275_v28  ;;  %v7451_v33 = vld [vmem:[%s13185_s10 + $0x30] sm:$0xff] }
 0xa1c   : > { %8471 = vmatmul.msk.f32.vlgmr.msra.gmra.mxu0 %vm13402_vm0, %v7305_v60  ;;  %8476 = vmatmul.msk.f32.vlgmr.msra.gmra.mxu1 %vm13403_vm7, %v7305_v60  ;;  %vm13417_vm0 = vmmov %vm13416_vm4 }
 0xa1d   : > { %8481 = vmatmul.msk.f32.vlgmr.msrb.gmra.mxu2 %vm13404_vm5, %v7305_v60 }
 0xa20   : > { %v7307_v56 = vpop.f32.mrf.mxu3 }
 0xa22   : > { %v7278_v10 = vpop.f32.mrf.mxu2 }
 0xa23   : > { %v7308_v53 = vadd.f32 %v7307_v56, %v7278_v10  ;;  %v7456_v10 = vld [vmem:[%s13185_s10 + $0x58] sm:$0xff] }
 0xa25   : > { %8472 = vmatmul.msk.f32.gmra.mxu0 %vm13405_vm6, %v7308_v53  ;;  %8477 = vmatmul.msk.f32.gmra.mxu1 %vm13406_vm8, %v7308_v53 }
 0xa26   : > { %8482 = vmatmul.msk.f32.gmra.mxu2 %vm13407_vm9, %v7308_v53 }
 0xa29   : > { %v7310_v12 = vpop.f32.mrf.mxu3 }
 0xa2a   : > { %v7281_v35 = vpop.f32.mrf.mxu2 }
 0xa2b   : > { %v7311_v16 = vadd.f32 %v7310_v12, %v7281_v35 }
 0xa2d   : > { %8473 = vmatmul.msk.f32.gmra.mxu0 %vm13408_vm10, %v7311_v16  ;;  %8478 = vmatmul.msk.f32.gmra.mxu1 %vm13409_vm11, %v7311_v16 }
 0xa2e   : > { %8483 = vmatmul.msk.f32.gmra.mxu2 %vm13410_vm15, %v7311_v16 }
 0xa31   : > { %v7313_v51 = vpop.f32.mrf.mxu3 }
 0xa32   : > { %v7284_v43 = vpop.f32.mrf.mxu2 }
 0xa33   : > { %v7314_v17 = vadd.f32 %v7313_v51, %v7284_v43 }
 0xa35   : > { %8474 = vmatmul.msk.f32.gmra.mxu0 %vm13411_vm12, %v7314_v17  ;;  %8479 = vmatmul.msk.f32.gmra.mxu1 %vm13412_vm2, %v7314_v17 }
 0xa36   : > { %8484 = vmatmul.msk.f32.gmra.mxu2 %vm13413_vm3, %v7314_v17 }
 0xa99   : > { %v7375_v15 = vpop.f32.mrf.mxu0  ;;  %v7404_v49 = vpop.f32.mrf.mxu1 }
 0xa9a   : > { %v7457_v20 = vmul.f32 %v7445_v27, %v7375_v15  ;;  %v7458_v50 = vmul.f32 %v7446_v1, %v7404_v49 }
 0xa9c   : > { %7537 = vmatmul.f32.vlgmr.msrb.gmra.mxu3 %v7457_v20  ;;  %7566 = vmatmul.f32.vlgmr.msrb.gmra.mxu0 %v7458_v50  ;;  %v7621_v20 = vld [vmem:[%s13187_s12] sm:$0x1] }
 0xaa0   : > { %v7433_v7 = vpop.f32.mrf.mxu2 }
 0xaa1   : > { %v7459_v29 = vmul.f32 %v7447_v62, %v7433_v7 }
 0xaa2   : > { %v7378_v2 = vpop.f32.mrf.mxu0  ;;  %v7407_v52 = vpop.f32.mrf.mxu1 }
 0xaa3   : > { %v7460_v14 = vmul.f32 %v7448_v39, %v7378_v2  ;;  %v7461_v31 = vmul.f32 %v7449_v36, %v7407_v52  ;;  %8485 = vmatmul.msk.f32.vlgmr.msrb.gmra.mxu1 %vm3943_vm14, %v7459_v29 }
 0xaa5   : > { %7540 = vmatmul.f32.gmra.mxu3 %v7460_v14  ;;  %7569 = vmatmul.f32.gmra.mxu0 %v7461_v31 }
 0xaa9   : > { %v7436_v3 = vpop.f32.mrf.mxu2 }
 0xaaa   : > { %v7462_v28 = vmul.f32 %v7450_v30, %v7436_v3  ;;  %v7381_v60 = vpop.f32.mrf.mxu0  ;;  %v7410_v9 = vpop.f32.mrf.mxu1 }
 0xaab   : > { %v7463_v44 = vmul.f32 %v7451_v33, %v7381_v60  ;;  %v7464_v42 = vmul.f32 %v7452_v24, %v7410_v9 }
 0xaac   : > { %8486 = vmatmul.msk.f32.gmra.mxu1 %vm3943_vm14, %v7462_v28 }
 0xaad   : > { %7543 = vmatmul.f32.gmra.mxu3 %v7463_v44  ;;  %7572 = vmatmul.f32.gmra.mxu0 %v7464_v42 }
 0xab1   : > { %v7439_v48 = vpop.f32.mrf.mxu2 }
 0xab2   : > { %v7465_v41 = vmul.f32 %v7453_v46, %v7439_v48  ;;  %v7384_v56 = vpop.f32.mrf.mxu0  ;;  %v7413_v6 = vpop.f32.mrf.mxu1 }
 0xab3   : > { %v7466_v21 = vmul.f32 %v7454_v57, %v7384_v56  ;;  %v7467_v34 = vmul.f32 %v7455_v45, %v7413_v6 }
 0xab4   : > { %8487 = vmatmul.msk.f32.gmra.mxu1 %vm3943_vm14, %v7465_v41 }
 0xab5   : > { %7546 = vmatmul.f32.gmra.mxu3 %v7466_v21  ;;  %7575 = vmatmul.f32.gmra.mxu0 %v7467_v34 }
 0xab9   : > { %v7442_v53 = vpop.f32.mrf.mxu2 }
 0xaba   : > { %v7468_v26 = vmul.f32 %v7456_v10, %v7442_v53 }
 0xabc   : > { %8488 = vmatmul.msk.f32.gmra.mxu1 %vm3943_vm14, %v7468_v26  ;;  %vm13415_vm14 = vmmov %vm13414_vm13 }
 0xb19   : > { %v7567_v63 = vpop.f32.mrf.mxu0 }
 0xb1f   : > { %v7538_v40 = vpop.f32.mrf.mxu3 }
 0xb20   : > { %v7596_v37 = vpop.f32.mrf.mxu1  ;;  %v7568_v23 = vadd.f32 %v7567_v63, %v7538_v40 }
 0xb22   : > { %v7570_v22 = vpop.f32.mrf.mxu0  ;;  %v7597_v0 = vadd.f32 %v7596_v37, %v7568_v23 }
 0xb24   : > { %v7608_v17 = vsel %vm13415_vm14, %v7597_v0, 0.0 }
 0xb28   : > { %v7541_v19 = vpop.f32.mrf.mxu3 }
 0xb29   : > { %v7599_v12 = vpop.f32.mrf.mxu1  ;;  %v7571_v35 = vadd.f32 %v7570_v22, %v7541_v19 }
 0xb2a   : > { %v7573_v32 = vpop.f32.mrf.mxu0 }
 0xb2b   : > { %v7600_v54 = vadd.f32 %v7599_v12, %v7571_v35 }
 0xb2d   : > { %v7609_v51 = vsel %vm13414_vm13, %v7600_v54, 0.0 }
 0xb2e   : > { %v7610_v25 = vadd.f32 %v7609_v51, %v7608_v17 }
 0xb30   : > { %v7544_v16 = vpop.f32.mrf.mxu3 }
 0xb31   : > { %v7574_v61 = vadd.f32 %v7573_v32, %v7544_v16  ;;  %v7602_v55 = vpop.f32.mrf.mxu1 }
 0xb32   : > { %v7576_v18 = vpop.f32.mrf.mxu0 }
 0xb33   : > { %v7603_v59 = vadd.f32 %v7602_v55, %v7574_v61 }
 0xb35   : > { %v7611_v58 = vsel %vm13416_vm4, %v7603_v59, 0.0 }
 0xb36   : > { %v7612_v4 = vadd.f32 %v7611_v58, %v7610_v25 }
 0xb38   : > { %v7547_v43 = vpop.f32.mrf.mxu3 }
 0xb39   : > { %v7577_v8 = vadd.f32 %v7576_v18, %v7547_v43  ;;  %v7605_v11 = vpop.f32.mrf.mxu1 }
 0xb3b   : > { %v7606_v38 = vadd.f32 %v7605_v11, %v7577_v8 }
 0xb3d   : > { %v7613_v47 = vsel %vm13417_vm0, %v7606_v38, 0.0 }
 0xb3e   : > { %v7614_v13 = vadd.f32 %v7613_v47, %v7612_v4 }
 0xb40   : > { %v7615_v5 = vrot.slane %v7614_v13, 4 }
 0xb42   : > { %v7616_v27 = vadd.f32 %v7615_v5, %v7614_v13 }
 0xb44   : > { %v7617_v1 = vrot.slane %v7616_v27, 2 }
 0xb46   : > { %v7618_v15 = vadd.f32 %v7617_v1, %v7616_v27 }
 0xb48   : > { %v7619_v49 = vrot.slane %v7618_v15, 1 }
 0xb4a   : > { %v7620_v50 = vadd.f32 %v7619_v49, %v7618_v15 }
 0xb4c   : > { %v7622_v62 = vadd.f32 %v7621_v20, %v7620_v50 }
 0xb4e   : > { %7623 = vst.msk [vmem:[%s11476_s19 + $0x1] sm:$0x1] %vm4059_vm1, %v7622_v62 }
 0xb4f   : > { %9268 = shalt.err (!%p9265_p3)
}
 0xb50   : > { %8494 = dma.vmem_to_hbm [thread:$0]  (%p9438_p5), %s7638_s27, 32, %s7640_s14, %s7625_s29  }
 0xb51 PF: > { %s13418_s17 = sld [smem:[#allocation5_spill]]  ;;  %p8500_p4 = scmp.ge.s32.totalorder %s9303_s28, 2 }
 0xb53   : > { %p8497_p7 = pnand %p8500_p4, %p9442_p6 }
 0xb55   : > { %p8498_p8 = pneg %p8497_p7 }
 0xb57   : > { %s7651_s16 = sand.u32 1, %s13418_s17  }
 0xb58   : > { %s7652_s21 = scalar_lea.sflag [#allocation3], %s7651_s16 }
 0xb59   : > { %9286 = dma.done.wait (%p8498_p8), %s7652_s21, 32  }
 0xb5a   : > { %9288 = vsyncadd (%p8498_p8), %s7652_s21, 4294967264  ;;  %s13420_s28 = sld [smem:[#allocation7_spill]]  ;;  %s13423_s25 = smov %s9295_s26 }
 0xb5b   : > { %s13421_s0 = sld [smem:[#allocation6_spill]] }
 0xb5c   : > { %s13422_s27 = sld [smem:[#allocation8_spill]] }
 0xb60   : > { %p23_p9 = scmp.ge.s32.totalorder %s13420_s28, 4  }
 0xb61   : > { %s13424_s26 = smov %s13421_s0 }
 0xb62   :  { %25 = sbr.rel (!%p23_p9) target bundleno = 5 (0x5), region = 134 }
 0xb67   :  { %7658 = vsyncpa [#allocation3], 1 }
 0xb68   :  { %7660 = vsyncpa [#allocation3 + $0x1], 1 }

</bundles_post_ra>
